<compile_context>
chip_gen: v7x
topology: tpu7x:2x2x1
jax: 0.10.0
libtpu: 0.0.40
codegen_flags: <defaults>
</compile_context>

<pallas_src>
import functools

import jax
import jax.numpy as jnp
from jax.experimental import pallas as pl
from jax.experimental.pallas import tpu as pltpu


# ---------------------------------------------------------------------------
# Fused kernel: full conv stack + pool + per-sample loss, one batch element
# per grid step.
# ---------------------------------------------------------------------------
def _fused_kernel(*refs, kinds, H, W):
    n_layers = len(kinds)
    x_ref = refs[0]
    wb_refs = refs[1:1 + 2 * n_layers]          # w0,b0, w1,b1, ...
    label_ref = refs[1 + 2 * n_layers]
    cam_ref = refs[2 + 2 * n_layers]
    logit_ref = refs[3 + 2 * n_layers]
    loss_ref = refs[4 + 2 * n_layers]
    h_ref, acc_ref = refs[5 + 2 * n_layers:]

    HW = H * W
    f32 = jnp.float32
    bf16 = jnp.bfloat16
    taps = [(i, j) for i in range(3) for j in range(3)]

    # ---- layer 0: 1x1 conv (inc -> E) + ReLU ------------------------------
    # cin is tiny (4 in the demo); folded into the fused kernel it is one
    # cheap MXU pass hidden under the following 3x3 conv's work (the old
    # standalone launch + HBM round trip are gone).  Kept in f32 to preserve
    # the input features' precision; cost is negligible at K=inc.
    x0 = x_ref[0].astype(f32)                                  # (HW, inc)
    y = jnp.dot(x0, wb_refs[0][...], preferred_element_type=f32) + wb_refs[1][...]
    h_ref[...] = jnp.maximum(y, 0.0) if kinds[0][1] else y

    # ---- boundary masks for the 3x3 taps (computed once, reused) ----------
    # Row r of the flattened (HW, C) slab is pixel (h, w) = (r // W, r % W).
    # Tap (i, j) reads pixel (h+i-1, w+j-1); its mask zeroes rows whose source
    # pixel falls outside the image (== Conv2d padding=1 zero padding).
    masks = None
    if any(k == 3 for k, _ in kinds):
        row = jax.lax.broadcasted_iota(jnp.int32, (HW, 1), 0)
        if (W & (W - 1)) == 0:
            ww = jnp.bitwise_and(row, W - 1)                   # w = r % W
        else:
            ww = row % W   # TODO(synk): non-power-of-two W path untested
        mh = {0: row >= W, 1: None, 2: row < (H - 1) * W}      # h-1>=0 / h+1<H
        mw = {0: ww >= 1, 1: None, 2: ww < W - 1}              # w-1>=0 / w+1<W
        masks = []
        for (i, j) in taps:
            m = None
            for cond in (mh[i], mw[j]):
                if cond is not None:
                    m = cond if m is None else jnp.logical_and(m, cond)
            masks.append(None if m is None else m.astype(f32))  # (HW, 1) or None

    # ---- middle layers -----------------------------------------------------
    for li in range(1, n_layers - 1):
        k, relu = kinds[li]
        w_ref = wb_refs[2 * li]                 # bf16 weights
        b_ref = wb_refs[2 * li + 1]             # f32 bias (1, C)
        if k == 1:
            y = jnp.dot(h_ref[...].astype(bf16), w_ref[...],
                        preferred_element_type=f32) + b_ref[...]
        else:
            # conv3x3 as 9 shifted (HW, C) @ (C, C) matmuls.
            for t, (i, j) in enumerate(taps):
                off = (i - 1) * W + (j - 1)     # flattened-row source offset
                sh = (-off) % HW                # jnp.roll-style rotation amount
                src = h_ref[...]                # (HW, C) f32
                if sh:
                    src = pltpu.roll(src, sh, 0)        # XLU sublane rotate
                if masks[t] is not None:
                    src = src * masks[t]                # zero out-of-image rows
                patch = src.astype(bf16)
                contrib = jnp.dot(patch, w_ref[t], preferred_element_type=f32)
                if t == 0:
                    acc_ref[...] = contrib
                else:
                    acc_ref[...] = acc_ref[...] + contrib
            y = acc_ref[...] + b_ref[...]
        h_ref[...] = jnp.maximum(y, 0.0) if relu else y

    # ---- last layer: 1x1 conv (E -> num_class) => cam ----------------------
    k, relu = kinds[-1]
    w_last = wb_refs[2 * (n_layers - 1)][...]   # (E, NC) bf16
    b_last = wb_refs[2 * (n_layers - 1) + 1][...]
    cam = jnp.dot(h_ref[...].astype(bf16), w_last,
                  preferred_element_type=f32) + b_last          # (HW, NC) f32
    if relu:
        cam = jnp.maximum(cam, 0.0)
    cam_ref[...] = cam[None].astype(cam_ref.dtype)

    # ---- fused AdaptiveAvgPool2d((1,1)) -> logits --------------------------
    logit = jnp.sum(cam, axis=0, keepdims=True) * (1.0 / HW)    # (1, NC) f32
    logit_ref[...] = logit[None].astype(logit_ref.dtype)

    # ---- per-sample multilabel_soft_margin_loss (mean over classes) --------
    lab = label_ref[0]                                          # (1, NC) f32
    absx = jnp.abs(logit)
    log1pexp = jnp.log(1.0 + jnp.exp(-absx))
    logsig_pos = jnp.minimum(logit, 0.0) - log1pexp             # log sigmoid(x)
    logsig_neg = jnp.minimum(-logit, 0.0) - log1pexp            # log sigmoid(-x)
    per_elem = -(lab * logsig_pos + (1.0 - lab) * logsig_neg)   # (1, NC)
    loss_ref[...] = jnp.mean(per_elem, axis=-1, keepdims=True)[None]


# ---------------------------------------------------------------------------
# Wrapper
# ---------------------------------------------------------------------------
def attention_map_forward(x_nchw, label, params):
    """x_nchw: (B, inc, H, W) float32, label: (B, num_class) float {0,1}."""
    B, inc, H, W = x_nchw.shape
    HW = H * W
    n_layers = len(params)
    E = params[0][1].shape[-1]
    NC = params[-1][1].shape[-1]
    assert params[-1][0] == 1, "final layer of AttentionMap is a 1x1 conv"
    kinds = tuple((k, relu) for (k, _, _, relu) in params)

    # channels-last token layout: (B, H*W, C)
    x_tok = jnp.transpose(x_nchw, (0, 2, 3, 1)).reshape(B, HW, inc)
    label3 = label.astype(jnp.float32).reshape(B, 1, NC)

    def _replicated(shape):
        ndim = len(shape)
        return pl.BlockSpec(shape, lambda b: (0,) * ndim)

    inputs = [x_tok]
    in_specs = [pl.BlockSpec((1, HW, inc), lambda b: (b, 0, 0))]
    for li, (k, w, bias, _relu) in enumerate(params):
        cin, cout = w.shape[2], w.shape[3]
        wk = w.reshape(cin, cout) if k == 1 else w.reshape(k * k, cin, cout)
        if li > 0:
            wk = wk.astype(jnp.bfloat16)        # MXU operands in bf16
        bk = bias.reshape(1, cout).astype(jnp.float32)
        inputs.extend([wk, bk])
        in_specs.extend([_replicated(tuple(wk.shape)), _replicated((1, cout))])
    inputs.append(label3)
    in_specs.append(pl.BlockSpec((1, 1, NC), lambda b: (b, 0, 0)))

    out_shape = (jax.ShapeDtypeStruct((B, HW, NC), jnp.float32),   # cam tokens
                 jax.ShapeDtypeStruct((B, 1, NC), jnp.float32),    # logits
                 jax.ShapeDtypeStruct((B, 1, 1), jnp.float32))     # per-sample loss
    out_specs = (pl.BlockSpec((1, HW, NC), lambda b: (b, 0, 0)),
                 pl.BlockSpec((1, 1, NC), lambda b: (b, 0, 0)),
                 pl.BlockSpec((1, 1, 1), lambda b: (b, 0, 0)))

    kernel = functools.partial(_fused_kernel, kinds=kinds, H=H, W=W)
    cam_tok, logit3, loss_b = pl.pallas_call(
        kernel,
        out_shape=out_shape,
        grid_spec=pltpu.PrefetchScalarGridSpec(
            num_scalar_prefetch=0,
            grid=(B,),
            in_specs=in_specs,
            out_specs=out_specs,
            scratch_shapes=[pltpu.VMEM((HW, E), jnp.float32),   # activation
                            pltpu.VMEM((HW, E), jnp.float32)],  # 3x3 accumulator
        ),
        compiler_params=pltpu.CompilerParams(
            dimension_semantics=("parallel",),      # batch across cores on v7x
            vmem_limit_bytes=32 * 1024 * 1024,
        ),
    )(*inputs)

    cam = jnp.transpose(cam_tok.reshape(B, H, W, NC), (0, 3, 1, 2))   # NCHW
    logit = logit3.reshape(B, NC)
    loss = jnp.mean(loss_b)         # tiny (B,) reduce kept outside the kernel
    return dict(loss=loss, cam=cam, logit=logit)


# ---------------------------------------------------------------------------
# Parameter init (deterministic, matching nn.Conv2d shapes of the module);
# weights stored as (kh, kw, Cin, Cout).
# ---------------------------------------------------------------------------
def init_params(key, inc, emd_dim, num_class, blocks=5):
    specs = [(1, inc, emd_dim, True)]
    for i in range(blocks - 1):
        k = 3 if i % 2 == 0 else 1
        specs.append((k, emd_dim, emd_dim, True))
    specs.append((1, emd_dim, num_class, False))

    params = []
    for idx, (k, cin, cout, relu) in enumerate(specs):
        wkey, bkey = jax.random.split(jax.random.fold_in(key, idx))
        fan_in = cin * k * k
        w = jax.random.normal(wkey, (k, k, cin, cout), jnp.float32) * (fan_in ** -0.5)
        b = jax.random.normal(bkey, (cout,), jnp.float32) * 0.01
        params.append((k, w, b, relu))
    return params


if __name__ == "__main__":
    key = jax.random.PRNGKey(0)
    B, inc, H, W = 2, 4, 16, 16
    num_class, emd_dim, blocks = 4, 128, 5

    kx, kl, kp = jax.random.split(key, 3)
    x = jax.random.normal(kx, (B, inc, H, W), jnp.float32)
    label = (jax.random.uniform(kl, (B, num_class)) > 0.5).astype(jnp.float32)
    params = init_params(kp, inc, emd_dim, num_class, blocks)

    out = attention_map_forward(x, label, params)
    jax.block_until_ready(out)
    assert out["cam"].shape == (B, num_class, H, W)
    assert out["logit"].shape == (B, num_class)
    assert out["loss"].shape == ()
    assert bool(jnp.isfinite(out["loss"]))
    print("KERNEL_OK")
</pallas_src>

<mosaic_0001>
module attributes {stable_mosaic.version = 11 : i64} {
  func.func @_fused_kernel(%arg0: i32, %arg1: memref<1x256x4xf32, #tpu.memory_space<vmem>>, %arg2: memref<4x128xf32, #tpu.memory_space<vmem>>, %arg3: memref<1x128xf32, #tpu.memory_space<vmem>>, %arg4: memref<9x128x128xbf16, #tpu.memory_space<vmem>>, %arg5: memref<1x128xf32, #tpu.memory_space<vmem>>, %arg6: memref<128x128xbf16, #tpu.memory_space<vmem>>, %arg7: memref<1x128xf32, #tpu.memory_space<vmem>>, %arg8: memref<9x128x128xbf16, #tpu.memory_space<vmem>>, %arg9: memref<1x128xf32, #tpu.memory_space<vmem>>, %arg10: memref<128x128xbf16, #tpu.memory_space<vmem>>, %arg11: memref<1x128xf32, #tpu.memory_space<vmem>>, %arg12: memref<128x4xbf16, #tpu.memory_space<vmem>>, %arg13: memref<1x4xf32, #tpu.memory_space<vmem>>, %arg14: memref<1x1x4xf32, #tpu.memory_space<vmem>>, %arg15: memref<1x256x4xf32, #tpu.memory_space<vmem>>, %arg16: memref<1x1x4xf32, #tpu.memory_space<vmem>>, %arg17: memref<1x1x1xf32, #tpu.memory_space<vmem>>, %arg18: memref<256x128xf32, #tpu.memory_space<vmem>>, %arg19: memref<256x128xf32, #tpu.memory_space<vmem>>) attributes {dimension_semantics = [#tpu.dimension_semantics<parallel>], iteration_bounds = array<i64: 2>, scalar_prefetch = 0 : i64, scratch_operands = 2 : i64, tpu.core_type = #tpu.core_type<tc>, window_params = [{transform_indices = @transform_0, window_bounds = array<i64: 1, 256, 4>}, {pipeline_mode = #tpu.pipeline_mode<synchronous>, transform_indices = @transform_1, window_bounds = array<i64: 4, 128>}, {pipeline_mode = #tpu.pipeline_mode<synchronous>, transform_indices = @transform_2, window_bounds = array<i64: 1, 128>}, {pipeline_mode = #tpu.pipeline_mode<synchronous>, transform_indices = @transform_3, window_bounds = array<i64: 9, 128, 128>}, {pipeline_mode = #tpu.pipeline_mode<synchronous>, transform_indices = @transform_4, window_bounds = array<i64: 1, 128>}, {pipeline_mode = #tpu.pipeline_mode<synchronous>, transform_indices = @transform_5, window_bounds = array<i64: 128, 128>}, {pipeline_mode = #tpu.pipeline_mode<synchronous>, transform_indices = @transform_6, window_bounds = array<i64: 1, 128>}, {pipeline_mode = #tpu.pipeline_mode<synchronous>, transform_indices = @transform_7, window_bounds = array<i64: 9, 128, 128>}, {pipeline_mode = #tpu.pipeline_mode<synchronous>, transform_indices = @transform_8, window_bounds = array<i64: 1, 128>}, {pipeline_mode = #tpu.pipeline_mode<synchronous>, transform_indices = @transform_9, window_bounds = array<i64: 128, 128>}, {pipeline_mode = #tpu.pipeline_mode<synchronous>, transform_indices = @transform_10, window_bounds = array<i64: 1, 128>}, {pipeline_mode = #tpu.pipeline_mode<synchronous>, transform_indices = @transform_11, window_bounds = array<i64: 128, 4>}, {pipeline_mode = #tpu.pipeline_mode<synchronous>, transform_indices = @transform_12, window_bounds = array<i64: 1, 4>}, {transform_indices = @transform_13, window_bounds = array<i64: 1, 1, 4>}, {transform_indices = @transform_14, window_bounds = array<i64: 1, 256, 4>}, {transform_indices = @transform_15, window_bounds = array<i64: 1, 1, 4>}, {transform_indices = @transform_16, window_bounds = array<i64: 1, 1, 1>}]} {
    %c0 = arith.constant 0 : index
    %c0_0 = arith.constant 0 : index
    %c0_1 = arith.constant 0 : index
    %0 = vector.load %arg1[%c0, %c0_0, %c0_1] : memref<1x256x4xf32, #tpu.memory_space<vmem>>, vector<1x256x4xf32>
    %1 = vector.shape_cast %0 : vector<1x256x4xf32> to vector<256x4xf32>
    %c0_2 = arith.constant 0 : index
    %c0_3 = arith.constant 0 : index
    %2 = vector.load %arg2[%c0_2, %c0_3] : memref<4x128xf32, #tpu.memory_space<vmem>>, vector<4x128xf32>
    %cst = arith.constant dense<0.000000e+00> : vector<256x128xf32>
    %3 = tpu.matmul %1, %2, %cst {dimension_numbers = #tpu.dot_dimension_numbers<[1], [0], [0], [1], [0, 0, 1, 1], [], []>} : vector<256x4xf32>, vector<4x128xf32>, vector<256x128xf32> -> vector<256x128xf32>
    %c0_4 = arith.constant 0 : index
    %c0_5 = arith.constant 0 : index
    %4 = vector.load %arg3[%c0_4, %c0_5] : memref<1x128xf32, #tpu.memory_space<vmem>>, vector<1x128xf32>
    %5 = vector.broadcast %4 : vector<1x128xf32> to vector<256x128xf32>
    %6 = arith.addf %3, %5 : vector<256x128xf32>
    %cst_6 = arith.constant 0.000000e+00 : f32
    %7 = vector.broadcast %cst_6 : f32 to vector<256x128xf32>
    %8 = arith.maximumf %6, %7 : vector<256x128xf32>
    %c0_7 = arith.constant 0 : index
    %c0_8 = arith.constant 0 : index
    %9 = vector.load %arg18[%c0_7, %c0_8] : memref<256x128xf32, #tpu.memory_space<vmem>>, vector<256x128xf32>
    tpu.vector_store %arg18[%c0_7, %c0_8], %8 {strides = array<i32>} : memref<256x128xf32, #tpu.memory_space<vmem>>, vector<256x128xf32>,
    %10 = tpu.iota {dimensions = array<i32: 0>} : vector<256x1xi32>
    %c15_i32 = arith.constant 15 : i32
    %11 = vector.broadcast %c15_i32 : i32 to vector<256x1xi32>
    %12 = arith.andi %10, %11 : vector<256x1xi32>
    %c16_i32 = arith.constant 16 : i32
    %13 = vector.broadcast %c16_i32 : i32 to vector<256x1xi32>
    %14 = arith.cmpi sge, %10, %13 : vector<256x1xi32>
    %c240_i32 = arith.constant 240 : i32
    %15 = vector.broadcast %c240_i32 : i32 to vector<256x1xi32>
    %16 = arith.cmpi slt, %10, %15 : vector<256x1xi32>
    %c1_i32 = arith.constant 1 : i32
    %17 = vector.broadcast %c1_i32 : i32 to vector<256x1xi32>
    %18 = arith.cmpi sge, %12, %17 : vector<256x1xi32>
    %c15_i32_9 = arith.constant 15 : i32
    %19 = vector.broadcast %c15_i32_9 : i32 to vector<256x1xi32>
    %20 = arith.cmpi slt, %12, %19 : vector<256x1xi32>
    %21 = arith.andi %14, %18 : vector<256x1xi1>
    %22 = arith.extui %21 : vector<256x1xi1> to vector<256x1xi32>
    %23 = arith.sitofp %22 : vector<256x1xi32> to vector<256x1xf32>
    %24 = arith.extui %14 : vector<256x1xi1> to vector<256x1xi32>
    %25 = arith.sitofp %24 : vector<256x1xi32> to vector<256x1xf32>
    %26 = arith.andi %14, %20 : vector<256x1xi1>
    %27 = arith.extui %26 : vector<256x1xi1> to vector<256x1xi32>
    %28 = arith.sitofp %27 : vector<256x1xi32> to vector<256x1xf32>
    %29 = arith.extui %18 : vector<256x1xi1> to vector<256x1xi32>
    %30 = arith.sitofp %29 : vector<256x1xi32> to vector<256x1xf32>
    %31 = arith.extui %20 : vector<256x1xi1> to vector<256x1xi32>
    %32 = arith.sitofp %31 : vector<256x1xi32> to vector<256x1xf32>
    %33 = arith.andi %16, %18 : vector<256x1xi1>
    %34 = arith.extui %33 : vector<256x1xi1> to vector<256x1xi32>
    %35 = arith.sitofp %34 : vector<256x1xi32> to vector<256x1xf32>
    %36 = arith.extui %16 : vector<256x1xi1> to vector<256x1xi32>
    %37 = arith.sitofp %36 : vector<256x1xi32> to vector<256x1xf32>
    %38 = arith.andi %16, %20 : vector<256x1xi1>
    %39 = arith.extui %38 : vector<256x1xi1> to vector<256x1xi32>
    %40 = arith.sitofp %39 : vector<256x1xi32> to vector<256x1xf32>
    %c0_10 = arith.constant 0 : index
    %c0_11 = arith.constant 0 : index
    %41 = vector.load %arg18[%c0_10, %c0_11] : memref<256x128xf32, #tpu.memory_space<vmem>>, vector<256x128xf32>
    %c17_i32 = arith.constant 17 : i32
    %42 = tpu.dynamic_rotate %41 by %c17_i32 dim 0 : vector<256x128xf32>, i32 -> vector<256x128xf32>
    %43 = vector.broadcast %23 : vector<256x1xf32> to vector<256x128xf32>
    %44 = arith.mulf %42, %43 : vector<256x128xf32>
    %45 = arith.truncf %44 : vector<256x128xf32> to vector<256x128xbf16>
    %c0_12 = arith.constant 0 : index
    %c0_13 = arith.constant 0 : index
    %c0_14 = arith.constant 0 : index
    %46 = vector.load %arg4[%c0_12, %c0_13, %c0_14] : memref<9x128x128xbf16, #tpu.memory_space<vmem>>, vector<1x128x128xbf16>
    %47 = vector.shape_cast %46 : vector<1x128x128xbf16> to vector<128x128xbf16>
    %cst_15 = arith.constant dense<0.000000e+00> : vector<256x128xf32>
    %48 = tpu.matmul %45, %47, %cst_15 {dimension_numbers = #tpu.dot_dimension_numbers<[1], [0], [0], [1], [0, 0, 1, 1], [], []>} : vector<256x128xbf16>, vector<128x128xbf16>, vector<256x128xf32> -> vector<256x128xf32>
    %c0_16 = arith.constant 0 : index
    %c0_17 = arith.constant 0 : index
    %49 = vector.load %arg19[%c0_16, %c0_17] : memref<256x128xf32, #tpu.memory_space<vmem>>, vector<256x128xf32>
    tpu.vector_store %arg19[%c0_16, %c0_17], %48 {strides = array<i32>} : memref<256x128xf32, #tpu.memory_space<vmem>>, vector<256x128xf32>,
    %c0_18 = arith.constant 0 : index
    %c0_19 = arith.constant 0 : index
    %50 = vector.load %arg18[%c0_18, %c0_19] : memref<256x128xf32, #tpu.memory_space<vmem>>, vector<256x128xf32>
    %c16_i32_20 = arith.constant 16 : i32
    %51 = tpu.dynamic_rotate %50 by %c16_i32_20 dim 0 : vector<256x128xf32>, i32 -> vector<256x128xf32>
    %52 = vector.broadcast %25 : vector<256x1xf32> to vector<256x128xf32>
    %53 = arith.mulf %51, %52 : vector<256x128xf32>
    %54 = arith.truncf %53 : vector<256x128xf32> to vector<256x128xbf16>
    %c1 = arith.constant 1 : index
    %c0_21 = arith.constant 0 : index
    %c0_22 = arith.constant 0 : index
    %55 = vector.load %arg4[%c1, %c0_21, %c0_22] : memref<9x128x128xbf16, #tpu.memory_space<vmem>>, vector<1x128x128xbf16>
    %56 = vector.shape_cast %55 : vector<1x128x128xbf16> to vector<128x128xbf16>
    %cst_23 = arith.constant dense<0.000000e+00> : vector<256x128xf32>
    %57 = tpu.matmul %54, %56, %cst_23 {dimension_numbers = #tpu.dot_dimension_numbers<[1], [0], [0], [1], [0, 0, 1, 1], [], []>} : vector<256x128xbf16>, vector<128x128xbf16>, vector<256x128xf32> -> vector<256x128xf32>
    %c0_24 = arith.constant 0 : index
    %c0_25 = arith.constant 0 : index
    %58 = vector.load %arg19[%c0_24, %c0_25] : memref<256x128xf32, #tpu.memory_space<vmem>>, vector<256x128xf32>
    %59 = arith.addf %58, %57 : vector<256x128xf32>
    %c0_26 = arith.constant 0 : index
    %c0_27 = arith.constant 0 : index
    %60 = vector.load %arg19[%c0_26, %c0_27] : memref<256x128xf32, #tpu.memory_space<vmem>>, vector<256x128xf32>
    tpu.vector_store %arg19[%c0_26, %c0_27], %59 {strides = array<i32>} : memref<256x128xf32, #tpu.memory_space<vmem>>, vector<256x128xf32>,
    %c0_28 = arith.constant 0 : index
    %c0_29 = arith.constant 0 : index
    %61 = vector.load %arg18[%c0_28, %c0_29] : memref<256x128xf32, #tpu.memory_space<vmem>>, vector<256x128xf32>
    %c15_i32_30 = arith.constant 15 : i32
    %62 = tpu.dynamic_rotate %61 by %c15_i32_30 dim 0 : vector<256x128xf32>, i32 -> vector<256x128xf32>
    %63 = vector.broadcast %28 : vector<256x1xf32> to vector<256x128xf32>
    %64 = arith.mulf %62, %63 : vector<256x128xf32>
    %65 = arith.truncf %64 : vector<256x128xf32> to vector<256x128xbf16>
    %c2 = arith.constant 2 : index
    %c0_31 = arith.constant 0 : index
    %c0_32 = arith.constant 0 : index
    %66 = vector.load %arg4[%c2, %c0_31, %c0_32] : memref<9x128x128xbf16, #tpu.memory_space<vmem>>, vector<1x128x128xbf16>
    %67 = vector.shape_cast %66 : vector<1x128x128xbf16> to vector<128x128xbf16>
    %cst_33 = arith.constant dense<0.000000e+00> : vector<256x128xf32>
    %68 = tpu.matmul %65, %67, %cst_33 {dimension_numbers = #tpu.dot_dimension_numbers<[1], [0], [0], [1], [0, 0, 1, 1], [], []>} : vector<256x128xbf16>, vector<128x128xbf16>, vector<256x128xf32> -> vector<256x128xf32>
    %c0_34 = arith.constant 0 : index
    %c0_35 = arith.constant 0 : index
    %69 = vector.load %arg19[%c0_34, %c0_35] : memref<256x128xf32, #tpu.memory_space<vmem>>, vector<256x128xf32>
    %70 = arith.addf %69, %68 : vector<256x128xf32>
    %c0_36 = arith.constant 0 : index
    %c0_37 = arith.constant 0 : index
    %71 = vector.load %arg19[%c0_36, %c0_37] : memref<256x128xf32, #tpu.memory_space<vmem>>, vector<256x128xf32>
    tpu.vector_store %arg19[%c0_36, %c0_37], %70 {strides = array<i32>} : memref<256x128xf32, #tpu.memory_space<vmem>>, vector<256x128xf32>,
    %c0_38 = arith.constant 0 : index
    %c0_39 = arith.constant 0 : index
    %72 = vector.load %arg18[%c0_38, %c0_39] : memref<256x128xf32, #tpu.memory_space<vmem>>, vector<256x128xf32>
    %c1_i32_40 = arith.constant 1 : i32
    %73 = tpu.dynamic_rotate %72 by %c1_i32_40 dim 0 : vector<256x128xf32>, i32 -> vector<256x128xf32>
    %74 = vector.broadcast %30 : vector<256x1xf32> to vector<256x128xf32>
    %75 = arith.mulf %73, %74 : vector<256x128xf32>
    %76 = arith.truncf %75 : vector<256x128xf32> to vector<256x128xbf16>
    %c3 = arith.constant 3 : index
    %c0_41 = arith.constant 0 : index
    %c0_42 = arith.constant 0 : index
    %77 = vector.load %arg4[%c3, %c0_41, %c0_42] : memref<9x128x128xbf16, #tpu.memory_space<vmem>>, vector<1x128x128xbf16>
    %78 = vector.shape_cast %77 : vector<1x128x128xbf16> to vector<128x128xbf16>
    %cst_43 = arith.constant dense<0.000000e+00> : vector<256x128xf32>
    %79 = tpu.matmul %76, %78, %cst_43 {dimension_numbers = #tpu.dot_dimension_numbers<[1], [0], [0], [1], [0, 0, 1, 1], [], []>} : vector<256x128xbf16>, vector<128x128xbf16>, vector<256x128xf32> -> vector<256x128xf32>
    %c0_44 = arith.constant 0 : index
    %c0_45 = arith.constant 0 : index
    %80 = vector.load %arg19[%c0_44, %c0_45] : memref<256x128xf32, #tpu.memory_space<vmem>>, vector<256x128xf32>
    %81 = arith.addf %80, %79 : vector<256x128xf32>
    %c0_46 = arith.constant 0 : index
    %c0_47 = arith.constant 0 : index
    %82 = vector.load %arg19[%c0_46, %c0_47] : memref<256x128xf32, #tpu.memory_space<vmem>>, vector<256x128xf32>
    tpu.vector_store %arg19[%c0_46, %c0_47], %81 {strides = array<i32>} : memref<256x128xf32, #tpu.memory_space<vmem>>, vector<256x128xf32>,
    %c0_48 = arith.constant 0 : index
    %c0_49 = arith.constant 0 : index
    %83 = vector.load %arg18[%c0_48, %c0_49] : memref<256x128xf32, #tpu.memory_space<vmem>>, vector<256x128xf32>
    %84 = arith.truncf %83 : vector<256x128xf32> to vector<256x128xbf16>
    %c4 = arith.constant 4 : index
    %c0_50 = arith.constant 0 : index
    %c0_51 = arith.constant 0 : index
    %85 = vector.load %arg4[%c4, %c0_50, %c0_51] : memref<9x128x128xbf16, #tpu.memory_space<vmem>>, vector<1x128x128xbf16>
    %86 = vector.shape_cast %85 : vector<1x128x128xbf16> to vector<128x128xbf16>
    %cst_52 = arith.constant dense<0.000000e+00> : vector<256x128xf32>
    %87 = tpu.matmul %84, %86, %cst_52 {dimension_numbers = #tpu.dot_dimension_numbers<[1], [0], [0], [1], [0, 0, 1, 1], [], []>} : vector<256x128xbf16>, vector<128x128xbf16>, vector<256x128xf32> -> vector<256x128xf32>
    %c0_53 = arith.constant 0 : index
    %c0_54 = arith.constant 0 : index
    %88 = vector.load %arg19[%c0_53, %c0_54] : memref<256x128xf32, #tpu.memory_space<vmem>>, vector<256x128xf32>
    %89 = arith.addf %88, %87 : vector<256x128xf32>
    %c0_55 = arith.constant 0 : index
    %c0_56 = arith.constant 0 : index
    %90 = vector.load %arg19[%c0_55, %c0_56] : memref<256x128xf32, #tpu.memory_space<vmem>>, vector<256x128xf32>
    tpu.vector_store %arg19[%c0_55, %c0_56], %89 {strides = array<i32>} : memref<256x128xf32, #tpu.memory_space<vmem>>, vector<256x128xf32>,
    %c0_57 = arith.constant 0 : index
    %c0_58 = arith.constant 0 : index
    %91 = vector.load %arg18[%c0_57, %c0_58] : memref<256x128xf32, #tpu.memory_space<vmem>>, vector<256x128xf32>
    %c255_i32 = arith.constant 255 : i32
    %92 = tpu.dynamic_rotate %91 by %c255_i32 dim 0 : vector<256x128xf32>, i32 -> vector<256x128xf32>
    %93 = vector.broadcast %32 : vector<256x1xf32> to vector<256x128xf32>
    %94 = arith.mulf %92, %93 : vector<256x128xf32>
    %95 = arith.truncf %94 : vector<256x128xf32> to vector<256x128xbf16>
    %c5 = arith.constant 5 : index
    %c0_59 = arith.constant 0 : index
    %c0_60 = arith.constant 0 : index
    %96 = vector.load %arg4[%c5, %c0_59, %c0_60] : memref<9x128x128xbf16, #tpu.memory_space<vmem>>, vector<1x128x128xbf16>
    %97 = vector.shape_cast %96 : vector<1x128x128xbf16> to vector<128x128xbf16>
    %cst_61 = arith.constant dense<0.000000e+00> : vector<256x128xf32>
    %98 = tpu.matmul %95, %97, %cst_61 {dimension_numbers = #tpu.dot_dimension_numbers<[1], [0], [0], [1], [0, 0, 1, 1], [], []>} : vector<256x128xbf16>, vector<128x128xbf16>, vector<256x128xf32> -> vector<256x128xf32>
    %c0_62 = arith.constant 0 : index
    %c0_63 = arith.constant 0 : index
    %99 = vector.load %arg19[%c0_62, %c0_63] : memref<256x128xf32, #tpu.memory_space<vmem>>, vector<256x128xf32>
    %100 = arith.addf %99, %98 : vector<256x128xf32>
    %c0_64 = arith.constant 0 : index
    %c0_65 = arith.constant 0 : index
    %101 = vector.load %arg19[%c0_64, %c0_65] : memref<256x128xf32, #tpu.memory_space<vmem>>, vector<256x128xf32>
    tpu.vector_store %arg19[%c0_64, %c0_65], %100 {strides = array<i32>} : memref<256x128xf32, #tpu.memory_space<vmem>>, vector<256x128xf32>,
    %c0_66 = arith.constant 0 : index
    %c0_67 = arith.constant 0 : index
    %102 = vector.load %arg18[%c0_66, %c0_67] : memref<256x128xf32, #tpu.memory_space<vmem>>, vector<256x128xf32>
    %c241_i32 = arith.constant 241 : i32
    %103 = tpu.dynamic_rotate %102 by %c241_i32 dim 0 : vector<256x128xf32>, i32 -> vector<256x128xf32>
    %104 = vector.broadcast %35 : vector<256x1xf32> to vector<256x128xf32>
    %105 = arith.mulf %103, %104 : vector<256x128xf32>
    %106 = arith.truncf %105 : vector<256x128xf32> to vector<256x128xbf16>
    %c6 = arith.constant 6 : index
    %c0_68 = arith.constant 0 : index
    %c0_69 = arith.constant 0 : index
    %107 = vector.load %arg4[%c6, %c0_68, %c0_69] : memref<9x128x128xbf16, #tpu.memory_space<vmem>>, vector<1x128x128xbf16>
    %108 = vector.shape_cast %107 : vector<1x128x128xbf16> to vector<128x128xbf16>
    %cst_70 = arith.constant dense<0.000000e+00> : vector<256x128xf32>
    %109 = tpu.matmul %106, %108, %cst_70 {dimension_numbers = #tpu.dot_dimension_numbers<[1], [0], [0], [1], [0, 0, 1, 1], [], []>} : vector<256x128xbf16>, vector<128x128xbf16>, vector<256x128xf32> -> vector<256x128xf32>
    %c0_71 = arith.constant 0 : index
    %c0_72 = arith.constant 0 : index
    %110 = vector.load %arg19[%c0_71, %c0_72] : memref<256x128xf32, #tpu.memory_space<vmem>>, vector<256x128xf32>
    %111 = arith.addf %110, %109 : vector<256x128xf32>
    %c0_73 = arith.constant 0 : index
    %c0_74 = arith.constant 0 : index
    %112 = vector.load %arg19[%c0_73, %c0_74] : memref<256x128xf32, #tpu.memory_space<vmem>>, vector<256x128xf32>
    tpu.vector_store %arg19[%c0_73, %c0_74], %111 {strides = array<i32>} : memref<256x128xf32, #tpu.memory_space<vmem>>, vector<256x128xf32>,
    %c0_75 = arith.constant 0 : index
    %c0_76 = arith.constant 0 : index
    %113 = vector.load %arg18[%c0_75, %c0_76] : memref<256x128xf32, #tpu.memory_space<vmem>>, vector<256x128xf32>
    %c240_i32_77 = arith.constant 240 : i32
    %114 = tpu.dynamic_rotate %113 by %c240_i32_77 dim 0 : vector<256x128xf32>, i32 -> vector<256x128xf32>
    %115 = vector.broadcast %37 : vector<256x1xf32> to vector<256x128xf32>
    %116 = arith.mulf %114, %115 : vector<256x128xf32>
    %117 = arith.truncf %116 : vector<256x128xf32> to vector<256x128xbf16>
    %c7 = arith.constant 7 : index
    %c0_78 = arith.constant 0 : index
    %c0_79 = arith.constant 0 : index
    %118 = vector.load %arg4[%c7, %c0_78, %c0_79] : memref<9x128x128xbf16, #tpu.memory_space<vmem>>, vector<1x128x128xbf16>
    %119 = vector.shape_cast %118 : vector<1x128x128xbf16> to vector<128x128xbf16>
    %cst_80 = arith.constant dense<0.000000e+00> : vector<256x128xf32>
    %120 = tpu.matmul %117, %119, %cst_80 {dimension_numbers = #tpu.dot_dimension_numbers<[1], [0], [0], [1], [0, 0, 1, 1], [], []>} : vector<256x128xbf16>, vector<128x128xbf16>, vector<256x128xf32> -> vector<256x128xf32>
    %c0_81 = arith.constant 0 : index
    %c0_82 = arith.constant 0 : index
    %121 = vector.load %arg19[%c0_81, %c0_82] : memref<256x128xf32, #tpu.memory_space<vmem>>, vector<256x128xf32>
    %122 = arith.addf %121, %120 : vector<256x128xf32>
    %c0_83 = arith.constant 0 : index
    %c0_84 = arith.constant 0 : index
    %123 = vector.load %arg19[%c0_83, %c0_84] : memref<256x128xf32, #tpu.memory_space<vmem>>, vector<256x128xf32>
    tpu.vector_store %arg19[%c0_83, %c0_84], %122 {strides = array<i32>} : memref<256x128xf32, #tpu.memory_space<vmem>>, vector<256x128xf32>,
    %c0_85 = arith.constant 0 : index
    %c0_86 = arith.constant 0 : index
    %124 = vector.load %arg18[%c0_85, %c0_86] : memref<256x128xf32, #tpu.memory_space<vmem>>, vector<256x128xf32>
    %c239_i32 = arith.constant 239 : i32
    %125 = tpu.dynamic_rotate %124 by %c239_i32 dim 0 : vector<256x128xf32>, i32 -> vector<256x128xf32>
    %126 = vector.broadcast %40 : vector<256x1xf32> to vector<256x128xf32>
    %127 = arith.mulf %125, %126 : vector<256x128xf32>
    %128 = arith.truncf %127 : vector<256x128xf32> to vector<256x128xbf16>
    %c8 = arith.constant 8 : index
    %c0_87 = arith.constant 0 : index
    %c0_88 = arith.constant 0 : index
    %129 = vector.load %arg4[%c8, %c0_87, %c0_88] : memref<9x128x128xbf16, #tpu.memory_space<vmem>>, vector<1x128x128xbf16>
    %130 = vector.shape_cast %129 : vector<1x128x128xbf16> to vector<128x128xbf16>
    %cst_89 = arith.constant dense<0.000000e+00> : vector<256x128xf32>
    %131 = tpu.matmul %128, %130, %cst_89 {dimension_numbers = #tpu.dot_dimension_numbers<[1], [0], [0], [1], [0, 0, 1, 1], [], []>} : vector<256x128xbf16>, vector<128x128xbf16>, vector<256x128xf32> -> vector<256x128xf32>
    %c0_90 = arith.constant 0 : index
    %c0_91 = arith.constant 0 : index
    %132 = vector.load %arg19[%c0_90, %c0_91] : memref<256x128xf32, #tpu.memory_space<vmem>>, vector<256x128xf32>
    %133 = arith.addf %132, %131 : vector<256x128xf32>
    %c0_92 = arith.constant 0 : index
    %c0_93 = arith.constant 0 : index
    %134 = vector.load %arg19[%c0_92, %c0_93] : memref<256x128xf32, #tpu.memory_space<vmem>>, vector<256x128xf32>
    tpu.vector_store %arg19[%c0_92, %c0_93], %133 {strides = array<i32>} : memref<256x128xf32, #tpu.memory_space<vmem>>, vector<256x128xf32>,
    %c0_94 = arith.constant 0 : index
    %c0_95 = arith.constant 0 : index
    %135 = vector.load %arg19[%c0_94, %c0_95] : memref<256x128xf32, #tpu.memory_space<vmem>>, vector<256x128xf32>
    %c0_96 = arith.constant 0 : index
    %c0_97 = arith.constant 0 : index
    %136 = vector.load %arg5[%c0_96, %c0_97] : memref<1x128xf32, #tpu.memory_space<vmem>>, vector<1x128xf32>
    %137 = vector.broadcast %136 : vector<1x128xf32> to vector<256x128xf32>
    %138 = arith.addf %135, %137 : vector<256x128xf32>
    %cst_98 = arith.constant 0.000000e+00 : f32
    %139 = vector.broadcast %cst_98 : f32 to vector<256x128xf32>
    %140 = arith.maximumf %138, %139 : vector<256x128xf32>
    %c0_99 = arith.constant 0 : index
    %c0_100 = arith.constant 0 : index
    %141 = vector.load %arg18[%c0_99, %c0_100] : memref<256x128xf32, #tpu.memory_space<vmem>>, vector<256x128xf32>
    tpu.vector_store %arg18[%c0_99, %c0_100], %140 {strides = array<i32>} : memref<256x128xf32, #tpu.memory_space<vmem>>, vector<256x128xf32>,
    %c0_101 = arith.constant 0 : index
    %c0_102 = arith.constant 0 : index
    %142 = vector.load %arg18[%c0_101, %c0_102] : memref<256x128xf32, #tpu.memory_space<vmem>>, vector<256x128xf32>
    %143 = arith.truncf %142 : vector<256x128xf32> to vector<256x128xbf16>
    %c0_103 = arith.constant 0 : index
    %c0_104 = arith.constant 0 : index
    %144 = vector.load %arg6[%c0_103, %c0_104] : memref<128x128xbf16, #tpu.memory_space<vmem>>, vector<128x128xbf16>
    %cst_105 = arith.constant dense<0.000000e+00> : vector<256x128xf32>
    %145 = tpu.matmul %143, %144, %cst_105 {dimension_numbers = #tpu.dot_dimension_numbers<[1], [0], [0], [1], [0, 0, 1, 1], [], []>} : vector<256x128xbf16>, vector<128x128xbf16>, vector<256x128xf32> -> vector<256x128xf32>
    %c0_106 = arith.constant 0 : index
    %c0_107 = arith.constant 0 : index
    %146 = vector.load %arg7[%c0_106, %c0_107] : memref<1x128xf32, #tpu.memory_space<vmem>>, vector<1x128xf32>
    %147 = vector.broadcast %146 : vector<1x128xf32> to vector<256x128xf32>
    %148 = arith.addf %145, %147 : vector<256x128xf32>
    %cst_108 = arith.constant 0.000000e+00 : f32
    %149 = vector.broadcast %cst_108 : f32 to vector<256x128xf32>
    %150 = arith.maximumf %148, %149 : vector<256x128xf32>
    %c0_109 = arith.constant 0 : index
    %c0_110 = arith.constant 0 : index
    %151 = vector.load %arg18[%c0_109, %c0_110] : memref<256x128xf32, #tpu.memory_space<vmem>>, vector<256x128xf32>
    tpu.vector_store %arg18[%c0_109, %c0_110], %150 {strides = array<i32>} : memref<256x128xf32, #tpu.memory_space<vmem>>, vector<256x128xf32>,
    %c0_111 = arith.constant 0 : index
    %c0_112 = arith.constant 0 : index
    %152 = vector.load %arg18[%c0_111, %c0_112] : memref<256x128xf32, #tpu.memory_space<vmem>>, vector<256x128xf32>
    %c17_i32_113 = arith.constant 17 : i32
    %153 = tpu.dynamic_rotate %152 by %c17_i32_113 dim 0 : vector<256x128xf32>, i32 -> vector<256x128xf32>
    %154 = vector.broadcast %23 : vector<256x1xf32> to vector<256x128xf32>
    %155 = arith.mulf %153, %154 : vector<256x128xf32>
    %156 = arith.truncf %155 : vector<256x128xf32> to vector<256x128xbf16>
    %c0_114 = arith.constant 0 : index
    %c0_115 = arith.constant 0 : index
    %c0_116 = arith.constant 0 : index
    %157 = vector.load %arg8[%c0_114, %c0_115, %c0_116] : memref<9x128x128xbf16, #tpu.memory_space<vmem>>, vector<1x128x128xbf16>
    %158 = vector.shape_cast %157 : vector<1x128x128xbf16> to vector<128x128xbf16>
    %cst_117 = arith.constant dense<0.000000e+00> : vector<256x128xf32>
    %159 = tpu.matmul %156, %158, %cst_117 {dimension_numbers = #tpu.dot_dimension_numbers<[1], [0], [0], [1], [0, 0, 1, 1], [], []>} : vector<256x128xbf16>, vector<128x128xbf16>, vector<256x128xf32> -> vector<256x128xf32>
    %c0_118 = arith.constant 0 : index
    %c0_119 = arith.constant 0 : index
    %160 = vector.load %arg19[%c0_118, %c0_119] : memref<256x128xf32, #tpu.memory_space<vmem>>, vector<256x128xf32>
    tpu.vector_store %arg19[%c0_118, %c0_119], %159 {strides = array<i32>} : memref<256x128xf32, #tpu.memory_space<vmem>>, vector<256x128xf32>,
    %c0_120 = arith.constant 0 : index
    %c0_121 = arith.constant 0 : index
    %161 = vector.load %arg18[%c0_120, %c0_121] : memref<256x128xf32, #tpu.memory_space<vmem>>, vector<256x128xf32>
    %c16_i32_122 = arith.constant 16 : i32
    %162 = tpu.dynamic_rotate %161 by %c16_i32_122 dim 0 : vector<256x128xf32>, i32 -> vector<256x128xf32>
    %163 = vector.broadcast %25 : vector<256x1xf32> to vector<256x128xf32>
    %164 = arith.mulf %162, %163 : vector<256x128xf32>
    %165 = arith.truncf %164 : vector<256x128xf32> to vector<256x128xbf16>
    %c1_123 = arith.constant 1 : index
    %c0_124 = arith.constant 0 : index
    %c0_125 = arith.constant 0 : index
    %166 = vector.load %arg8[%c1_123, %c0_124, %c0_125] : memref<9x128x128xbf16, #tpu.memory_space<vmem>>, vector<1x128x128xbf16>
    %167 = vector.shape_cast %166 : vector<1x128x128xbf16> to vector<128x128xbf16>
    %cst_126 = arith.constant dense<0.000000e+00> : vector<256x128xf32>
    %168 = tpu.matmul %165, %167, %cst_126 {dimension_numbers = #tpu.dot_dimension_numbers<[1], [0], [0], [1], [0, 0, 1, 1], [], []>} : vector<256x128xbf16>, vector<128x128xbf16>, vector<256x128xf32> -> vector<256x128xf32>
    %c0_127 = arith.constant 0 : index
    %c0_128 = arith.constant 0 : index
    %169 = vector.load %arg19[%c0_127, %c0_128] : memref<256x128xf32, #tpu.memory_space<vmem>>, vector<256x128xf32>
    %170 = arith.addf %169, %168 : vector<256x128xf32>
    %c0_129 = arith.constant 0 : index
    %c0_130 = arith.constant 0 : index
    %171 = vector.load %arg19[%c0_129, %c0_130] : memref<256x128xf32, #tpu.memory_space<vmem>>, vector<256x128xf32>
    tpu.vector_store %arg19[%c0_129, %c0_130], %170 {strides = array<i32>} : memref<256x128xf32, #tpu.memory_space<vmem>>, vector<256x128xf32>,
    %c0_131 = arith.constant 0 : index
    %c0_132 = arith.constant 0 : index
    %172 = vector.load %arg18[%c0_131, %c0_132] : memref<256x128xf32, #tpu.memory_space<vmem>>, vector<256x128xf32>
    %c15_i32_133 = arith.constant 15 : i32
    %173 = tpu.dynamic_rotate %172 by %c15_i32_133 dim 0 : vector<256x128xf32>, i32 -> vector<256x128xf32>
    %174 = vector.broadcast %28 : vector<256x1xf32> to vector<256x128xf32>
    %175 = arith.mulf %173, %174 : vector<256x128xf32>
    %176 = arith.truncf %175 : vector<256x128xf32> to vector<256x128xbf16>
    %c2_134 = arith.constant 2 : index
    %c0_135 = arith.constant 0 : index
    %c0_136 = arith.constant 0 : index
    %177 = vector.load %arg8[%c2_134, %c0_135, %c0_136] : memref<9x128x128xbf16, #tpu.memory_space<vmem>>, vector<1x128x128xbf16>
    %178 = vector.shape_cast %177 : vector<1x128x128xbf16> to vector<128x128xbf16>
    %cst_137 = arith.constant dense<0.000000e+00> : vector<256x128xf32>
    %179 = tpu.matmul %176, %178, %cst_137 {dimension_numbers = #tpu.dot_dimension_numbers<[1], [0], [0], [1], [0, 0, 1, 1], [], []>} : vector<256x128xbf16>, vector<128x128xbf16>, vector<256x128xf32> -> vector<256x128xf32>
    %c0_138 = arith.constant 0 : index
    %c0_139 = arith.constant 0 : index
    %180 = vector.load %arg19[%c0_138, %c0_139] : memref<256x128xf32, #tpu.memory_space<vmem>>, vector<256x128xf32>
    %181 = arith.addf %180, %179 : vector<256x128xf32>
    %c0_140 = arith.constant 0 : index
    %c0_141 = arith.constant 0 : index
    %182 = vector.load %arg19[%c0_140, %c0_141] : memref<256x128xf32, #tpu.memory_space<vmem>>, vector<256x128xf32>
    tpu.vector_store %arg19[%c0_140, %c0_141], %181 {strides = array<i32>} : memref<256x128xf32, #tpu.memory_space<vmem>>, vector<256x128xf32>,
    %c0_142 = arith.constant 0 : index
    %c0_143 = arith.constant 0 : index
    %183 = vector.load %arg18[%c0_142, %c0_143] : memref<256x128xf32, #tpu.memory_space<vmem>>, vector<256x128xf32>
    %c1_i32_144 = arith.constant 1 : i32
    %184 = tpu.dynamic_rotate %183 by %c1_i32_144 dim 0 : vector<256x128xf32>, i32 -> vector<256x128xf32>
    %185 = vector.broadcast %30 : vector<256x1xf32> to vector<256x128xf32>
    %186 = arith.mulf %184, %185 : vector<256x128xf32>
    %187 = arith.truncf %186 : vector<256x128xf32> to vector<256x128xbf16>
    %c3_145 = arith.constant 3 : index
    %c0_146 = arith.constant 0 : index
    %c0_147 = arith.constant 0 : index
    %188 = vector.load %arg8[%c3_145, %c0_146, %c0_147] : memref<9x128x128xbf16, #tpu.memory_space<vmem>>, vector<1x128x128xbf16>
    %189 = vector.shape_cast %188 : vector<1x128x128xbf16> to vector<128x128xbf16>
    %cst_148 = arith.constant dense<0.000000e+00> : vector<256x128xf32>
    %190 = tpu.matmul %187, %189, %cst_148 {dimension_numbers = #tpu.dot_dimension_numbers<[1], [0], [0], [1], [0, 0, 1, 1], [], []>} : vector<256x128xbf16>, vector<128x128xbf16>, vector<256x128xf32> -> vector<256x128xf32>
    %c0_149 = arith.constant 0 : index
    %c0_150 = arith.constant 0 : index
    %191 = vector.load %arg19[%c0_149, %c0_150] : memref<256x128xf32, #tpu.memory_space<vmem>>, vector<256x128xf32>
    %192 = arith.addf %191, %190 : vector<256x128xf32>
    %c0_151 = arith.constant 0 : index
    %c0_152 = arith.constant 0 : index
    %193 = vector.load %arg19[%c0_151, %c0_152] : memref<256x128xf32, #tpu.memory_space<vmem>>, vector<256x128xf32>
    tpu.vector_store %arg19[%c0_151, %c0_152], %192 {strides = array<i32>} : memref<256x128xf32, #tpu.memory_space<vmem>>, vector<256x128xf32>,
    %c0_153 = arith.constant 0 : index
    %c0_154 = arith.constant 0 : index
    %194 = vector.load %arg18[%c0_153, %c0_154] : memref<256x128xf32, #tpu.memory_space<vmem>>, vector<256x128xf32>
    %195 = arith.truncf %194 : vector<256x128xf32> to vector<256x128xbf16>
    %c4_155 = arith.constant 4 : index
    %c0_156 = arith.constant 0 : index
    %c0_157 = arith.constant 0 : index
    %196 = vector.load %arg8[%c4_155, %c0_156, %c0_157] : memref<9x128x128xbf16, #tpu.memory_space<vmem>>, vector<1x128x128xbf16>
    %197 = vector.shape_cast %196 : vector<1x128x128xbf16> to vector<128x128xbf16>
    %cst_158 = arith.constant dense<0.000000e+00> : vector<256x128xf32>
    %198 = tpu.matmul %195, %197, %cst_158 {dimension_numbers = #tpu.dot_dimension_numbers<[1], [0], [0], [1], [0, 0, 1, 1], [], []>} : vector<256x128xbf16>, vector<128x128xbf16>, vector<256x128xf32> -> vector<256x128xf32>
    %c0_159 = arith.constant 0 : index
    %c0_160 = arith.constant 0 : index
    %199 = vector.load %arg19[%c0_159, %c0_160] : memref<256x128xf32, #tpu.memory_space<vmem>>, vector<256x128xf32>
    %200 = arith.addf %199, %198 : vector<256x128xf32>
    %c0_161 = arith.constant 0 : index
    %c0_162 = arith.constant 0 : index
    %201 = vector.load %arg19[%c0_161, %c0_162] : memref<256x128xf32, #tpu.memory_space<vmem>>, vector<256x128xf32>
    tpu.vector_store %arg19[%c0_161, %c0_162], %200 {strides = array<i32>} : memref<256x128xf32, #tpu.memory_space<vmem>>, vector<256x128xf32>,
    %c0_163 = arith.constant 0 : index
    %c0_164 = arith.constant 0 : index
    %202 = vector.load %arg18[%c0_163, %c0_164] : memref<256x128xf32, #tpu.memory_space<vmem>>, vector<256x128xf32>
    %c255_i32_165 = arith.constant 255 : i32
    %203 = tpu.dynamic_rotate %202 by %c255_i32_165 dim 0 : vector<256x128xf32>, i32 -> vector<256x128xf32>
    %204 = vector.broadcast %32 : vector<256x1xf32> to vector<256x128xf32>
    %205 = arith.mulf %203, %204 : vector<256x128xf32>
    %206 = arith.truncf %205 : vector<256x128xf32> to vector<256x128xbf16>
    %c5_166 = arith.constant 5 : index
    %c0_167 = arith.constant 0 : index
    %c0_168 = arith.constant 0 : index
    %207 = vector.load %arg8[%c5_166, %c0_167, %c0_168] : memref<9x128x128xbf16, #tpu.memory_space<vmem>>, vector<1x128x128xbf16>
    %208 = vector.shape_cast %207 : vector<1x128x128xbf16> to vector<128x128xbf16>
    %cst_169 = arith.constant dense<0.000000e+00> : vector<256x128xf32>
    %209 = tpu.matmul %206, %208, %cst_169 {dimension_numbers = #tpu.dot_dimension_numbers<[1], [0], [0], [1], [0, 0, 1, 1], [], []>} : vector<256x128xbf16>, vector<128x128xbf16>, vector<256x128xf32> -> vector<256x128xf32>
    %c0_170 = arith.constant 0 : index
    %c0_171 = arith.constant 0 : index
    %210 = vector.load %arg19[%c0_170, %c0_171] : memref<256x128xf32, #tpu.memory_space<vmem>>, vector<256x128xf32>
    %211 = arith.addf %210, %209 : vector<256x128xf32>
    %c0_172 = arith.constant 0 : index
    %c0_173 = arith.constant 0 : index
    %212 = vector.load %arg19[%c0_172, %c0_173] : memref<256x128xf32, #tpu.memory_space<vmem>>, vector<256x128xf32>
    tpu.vector_store %arg19[%c0_172, %c0_173], %211 {strides = array<i32>} : memref<256x128xf32, #tpu.memory_space<vmem>>, vector<256x128xf32>,
    %c0_174 = arith.constant 0 : index
    %c0_175 = arith.constant 0 : index
    %213 = vector.load %arg18[%c0_174, %c0_175] : memref<256x128xf32, #tpu.memory_space<vmem>>, vector<256x128xf32>
    %c241_i32_176 = arith.constant 241 : i32
    %214 = tpu.dynamic_rotate %213 by %c241_i32_176 dim 0 : vector<256x128xf32>, i32 -> vector<256x128xf32>
    %215 = vector.broadcast %35 : vector<256x1xf32> to vector<256x128xf32>
    %216 = arith.mulf %214, %215 : vector<256x128xf32>
    %217 = arith.truncf %216 : vector<256x128xf32> to vector<256x128xbf16>
    %c6_177 = arith.constant 6 : index
    %c0_178 = arith.constant 0 : index
    %c0_179 = arith.constant 0 : index
    %218 = vector.load %arg8[%c6_177, %c0_178, %c0_179] : memref<9x128x128xbf16, #tpu.memory_space<vmem>>, vector<1x128x128xbf16>
    %219 = vector.shape_cast %218 : vector<1x128x128xbf16> to vector<128x128xbf16>
    %cst_180 = arith.constant dense<0.000000e+00> : vector<256x128xf32>
    %220 = tpu.matmul %217, %219, %cst_180 {dimension_numbers = #tpu.dot_dimension_numbers<[1], [0], [0], [1], [0, 0, 1, 1], [], []>} : vector<256x128xbf16>, vector<128x128xbf16>, vector<256x128xf32> -> vector<256x128xf32>
    %c0_181 = arith.constant 0 : index
    %c0_182 = arith.constant 0 : index
    %221 = vector.load %arg19[%c0_181, %c0_182] : memref<256x128xf32, #tpu.memory_space<vmem>>, vector<256x128xf32>
    %222 = arith.addf %221, %220 : vector<256x128xf32>
    %c0_183 = arith.constant 0 : index
    %c0_184 = arith.constant 0 : index
    %223 = vector.load %arg19[%c0_183, %c0_184] : memref<256x128xf32, #tpu.memory_space<vmem>>, vector<256x128xf32>
    tpu.vector_store %arg19[%c0_183, %c0_184], %222 {strides = array<i32>} : memref<256x128xf32, #tpu.memory_space<vmem>>, vector<256x128xf32>,
    %c0_185 = arith.constant 0 : index
    %c0_186 = arith.constant 0 : index
    %224 = vector.load %arg18[%c0_185, %c0_186] : memref<256x128xf32, #tpu.memory_space<vmem>>, vector<256x128xf32>
    %c240_i32_187 = arith.constant 240 : i32
    %225 = tpu.dynamic_rotate %224 by %c240_i32_187 dim 0 : vector<256x128xf32>, i32 -> vector<256x128xf32>
    %226 = vector.broadcast %37 : vector<256x1xf32> to vector<256x128xf32>
    %227 = arith.mulf %225, %226 : vector<256x128xf32>
    %228 = arith.truncf %227 : vector<256x128xf32> to vector<256x128xbf16>
    %c7_188 = arith.constant 7 : index
    %c0_189 = arith.constant 0 : index
    %c0_190 = arith.constant 0 : index
    %229 = vector.load %arg8[%c7_188, %c0_189, %c0_190] : memref<9x128x128xbf16, #tpu.memory_space<vmem>>, vector<1x128x128xbf16>
    %230 = vector.shape_cast %229 : vector<1x128x128xbf16> to vector<128x128xbf16>
    %cst_191 = arith.constant dense<0.000000e+00> : vector<256x128xf32>
    %231 = tpu.matmul %228, %230, %cst_191 {dimension_numbers = #tpu.dot_dimension_numbers<[1], [0], [0], [1], [0, 0, 1, 1], [], []>} : vector<256x128xbf16>, vector<128x128xbf16>, vector<256x128xf32> -> vector<256x128xf32>
    %c0_192 = arith.constant 0 : index
    %c0_193 = arith.constant 0 : index
    %232 = vector.load %arg19[%c0_192, %c0_193] : memref<256x128xf32, #tpu.memory_space<vmem>>, vector<256x128xf32>
    %233 = arith.addf %232, %231 : vector<256x128xf32>
    %c0_194 = arith.constant 0 : index
    %c0_195 = arith.constant 0 : index
    %234 = vector.load %arg19[%c0_194, %c0_195] : memref<256x128xf32, #tpu.memory_space<vmem>>, vector<256x128xf32>
    tpu.vector_store %arg19[%c0_194, %c0_195], %233 {strides = array<i32>} : memref<256x128xf32, #tpu.memory_space<vmem>>, vector<256x128xf32>,
    %c0_196 = arith.constant 0 : index
    %c0_197 = arith.constant 0 : index
    %235 = vector.load %arg18[%c0_196, %c0_197] : memref<256x128xf32, #tpu.memory_space<vmem>>, vector<256x128xf32>
    %c239_i32_198 = arith.constant 239 : i32
    %236 = tpu.dynamic_rotate %235 by %c239_i32_198 dim 0 : vector<256x128xf32>, i32 -> vector<256x128xf32>
    %237 = vector.broadcast %40 : vector<256x1xf32> to vector<256x128xf32>
    %238 = arith.mulf %236, %237 : vector<256x128xf32>
    %239 = arith.truncf %238 : vector<256x128xf32> to vector<256x128xbf16>
    %c8_199 = arith.constant 8 : index
    %c0_200 = arith.constant 0 : index
    %c0_201 = arith.constant 0 : index
    %240 = vector.load %arg8[%c8_199, %c0_200, %c0_201] : memref<9x128x128xbf16, #tpu.memory_space<vmem>>, vector<1x128x128xbf16>
    %241 = vector.shape_cast %240 : vector<1x128x128xbf16> to vector<128x128xbf16>
    %cst_202 = arith.constant dense<0.000000e+00> : vector<256x128xf32>
    %242 = tpu.matmul %239, %241, %cst_202 {dimension_numbers = #tpu.dot_dimension_numbers<[1], [0], [0], [1], [0, 0, 1, 1], [], []>} : vector<256x128xbf16>, vector<128x128xbf16>, vector<256x128xf32> -> vector<256x128xf32>
    %c0_203 = arith.constant 0 : index
    %c0_204 = arith.constant 0 : index
    %243 = vector.load %arg19[%c0_203, %c0_204] : memref<256x128xf32, #tpu.memory_space<vmem>>, vector<256x128xf32>
    %244 = arith.addf %243, %242 : vector<256x128xf32>
    %c0_205 = arith.constant 0 : index
    %c0_206 = arith.constant 0 : index
    %245 = vector.load %arg19[%c0_205, %c0_206] : memref<256x128xf32, #tpu.memory_space<vmem>>, vector<256x128xf32>
    tpu.vector_store %arg19[%c0_205, %c0_206], %244 {strides = array<i32>} : memref<256x128xf32, #tpu.memory_space<vmem>>, vector<256x128xf32>,
    %c0_207 = arith.constant 0 : index
    %c0_208 = arith.constant 0 : index
    %246 = vector.load %arg19[%c0_207, %c0_208] : memref<256x128xf32, #tpu.memory_space<vmem>>, vector<256x128xf32>
    %c0_209 = arith.constant 0 : index
    %c0_210 = arith.constant 0 : index
    %247 = vector.load %arg9[%c0_209, %c0_210] : memref<1x128xf32, #tpu.memory_space<vmem>>, vector<1x128xf32>
    %248 = vector.broadcast %247 : vector<1x128xf32> to vector<256x128xf32>
    %249 = arith.addf %246, %248 : vector<256x128xf32>
    %cst_211 = arith.constant 0.000000e+00 : f32
    %250 = vector.broadcast %cst_211 : f32 to vector<256x128xf32>
    %251 = arith.maximumf %249, %250 : vector<256x128xf32>
    %c0_212 = arith.constant 0 : index
    %c0_213 = arith.constant 0 : index
    %252 = vector.load %arg18[%c0_212, %c0_213] : memref<256x128xf32, #tpu.memory_space<vmem>>, vector<256x128xf32>
    tpu.vector_store %arg18[%c0_212, %c0_213], %251 {strides = array<i32>} : memref<256x128xf32, #tpu.memory_space<vmem>>, vector<256x128xf32>,
    %c0_214 = arith.constant 0 : index
    %c0_215 = arith.constant 0 : index
    %253 = vector.load %arg18[%c0_214, %c0_215] : memref<256x128xf32, #tpu.memory_space<vmem>>, vector<256x128xf32>
    %254 = arith.truncf %253 : vector<256x128xf32> to vector<256x128xbf16>
    %c0_216 = arith.constant 0 : index
    %c0_217 = arith.constant 0 : index
    %255 = vector.load %arg10[%c0_216, %c0_217] : memref<128x128xbf16, #tpu.memory_space<vmem>>, vector<128x128xbf16>
    %cst_218 = arith.constant dense<0.000000e+00> : vector<256x128xf32>
    %256 = tpu.matmul %254, %255, %cst_218 {dimension_numbers = #tpu.dot_dimension_numbers<[1], [0], [0], [1], [0, 0, 1, 1], [], []>} : vector<256x128xbf16>, vector<128x128xbf16>, vector<256x128xf32> -> vector<256x128xf32>
    %c0_219 = arith.constant 0 : index
    %c0_220 = arith.constant 0 : index
    %257 = vector.load %arg11[%c0_219, %c0_220] : memref<1x128xf32, #tpu.memory_space<vmem>>, vector<1x128xf32>
    %258 = vector.broadcast %257 : vector<1x128xf32> to vector<256x128xf32>
    %259 = arith.addf %256, %258 : vector<256x128xf32>
    %cst_221 = arith.constant 0.000000e+00 : f32
    %260 = vector.broadcast %cst_221 : f32 to vector<256x128xf32>
    %261 = arith.maximumf %259, %260 : vector<256x128xf32>
    %c0_222 = arith.constant 0 : index
    %c0_223 = arith.constant 0 : index
    %262 = vector.load %arg18[%c0_222, %c0_223] : memref<256x128xf32, #tpu.memory_space<vmem>>, vector<256x128xf32>
    tpu.vector_store %arg18[%c0_222, %c0_223], %261 {strides = array<i32>} : memref<256x128xf32, #tpu.memory_space<vmem>>, vector<256x128xf32>,
    %c0_224 = arith.constant 0 : index
    %c0_225 = arith.constant 0 : index
    %263 = vector.load %arg12[%c0_224, %c0_225] : memref<128x4xbf16, #tpu.memory_space<vmem>>, vector<128x4xbf16>
    %c0_226 = arith.constant 0 : index
    %c0_227 = arith.constant 0 : index
    %264 = vector.load %arg13[%c0_226, %c0_227] : memref<1x4xf32, #tpu.memory_space<vmem>>, vector<1x4xf32>
    %c0_228 = arith.constant 0 : index
    %c0_229 = arith.constant 0 : index
    %265 = vector.load %arg18[%c0_228, %c0_229] : memref<256x128xf32, #tpu.memory_space<vmem>>, vector<256x128xf32>
    %266 = arith.truncf %265 : vector<256x128xf32> to vector<256x128xbf16>
    %cst_230 = arith.constant dense<0.000000e+00> : vector<256x4xf32>
    %267 = tpu.matmul %266, %263, %cst_230 {dimension_numbers = #tpu.dot_dimension_numbers<[1], [0], [0], [1], [0, 0, 1, 1], [], []>} : vector<256x128xbf16>, vector<128x4xbf16>, vector<256x4xf32> -> vector<256x4xf32>
    %268 = vector.broadcast %264 : vector<1x4xf32> to vector<256x4xf32>
    %269 = arith.addf %267, %268 : vector<256x4xf32>
    %270 = vector.shape_cast %269 : vector<256x4xf32> to vector<1x256x4xf32>
    %c0_231 = arith.constant 0 : index
    %c0_232 = arith.constant 0 : index
    %c0_233 = arith.constant 0 : index
    %271 = vector.load %arg15[%c0_231, %c0_232, %c0_233] : memref<1x256x4xf32, #tpu.memory_space<vmem>>, vector<1x256x4xf32>
    tpu.vector_store %arg15[%c0_231, %c0_232, %c0_233], %270 {strides = array<i32>} : memref<1x256x4xf32, #tpu.memory_space<vmem>>, vector<1x256x4xf32>,
    %cst_234 = arith.constant dense<0.000000e+00> : vector<4xf32>
    %272 = vector.multi_reduction <add>, %269, %cst_234 [0] : vector<256x4xf32> to vector<4xf32>
    %273 = vector.shape_cast %272 : vector<4xf32> to vector<1x4xf32>
    %cst_235 = arith.constant 3.906250e-03 : f32
    %274 = vector.broadcast %cst_235 : f32 to vector<1x4xf32>
    %275 = arith.mulf %273, %274 : vector<1x4xf32>
    %276 = vector.shape_cast %275 : vector<1x4xf32> to vector<1x1x4xf32>
    %c0_236 = arith.constant 0 : index
    %c0_237 = arith.constant 0 : index
    %c0_238 = arith.constant 0 : index
    %277 = vector.load %arg16[%c0_236, %c0_237, %c0_238] : memref<1x1x4xf32, #tpu.memory_space<vmem>>, vector<1x1x4xf32>
    tpu.vector_store %arg16[%c0_236, %c0_237, %c0_238], %276 {strides = array<i32>} : memref<1x1x4xf32, #tpu.memory_space<vmem>>, vector<1x1x4xf32>,
    %c0_239 = arith.constant 0 : index
    %c0_240 = arith.constant 0 : index
    %c0_241 = arith.constant 0 : index
    %278 = vector.load %arg14[%c0_239, %c0_240, %c0_241] : memref<1x1x4xf32, #tpu.memory_space<vmem>>, vector<1x1x4xf32>
    %279 = vector.shape_cast %278 : vector<1x1x4xf32> to vector<1x4xf32>
    %280 = math.absf %275 : vector<1x4xf32>
    %cst_242 = arith.constant 0.000000e+00 : f32
    %281 = vector.broadcast %cst_242 : f32 to vector<1x4xf32>
    %282 = arith.subf %281, %280 : vector<1x4xf32>
    %283 = math.exp %282 : vector<1x4xf32>
    %cst_243 = arith.constant 1.000000e+00 : f32
    %284 = vector.broadcast %cst_243 : f32 to vector<1x4xf32>
    %285 = arith.addf %284, %283 : vector<1x4xf32>
    %286 = math.log %285 : vector<1x4xf32>
    %cst_244 = arith.constant 0.000000e+00 : f32
    %287 = vector.broadcast %cst_244 : f32 to vector<1x4xf32>
    %288 = arith.minimumf %275, %287 : vector<1x4xf32>
    %289 = arith.subf %288, %286 : vector<1x4xf32>
    %cst_245 = arith.constant 0.000000e+00 : f32
    %290 = vector.broadcast %cst_245 : f32 to vector<1x4xf32>
    %291 = arith.subf %290, %275 : vector<1x4xf32>
    %cst_246 = arith.constant 0.000000e+00 : f32
    %292 = vector.broadcast %cst_246 : f32 to vector<1x4xf32>
    %293 = arith.minimumf %291, %292 : vector<1x4xf32>
    %294 = arith.subf %293, %286 : vector<1x4xf32>
    %295 = arith.mulf %279, %289 : vector<1x4xf32>
    %cst_247 = arith.constant 1.000000e+00 : f32
    %296 = vector.broadcast %cst_247 : f32 to vector<1x4xf32>
    %297 = arith.subf %296, %279 : vector<1x4xf32>
    %298 = arith.mulf %297, %294 : vector<1x4xf32>
    %299 = arith.addf %295, %298 : vector<1x4xf32>
    %cst_248 = arith.constant 0.000000e+00 : f32
    %300 = vector.broadcast %cst_248 : f32 to vector<1x4xf32>
    %301 = arith.subf %300, %299 : vector<1x4xf32>
    %cst_249 = arith.constant dense<0.000000e+00> : vector<1xf32>
    %302 = vector.multi_reduction <add>, %301, %cst_249 [1] : vector<1x4xf32> to vector<1xf32>
    %303 = vector.shape_cast %302 : vector<1xf32> to vector<1x1xf32>
    %cst_250 = arith.constant 4.000000e+00 : f32
    %304 = vector.broadcast %cst_250 : f32 to vector<1x1xf32>
    %305 = arith.divf %303, %304 : vector<1x1xf32>
    %306 = vector.shape_cast %305 : vector<1x1xf32> to vector<1x1x1xf32>
    %c0_251 = arith.constant 0 : index
    %c0_252 = arith.constant 0 : index
    %c0_253 = arith.constant 0 : index
    %307 = vector.load %arg17[%c0_251, %c0_252, %c0_253] : memref<1x1x1xf32, #tpu.memory_space<vmem>>, vector<1x1x1xf32>
    tpu.vector_store %arg17[%c0_251, %c0_252, %c0_253], %306 {strides = array<i32>} : memref<1x1x1xf32, #tpu.memory_space<vmem>>, vector<1x1x1xf32>,
    return
  }
  func.func @transform_0(%arg0: i32) -> (i32, i32, i32) {
    %c0_i32 = arith.constant 0 : i32
    %c0_i32_0 = arith.constant 0 : i32
    %c0_i32_1 = arith.constant 0 : i32
    return %arg0, %c0_i32, %c0_i32_0 : i32, i32, i32
  }
  func.func @transform_1(%arg0: i32) -> (i32, i32) {
    %c0_i32 = arith.constant 0 : i32
    %c0_i32_0 = arith.constant 0 : i32
    %c0_i32_1 = arith.constant 0 : i32
    return %c0_i32, %c0_i32_0 : i32, i32
  }
  func.func @transform_2(%arg0: i32) -> (i32, i32) {
    %c0_i32 = arith.constant 0 : i32
    %c0_i32_0 = arith.constant 0 : i32
    %c0_i32_1 = arith.constant 0 : i32
    return %c0_i32, %c0_i32_0 : i32, i32
  }
  func.func @transform_3(%arg0: i32) -> (i32, i32, i32) {
    %c0_i32 = arith.constant 0 : i32
    %c0_i32_0 = arith.constant 0 : i32
    %c0_i32_1 = arith.constant 0 : i32
    %c0_i32_2 = arith.constant 0 : i32
    return %c0_i32, %c0_i32_0, %c0_i32_1 : i32, i32, i32
  }
  func.func @transform_4(%arg0: i32) -> (i32, i32) {
    %c0_i32 = arith.constant 0 : i32
    %c0_i32_0 = arith.constant 0 : i32
    %c0_i32_1 = arith.constant 0 : i32
    return %c0_i32, %c0_i32_0 : i32, i32
  }
  func.func @transform_5(%arg0: i32) -> (i32, i32) {
    %c0_i32 = arith.constant 0 : i32
    %c0_i32_0 = arith.constant 0 : i32
    %c0_i32_1 = arith.constant 0 : i32
    return %c0_i32, %c0_i32_0 : i32, i32
  }
  func.func @transform_6(%arg0: i32) -> (i32, i32) {
    %c0_i32 = arith.constant 0 : i32
    %c0_i32_0 = arith.constant 0 : i32
    %c0_i32_1 = arith.constant 0 : i32
    return %c0_i32, %c0_i32_0 : i32, i32
  }
  func.func @transform_7(%arg0: i32) -> (i32, i32, i32) {
    %c0_i32 = arith.constant 0 : i32
    %c0_i32_0 = arith.constant 0 : i32
    %c0_i32_1 = arith.constant 0 : i32
    %c0_i32_2 = arith.constant 0 : i32
    return %c0_i32, %c0_i32_0, %c0_i32_1 : i32, i32, i32
  }
  func.func @transform_8(%arg0: i32) -> (i32, i32) {
    %c0_i32 = arith.constant 0 : i32
    %c0_i32_0 = arith.constant 0 : i32
    %c0_i32_1 = arith.constant 0 : i32
    return %c0_i32, %c0_i32_0 : i32, i32
  }
  func.func @transform_9(%arg0: i32) -> (i32, i32) {
    %c0_i32 = arith.constant 0 : i32
    %c0_i32_0 = arith.constant 0 : i32
    %c0_i32_1 = arith.constant 0 : i32
    return %c0_i32, %c0_i32_0 : i32, i32
  }
  func.func @transform_10(%arg0: i32) -> (i32, i32) {
    %c0_i32 = arith.constant 0 : i32
    %c0_i32_0 = arith.constant 0 : i32
    %c0_i32_1 = arith.constant 0 : i32
    return %c0_i32, %c0_i32_0 : i32, i32
  }
  func.func @transform_11(%arg0: i32) -> (i32, i32) {
    %c0_i32 = arith.constant 0 : i32
    %c0_i32_0 = arith.constant 0 : i32
    %c0_i32_1 = arith.constant 0 : i32
    return %c0_i32, %c0_i32_0 : i32, i32
  }
  func.func @transform_12(%arg0: i32) -> (i32, i32) {
    %c0_i32 = arith.constant 0 : i32
    %c0_i32_0 = arith.constant 0 : i32
    %c0_i32_1 = arith.constant 0 : i32
    return %c0_i32, %c0_i32_0 : i32, i32
  }
  func.func @transform_13(%arg0: i32) -> (i32, i32, i32) {
    %c0_i32 = arith.constant 0 : i32
    %c0_i32_0 = arith.constant 0 : i32
    %c0_i32_1 = arith.constant 0 : i32
    return %arg0, %c0_i32, %c0_i32_0 : i32, i32, i32
  }
  func.func @transform_14(%arg0: i32) -> (i32, i32, i32) {
    %c0_i32 = arith.constant 0 : i32
    %c0_i32_0 = arith.constant 0 : i32
    %c0_i32_1 = arith.constant 0 : i32
    return %arg0, %c0_i32, %c0_i32_0 : i32, i32, i32
  }
  func.func @transform_15(%arg0: i32) -> (i32, i32, i32) {
    %c0_i32 = arith.constant 0 : i32
    %c0_i32_0 = arith.constant 0 : i32
    %c0_i32_1 = arith.constant 0 : i32
    return %arg0, %c0_i32, %c0_i32_0 : i32, i32, i32
  }
  func.func @transform_16(%arg0: i32) -> (i32, i32, i32) {
    %c0_i32 = arith.constant 0 : i32
    %c0_i32_0 = arith.constant 0 : i32
    %c0_i32_1 = arith.constant 0 : i32
    return %arg0, %c0_i32, %c0_i32_0 : i32, i32, i32
  }
}

</mosaic_0001>

<bundles_post_ra>
// kernel: tpu_custom_call.1
= control target key start
LH: loop header
LB: loop body
LE: loop exit
PB: predicated region body
PF: predicated region fallthrough
CT: control target
= control target key end

     0   :  { %s18074_s0 = inlined_call_operand.vmem [shape: f32[2,256,4], index: 0, kind: input, shape index: {}]   ;;  %s18075_s1 = inlined_call_operand.vmem [shape: f32[4,128], index: 1, kind: input, shape index: {}]   ;;  %s18076_s2 = inlined_call_operand.vmem [shape: f32[1,128], index: 2, kind: input, shape index: {}]   ;;  %s18077_s3 = inlined_call_operand.vmem [shape: bf16[9,128,128], index: 3, kind: input, shape index: {}]   ;;  %s18078_s4 = inlined_call_operand.vmem [shape: f32[1,128], index: 4, kind: input, shape index: {}]   ;;  %s18079_s5 = inlined_call_operand.hbm [shape: bf16[128,128], index: 5, kind: input, shape index: {}]   ;;  %s18080_s6 = inlined_call_operand.vmem [shape: f32[1,128], index: 6, kind: input, shape index: {}]   ;;  %s18081_s7 = inlined_call_operand.hbm [shape: bf16[9,128,128], index: 7, kind: input, shape index: {}]   ;;  %s18082_s8 = inlined_call_operand.vmem [shape: f32[1,128], index: 8, kind: input, shape index: {}]   ;;  %s18083_s9 = inlined_call_operand.hbm [shape: bf16[128,128], index: 9, kind: input, shape index: {}]   ;;  %s18084_s10 = inlined_call_operand.vmem [shape: f32[1,128], index: 10, kind: input, shape index: {}]   ;;  %s18085_s11 = inlined_call_operand.vmem [shape: bf16[128,4], index: 11, kind: input, shape index: {}]   ;;  %s18086_s12 = inlined_call_operand.vmem [shape: f32[1,4], index: 12, kind: input, shape index: {}]   ;;  %s18087_s13 = inlined_call_operand.vmem [shape: f32[2,1,4], index: 13, kind: input, shape index: {}]   ;;  %s18088_s14 = inlined_call_operand.vmem [shape: f32[2,256,4], index: 14, kind: output, shape index: {0}]   ;;  %s18089_s15 = inlined_call_operand.hbm [shape: f32[2,1,4], index: 15, kind: output, shape index: {1}]   ;;  %s18090_s16 = inlined_call_operand.vmem [shape: f32[2,1,1], index: 16, kind: output, shape index: {2}]  }
   0x1   :  { %18533 = sst [smem:[#allocation162_spill]] %s18074_s0 }
   0x2   :  { %18534 = sst [smem:[#allocation163_spill]] %s18087_s13 }
   0x3   :  { %18535 = sst [smem:[#allocation164_spill]] %s18089_s15 }
   0x4   :  { %18536 = sst [smem:[#allocation165_spill]] %s18090_s16 }
   0x5   :  { %22 = vsyncpa [#allocation5], 0 }
   0x6   :  { %23 = vsyncpa [#allocation8], 0 }
   0x7   :  { %24 = vsyncpa [#allocation6], 0 }
   0x8   :  { %26 = vsyncpa [#allocation6 + $0x1], 0  ;;  %s14269_s21 = smov 0   ;;  %s14271_s22 = smov 0  }
   0x9   :  { %s14273_s23 = smov 0   ;;  %s14275_s24 = smov 0  }
   0xa LB: > { %18537 = sst [smem:[#allocation14_spill]] %s14163_s21  ;;  %s14290_s25 = sadd.s32 4294967295, %s14175_s24   ;;  %s14175_s24 = sphi %s14275_s24, %s19548_s24   ;;  %s14171_s23 = sphi %s14273_s23, %s19551_s23   ;;  %s14167_s22 = sphi %s14271_s22, %s19550_s22   ;;  %s14163_s21 = sphi %s14269_s21, %s19549_s21  }
   0xb   : > { %18538 = sst [smem:[#allocation15_spill]] %s14167_s22  ;;  %s11207_s26 = sadd.s32 4294967294, %s14175_s24  }
   0xc   : > { %18539 = sst [smem:[#allocation16_spill]] %s14171_s23  ;;  %s14294_s27 = sadd.s32 1, %s14175_s24  }
   0xd   : > { %18540 = sst [smem:[#allocation17_spill]] %s14175_s24  ;;  %s369_s28 = sadd.s32 1, %s14171_s23 }
   0xe   : > { %18541 = sst [smem:[#allocation18_spill]] %s14294_s27  ;;  %s366_s29 = ssub.s32 %s14175_s24, %s14294_s27 }
   0xf   : > { %p379_p0 = scmp.ne.s32.totalorder %s14171_s23, %s14167_s22  ;;  %p367_p1 = scmp.eq.s32.totalorder %s366_s29, 0 }
  0x10   : > { %p380_p2 = scmp.eq.s32.totalorder %s14290_s25, 1  ;;  %p385_p3 = scmp.ne.s32.totalorder %s14167_s22, %s14163_s21 }
  0x11   : > { %p386_p4 = scmp.eq.s32.totalorder %s11207_s26, 1  ;;  %p11208_p7 = scmp.ge.s32.totalorder %s14175_s24, 1 }
  0x12   : > { %s14305_s30 = scalar_select %p367_p1, %s14171_s23, %s369_s28  }
  0x13   : > { %p14307_p5 = por %p380_p2, %p379_p0  ;;  %p14311_p6 = por %p386_p4, %p385_p3 }
  0x14   : > { %18542 = sst [smem:[#allocation19_spill]] %s14305_s30  ;;  %p419_p8 = scmp.lt.s32.totalorder %s14175_s24, 3 }
  0x15   : > { %s18543_s0 = scalar_select %p14307_p5, 1, 0 }
  0x16   : > { %s18545_s17 = scalar_select %p14311_p6, 1, 0 }
  0x17   : > { %18544 = sst [smem:[#allocation20_spill]] %s18543_s0  ;;  %p18097_p9 = scmp.eq.s32.totalorder %s14290_s25, 0 }
  0x18   : > { %18546 = sst [smem:[#allocation21_spill]] %s18545_s17  ;;  %p14318_p10 = pnand %p11208_p7, %p419_p8 }
  0x19   : > { %s14177_s19 = smov [#allocation7]   ;;  %s14178_s28 = smov [#allocation4]  }
  0x1a   : > { %s18547_s18 = scalar_select %p14318_p10, 1, 0 }
  0x1b   : > { %p13790_p11 = pneg %p14318_p10  ;;  %s459_s20 = sshll.u32 %s14177_s19, 4  ;;  %s14324_s20 = int_to_ptr.vmem [resolvable:$true] %s459_s20 }
  0x1c   : > { %s443_s29 = sshll.u32 %s14178_s28, 4  ;;  %s14179_s30 = smov [#allocation9]   ;;  %s14332_s29 = int_to_ptr.vmem [resolvable:$true] %s443_s29 }
  0x1d   : > { %p14328_p12 = pnand %p18097_p9, %p13790_p11  ;;  %s14334_s23 = sshll.u32 %s14179_s30, 4  ;;  %s476_s23 = int_to_ptr.vmem [resolvable:$true] %s14334_s23 }
  0x1e   : > { %s14021_s21 = scalar_lea.hbm %s18081_s7, 9216 }
  0x1f   : > { %p14022_p13 = scmp.ne.s32.totalorder %s18081_s7, %s14021_s21  ;;  %p14344_p0 = pneg %p14328_p12 }
  0x20   : > { %p14028_p3 = scmp.lt.u32.totalorder %s14021_s21, %s18081_s7 }
  0x21   : > { %p14024_p1 = pnand %p14344_p0, %p14022_p13 }
  0x23   : > { %p14025_p2 = pneg %p14024_p1 }
  0x25   : > { %p14030_p4 = pnand %p14028_p3, %p14025_p2 }
  0x27   : > { %14033 = shalt.err (!%p14030_p4)
}
  0x28   : > { %s14034_s24 = scalar_lea.vmem %s14324_s20, 9216  ;;  %p14042_p9 = scmp.lt.s32.totalorder %s14324_s20, %s14324_s20 }
  0x29   : > { %p14035_p7 = scmp.ne.s32.totalorder %s14324_s20, %s14034_s24  ;;  %p14043_p6 = scmp.lt.s32.totalorder %s14034_s24, %s14034_s24 }
  0x2b   : > { %p14037_p8 = pnand %p14035_p7, %p14344_p0  ;;  %p14044_p13 = por %p14043_p6, %p14042_p9 }
  0x2d   : > { %p14038_p11 = pneg %p14037_p8 }
  0x2f   : > { %p14045_p1 = pnand %p14044_p13, %p14038_p11 }
  0x31   : > { %14048 = shalt.err (!%p14045_p1)
}
  0x32   : > { %s14180_s27 = smov 64   ;;  %s14181_s21 = smov 4  }
  0x33   : > { %13796 = dma.hbm_to_vmem [thread:$0]  (!%p14328_p12), %s18081_s7, 9216, %s14324_s20, [#allocation8], %s14180_s27, %s14180_s27, %s14181_s21  }
  0x34   : > { %s14049_s24 = scalar_lea.hbm %s18079_s5, 1024 }
  0x35   : > { %p14050_p6 = scmp.ne.s32.totalorder %s18079_s5, %s14049_s24  ;;  %p14056_p3 = scmp.lt.u32.totalorder %s14049_s24, %s18079_s5 }
  0x37   : > { %p14052_p9 = pnand %p14050_p6, %p14344_p0 }
  0x39   : > { %p14053_p2 = pneg %p14052_p9 }
  0x3b   : > { %p14058_p4 = pnand %p14056_p3, %p14053_p2 }
  0x3d   : > { %14061 = shalt.err (!%p14058_p4)
}
  0x3e   : > { %s14062_s20 = scalar_lea.vmem %s14332_s29, 1024  ;;  %p14070_p13 = scmp.lt.s32.totalorder %s14332_s29, %s14332_s29 }
  0x3f   : > { %p14063_p7 = scmp.ne.s32.totalorder %s14332_s29, %s14062_s20  ;;  %p14071_p1 = scmp.lt.s32.totalorder %s14062_s20, %s14062_s20 }
  0x41   : > { %p14065_p8 = pnand %p14063_p7, %p14344_p0  ;;  %p14072_p6 = por %p14071_p1, %p14070_p13 }
  0x43   : > { %p14066_p11 = pneg %p14065_p8 }
  0x45   : > { %p14073_p9 = pnand %p14072_p6, %p14066_p11 }
  0x47   : > { %14076 = shalt.err (!%p14073_p9)
}
  0x48   : > { %13793 = dma.hbm_to_vmem [thread:$0]  (!%p14328_p12), %s18079_s5, 1024, %s14332_s29, [#allocation5], %s14180_s27, %s14180_s27, %s14181_s21  }
  0x49   : > { %s14077_s17 = scalar_lea.hbm %s18083_s9, 1024 }
  0x4a   : > { %p14078_p2 = scmp.ne.s32.totalorder %s18083_s9, %s14077_s17  ;;  %p14084_p7 = scmp.lt.u32.totalorder %s14077_s17, %s18083_s9 }
  0x4c   : > { %p14080_p3 = pnand %p14078_p2, %p14344_p0 }
  0x4e   : > { %p14081_p4 = pneg %p14080_p3 }
  0x50   : > { %p14086_p8 = pnand %p14084_p7, %p14081_p4 }
  0x52   : > { %14089 = shalt.err (!%p14086_p8)
}
  0x53   : > { %s14090_s20 = scalar_lea.vmem %s476_s23, 1024  ;;  %p14098_p6 = scmp.lt.s32.totalorder %s476_s23, %s476_s23 }
  0x54   : > { %p14091_p11 = scmp.ne.s32.totalorder %s476_s23, %s14090_s20  ;;  %p14099_p9 = scmp.lt.s32.totalorder %s14090_s20, %s14090_s20 }
  0x56   : > { %p14093_p13 = pnand %p14091_p11, %p14344_p0  ;;  %p14100_p5 = por %p14099_p9, %p14098_p6 }
  0x58   : > { %p14094_p1 = pneg %p14093_p13 }
  0x5a   : > { %p14101_p10 = pnand %p14100_p5, %p14094_p1 }
  0x5c   : > { %14104 = shalt.err (!%p14101_p10)
}
  0x5d   : > { %13799 = dma.hbm_to_vmem [thread:$0]  (!%p14328_p12), %s18083_s9, 1024, %s476_s23, [#allocation8], %s14180_s27, %s14180_s27, %s14181_s21  }
  0x5e   : > { %p18550_p2 = scmp.ne.s32.totalorder %s18547_s18, 0 }
  0x60   : > { %514 = sbr.rel (%p18550_p2) target bundleno = 2869 (0xb35), region = 76 }
  0x67   : > { %p18551_p0 = scmp.eq.s32.totalorder %s14290_s25, 0 }
  0x69   : > { %14150 = dma.done.wait (%p18551_p0), [#allocation5], 1024   ;;  %p18552_p3 = pmov %p18551_p0 }
  0x6a   : > { %p18553_p5 = pmov %p18551_p0 }
  0x6b   : > { %14152 = vsyncadd (%p18552_p3), [#allocation5], 4294966272 }
  0x6c   : > { %14154 = dma.done.wait (%p18553_p5), [#allocation8], 10240   ;;  %p18554_p10 = pmov %p18551_p0 }
  0x6d   : > { %p582_p4 = scmp.lt.s32.totalorder %s14290_s25, 1  ;;  %vm736_vm0 = vcmask 1043456   ;;  %s18555_s27 = sld [smem:[#allocation162_spill]]  ;;  %vm639_vm1 = vcmask 31744   ;;  %v631_v0 = vld [vmem:[%s18075_s1] sm:$0xf]  ;;  %v1029_v42 = vlaneseq }
  0x6e   : > { %14156 = vsyncadd (%p18554_p10), [#allocation8], 4294957056  ;;  %12190 = vmatprep.subr.msk.mxu0 %vm736_vm0, %v631_v0  ;;  %v13849_v33 = vld [vmem:[%s18077_s3] sm:$0xff]   ;;  %v13850_v34 = vld [vmem:[%s18077_s3 + $0x8] sm:$0xff]   ;;  %v18107_v59 = vmov 0.0   ;;  %s19538_s22 = sld [smem:[#allocation163_spill]] }
  0x6f   : > { %s14428_s16 = scalar_select %p582_p4, %s14290_s25, 1  ;;  %12191 = vmatpush3.msk.msra.mxu0 %vm736_vm0, %v631_v0  ;;  %12240 = vmatprep.subr.bf16.mxu1 %v13849_v33  ;;  %v13851_v35 = vld [vmem:[%s18077_s3 + $0x10] sm:$0xff]   ;;  %v13852_v36 = vld [vmem:[%s18077_s3 + $0x18] sm:$0xff]   ;;  %v13853_v37 = vld [vmem:[%s18077_s3 + $0x20] sm:$0xff]   ;;  %v14535_v43 = vshrl.u32 %v1029_v42, 7 }
  0x70   : > { %12241 = vmatpush3.bf16.msra.mxu1 %v13849_v33  ;;  %v13854_v38 = vld [vmem:[%s18077_s3 + $0x28] sm:$0xff]   ;;  %v13855_v39 = vld [vmem:[%s18077_s3 + $0x30] sm:$0xff]   ;;  %v13856_v40 = vld [vmem:[%s18077_s3 + $0x38] sm:$0xff]   ;;  %s19539_s17 = sld [smem:[#allocation20_spill]]  ;;  %s11648_s19 = sshll.u32 %s14290_s25, 4 }
  0x71   : > { %s11651_s23 = sshll.u32 %s14428_s16, 8  ;;  %12242 = vmatprep.subr.bf16.mxu1 %v13850_v34  ;;  %v14532_v41 = vld [vmem:[%s18077_s3 + $0x40] sm:$0xff]   ;;  %18556 = vst [vmem:[#allocation22_spill] sm:$0xff] %v14535_v43  ;;  %v1033_v44 = vadd.s32 24, %v14535_v43  ;;  %v1032_v45 = vadd.s32 16, %v14535_v43  ;;  %v1034_v47 = vadd.s32 32, %v14535_v43 }
  0x72   : > { %v1036_v48 = vadd.s32 48, %v14535_v43  ;;  %v1038_v49 = vadd.s32 64, %v14535_v43  ;;  %v1042_v50 = vadd.s32 96, %v14535_v43  ;;  %v1037_v52 = vadd.s32 56, %v14535_v43  ;;  %s17889_s18 = scalar_lea.vmem %s18088_s14, %s11651_s23  ;;  %s19540_s24 = sld [smem:[#allocation164_spill]] }
  0x73   : > { %s14436_s21 = scalar_lea.vmem %s18555_s27, %s11651_s23  ;;  %v1065_v46 = vand.u32 15, %v1033_v44  ;;  %v1064_v51 = vand.u32 15, %v1032_v45  ;;  %v1066_v53 = vand.u32 15, %v1034_v47  ;;  %v1044_v57 = vadd.s32 112, %v14535_v43  ;;  %s19537_s23 = sld [smem:[#allocation15_spill]] }
  0x74   : > { %v599_v1 = vld [vmem:[%s14436_s21] sm:$0xff]  ;;  %v600_v2 = vld [vmem:[%s14436_s21 + $0x8] sm:$0xff]  ;;  %v601_v3 = vld [vmem:[%s14436_s21 + $0x10] sm:$0xff]  ;;  %12243 = vmatpush3.bf16.msra.mxu1 %v13850_v34  ;;  %v1068_v54 = vand.u32 15, %v1036_v48  ;;  %v1070_v55 = vand.u32 15, %v1038_v49  ;;  %v1074_v56 = vand.u32 15, %v1042_v50  ;;  %s589_s0 = scalar_lea.vmem %s19538_s22, %s14428_s16 }
  0x75   : > { %12192 = vmatprep.mubr.msk.f32.mxu0 %vm639_vm1, %v599_v1  ;;  %v602_v4 = vld [vmem:[%s14436_s21 + $0x18] sm:$0xff]  ;;  %v603_v5 = vld [vmem:[%s14436_s21 + $0x20] sm:$0xff]  ;;  %v604_v6 = vld [vmem:[%s14436_s21 + $0x28] sm:$0xff]  ;;  %12244 = vmatprep.subr.bf16.mxu1 %v13851_v35  ;;  %vm1193_vm2 = vcmp.lt.s32.totalorder %v1065_v46, 15  ;;  %vm1160_vm3 = vcmp.ge.s32.totalorder %v1064_v51, 1  ;;  %v1069_v58 = vand.u32 15, %v1037_v52 }
  0x76   : > { %12193 = vmatmul.mubr.msk.f32.vlgmr.msra.gmra.mrb[0].mxu0 %vm639_vm1, %v600_v2  ;;  %v605_v7 = vld [vmem:[%s14436_s21 + $0x30] sm:$0xff]  ;;  %v606_v8 = vld [vmem:[%s14436_s21 + $0x38] sm:$0xff]  ;;  %v607_v9 = vld [vmem:[%s14436_s21 + $0x40] sm:$0xff]  ;;  %v14546_v60 = vsel %vm1193_vm2, 1.0, %v18107_v59  ;;  %v14549_v61 = vadd.s32 40, %v14535_v43  ;;  %vm1162_vm4 = vcmp.ge.s32.totalorder %v1066_v53, 1 }
  0x77   : > { %12195 = vmatprep.mubr.msk.f32.mxu0 %vm639_vm1, %v601_v3  ;;  %v608_v10 = vld [vmem:[%s14436_s21 + $0x48] sm:$0xff]  ;;  %v609_v11 = vld [vmem:[%s14436_s21 + $0x50] sm:$0xff]  ;;  %v610_v12 = vld [vmem:[%s14436_s21 + $0x58] sm:$0xff]  ;;  %18557 = vst [vmem:[#allocation23_spill] sm:$0xff] %v14546_v60  ;;  %vm1164_vm5 = vcmp.ge.s32.totalorder %v1068_v54, 1  ;;  %v14552_v62 = vadd.s32 80, %v14535_v43 }
  0x78   : > { %v611_v13 = vld [vmem:[%s14436_s21 + $0x60] sm:$0xff]  ;;  %v612_v14 = vld [vmem:[%s14436_s21 + $0x68] sm:$0xff]  ;;  %v613_v15 = vld [vmem:[%s14436_s21 + $0x70] sm:$0xff]  ;;  %12245 = vmatpush3.bf16.msra.mxu1 %v13851_v35  ;;  %v1046_v63 = vadd.s32 128, %v14535_v43  ;;  %v14556_v0 = vsel %vm1160_vm3, 1.0, %v18107_v59  ;;  %vm1166_vm6 = vcmp.ge.s32.totalorder %v1070_v55, 1  ;;  %s19541_s20 = smov %s19540_s24  ;;  %s18032_s29 = scalar_lea.hbm %s19540_s24, %s11648_s19 }
  0x79   : > { %v614_v16 = vld [vmem:[%s14436_s21 + $0x78] sm:$0xff]  ;;  %v615_v17 = vld [vmem:[%s14436_s21 + $0x80] sm:$0xff]  ;;  %v616_v18 = vld [vmem:[%s14436_s21 + $0x88] sm:$0xff]  ;;  %12246 = vmatprep.subr.bf16.mxu1 %v13852_v36  ;;  %18558 = vst [vmem:[#allocation24_spill] sm:$0xff] %v14556_v0  ;;  %vm1170_vm7 = vcmp.ge.s32.totalorder %v1074_v56, 1  ;;  %v1076_v1 = vand.u32 15, %v1044_v57 }
  0x7a   : > { %12196 = vmatmul.mubr.msk.f32.gmra.mrb[2].mxu0 %vm639_vm1, %v602_v4  ;;  %v617_v19 = vld [vmem:[%s14436_s21 + $0x90] sm:$0xff]  ;;  %v618_v20 = vld [vmem:[%s14436_s21 + $0x98] sm:$0xff]  ;;  %v619_v21 = vld [vmem:[%s14436_s21 + $0xa0] sm:$0xff]  ;;  %v1048_v2 = vadd.s32 144, %v14535_v43  ;;  %v1050_v3 = vadd.s32 160, %v14535_v43  ;;  %vm1197_vm8 = vcmp.lt.s32.totalorder %v1069_v58, 15 }
  0x7b   : > { %12198 = vmatprep.mubr.msk.f32.mxu0 %vm639_vm1, %v603_v5  ;;  %v620_v22 = vld [vmem:[%s14436_s21 + $0xa8] sm:$0xff]  ;;  %v621_v23 = vld [vmem:[%s14436_s21 + $0xb0] sm:$0xff]  ;;  %v622_v24 = vld [vmem:[%s14436_s21 + $0xb8] sm:$0xff]  ;;  %v1039_v4 = vadd.s32 72, %v14535_v43  ;;  %v14562_v5 = vsel %vm1162_vm4, 1.0, %v18107_v59  ;;  %vm14582_vm9 = vcmp.ge.s32.totalorder %v1076_v1, 1 }
  0x7c   : > { %v623_v25 = vld [vmem:[%s14436_s21 + $0xc0] sm:$0xff]  ;;  %v624_v26 = vld [vmem:[%s14436_s21 + $0xc8] sm:$0xff]  ;;  %v625_v27 = vld [vmem:[%s14436_s21 + $0xd0] sm:$0xff]  ;;  %12247 = vmatpush3.bf16.msra.mxu1 %v13852_v36  ;;  %18559 = vst [vmem:[#allocation25_spill] sm:$0xff] %v14562_v5  ;;  %v14600_v33 = vsel %vm14582_vm9, 1.0, %v18107_v59  ;;  %vm2730_vm0 = vcmp.lt.s32.totalorder %v14535_v43, 7 }
  0x7d   : > { %v626_v28 = vld [vmem:[%s14436_s21 + $0xd8] sm:$0xff]  ;;  %v627_v29 = vld [vmem:[%s14436_s21 + $0xe0] sm:$0xff]  ;;  %v628_v30 = vld [vmem:[%s14436_s21 + $0xe8] sm:$0xff]  ;;  %12248 = vmatprep.subr.bf16.mxu1 %v13853_v37  ;;  %18568 = vst [vmem:[#allocation30_spill] sm:$0xff] %v14600_v33  ;;  %vm1926_vm2 = vcmp.lt.s32.totalorder %v14535_v43, 1  ;;  %s575_s26 = sand.u32 1, %s19537_s23  }
  0x7e   : > { %12199 = vmatmul.mubr.msk.f32.gmra.mrb[4].mxu0 %vm639_vm1, %v604_v6  ;;  %v629_v31 = vld [vmem:[%s14436_s21 + $0xf0] sm:$0xff]  ;;  %v630_v32 = vld [vmem:[%s14436_s21 + $0xf8] sm:$0xff]  ;;  %v14565_v6 = vsel %vm1164_vm5, 1.0, %v18107_v59  ;;  %v14628_v48 = vld [vmem:[%s18076_s2] ss:$0 sm:$0xff]  ;;  %s576_s27 = scalar_lea.vmem [#allocation10], %s575_s26 }
  0x7f   : > { %12201 = vmatprep.mubr.msk.f32.mxu0 %vm639_vm1, %v605_v7  ;;  %18560 = vst [vmem:[#allocation26_spill] sm:$0xff] %v14565_v6  ;;  %s11065_s13 = sshll.u32 %s576_s27, 4  ;;  %p19542_p7 = scmp.ne.s32.totalorder %s19539_s17, 0  ;;  %s11066_s13 = int_to_ptr.vmem [resolvable:$true] %s11065_s13 }
  0x80   : > { %12249 = vmatpush3.bf16.msra.mxu1 %v13853_v37  ;;  %s14105_s21 = scalar_lea.vmem %s11066_s13, 16  ;;  %s14183_s15 = smov [#allocation10]  }
  0x81   : > { %12250 = vmatprep.subr.bf16.mxu1 %v13854_v38  ;;  %p14106_p12 = scmp.ne.s32.totalorder %s11066_s13, %s14105_s21  ;;  %s14109_s22 = sshll.u32 %s14183_s15, 4  ;;  %s14110_s22 = int_to_ptr.vmem [resolvable:$false] %s14109_s22 }
  0x82   : > { %12202 = vmatmul.mubr.msk.f32.gmra.mrb[6].mxu0 %vm639_vm1, %v606_v8  ;;  %v1041_v8 = vadd.s32 88, %v14535_v43  ;;  %p14112_p13 = scmp.lt.s32.totalorder %s11066_s13, %s14110_s22 }
  0x83   : > { %12204 = vmatprep.mubr.msk.f32.mxu0 %vm639_vm1, %v607_v9  ;;  %v14570_v9 = vsel %vm1166_vm6, 1.0, %v18107_v59  ;;  %p14107_p8 = pnand %p14106_p12, %p19542_p7 }
  0x84   : > { %12251 = vmatpush3.bf16.msra.mxu1 %v13854_v38  ;;  %18561 = vst [vmem:[#allocation27_spill] sm:$0xff] %v14570_v9 }
  0x85   : > { %12252 = vmatprep.subr.bf16.mxu1 %v13855_v39  ;;  %p14108_p11 = pneg %p14107_p8 }
  0x86   : > { %12205 = vmatmul.mubr.msk.f32.gmra.mrb[8].mxu0 %vm639_vm1, %v608_v10 }
  0x87   : > { %12207 = vmatprep.mubr.msk.f32.mxu0 %vm639_vm1, %v609_v11  ;;  %v1078_v11 = vand.u32 15, %v1046_v63  ;;  %v1053_v63 = vadd.s32 184, %v14535_v43 }
  0x88   : > { %12253 = vmatpush3.bf16.msra.mxu1 %v13855_v39 }
  0x89   : > { %12254 = vmatprep.subr.bf16.mxu1 %v13856_v40  ;;  %vm14589_vm10 = vcmp.ge.s32.totalorder %v1078_v11, 1 }
  0x8a   : > { %12208 = vmatmul.mubr.msk.f32.gmra.mrb[10].mxu0 %vm639_vm1, %v610_v12  ;;  %v1052_v12 = vadd.s32 176, %v14535_v43  ;;  %v14621_v42 = vsel %vm14589_vm10, 1.0, %v18107_v59 }
  0x8b   : > { %12210 = vmatprep.mubr.msk.f32.mxu0 %vm639_vm1, %v611_v13  ;;  %v14575_v13 = vsel %vm1170_vm7, 1.0, %v18107_v59  ;;  %18577 = vst [vmem:[#allocation31_spill] sm:$0xff] %v14621_v42 }
  0x8c   : > { %12255 = vmatpush3.bf16.msra.mxu1 %v13856_v40  ;;  %18562 = vst [vmem:[#allocation28_spill] sm:$0xff] %v14575_v13 }
  0x8d   : > { %12288 = vmatprep.subr.bf16.mxu1 %v14532_v41 }
  0x8e   : > { %12211 = vmatmul.mubr.msk.f32.gmra.mrb[12].mxu0 %vm639_vm1, %v612_v14  ;;  %v1054_v14 = vadd.s32 192, %v14535_v43 }
  0x8f   : > { %12213 = vmatprep.mubr.msk.f32.mxu0 %vm639_vm1, %v613_v15  ;;  %v14579_v15 = vsel %vm1197_vm8, 1.0, %v18107_v59 }
  0x90   : > { %18563 = vst [vmem:[#allocation29_spill] sm:$0xff] %v14579_v15 }
  0x92   : > { %12214 = vmatmul.mubr.msk.f32.gmra.mrb[14].mxu0 %vm639_vm1, %v614_v16  ;;  %v1043_v16 = vadd.s32 104, %v14535_v43 }
  0x93   : > { %12216 = vmatprep.mubr.msk.f32.mxu0 %vm639_vm1, %v615_v17 }
  0x96   : > { %12217 = vmatmul.mubr.msk.f32.gmra.mrb[16].mxu0 %vm639_vm1, %v616_v18  ;;  %v1080_v18 = vand.u32 15, %v1048_v2 }
  0x97   : > { %12219 = vmatprep.mubr.msk.f32.mxu0 %vm639_vm1, %v617_v19  ;;  %v1082_v19 = vand.u32 15, %v1050_v3 }
  0x98   : > { %vm14602_vm11 = vcmp.ge.s32.totalorder %v1080_v18, 1 }
  0x99   : > { %vm14606_vm12 = vcmp.ge.s32.totalorder %v1082_v19, 1  ;;  %v14633_v49 = vsel %vm14602_vm11, 1.0, %v18107_v59 }
  0x9a   : > { %12220 = vmatmul.mubr.msk.f32.gmra.mrb[18].mxu0 %vm639_vm1, %v618_v20  ;;  %v1071_v20 = vand.u32 15, %v1039_v4  ;;  %18578 = vst [vmem:[#allocation32_spill] sm:$0xff] %v14633_v49  ;;  %v14638_v50 = vsel %vm14606_vm12, 1.0, %v18107_v59 }
  0x9b   : > { %12222 = vmatprep.mubr.msk.f32.mxu0 %vm639_vm1, %v619_v21  ;;  %v1056_v21 = vadd.s32 208, %v14535_v43  ;;  %18579 = vst [vmem:[#allocation33_spill] sm:$0xff] %v14638_v50 }
  0x9c   : > { %vm14610_vm13 = vcmp.lt.s32.totalorder %v1071_v20, 15  ;;  %v1057_v20 = vadd.s32 216, %v14535_v43 }
  0x9d   : > { %v1088_v37 = vand.u32 15, %v1056_v21  ;;  %v14643_v51 = vsel %vm14610_vm13, 1.0, %v18107_v59 }
  0x9e   : > { %12223 = vmatmul.mubr.msk.f32.gmra.mrb[20].mxu0 %vm639_vm1, %v620_v22  ;;  %v1058_v22 = vadd.s32 224, %v14535_v43  ;;  %18580 = vst [vmem:[#allocation34_spill] sm:$0xff] %v14643_v51  ;;  %v1089_v39 = vand.u32 15, %v1057_v20 }
  0x9f   : > { %12225 = vmatprep.mubr.msk.f32.mxu0 %vm639_vm1, %v621_v23  ;;  %v1073_v23 = vand.u32 15, %v1041_v8  ;;  %vm1184_vm5 = vcmp.ge.s32.totalorder %v1088_v37, 1 }
  0xa0   : > { %v1090_v38 = vand.u32 15, %v1058_v22  ;;  %v14663_v2 = vsel %vm1184_vm5, 1.0, %v18107_v59 }
  0xa1   : > { %vm14614_vm14 = vcmp.lt.s32.totalorder %v1073_v23, 15  ;;  %18585 = vst [vmem:[#allocation39_spill] sm:$0xff] %v14663_v2 }
  0xa2   : > { %12226 = vmatmul.mubr.msk.f32.gmra.mrb[22].mxu0 %vm639_vm1, %v622_v24  ;;  %v1045_v24 = vadd.s32 120, %v14535_v43  ;;  %v14648_v52 = vsel %vm14614_vm14, 1.0, %v18107_v59  ;;  %vm1186_vm6 = vcmp.ge.s32.totalorder %v1090_v38, 1  ;;  %vm1217_vm14 = vcmp.lt.s32.totalorder %v1089_v39, 15 }
  0xa3   : > { %12228 = vmatprep.mubr.msk.f32.mxu0 %vm639_vm1, %v623_v25  ;;  %18581 = vst [vmem:[#allocation35_spill] sm:$0xff] %v14648_v52  ;;  %v14666_v3 = vsel %vm1186_vm6, 1.0, %v18107_v59  ;;  %v1085_v25 = vand.u32 15, %v1053_v63 }
  0xa4   : > { %v1077_v40 = vand.u32 15, %v1045_v24  ;;  %18586 = vst [vmem:[#allocation40_spill] sm:$0xff] %v14666_v3 }
  0xa5   : > { %vm1213_vm12 = vcmp.lt.s32.totalorder %v1085_v25, 15 }
  0xa6   : > { %12229 = vmatmul.mubr.msk.f32.gmra.mrb[24].mxu0 %vm639_vm1, %v624_v26  ;;  %v1084_v26 = vand.u32 15, %v1052_v12  ;;  %vm1205_vm7 = vcmp.lt.s32.totalorder %v1077_v40, 15 }
  0xa7   : > { %12231 = vmatprep.mubr.msk.f32.mxu0 %vm639_vm1, %v625_v27  ;;  %v1060_v27 = vadd.s32 240, %v14535_v43  ;;  %v14669_v4 = vsel %vm1205_vm7, 1.0, %v18107_v59 }
  0xa8   : > { %vm1180_vm15 = vcmp.ge.s32.totalorder %v1084_v26, 1  ;;  %18587 = vst [vmem:[#allocation41_spill] sm:$0xff] %v14669_v4 }
  0xa9   : > { %v1092_v44 = vand.u32 15, %v1060_v27  ;;  %v14651_v53 = vsel %vm1180_vm15, 1.0, %v18107_v59 }
  0xaa   : > { %12232 = vmatmul.mubr.msk.f32.gmra.mrb[26].mxu0 %vm639_vm1, %v626_v28  ;;  %v1047_v28 = vadd.s32 136, %v14535_v43  ;;  %18582 = vst [vmem:[#allocation36_spill] sm:$0xff] %v14651_v53 }
  0xab   : > { %12234 = vmatprep.mubr.msk.f32.mxu0 %vm639_vm1, %v627_v29  ;;  %v1086_v29 = vand.u32 15, %v1054_v14  ;;  %vm1188_vm8 = vcmp.ge.s32.totalorder %v1092_v44, 1  ;;  %v1055_v14 = vadd.s32 200, %v14535_v43 }
  0xac   : > { %v1079_v45 = vand.u32 15, %v1047_v28  ;;  %v14672_v11 = vsel %vm1188_vm8, 1.0, %v18107_v59 }
  0xad   : > { %vm1182_vm3 = vcmp.ge.s32.totalorder %v1086_v29, 1  ;;  %18588 = vst [vmem:[#allocation42_spill] sm:$0xff] %v14672_v11 }
  0xae   : > { %12235 = vmatmul.mubr.msk.f32.gmra.mrb[28].mxu0 %vm639_vm1, %v628_v30  ;;  %v1075_v30 = vand.u32 15, %v1043_v16  ;;  %v14654_v55 = vsel %vm1182_vm3, 1.0, %v18107_v59  ;;  %vm1207_vm9 = vcmp.lt.s32.totalorder %v1079_v45, 15 }
  0xaf   : > { %12237 = vmatprep.mubr.msk.f32.mxu0 %vm639_vm1, %v629_v31  ;;  %v1049_v31 = vadd.s32 152, %v14535_v43  ;;  %18583 = vst [vmem:[#allocation37_spill] sm:$0xff] %v14654_v55  ;;  %v14675_v12 = vsel %vm1207_vm9, 1.0, %v18107_v59 }
  0xb0   : > { %vm1203_vm4 = vcmp.lt.s32.totalorder %v1075_v30, 15  ;;  %18589 = vst [vmem:[#allocation43_spill] sm:$0xff] %v14675_v12 }
  0xb1   : > { %v1081_v46 = vand.u32 15, %v1049_v31  ;;  %v14657_v56 = vsel %vm1203_vm4, 1.0, %v18107_v59  ;;  %v1087_v31 = vand.u32 15, %v1055_v14 }
  0xb2   : > { %12238 = vmatmul.mubr.msk.f32.gmra.mrb[30].mxu0 %vm639_vm1, %v630_v32  ;;  %v1051_v32 = vadd.s32 168, %v14535_v43  ;;  %18584 = vst [vmem:[#allocation38_spill] sm:$0xff] %v14657_v56 }
  0xb3   : > { %vm1209_vm10 = vcmp.lt.s32.totalorder %v1081_v46, 15  ;;  %v1059_v46 = vadd.s32 232, %v14535_v43  ;;  %vm14728_vm13 = vcmp.lt.s32.totalorder %v1087_v31, 15 }
  0xb4   : > { %v1083_v47 = vand.u32 15, %v1051_v32  ;;  %v14681_v18 = vsel %vm1209_vm10, 1.0, %v18107_v59  ;;  %v14765_v39 = vsel %vm14728_vm13, 1.0, %v18107_v59 }
  0xb5   : > { %18590 = vst [vmem:[#allocation44_spill] sm:$0xff] %v14681_v18  ;;  %18605 = vst [vmem:[#allocation57_spill] sm:$0xff] %v14765_v39 }
  0xb6   : > { %vm1211_vm11 = vcmp.lt.s32.totalorder %v1083_v47, 15  ;;  %v1061_v47 = vadd.s32 248, %v14535_v43 }
  0xb7   : > { %v14684_v19 = vsel %vm1211_vm11, 1.0, %v18107_v59 }
  0xb8   : > { %18591 = vst [vmem:[#allocation45_spill] sm:$0xff] %v14684_v19 }
 0x149   : > { %v12194_v54 = vpop.f32.mrb[0].mxu0 }
 0x14a   : > { %v812_v57 = vadd.f32 %v12194_v54, %v14628_v48  ;;  %v806_v58 = vpop.f32.mrb[1].mxu0 }
 0x14b   : > { %v807_v1 = vadd.f32 %v14628_v48, %v806_v58 }
 0x14c   : > { %v966_v8 = vmax.f32 %v812_v57, 0.0 }
 0x14d   : > { %v14678_v16 = vmax.f32 %v807_v1, 0.0  ;;  %v12197_v17 = vpop.f32.mrb[2].mxu0 }
 0x14e   : > { %v1895_v21 = vrot.slane %v966_v8, 7  ;;  %v2699_v22 = vrot.slane %v966_v8, 1  ;;  %v822_v23 = vadd.f32 %v12197_v17, %v14628_v48  ;;  %v816_v24 = vpop.f32.mrb[3].mxu0  ;;  %v14699_v34 = vmul.f32 0.0, %v966_v8 }
 0x14f   : > { %v18106_v26 = vrot.slane %v14678_v16, 7  ;;  %v14690_v27 = vpack.c.bf16 %v966_v8, %v14678_v16  ;;  %v18105_v28 = vrot.slane %v14678_v16, 1  ;;  %v817_v29 = vadd.f32 %v14628_v48, %v816_v24 }
 0x150   : > { %v14694_v30 = vmax.f32 %v822_v23, 0.0  ;;  %v14697_v32 = vmul.f32 0.0, %v14678_v16  ;;  %18594 = vst [vmem:[#allocation48_spill] sm:$0xff] %v14699_v34 }
 0x151   : > { %18592 = vst [vmem:[#allocation46_spill] sm:$0xff] %v14690_v27  ;;  %v14705_v35 = vsel %vm2730_vm0, %v18105_v28, %v2699_v22  ;;  %v14707_v36 = vmax.f32 %v817_v29, 0.0  ;;  %v12200_v37 = vpop.f32.mrb[4].mxu0  ;;  %v14713_v38 = vsel %vm1926_vm2, %v18106_v26, %v1895_v21 }
 0x152   : > { %18593 = vst [vmem:[#allocation47_spill] sm:$0xff] %v14697_v32  ;;  %18595 = vst [vmem:[#allocation49_spill] sm:$0xff] %v14705_v35  ;;  %v1897_v40 = vrot.slane %v14694_v30, 7  ;;  %v832_v44 = vadd.f32 %v12200_v37, %v14628_v48  ;;  %v826_v45 = vpop.f32.mrb[5].mxu0  ;;  %v1091_v37 = vand.u32 15, %v1059_v46 }
 0x153   : > { %18596 = vst [vmem:[#allocation50_spill] sm:$0xff] %v14713_v38  ;;  %v1896_v54 = vrot.slane %v14707_v36, 7  ;;  %v2700_v57 = vrot.slane %v14707_v36, 1  ;;  %v827_v58 = vadd.f32 %v14628_v48, %v826_v45  ;;  %v14724_v63 = vpack.c.bf16 %v14694_v30, %v14707_v36 }
 0x154   : > { %v14726_v1 = vmax.f32 %v832_v44, 0.0  ;;  %v14753_v45 = vsel %vm1213_vm12, 1.0, %v18107_v59  ;;  %vm14783_vm15 = vcmp.lt.s32.totalorder %v1091_v37, 15 }
 0x155   : > { %18597 = vst [vmem:[#allocation51_spill] sm:$0xff] %v14724_v63  ;;  %v14736_v17 = vsel %vm2730_vm0, %v2699_v22, %v2700_v57  ;;  %v14738_v20 = vmax.f32 %v827_v58, 0.0  ;;  %v12203_v23 = vpop.f32.mrb[6].mxu0  ;;  %v14742_v24 = vsel %vm1926_vm2, %v1896_v54, %v1897_v40  ;;  %v14746_v25 = vsel %vm1926_vm2, %v1895_v21, %v1896_v54  ;;  %18603 = vst [vmem:[#allocation55_spill] sm:$0xff] %v14753_v45 }
 0x156   : > { %18600 = vst [vmem:[#allocation52_spill] sm:$0xff] %v14736_v17  ;;  %18601 = vst [vmem:[#allocation53_spill] sm:$0xff] %v14742_v24  ;;  %v1899_v29 = vrot.slane %v14726_v1, 7  ;;  %v842_v31 = vadd.f32 %v12203_v23, %v14628_v48  ;;  %v836_v36 = vpop.f32.mrb[7].mxu0  ;;  %v1093_v58 = vand.u32 15, %v1061_v47 }
 0x157   : > { %18602 = vst [vmem:[#allocation54_spill] sm:$0xff] %v14746_v25  ;;  %v1898_v22 = vrot.slane %v14738_v20, 7  ;;  %v837_v44 = vadd.f32 %v14628_v48, %v836_v36  ;;  %v14760_v21 = vpack.c.bf16 %v14726_v1, %v14738_v20  ;;  %v2701_v36 = vrot.slane %v14694_v30, 1 }
 0x158   : > { %v14756_v7 = vmax.f32 %v842_v31, 0.0  ;;  %v14778_v31 = vsel %vm1217_vm14, 1.0, %v18107_v59  ;;  %vm14793_vm3 = vcmp.lt.s32.totalorder %v1093_v58, 15 }
 0x159   : > { %18604 = vst [vmem:[#allocation56_spill] sm:$0xff] %v14760_v21  ;;  %v14767_v46 = vmax.f32 %v837_v44, 0.0  ;;  %v12206_v54 = vpop.f32.mrb[8].mxu0  ;;  %v14771_v23 = vsel %vm1926_vm2, %v1898_v22, %v1899_v29  ;;  %v14775_v47 = vsel %vm1926_vm2, %v1897_v40, %v1898_v22  ;;  %18607 = vst [vmem:[#allocation59_spill] sm:$0xff] %v14778_v31  ;;  %v18619_v21 = vmov 0.0  }
 0x15a   : > { %18606 = vst [vmem:[#allocation58_spill] sm:$0xff] %v14771_v23  ;;  %v1901_v8 = vrot.slane %v14756_v7, 7  ;;  %v852_v28 = vadd.f32 %v12206_v54, %v14628_v48  ;;  %v846_v44 = vpop.f32.mrb[9].mxu0  ;;  %v14791_v40 = vmul.f32 %v14565_v6, %v14775_v47  ;;  %v14801_v37 = vmul.f32 %v14556_v0, %v14775_v47 }
 0x15b   : > { %v1900_v10 = vrot.slane %v14767_v46, 7  ;;  %v847_v14 = vadd.f32 %v14628_v48, %v846_v44  ;;  %v14805_v54 = vpack.c.bf16 %v14756_v7, %v14767_v46  ;;  %v18615_v44 = vrot.slane %v14738_v20, 1 }
 0x15c   : > { %18610 = vst [vmem:[#allocation60_spill] sm:$0xff] %v14791_v40  ;;  %v14797_v30 = vmax.f32 %v852_v28, 0.0  ;;  %18613 = vst [vmem:[#allocation61_spill] sm:$0xff] %v14801_v37 }
 0x15d   : > { %18614 = vst [vmem:[#allocation62_spill] sm:$0xff] %v14805_v54  ;;  %v14811_v59 = vsel %vm2730_vm0, %v2701_v36, %v18615_v44  ;;  %v14813_v58 = vmax.f32 %v847_v14, 0.0  ;;  %v12209_v32 = vpop.f32.mrb[10].mxu0  ;;  %v14819_v34 = vsel %vm1926_vm2, %v1900_v10, %v1901_v8  ;;  %v14823_v6 = vsel %vm1926_vm2, %v1899_v29, %v1900_v10 }
 0x15e   : > { %18616 = vst [vmem:[#allocation63_spill] sm:$0xff] %v14811_v59  ;;  %18617 = vst [vmem:[#allocation64_spill] sm:$0xff] %v14819_v34  ;;  %v1903_v35 = vrot.slane %v14797_v30, 7  ;;  %v862_v17 = vadd.f32 %v12209_v32, %v14628_v48  ;;  %v856_v44 = vpop.f32.mrb[11].mxu0  ;;  %v14829_v14 = vmul.f32 %v14562_v5, %v14746_v25  ;;  %v14838_v10 = vsel %vm14783_vm15, 1.0, %v18619_v21 }
 0x15f   : > { %18618 = vst [vmem:[#allocation65_spill] sm:$0xff] %v14823_v6  ;;  %v1902_v59 = vrot.slane %v14813_v58, 7  ;;  %v857_v54 = vadd.f32 %v14628_v48, %v856_v44  ;;  %18620 = vst [vmem:[#allocation66_spill] sm:$0xff] %v14838_v10  ;;  %v14843_v32 = vsel %vm14793_vm3, 1.0, %v18619_v21  ;;  %v2703_v29 = vrot.slane %v14726_v1, 1 }
 0x160   : > { %18621 = vst [vmem:[#allocation67_spill] sm:$0xff] %v14843_v32  ;;  %v14846_v25 = vmax.f32 %v862_v17, 0.0  ;;  %v14850_v28 = vpack.c.bf16 %v14797_v30, %v14813_v58  ;;  %v14854_v44 = vsel %vm2730_vm0, %v2700_v57, %v2701_v36  ;;  %v18633_v34 = vrot.slane %v14738_v20, 1 }
 0x161   : > { %18623 = vst [vmem:[#allocation69_spill] sm:$0xff] %v14854_v44  ;;  %v14857_v37 = vmax.f32 %v857_v54, 0.0  ;;  %v12212_v63 = vpop.f32.mrb[12].mxu0  ;;  %v14861_v22 = vsel %vm1926_vm2, %v1902_v59, %v1903_v35  ;;  %v14865_v1 = vsel %vm1926_vm2, %v1901_v8, %v1902_v59  ;;  %v18629_v8 = vrot.slane %v14767_v46, 1 }
 0x162   : > { %18622 = vst [vmem:[#allocation68_spill] sm:$0xff] %v14850_v28  ;;  %18624 = vst [vmem:[#allocation70_spill] sm:$0xff] %v14861_v22  ;;  %v1905_v28 = vrot.slane %v14846_v25, 7  ;;  %v872_v57 = vadd.f32 %v12212_v63, %v14628_v48  ;;  %v866_v36 = vpop.f32.mrb[13].mxu0  ;;  %v14885_v63 = vmul.f32 %v14570_v9, %v14823_v6 }
 0x163   : > { %18625 = vst [vmem:[#allocation71_spill] sm:$0xff] %v14865_v1  ;;  %v1904_v44 = vrot.slane %v14857_v37, 7  ;;  %v867_v27 = vadd.f32 %v14628_v48, %v866_v36  ;;  %v14877_v59 = vpack.c.bf16 %v14846_v25, %v14857_v37 }
 0x164   : > { %v14881_v22 = vmax.f32 %v872_v57, 0.0  ;;  %18627 = vst [vmem:[#allocation73_spill] sm:$0xff] %v14885_v63  ;;  %v14901_v57 = vsel %vm2730_vm0, %v2703_v29, %v18629_v8 }
 0x165   : > { %18626 = vst [vmem:[#allocation72_spill] sm:$0xff] %v14877_v59  ;;  %v14887_v54 = vmax.f32 %v867_v27, 0.0  ;;  %v12215_v26 = vpop.f32.mrb[14].mxu0  ;;  %v14891_v36 = vsel %vm1926_vm2, %v1904_v44, %v1905_v28  ;;  %v14895_v59 = vsel %vm1926_vm2, %v1903_v35, %v1904_v44  ;;  %18630 = vst [vmem:[#allocation75_spill] sm:$0xff] %v14901_v57  ;;  %v14926_v35 = vsel %vm2730_vm0, %v18633_v34, %v2703_v29 }
 0x166   : > { %18628 = vst [vmem:[#allocation74_spill] sm:$0xff] %v14891_v36  ;;  %v1907_v27 = vrot.slane %v14881_v22, 7  ;;  %v882_v6 = vadd.f32 %v12215_v26, %v14628_v48  ;;  %v876_v9 = vpop.f32.mrb[15].mxu0  ;;  %v14908_v40 = vmul.f32 %v14575_v13, %v14895_v59  ;;  %18634 = vst [vmem:[#allocation78_spill] sm:$0xff] %v14926_v35  ;;  %v14940_v26 = vmul.f32 %v14579_v15, %v14901_v57 }
 0x167   : > { %v1906_v44 = vrot.slane %v14887_v54, 7  ;;  %v877_v1 = vadd.f32 %v14628_v48, %v876_v9  ;;  %v14915_v8 = vpack.c.bf16 %v14881_v22, %v14887_v54  ;;  %v14964_v36 = vmul.f32 %v14546_v60, %v14901_v57 }
 0x168   : > { %18631 = vst [vmem:[#allocation76_spill] sm:$0xff] %v14908_v40  ;;  %v14918_v23 = vmax.f32 %v882_v6, 0.0  ;;  %18637 = vst [vmem:[#allocation81_spill] sm:$0xff] %v14940_v26  ;;  %v18655_v35 = vrot.slane %v14857_v37, 1 }
 0x169   : > { %18632 = vst [vmem:[#allocation77_spill] sm:$0xff] %v14915_v8  ;;  %v14928_v63 = vmax.f32 %v877_v1, 0.0  ;;  %v12218_v9 = vpop.f32.mrb[16].mxu0  ;;  %v14932_v13 = vsel %vm1926_vm2, %v1906_v44, %v1907_v27  ;;  %v14936_v6 = vsel %vm1926_vm2, %v1905_v28, %v1906_v44  ;;  %18640 = vst [vmem:[#allocation84_spill] sm:$0xff] %v14964_v36 }
 0x16a   : > { %18635 = vst [vmem:[#allocation79_spill] sm:$0xff] %v14932_v13  ;;  %18636 = vst [vmem:[#allocation80_spill] sm:$0xff] %v14936_v6  ;;  %v1909_v20 = vrot.slane %v14918_v23, 7  ;;  %v892_v29 = vadd.f32 %v12218_v9, %v14628_v48  ;;  %v886_v1 = vpop.f32.mrb[17].mxu0  ;;  %v14947_v17 = vmul.f32 %v14600_v33, %v14936_v6  ;;  %v18643_v9 = vrot.slane %v14813_v58, 1  ;;  %v18765_v43 = vld [vmem:[#allocation71_spill] sm:$0xff] }
 0x16b   : > { %v1908_v8 = vrot.slane %v14928_v63, 7  ;;  %v887_v44 = vadd.f32 %v14628_v48, %v886_v1  ;;  %v14954_v40 = vpack.c.bf16 %v14918_v23, %v14928_v63 }
 0x16c   : > { %18638 = vst [vmem:[#allocation82_spill] sm:$0xff] %v14947_v17  ;;  %v14956_v15 = vmax.f32 %v892_v29, 0.0 }
 0x16d   : > { %18639 = vst [vmem:[#allocation83_spill] sm:$0xff] %v14954_v40  ;;  %v14966_v33 = vmax.f32 %v887_v44, 0.0  ;;  %v12221_v28 = vpop.f32.mrb[18].mxu0  ;;  %v14970_v1 = vsel %vm1926_vm2, %v1908_v8, %v1909_v20  ;;  %v14974_v29 = vsel %vm1926_vm2, %v1907_v27, %v1908_v8  ;;  %v18644_v40 = vrot.slane %v14756_v7, 1 }
 0x16e   : > { %18641 = vst [vmem:[#allocation85_spill] sm:$0xff] %v14970_v1  ;;  %18642 = vst [vmem:[#allocation86_spill] sm:$0xff] %v14974_v29  ;;  %v1911_v44 = vrot.slane %v14956_v15, 7  ;;  %v902_v60 = vadd.f32 %v12221_v28, %v14628_v48  ;;  %v896_v17 = vpop.f32.mrb[19].mxu0  ;;  %v14989_v57 = vmul.f32 %v14621_v42, %v14974_v29  ;;  %v18648_v42 = vrot.slane %v14756_v7, 1 }
 0x16f   : > { %v14982_v34 = vsel %vm2730_vm0, %v18644_v40, %v18643_v9  ;;  %v1910_v27 = vrot.slane %v14966_v33, 7  ;;  %v897_v13 = vadd.f32 %v14628_v48, %v896_v17  ;;  %v14996_v40 = vpack.c.bf16 %v14956_v15, %v14966_v33 }
 0x170   : > { %18645 = vst [vmem:[#allocation87_spill] sm:$0xff] %v14982_v34  ;;  %18646 = vst [vmem:[#allocation88_spill] sm:$0xff] %v14989_v57  ;;  %v14998_v9 = vmax.f32 %v902_v60, 0.0  ;;  %v18649_v29 = vrot.slane %v14767_v46, 1  ;;  %v15024_v7 = vmul.f32 %v14643_v51, %v14982_v34  ;;  %v18656_v51 = vrot.slane %v14797_v30, 1 }
 0x171   : > { %18647 = vst [vmem:[#allocation89_spill] sm:$0xff] %v14996_v40  ;;  %v15012_v17 = vmax.f32 %v897_v13, 0.0  ;;  %v12224_v6 = vpop.f32.mrb[20].mxu0  ;;  %v15016_v60 = vsel %vm1926_vm2, %v1910_v27, %v1911_v44  ;;  %v15020_v28 = vsel %vm1926_vm2, %v1909_v20, %v1910_v27 }
 0x172   : > { %v15010_v8 = vsel %vm2730_vm0, %v18649_v29, %v18648_v42  ;;  %18651 = vst [vmem:[#allocation91_spill] sm:$0xff] %v15016_v60  ;;  %18652 = vst [vmem:[#allocation92_spill] sm:$0xff] %v15024_v7  ;;  %v1913_v46 = vrot.slane %v14998_v9, 7  ;;  %v912_v13 = vadd.f32 %v12224_v6, %v14628_v48  ;;  %v906_v29 = vpop.f32.mrb[21].mxu0  ;;  %v15031_v26 = vmul.f32 %v14633_v49, %v15020_v28 }
 0x173   : > { %18650 = vst [vmem:[#allocation90_spill] sm:$0xff] %v15010_v8  ;;  %v1912_v36 = vrot.slane %v15012_v17, 7  ;;  %v907_v27 = vadd.f32 %v14628_v48, %v906_v29  ;;  %v15038_v40 = vpack.c.bf16 %v14998_v9, %v15012_v17  ;;  %v15052_v20 = vsel %vm2730_vm0, %v18656_v51, %v18655_v35 }
 0x174   : > { %18653 = vst [vmem:[#allocation93_spill] sm:$0xff] %v15031_v26  ;;  %v15040_v57 = vmax.f32 %v912_v13, 0.0  ;;  %18657 = vst [vmem:[#allocation95_spill] sm:$0xff] %v15052_v20  ;;  %v18659_v42 = vmov %v18656_v51  ;;  %v18660_v7 = vrot.slane %v14813_v58, 1  ;;  %v18665_v35 = vrot.slane %v14887_v54, 1 }
 0x175   : > { %18654 = vst [vmem:[#allocation94_spill] sm:$0xff] %v15038_v40  ;;  %v15054_v29 = vmax.f32 %v907_v27, 0.0  ;;  %v12227_v34 = vpop.f32.mrb[22].mxu0  ;;  %v15058_v13 = vsel %vm1926_vm2, %v1912_v36, %v1913_v46  ;;  %v15062_v6 = vsel %vm1926_vm2, %v1911_v44, %v1912_v36  ;;  %v18666_v60 = vrot.slane %v14846_v25, 1 }
 0x176   : > { %18658 = vst [vmem:[#allocation96_spill] sm:$0xff] %v15058_v13  ;;  %v15070_v40 = vsel %vm2730_vm0, %v18660_v7, %v18659_v42  ;;  %v1915_v51 = vrot.slane %v15040_v57, 7  ;;  %v922_v27 = vadd.f32 %v12227_v34, %v14628_v48  ;;  %v916_v26 = vpop.f32.mrb[23].mxu0  ;;  %v15077_v8 = vmul.f32 %v14638_v50, %v15062_v6 }
 0x177   : > { %18661 = vst [vmem:[#allocation97_spill] sm:$0xff] %v15070_v40  ;;  %v1914_v36 = vrot.slane %v15054_v29, 7  ;;  %v917_v58 = vadd.f32 %v14628_v48, %v916_v26  ;;  %v15084_v44 = vpack.c.bf16 %v15040_v57, %v15054_v29  ;;  %v15092_v42 = vmul.f32 %v14648_v52, %v15052_v20 }
 0x178   : > { %18662 = vst [vmem:[#allocation98_spill] sm:$0xff] %v15077_v8  ;;  %v15086_v7 = vmax.f32 %v922_v27, 0.0  ;;  %v15100_v26 = vsel %vm2730_vm0, %v18666_v60, %v18665_v35  ;;  %v18669_v8 = vmov %v18666_v60  ;;  %v18670_v52 = vrot.slane %v14857_v37, 1 }
 0x179   : > { %18663 = vst [vmem:[#allocation99_spill] sm:$0xff] %v15084_v44  ;;  %18664 = vst [vmem:[#allocation100_spill] sm:$0xff] %v15092_v42  ;;  %v15102_v30 = vmax.f32 %v917_v58, 0.0  ;;  %v12230_v44 = vpop.f32.mrb[24].mxu0  ;;  %v15106_v27 = vsel %vm1926_vm2, %v1914_v36, %v1915_v51  ;;  %v15110_v34 = vsel %vm1926_vm2, %v1913_v46, %v1914_v36  ;;  %v15142_v35 = vmul.f32 %v14657_v56, %v15100_v26 }
 0x17a   : > { %18667 = vst [vmem:[#allocation101_spill] sm:$0xff] %v15100_v26  ;;  %18668 = vst [vmem:[#allocation102_spill] sm:$0xff] %v15106_v27  ;;  %v15118_v20 = vsel %vm2730_vm0, %v18670_v52, %v18669_v8  ;;  %v1917_v60 = vrot.slane %v15086_v7, 7  ;;  %v932_v58 = vadd.f32 %v12230_v44, %v14628_v48  ;;  %v926_v13 = vpop.f32.mrb[25].mxu0  ;;  %v15125_v50 = vmul.f32 %v14651_v53, %v15110_v34 }
 0x17b   : > { %18671 = vst [vmem:[#allocation103_spill] sm:$0xff] %v15118_v20  ;;  %v1916_v46 = vrot.slane %v15102_v30, 7  ;;  %v927_v37 = vadd.f32 %v14628_v48, %v926_v13  ;;  %v15132_v52 = vpack.c.bf16 %v15086_v7, %v15102_v30  ;;  %18674 = vst [vmem:[#allocation106_spill] sm:$0xff] %v15142_v35  ;;  %v18677_v36 = vrot.slane %v14928_v63, 1 }
 0x17c   : > { %18672 = vst [vmem:[#allocation104_spill] sm:$0xff] %v15125_v50  ;;  %v15134_v8 = vmax.f32 %v932_v58, 0.0  ;;  %v18682_v27 = vrot.slane %v14881_v22, 1  ;;  %v18689_v20 = vrot.slane %v14966_v33, 1 }
 0x17d   : > { %18673 = vst [vmem:[#allocation105_spill] sm:$0xff] %v15132_v52  ;;  %v15144_v53 = vmax.f32 %v927_v37, 0.0  ;;  %v12233_v25 = vpop.f32.mrb[26].mxu0  ;;  %v15148_v13 = vsel %vm1926_vm2, %v1916_v46, %v1917_v60  ;;  %v15152_v58 = vsel %vm1926_vm2, %v1915_v51, %v1916_v46  ;;  %v18678_v52 = vrot.slane %v14881_v22, 1 }
 0x17e   : > { %18675 = vst [vmem:[#allocation107_spill] sm:$0xff] %v15148_v13  ;;  %18676 = vst [vmem:[#allocation108_spill] sm:$0xff] %v15152_v58  ;;  %v1919_v37 = vrot.slane %v15134_v8, 7  ;;  %v942_v50 = vadd.f32 %v12233_v25, %v14628_v48  ;;  %v936_v40 = vpop.f32.mrb[27].mxu0  ;;  %v15167_v56 = vmul.f32 %v14654_v55, %v15152_v58  ;;  %v18683_v55 = vrot.slane %v14887_v54, 1 }
 0x17f   : > { %v15160_v44 = vsel %vm2730_vm0, %v18678_v52, %v18677_v36  ;;  %v1918_v51 = vrot.slane %v15144_v53, 7  ;;  %v937_v26 = vadd.f32 %v14628_v48, %v936_v40  ;;  %v15174_v52 = vpack.c.bf16 %v15134_v8, %v15144_v53 }
 0x180   : > { %18679 = vst [vmem:[#allocation109_spill] sm:$0xff] %v15160_v44  ;;  %18680 = vst [vmem:[#allocation110_spill] sm:$0xff] %v15167_v56  ;;  %v15176_v36 = vmax.f32 %v942_v50, 0.0  ;;  %v15188_v46 = vsel %vm2730_vm0, %v18683_v55, %v18682_v27  ;;  %v15202_v22 = vmul.f32 %v14669_v4, %v15160_v44  ;;  %v18690_v4 = vrot.slane %v14918_v23, 1 }
 0x181   : > { %18681 = vst [vmem:[#allocation111_spill] sm:$0xff] %v15174_v52  ;;  %18684 = vst [vmem:[#allocation112_spill] sm:$0xff] %v15188_v46  ;;  %v15190_v40 = vmax.f32 %v937_v26, 0.0  ;;  %v12236_v58 = vpop.f32.mrb[28].mxu0  ;;  %v15194_v50 = vsel %vm1926_vm2, %v1918_v51, %v1919_v37  ;;  %v15198_v25 = vsel %vm1926_vm2, %v1917_v60, %v1918_v51 }
 0x182   : > { %18685 = vst [vmem:[#allocation113_spill] sm:$0xff] %v15194_v50  ;;  %18686 = vst [vmem:[#allocation114_spill] sm:$0xff] %v15202_v22  ;;  %v1921_v54 = vrot.slane %v15176_v36, 7  ;;  %v952_v26 = vadd.f32 %v12236_v58, %v14628_v48  ;;  %v946_v27 = vpop.f32.mrb[29].mxu0  ;;  %v15209_v42 = vmul.f32 %v14663_v2, %v15198_v25  ;;  %v15230_v60 = vsel %vm2730_vm0, %v18690_v4, %v18689_v20 }
 0x183   : > { %v1920_v35 = vrot.slane %v15190_v40, 7  ;;  %v947_v51 = vadd.f32 %v14628_v48, %v946_v27  ;;  %v15216_v52 = vpack.c.bf16 %v15176_v36, %v15190_v40  ;;  %18691 = vst [vmem:[#allocation117_spill] sm:$0xff] %v15230_v60  ;;  %v18693_v55 = vmov %v18690_v4 }
 0x184   : > { %18687 = vst [vmem:[#allocation115_spill] sm:$0xff] %v15209_v42  ;;  %v15218_v56 = vmax.f32 %v952_v26, 0.0  ;;  %v18694_v22 = vrot.slane %v14928_v63, 1  ;;  %v18699_v20 = vrot.slane %v15012_v17, 1  ;;  %v18700_v50 = vrot.slane %v14956_v15, 1 }
 0x185   : > { %18688 = vst [vmem:[#allocation116_spill] sm:$0xff] %v15216_v52  ;;  %v15232_v27 = vmax.f32 %v947_v51, 0.0  ;;  %v12239_v44 = vpop.f32.mrb[30].mxu0  ;;  %v15236_v26 = vsel %vm1926_vm2, %v1920_v35, %v1921_v54  ;;  %v15240_v58 = vsel %vm1926_vm2, %v1919_v37, %v1920_v35 }
 0x186   : > { %18692 = vst [vmem:[#allocation118_spill] sm:$0xff] %v15236_v26  ;;  %v15248_v52 = vsel %vm2730_vm0, %v18694_v22, %v18693_v55  ;;  %v1923_v4 = vrot.slane %v15218_v56, 7  ;;  %v962_v51 = vadd.f32 %v12239_v44, %v14628_v48  ;;  %v956_v42 = vpop.f32.mrb[31].mxu0  ;;  %v15255_v46 = vmul.f32 %v14666_v3, %v15240_v58 }
 0x187   : > { %v1922_v35 = vrot.slane %v15232_v27, 7  ;;  %v957_v63 = vadd.f32 %v14628_v48, %v956_v42  ;;  %v15262_v37 = vpack.c.bf16 %v15218_v56, %v15232_v27  ;;  %v15270_v55 = vmul.f32 %v14675_v12, %v15230_v60 }
 0x188   : > { %18695 = vst [vmem:[#allocation119_spill] sm:$0xff] %v15255_v46  ;;  %v15264_v22 = vmax.f32 %v962_v51, 0.0  ;;  %v15278_v48 = vsel %vm2730_vm0, %v18700_v50, %v18699_v20  ;;  %v18703_v23 = vmov %v18700_v50  ;;  %v18711_v60 = vrot.slane %v14678_v16, 7 }
 0x189   : > { %18696 = vst [vmem:[#allocation120_spill] sm:$0xff] %v15262_v37  ;;  %18698 = vst [vmem:[#allocation122_spill] sm:$0xff] %v15270_v55  ;;  %v15280_v42 = vmax.f32 %v957_v63, 0.0  ;;  %v15284_v51 = vsel %vm1926_vm2, %v1922_v35, %v1923_v4  ;;  %v15288_v44 = vsel %vm1926_vm2, %v1921_v54, %v1922_v35  ;;  %v18704_v37 = vrot.slane %v14966_v33, 1 }
 0x18a   : > { %18697 = vst [vmem:[#allocation121_spill] sm:$0xff] %v15264_v22  ;;  %18702 = vst [vmem:[#allocation124_spill] sm:$0xff] %v15284_v51  ;;  %v2729_v50 = vrot.slane %v15264_v22, 1  ;;  %v1925_v20 = vrot.slane %v15264_v22, 7  ;;  %v15302_v63 = vmul.f32 %v14672_v11, %v15288_v44  ;;  %v15305_v12 = vmul.f32 0.0, %v15264_v22  ;;  %v18801_v51 = vld [vmem:[#allocation35_spill] sm:$0xff] }
 0x18b   : > { %18701 = vst [vmem:[#allocation123_spill] sm:$0xff] %v15280_v42  ;;  %v15296_v46 = vsel %vm2730_vm0, %v18704_v37, %v18703_v23  ;;  %v2728_v54 = vrot.slane %v15280_v42, 1  ;;  %v1924_v15 = vrot.slane %v15280_v42, 7  ;;  %v18707_v33 = vand.u32 15, %v14552_v62 }
 0x18c   : > { %18705 = vst [vmem:[#allocation125_spill] sm:$0xff] %v15302_v63  ;;  %18706 = vst [vmem:[#allocation126_spill] sm:$0xff] %v15305_v12  ;;  %v15316_v23 = vmul.f32 0.0, %v15280_v42  ;;  %v15324_v22 = vsel %vm1926_vm2, %v1925_v20, %v18711_v60  ;;  %v18713_v62 = vrot.slane %v14678_v16, 1  ;;  %v15336_v42 = vmul.f32 %v14681_v18, %v15278_v48 }
 0x18d   : > { %vm15311_vm4 = vcmp.ge.s32.totalorder %v18707_v33, 1  ;;  %18712 = vst [vmem:[#allocation128_spill] sm:$0xff] %v15324_v22  ;;  %v15340_v37 = vsel %vm1926_vm2, %v1924_v15, %v1925_v20  ;;  %v15344_v60 = vsel %vm1926_vm2, %v1923_v4, %v1924_v15  ;;  %v1961_v11 = vmul.f32 %v14556_v0, %v15324_v22 }
 0x18e   : > { %18710 = vst [vmem:[#allocation127_spill] sm:$0xff] %v15316_v23  ;;  %v15332_v33 = vsel %vm2730_vm0, %v2729_v50, %v18713_v62  ;;  %18715 = vst [vmem:[#allocation130_spill] sm:$0xff] %v15336_v42  ;;  %v1959_v62 = vmul.f32 0.0, %v15344_v60  ;;  %v1960_v55 = vmul.f32 0.0, %v15340_v37  ;;  %v15354_v63 = vsel %vm2730_vm0, %v2728_v54, %v2729_v50 }
 0x18f   : > { %18714 = vst [vmem:[#allocation129_spill] sm:$0xff] %v15332_v33  ;;  %18716 = vst [vmem:[#allocation131_spill] sm:$0xff] %v15354_v63  ;;  %v15357_v20 = vmul.f32 0.0, %v15332_v33  ;;  %v1992_v4 = vpack.c.bf16 %v14713_v38, %v1961_v11  ;;  %v15361_v15 = vmul.f32 0.0, %v15354_v63  ;;  %v18719_v16 = vrot.slane %v15054_v29, 1  ;;  %v18944_v63 = vld [vmem:[#allocation50_spill] sm:$0xff] }
 0x190   : > { %v18720_v22 = vrot.slane %v14998_v9, 1  ;;  %v1991_v50 = vpack.c.bf16 %v1960_v55, %v1959_v62  ;;  %v18722_v33 = vrot.slane %v15012_v17, 1  ;;  %v18724_v38 = vrot.slane %v15102_v30, 1  ;;  %v13858_v9 = vld [vmem:[%s18077_s3 + $0x48] sm:$0xff]  }
 0x191   : > { %18717 = vst [vmem:[#allocation132_spill] sm:$0xff] %v15357_v20  ;;  %18718 = vst [vmem:[#allocation133_spill] sm:$0xff] %v15361_v15  ;;  %v18725_v42 = vrot.slane %v15040_v57, 1  ;;  %v18727_v55 = vmov %v18719_v16  ;;  %v18734_v15 = vrot.slane %v15190_v40, 1  ;;  %v18740_v57 = vrot.slane %v15232_v27, 1 }
 0x192   : > { %v15371_v23 = vsel %vm2730_vm0, %v18720_v22, %v18719_v16  ;;  %v18721_v12 = vmov %v18720_v22  ;;  %12256 = vmatprep.mubr.bf16.mxu1 %v1991_v50 }
 0x193   : > { %v15379_v11 = vsel %vm2730_vm0, %v18722_v33, %v18721_v12  ;;  %v15383_v0 = vmul.f32 %v14684_v19, %v15371_v23  ;;  %v15391_v22 = vsel %vm2730_vm0, %v18725_v42, %v18724_v38  ;;  %v18726_v17 = vmov %v18725_v42  ;;  %12257 = vmatmul.mubr.bf16.vlgmr.msra.gmra.mrb[0].mxu1 %v1992_v4 }
 0x194   : > { %v15404_v33 = vsel %vm2730_vm0, %v18727_v55, %v18726_v17  ;;  %v15408_v16 = vmul.f32 %v14753_v45, %v15391_v22  ;;  %v18729_v38 = vrot.slane %v15144_v53, 1  ;;  %v18730_v42 = vrot.slane %v15086_v7, 1  ;;  %12289 = vmatpush3.bf16.msra.mxu1 %v14532_v41  ;;  %v13859_v41 = vld [vmem:[%s18077_s3 + $0x50] sm:$0xff]  }
 0x195   : > { %18723 = vst [vmem:[#allocation134_spill] sm:$0xff] %v15383_v0  ;;  %v18732_v17 = vrot.slane %v15102_v30, 1  ;;  %12290 = vmatprep.subr.bf16.mxu1 %v13858_v9  ;;  %v18760_v30 = vld [vmem:[#allocation64_spill] sm:$0xff]  ;;  %v18771_v0 = vld [vmem:[#allocation33_spill] sm:$0xff] }
 0x196   : > { %18728 = vst [vmem:[#allocation135_spill] sm:$0xff] %v15408_v16  ;;  %v15416_v62 = vsel %vm2730_vm0, %v18730_v42, %v18729_v38  ;;  %v18731_v29 = vmov %v18730_v42  ;;  %v18735_v38 = vrot.slane %v15134_v8, 1  ;;  %v18737_v42 = vrot.slane %v15144_v53, 1  ;;  %v18759_v8 = vld [vmem:[#allocation73_spill] sm:$0xff] }
 0x197   : > { %v15426_v55 = vsel %vm2730_vm0, %v18732_v17, %v18731_v29  ;;  %v15430_v12 = vmul.f32 %v14765_v39, %v15416_v62  ;;  %v18742_v53 = vpack.c.bf16 %v14742_v24, %v14829_v14  ;;  %v1995_v24 = vpack.c.bf16 %v18760_v30, %v18759_v8  ;;  %v18766_v8 = vld [vmem:[#allocation74_spill] sm:$0xff]  ;;  %v18774_v30 = vld [vmem:[#allocation36_spill] sm:$0xff]  ;;  %v18779_v16 = vld [vmem:[#allocation37_spill] sm:$0xff] }
 0x198   : > { %v15438_v50 = vsel %vm2730_vm0, %v18735_v38, %v18734_v15  ;;  %v18736_v7 = vmov %v18735_v38  ;;  %v18741_v15 = vrot.slane %v15176_v36, 1  ;;  %v18746_v36 = vrot.slane %v15218_v56, 1  ;;  %12291 = vmatpush3.bf16.msra.mxu1 %v13858_v9  ;;  %v13860_v9 = vld [vmem:[%s18077_s3 + $0x58] sm:$0xff]  }
 0x199   : > { %18733 = vst [vmem:[#allocation136_spill] sm:$0xff] %v15430_v12  ;;  %v15448_v29 = vsel %vm2730_vm0, %v18737_v42, %v18736_v7  ;;  %v15452_v17 = vmul.f32 %v14778_v31, %v15438_v50  ;;  %12260 = vmatprep.mubr.bf16.mxu1 %v18742_v53  ;;  %v18744_v7 = vrot.slane %v15190_v40, 1  ;;  %v18748_v53 = vrot.slane %v15232_v27, 1  ;;  %12292 = vmatprep.subr.bf16.mxu1 %v13859_v41 }
 0x19a   : > { %18738 = vst [vmem:[#allocation137_spill] sm:$0xff] %v15448_v29  ;;  %v15460_v4 = vsel %vm2730_vm0, %v18741_v15, %v18740_v57  ;;  %v18743_v38 = vmov %v18741_v15  ;;  %v15489_v40 = vsel %vm2730_vm0, %v18746_v36, %v2728_v54  ;;  %v18747_v15 = vmov %v18746_v36  ;;  %v18815_v36 = vld [vmem:[#allocation43_spill] sm:$0xff] }
 0x19b   : > { %18739 = vst [vmem:[#allocation138_spill] sm:$0xff] %v15452_v17  ;;  %v15474_v42 = vsel %vm2730_vm0, %v18744_v7, %v18743_v38  ;;  %v15478_v57 = vmul.f32 %v14838_v10, %v15460_v4  ;;  %v15497_v38 = vsel %vm2730_vm0, %v18748_v53, %v18747_v15  ;;  %v15502_v7 = vsel %vm15311_vm4, 1.0, %v18619_v21  ;;  %v18756_v15 = vld [vmem:[#allocation80_spill] sm:$0xff] }
 0x19c   : > { %18749 = vst [vmem:[#allocation140_spill] sm:$0xff] %v15502_v7  ;;  %v15508_v54 = vmul.f32 %v14843_v32, %v15489_v40  ;;  %v15512_v56 = vmul.f32 %v14562_v5, %v14775_v47  ;;  %v18752_v27 = vand.u32 15, %v14549_v61  ;;  %v15522_v35 = vmul.f32 %v15502_v7, %v14895_v59  ;;  %v18757_v53 = vld [vmem:[#allocation28_spill] sm:$0xff]  ;;  %v18761_v61 = vld [vmem:[#allocation58_spill] sm:$0xff]  ;;  %12293 = vmatpush3.bf16.msra.mxu1 %v13859_v41  ;;  %v18797_v47 = vld [vmem:[#allocation95_spill] sm:$0xff] }
 0x19d   : > { %18745 = vst [vmem:[#allocation139_spill] sm:$0xff] %v15478_v57  ;;  %v15526_v14 = vmul.f32 %v18757_v53, %v18756_v15  ;;  %v18762_v5 = vld [vmem:[#allocation86_spill] sm:$0xff]  ;;  %v1969_v12 = vmul.f32 %v15502_v7, %v18765_v43  ;;  %v15555_v43 = vmul.f32 %v14633_v49, %v15062_v6  ;;  %v15559_v20 = vmul.f32 %v18771_v0, %v15110_v34 }
 0x19e   : > { %18750 = vst [vmem:[#allocation141_spill] sm:$0xff] %v15508_v54  ;;  %18751 = vst [vmem:[#allocation142_spill] sm:$0xff] %v15512_v56  ;;  %vm15516_vm5 = vcmp.lt.s32.totalorder %v18752_v27, 15  ;;  %v18763_v57 = vld [vmem:[#allocation30_spill] sm:$0xff]  ;;  %v18768_v27 = vld [vmem:[#allocation31_spill] sm:$0xff]  ;;  %v15576_v49 = vmul.f32 %v14663_v2, %v15240_v58  ;;  %v15580_v0 = vmul.f32 %v14666_v3, %v15288_v44  ;;  %12294 = vmatprep.subr.bf16.mxu1 %v13860_v9 }
 0x19f   : > { %18755 = vst [vmem:[#allocation143_spill] sm:$0xff] %v15522_v35  ;;  %18758 = vst [vmem:[#allocation80_spill] sm:$0xff] %v15526_v14  ;;  %v15536_v17 = vmul.f32 %v18763_v57, %v18762_v5  ;;  %v15549_v56 = vmul.f32 %v18768_v27, %v15020_v28  ;;  %v18773_v57 = vld [vmem:[#allocation108_spill] sm:$0xff]  ;;  %v18778_v27 = vld [vmem:[#allocation91_spill] sm:$0xff] }
 0x1a0   : > { %18770 = vst [vmem:[#allocation74_spill] sm:$0xff] %v15555_v43  ;;  %18772 = vst [vmem:[#allocation144_spill] sm:$0xff] %v15559_v20  ;;  %v15563_v35 = vmul.f32 %v18774_v30, %v18773_v57  ;;  %v18776_v54 = vld [vmem:[#allocation60_spill] sm:$0xff]  ;;  %v18787_v43 = vld [vmem:[#allocation42_spill] sm:$0xff]  ;;  %12295 = vmatpush3.bf16.msra.mxu1 %v13860_v9  ;;  %v15666_v9 = vmul.f32 %v14753_v45, %v15416_v62 }
 0x1a1   : > { %18764 = vst [vmem:[#allocation73_spill] sm:$0xff] %v15536_v17  ;;  %18769 = vst [vmem:[#allocation86_spill] sm:$0xff] %v15549_v56  ;;  %v18777_v14 = vpack.c.bf16 %v18761_v61, %v18776_v54  ;;  %v15572_v17 = vmul.f32 %v18779_v16, %v15198_v25  ;;  %v18784_v54 = vld [vmem:[#allocation96_spill] sm:$0xff]  ;;  %v15604_v61 = vmul.f32 %v18787_v43, %v15344_v60  ;;  %v18789_v20 = vld [vmem:[#allocation123_spill] sm:$0xff] }
 0x1a2   : > { %18775 = vst [vmem:[#allocation108_spill] sm:$0xff] %v15563_v35  ;;  %18781 = vst [vmem:[#allocation145_spill] sm:$0xff] %v15576_v49  ;;  %v18790_v2 = vld [vmem:[#allocation121_spill] sm:$0xff]  ;;  %v18794_v56 = vld [vmem:[#allocation87_spill] sm:$0xff] }
 0x1a3   : > { %12261 = vmatmul.mubr.bf16.gmra.mrb[4].mxu1 %v18777_v14  ;;  %18780 = vst [vmem:[#allocation60_spill] sm:$0xff] %v15572_v17  ;;  %18782 = vst [vmem:[#allocation146_spill] sm:$0xff] %v15580_v0  ;;  %v15585_v14 = vsel %vm15516_vm5, 1.0, %v18619_v21  ;;  %v15608_v35 = vpack.c.bf16 %v18790_v2, %v18789_v20  ;;  %v18792_v21 = vld [vmem:[#allocation75_spill] sm:$0xff]  ;;  %v18795_v3 = vld [vmem:[#allocation29_spill] sm:$0xff] }
 0x1a4   : > { %12264 = vmatprep.mubr.bf16.mxu1 %v1995_v24  ;;  %18783 = vst [vmem:[#allocation147_spill] sm:$0xff] %v15585_v14  ;;  %v13861_v24 = vld [vmem:[%s18077_s3 + $0x60] sm:$0xff]   ;;  %18788 = vst [vmem:[#allocation96_spill] sm:$0xff] %v15604_v61  ;;  %v15612_v13 = vmul.f32 %v15585_v14, %v18792_v21  ;;  %v15616_v17 = vmul.f32 %v18795_v3, %v18794_v56  ;;  %v15658_v3 = vmul.f32 %v14681_v18, %v15371_v23 }
 0x1a5   : > { %18791 = vst [vmem:[#allocation123_spill] sm:$0xff] %v15608_v35  ;;  %v18798_v0 = vld [vmem:[#allocation34_spill] sm:$0xff]  ;;  %v18800_v43 = vld [vmem:[#allocation101_spill] sm:$0xff]  ;;  %12296 = vmatprep.subr.bf16.mxu1 %v13861_v24 }
 0x1a6   : > { %18793 = vst [vmem:[#allocation121_spill] sm:$0xff] %v15612_v13  ;;  %18796 = vst [vmem:[#allocation75_spill] sm:$0xff] %v15616_v17  ;;  %v15622_v49 = vmul.f32 %v18798_v0, %v18797_v47  ;;  %v15626_v26 = vmul.f32 %v18801_v51, %v18800_v43  ;;  %v18803_v2 = vld [vmem:[#allocation109_spill] sm:$0xff]  ;;  %v18804_v20 = vld [vmem:[#allocation38_spill] sm:$0xff]  ;;  %v15652_v17 = vmul.f32 %v18815_v36, %v15278_v48  ;;  %12297 = vmatpush3.bf16.msra.mxu1 %v13861_v24 }
 0x1a7   : > { %v15630_v35 = vmul.f32 %v18804_v20, %v18803_v2  ;;  %v18806_v21 = vld [vmem:[#allocation70_spill] sm:$0xff]  ;;  %v18809_v61 = vld [vmem:[#allocation117_spill] sm:$0xff]  ;;  %v15662_v2 = vmul.f32 %v14684_v19, %v15391_v22  ;;  %v15676_v13 = vmul.f32 %v14778_v31, %v15460_v4  ;;  %v15712_v31 = vmul.f32 %v15502_v7, %v18756_v15  ;;  %v18830_v15 = vld [vmem:[#allocation79_spill] sm:$0xff] }
 0x1a8   : > { %18799 = vst [vmem:[#allocation148_spill] sm:$0xff] %v15622_v49  ;;  %18802 = vst [vmem:[#allocation101_spill] sm:$0xff] %v15626_v26  ;;  %v1996_v14 = vpack.c.bf16 %v18806_v21, %v1969_v12  ;;  %v18808_v41 = vld [vmem:[#allocation90_spill] sm:$0xff]  ;;  %v18810_v0 = vld [vmem:[#allocation41_spill] sm:$0xff]  ;;  %v15747_v7 = vmul.f32 %v18774_v30, %v15198_v25 }
 0x1a9   : > { %18805 = vst [vmem:[#allocation149_spill] sm:$0xff] %v15630_v35  ;;  %v15639_v47 = vmul.f32 %v18810_v0, %v18809_v61  ;;  %v13862_v51 = vld [vmem:[%s18077_s3 + $0x68] sm:$0xff]   ;;  %v18812_v20 = vld [vmem:[#allocation97_spill] sm:$0xff]  ;;  %v18814_v21 = vld [vmem:[#allocation112_spill] sm:$0xff]  ;;  %v15672_v35 = vmul.f32 %v14765_v39, %v15438_v50 }
 0x1aa   : > { %v18813_v12 = vld [vmem:[#allocation103_spill] sm:$0xff]  ;;  %18816 = vst [vmem:[#allocation117_spill] sm:$0xff] %v15652_v17  ;;  %18817 = vst [vmem:[#allocation97_spill] sm:$0xff] %v15666_v9  ;;  %v18820_v26 = vld [vmem:[#allocation76_spill] sm:$0xff]  ;;  %12298 = vmatprep.subr.bf16.mxu1 %v13862_v51 }
 0x1ab   : > { %18811 = vst [vmem:[#allocation90_spill] sm:$0xff] %v15639_v47  ;;  %12265 = vmatmul.mubr.bf16.gmra.mrb[8].mxu1 %v1996_v14  ;;  %18818 = vst [vmem:[#allocation103_spill] sm:$0xff] %v15676_v13  ;;  %v15680_v47 = vmul.f32 %v14838_v10, %v15489_v40  ;;  %v18821_v49 = vpack.c.bf16 %v18766_v8, %v18820_v26  ;;  %v13863_v10 = vld [vmem:[%s18077_s3 + $0x70] sm:$0xff]   ;;  %v18822_v24 = vld [vmem:[#allocation129_spill] sm:$0xff] }
 0x1ac   : > { %v15702_v56 = vmul.f32 %v14843_v32, %v18822_v24  ;;  %v18824_v17 = vld [vmem:[#allocation27_spill] sm:$0xff]  ;;  %18826 = vst [vmem:[#allocation150_spill] sm:$0xff] %v15712_v31  ;;  %v18828_v26 = vld [vmem:[#allocation30_spill] sm:$0xff]  ;;  %12299 = vmatpush3.bf16.msra.mxu1 %v13862_v51  ;;  %v13864_v9 = vld [vmem:[%s18077_s3 + $0x78] sm:$0xff]  }
 0x1ad   : > { %18819 = vst [vmem:[#allocation112_spill] sm:$0xff] %v15680_v47  ;;  %12268 = vmatprep.mubr.bf16.mxu1 %v18821_v49  ;;  %v15706_v14 = vmul.f32 %v18824_v17, %v14895_v59  ;;  %v15716_v49 = vmul.f32 %v18757_v53, %v18762_v5  ;;  %v15720_v47 = vmul.f32 %v18828_v26, %v15020_v28  ;;  %v18831_v28 = vld [vmem:[#allocation31_spill] sm:$0xff]  ;;  %v18833_v59 = vld [vmem:[#allocation32_spill] sm:$0xff]  ;;  %v18835_v26 = vld [vmem:[#allocation33_spill] sm:$0xff] }
 0x1ae   : > { %18823 = vst [vmem:[#allocation76_spill] sm:$0xff] %v15702_v56  ;;  %12300 = vmatprep.subr.bf16.mxu1 %v13863_v10  ;;  %v15735_v51 = vmul.f32 %v18831_v28, %v15062_v6  ;;  %v15739_v32 = vmul.f32 %v18833_v59, %v15110_v34  ;;  %18837 = vst [vmem:[#allocation156_spill] sm:$0xff] %v15747_v7  ;;  %v15751_v5 = vmul.f32 %v18779_v16, %v15240_v58  ;;  %v18839_v53 = vld [vmem:[#allocation82_spill] sm:$0xff]  ;;  %v18841_v59 = vld [vmem:[#allocation39_spill] sm:$0xff] }
 0x1af   : > { %18825 = vst [vmem:[#allocation129_spill] sm:$0xff] %v15706_v14  ;;  %18827 = vst [vmem:[#allocation151_spill] sm:$0xff] %v15716_v49  ;;  %v15743_v14 = vmul.f32 %v18835_v26, %v18773_v57  ;;  %v18840_v6 = vpack.c.bf16 %v18830_v15, %v18839_v53  ;;  %v15760_v28 = vmul.f32 %v18841_v59, %v15288_v44  ;;  %v18843_v57 = vld [vmem:[#allocation40_spill] sm:$0xff]  ;;  %v18847_v58 = vld [vmem:[#allocation102_spill] sm:$0xff] }
 0x1b0   : > { %18829 = vst [vmem:[#allocation152_spill] sm:$0xff] %v15720_v47  ;;  %18832 = vst [vmem:[#allocation153_spill] sm:$0xff] %v15735_v51  ;;  %v15764_v26 = vmul.f32 %v18843_v57, %v15344_v60  ;;  %v18845_v25 = vld [vmem:[#allocation88_spill] sm:$0xff]  ;;  %12301 = vmatpush3.bf16.msra.mxu1 %v13863_v10  ;;  %v18849_v34 = vld [vmem:[#allocation113_spill] sm:$0xff] }
 0x1b1   : > { %18834 = vst [vmem:[#allocation154_spill] sm:$0xff] %v15739_v32  ;;  %18836 = vst [vmem:[#allocation155_spill] sm:$0xff] %v15743_v14  ;;  %v18846_v30 = vpack.c.bf16 %v14970_v1, %v18845_v25  ;;  %12302 = vmatprep.subr.bf16.mxu1 %v13864_v9  ;;  %v13865_v44 = vld [vmem:[%s18077_s3 + $0x80] sm:$0xff]   ;;  %v18852_v53 = vld [vmem:[#allocation87_spill] sm:$0xff]  ;;  %v15832_v25 = vmul.f32 %v14684_v19, %v15416_v62 }
 0x1b2   : > { %18838 = vst [vmem:[#allocation157_spill] sm:$0xff] %v15751_v5  ;;  %18842 = vst [vmem:[#allocation82_spill] sm:$0xff] %v15760_v28  ;;  %v18850_v60 = vld [vmem:[#allocation118_spill] sm:$0xff]  ;;  %v18853_v59 = vld [vmem:[#allocation147_spill] sm:$0xff] }
 0x1b3   : > { %12269 = vmatmul.mubr.bf16.gmra.mrb[12].mxu1 %v18840_v6  ;;  %18844 = vst [vmem:[#allocation158_spill] sm:$0xff] %v15764_v26  ;;  %v18848_v6 = vld [vmem:[#allocation107_spill] sm:$0xff]  ;;  %v15786_v16 = vmul.f32 %v18853_v59, %v18852_v53  ;;  %v18856_v51 = vld [vmem:[#allocation29_spill] sm:$0xff]  ;;  %v18858_v32 = vld [vmem:[#allocation34_spill] sm:$0xff]  ;;  %v15806_v53 = vmul.f32 %v18810_v0, %v15278_v48  ;;  %v15840_v48 = vmul.f32 %v14765_v39, %v15460_v4 }
 0x1b4   : > { %12272 = vmatprep.mubr.bf16.mxu1 %v18846_v30  ;;  %v18851_v30 = vld [vmem:[#allocation124_spill] sm:$0xff]  ;;  %v18855_v14 = vld [vmem:[#allocation95_spill] sm:$0xff]  ;;  %v15794_v47 = vmul.f32 %v18858_v32, %v18800_v43  ;;  %v18860_v49 = vld [vmem:[#allocation109_spill] sm:$0xff]  ;;  %12303 = vmatpush3.bf16.msra.mxu1 %v13864_v9  ;;  %v15828_v43 = vmul.f32 %v14681_v18, %v15391_v22 }
 0x1b5   : > { %18854 = vst [vmem:[#allocation88_spill] sm:$0xff] %v15786_v16  ;;  %v15790_v7 = vmul.f32 %v18856_v51, %v18855_v14  ;;  %v18861_v57 = vld [vmem:[#allocation35_spill] sm:$0xff]  ;;  %v18863_v10 = vld [vmem:[#allocation38_spill] sm:$0xff]  ;;  %18865 = vst [vmem:[#allocation124_spill] sm:$0xff] %v15806_v53  ;;  %v15810_v14 = vmul.f32 %v18815_v36, %v15371_v23  ;;  %12336 = vmatprep.subr.bf16.mxu1 %v13865_v44 }
 0x1b6   : > { %18859 = vst [vmem:[#allocation107_spill] sm:$0xff] %v15794_v47  ;;  %v15798_v5 = vmul.f32 %v18861_v57, %v18860_v49  ;;  %v15802_v28 = vmul.f32 %v18863_v10, %v18809_v61  ;;  %18867 = vst [vmem:[#allocation95_spill] sm:$0xff] %v15828_v43  ;;  %v15836_v61 = vmul.f32 %v14753_v45, %v15438_v50  ;;  %v18871_v23 = vld [vmem:[#allocation59_spill] sm:$0xff]  ;;  %v18873_v9 = vld [vmem:[#allocation93_spill] sm:$0xff] }
 0x1b7   : > { %18857 = vst [vmem:[#allocation102_spill] sm:$0xff] %v15790_v7  ;;  %18866 = vst [vmem:[#allocation87_spill] sm:$0xff] %v15810_v14  ;;  %v15844_v49 = vmul.f32 %v18871_v23, %v15489_v40  ;;  %v18874_v22 = vpack.c.bf16 %v18778_v27, %v18873_v9  ;;  %v18875_v19 = vld [vmem:[#allocation66_spill] sm:$0xff]  ;;  %v18879_v62 = vld [vmem:[#allocation104_spill] sm:$0xff] }
 0x1b8   : > { %18862 = vst [vmem:[#allocation113_spill] sm:$0xff] %v15798_v5  ;;  %18864 = vst [vmem:[#allocation118_spill] sm:$0xff] %v15802_v28  ;;  %v15853_v18 = vmul.f32 %v18875_v19, %v18822_v24  ;;  %v18877_v50 = vld [vmem:[#allocation98_spill] sm:$0xff]  ;;  %v18880_v19 = vpack.c.bf16 %v18847_v58, %v18879_v62  ;;  %v18883_v4 = vld [vmem:[#allocation115_spill] sm:$0xff] }
 0x1b9   : > { %18868 = vst [vmem:[#allocation109_spill] sm:$0xff] %v15832_v25  ;;  %18869 = vst [vmem:[#allocation159_spill] sm:$0xff] %v15836_v61  ;;  %v18878_v45 = vpack.c.bf16 %v18784_v54, %v18877_v50  ;;  %v18884_v40 = vpack.c.bf16 %v18849_v34, %v18883_v4  ;;  %v18885_v9 = vld [vmem:[#allocation119_spill] sm:$0xff]  ;;  %v18889_v24 = vld [vmem:[#allocation126_spill] sm:$0xff] }
 0x1ba   : > { %18870 = vst [vmem:[#allocation160_spill] sm:$0xff] %v15840_v48  ;;  %18872 = vst [vmem:[#allocation161_spill] sm:$0xff] %v15844_v49  ;;  %v18886_v23 = vpack.c.bf16 %v18850_v60, %v18885_v9  ;;  %v18890_v36 = vld [vmem:[#allocation127_spill] sm:$0xff]  ;;  %v18903_v10 = vld [vmem:[#allocation105_spill] sm:$0xff] }
 0x1bb   : > { %12273 = vmatmul.mubr.bf16.gmra.mrb[16].mxu1 %v18874_v22  ;;  %18876 = vst [vmem:[#allocation93_spill] sm:$0xff] %v15853_v18  ;;  %v18887_v22 = vld [vmem:[#allocation125_spill] sm:$0xff]  ;;  %v18891_v62 = vpack.c.bf16 %v18889_v24, %v18890_v36  ;;  %v18893_v4 = vld [vmem:[#allocation51_spill] sm:$0xff]  ;;  %v18894_v36 = vld [vmem:[#allocation56_spill] sm:$0xff] }
 0x1bc   : > { %12276 = vmatprep.mubr.bf16.mxu1 %v18878_v45  ;;  %v18881_v45 = vld [vmem:[#allocation110_spill] sm:$0xff]  ;;  %v18888_v39 = vpack.c.bf16 %v18851_v30, %v18887_v22  ;;  %v18896_v22 = vld [vmem:[#allocation68_spill] sm:$0xff]  ;;  %v18902_v0 = vld [vmem:[#allocation99_spill] sm:$0xff] }
 0x1bd   : > { %v18882_v50 = vpack.c.bf16 %v18848_v6, %v18881_v45  ;;  %v18892_v45 = vld [vmem:[#allocation46_spill] sm:$0xff]  ;;  %v18897_v24 = vld [vmem:[#allocation72_spill] sm:$0xff]  ;;  %v18904_v57 = vld [vmem:[#allocation111_spill] sm:$0xff] }
 0x1be   : > { %v13870_v9 = vld [vmem:[%s18077_s3 + $0xa8] sm:$0xff]   ;;  %v18905_v32 = vld [vmem:[#allocation116_spill] sm:$0xff]  ;;  %v18908_v18 = vld [vmem:[#allocation133_spill] sm:$0xff] }
 0x1bf   : > { %v18907_v51 = vld [vmem:[#allocation132_spill] sm:$0xff]  ;;  %v18911_v48 = vld [vmem:[#allocation23_spill] sm:$0xff]  ;;  %v18913_v14 = vld [vmem:[#allocation49_spill] sm:$0xff] }
 0x1c0   : > { %v18909_v49 = vpack.c.bf16 %v18907_v51, %v18908_v18  ;;  %v18912_v25 = vld [vmem:[#allocation63_spill] sm:$0xff]  ;;  %v18914_v5 = vld [vmem:[#allocation69_spill] sm:$0xff]  ;;  %v18918_v7 = vld [vmem:[#allocation92_spill] sm:$0xff] }
 0x1c1   : > { %v2768_v43 = vmul.f32 %v18853_v59, %v18912_v25  ;;  %v13874_v28 = vld [vmem:[%s18077_s3 + $0xc8] sm:$0xff]   ;;  %v13875_v18 = vld [vmem:[%s18077_s3 + $0xd0] sm:$0xff]   ;;  %v13876_v51 = vld [vmem:[%s18077_s3 + $0xd8] sm:$0xff]  }
 0x1c2   : > { %v18936_v16 = vld [vmem:[#allocation22_spill] sm:$0xff]  ;;  %v18949_v13 = vld [vmem:[#allocation53_spill] sm:$0xff] }
 0x1c3   : > { %12277 = vmatmul.mubr.bf16.gmra.mrb[20].mxu1 %v18880_v19  ;;  %v13866_v19 = vld [vmem:[%s18077_s3 + $0x88] sm:$0xff]   ;;  %v2797_v47 = vpack.c.bf16 %v2768_v43, %v18914_v5  ;;  %v18920_v43 = vld [vmem:[#allocation100_spill] sm:$0xff]  ;;  %v1062_v26 = vand.u32 15, %v18936_v16 }
 0x1c4   : > { %12280 = vmatprep.mubr.bf16.mxu1 %v18882_v50  ;;  %v13871_v50 = vld [vmem:[%s18077_s3 + $0xb0] sm:$0xff]  }
 0x1c5   : > { %vm1158_vm6 = vcmp.ge.s32.totalorder %v1062_v26, 1  ;;  %v18947_v26 = vld [vmem:[#allocation54_spill] sm:$0xff] }
 0x1cb   : > { %12281 = vmatmul.mubr.bf16.gmra.mrb[24].mxu1 %v18884_v40  ;;  %v18895_v40 = vld [vmem:[#allocation62_spill] sm:$0xff] }
 0x1cc   : > { %12284 = vmatprep.mubr.bf16.mxu1 %v18886_v23  ;;  %v13867_v23 = vld [vmem:[%s18077_s3 + $0x90] sm:$0xff]  }
 0x1d3   : > { %12285 = vmatmul.mubr.bf16.gmra.mrb[28].mxu1 %v18888_v39  ;;  %v13868_v39 = vld [vmem:[%s18077_s3 + $0x98] sm:$0xff]  }
 0x1d4   : > { %12304 = vmatprep.mubr.bf16.mxu1 %v18891_v62  ;;  %v13872_v62 = vld [vmem:[%s18077_s3 + $0xb8] sm:$0xff]  }
 0x1db   : > { %12305 = vmatmul.mubr.bf16.vlgmr.msra.gmra.mrb[0].mxu1 %v18892_v45 }
 0x1dc   : > { %12337 = vmatpush3.bf16.msra.mxu1 %v13865_v44  ;;  %12308 = vmatprep.mubr.bf16.mxu1 %v18893_v4  ;;  %v13869_v44 = vld [vmem:[%s18077_s3 + $0xa0] sm:$0xff]  }
 0x1dd   : > { %12338 = vmatprep.subr.bf16.mxu1 %v13866_v19 }
 0x1e0   : > { %12339 = vmatpush3.bf16.msra.mxu1 %v13866_v19  ;;  %v18898_v19 = vld [vmem:[#allocation77_spill] sm:$0xff] }
 0x1e1   : > { %12340 = vmatprep.subr.bf16.mxu1 %v13867_v23 }
 0x1e3   : > { %12309 = vmatmul.mubr.bf16.gmra.mrb[4].mxu1 %v18894_v36 }
 0x1e4   : > { %12312 = vmatprep.mubr.bf16.mxu1 %v18895_v40  ;;  %12341 = vmatpush3.bf16.msra.mxu1 %v13867_v23  ;;  %v18899_v23 = vld [vmem:[#allocation83_spill] sm:$0xff] }
 0x1e5   : > { %12342 = vmatprep.subr.bf16.mxu1 %v13868_v39 }
 0x1e8   : > { %12343 = vmatpush3.bf16.msra.mxu1 %v13868_v39  ;;  %v13873_v39 = vld [vmem:[%s18077_s3 + $0xc0] sm:$0xff]  }
 0x1e9   : > { %12344 = vmatprep.subr.bf16.mxu1 %v13869_v44 }
 0x1eb   : > { %12313 = vmatmul.mubr.bf16.gmra.mrb[8].mxu1 %v18896_v22 }
 0x1ec   : > { %12316 = vmatprep.mubr.bf16.mxu1 %v18897_v24  ;;  %12345 = vmatpush3.bf16.msra.mxu1 %v13869_v44  ;;  %v18900_v44 = vld [vmem:[#allocation89_spill] sm:$0xff] }
 0x1ed   : > { %12346 = vmatprep.subr.bf16.mxu1 %v13870_v9 }
 0x1f0   : > { %12347 = vmatpush3.bf16.msra.mxu1 %v13870_v9  ;;  %v18901_v9 = vld [vmem:[#allocation94_spill] sm:$0xff] }
 0x1f1   : > { %12348 = vmatprep.subr.bf16.mxu1 %v13871_v50 }
 0x1f3   : > { %12317 = vmatmul.mubr.bf16.gmra.mrb[12].mxu1 %v18898_v19 }
 0x1f4   : > { %12320 = vmatprep.mubr.bf16.mxu1 %v18899_v23  ;;  %12349 = vmatpush3.bf16.msra.mxu1 %v13871_v50  ;;  %v18906_v50 = vld [vmem:[#allocation120_spill] sm:$0xff] }
 0x1f5   : > { %12350 = vmatprep.subr.bf16.mxu1 %v13872_v62 }
 0x1f8   : > { %12351 = vmatpush3.bf16.msra.mxu1 %v13872_v62  ;;  %v18910_v62 = vld [vmem:[#allocation52_spill] sm:$0xff] }
 0x1f9   : > { %12384 = vmatprep.subr.bf16.mxu1 %v13873_v39  ;;  %v2766_v61 = vmul.f32 %v18911_v48, %v18910_v62 }
 0x1fb   : > { %12321 = vmatmul.mubr.bf16.gmra.mrb[16].mxu1 %v18900_v44  ;;  %v2796_v53 = vpack.c.bf16 %v2766_v61, %v18913_v14  ;;  %v18916_v61 = vld [vmem:[#allocation78_spill] sm:$0xff] }
 0x1fc   : > { %12324 = vmatprep.mubr.bf16.mxu1 %v18901_v9 }
 0x203   : > { %12325 = vmatmul.mubr.bf16.gmra.mrb[20].mxu1 %v18902_v0 }
 0x204   : > { %12328 = vmatprep.mubr.bf16.mxu1 %v18903_v10 }
 0x20b   : > { %12329 = vmatmul.mubr.bf16.gmra.mrb[24].mxu1 %v18904_v57 }
 0x20c   : > { %12332 = vmatprep.mubr.bf16.mxu1 %v18905_v32 }
 0x213   : > { %12333 = vmatmul.mubr.bf16.gmra.mrb[28].mxu1 %v18906_v50 }
 0x214   : > { %12352 = vmatprep.mubr.bf16.mxu1 %v18909_v49  ;;  %v18915_v49 = vld [vmem:[#allocation81_spill] sm:$0xff] }
 0x215   : > { %v18917_v59 = vpack.c.bf16 %v18915_v49, %v18916_v61  ;;  %v18924_v49 = vld [vmem:[#allocation114_spill] sm:$0xff] }
 0x21b   : > { %12353 = vmatmul.mubr.bf16.vlgmr.msra.gmra.mrb[0].mxu1 %v2796_v53  ;;  %v18919_v53 = vpack.c.bf16 %v18918_v7, %v18808_v41 }
 0x21c   : > { %12385 = vmatpush3.bf16.msra.mxu1 %v13873_v39  ;;  %12356 = vmatprep.mubr.bf16.mxu1 %v2797_v47  ;;  %v13877_v47 = vld [vmem:[%s18077_s3 + $0xe0] sm:$0xff]   ;;  %v18921_v39 = vpack.c.bf16 %v18920_v43, %v18812_v20 }
 0x21d   : > { %12386 = vmatprep.subr.bf16.mxu1 %v13874_v28  ;;  %v18926_v43 = vld [vmem:[#allocation122_spill] sm:$0xff] }
 0x220   : > { %12387 = vmatpush3.bf16.msra.mxu1 %v13874_v28  ;;  %v13878_v28 = vld [vmem:[%s18077_s3 + $0xe8] sm:$0xff]  }
 0x221   : > { %12388 = vmatprep.subr.bf16.mxu1 %v13875_v18 }
 0x223   : > { %12357 = vmatmul.mubr.bf16.gmra.mrb[4].mxu1 %v18917_v59  ;;  %v18922_v59 = vld [vmem:[#allocation106_spill] sm:$0xff] }
 0x224   : > { %12360 = vmatprep.mubr.bf16.mxu1 %v18919_v53  ;;  %12389 = vmatpush3.bf16.msra.mxu1 %v13875_v18  ;;  %v18923_v7 = vpack.c.bf16 %v18922_v59, %v18813_v12  ;;  %v13879_v18 = vld [vmem:[%s18077_s3 + $0xf0] sm:$0xff]   ;;  %v18925_v53 = vpack.c.bf16 %v18924_v49, %v18814_v21 }
 0x225   : > { %12390 = vmatprep.subr.bf16.mxu1 %v13876_v51 }
 0x228   : > { %12391 = vmatpush3.bf16.msra.mxu1 %v13876_v51  ;;  %v13880_v51 = vld [vmem:[%s18077_s3 + $0xf8] sm:$0xff]  }
 0x229   : > { %12392 = vmatprep.subr.bf16.mxu1 %v13877_v47 }
 0x22b   : > { %12361 = vmatmul.mubr.bf16.gmra.mrb[8].mxu1 %v18921_v39  ;;  %v18927_v39 = vpack.c.bf16 %v18926_v43, %v15248_v52 }
 0x22c   : > { %12364 = vmatprep.mubr.bf16.mxu1 %v18923_v7  ;;  %12393 = vmatpush3.bf16.msra.mxu1 %v13877_v47  ;;  %v13881_v47 = vld [vmem:[%s18077_s3 + $0x100] sm:$0xff]  }
 0x22d   : > { %12394 = vmatprep.subr.bf16.mxu1 %v13878_v28  ;;  %v18930_v7 = vld [vmem:[#allocation134_spill] sm:$0xff] }
 0x22e   : > { %v18931_v49 = vpack.c.bf16 %v18930_v7, %v15379_v11  ;;  %v18941_v7 = vmov 0.0  }
 0x230   : > { %12395 = vmatpush3.bf16.msra.mxu1 %v13878_v28  ;;  %v18928_v28 = vld [vmem:[#allocation130_spill] sm:$0xff] }
 0x231   : > { %12396 = vmatprep.subr.bf16.mxu1 %v13879_v18  ;;  %v18929_v59 = vpack.c.bf16 %v18928_v28, %v15296_v46  ;;  %v18939_v28 = vld [vmem:[#allocation139_spill] sm:$0xff] }
 0x233   : > { %12365 = vmatmul.mubr.bf16.gmra.mrb[12].mxu1 %v18925_v53  ;;  %v18932_v53 = vld [vmem:[#allocation135_spill] sm:$0xff] }
 0x234   : > { %12368 = vmatprep.mubr.bf16.mxu1 %v18927_v39  ;;  %12397 = vmatpush3.bf16.msra.mxu1 %v13879_v18  ;;  %v18933_v43 = vpack.c.bf16 %v18932_v53, %v15404_v33  ;;  %v18934_v18 = vld [vmem:[#allocation136_spill] sm:$0xff] }
 0x235   : > { %12398 = vmatprep.subr.bf16.mxu1 %v13880_v51  ;;  %v18935_v39 = vpack.c.bf16 %v18934_v18, %v15426_v55  ;;  %v18943_v53 = vld [vmem:[#allocation128_spill] sm:$0xff] }
 0x238   : > { %12399 = vmatpush3.bf16.msra.mxu1 %v13880_v51  ;;  %v18937_v51 = vld [vmem:[#allocation138_spill] sm:$0xff] }
 0x239   : > { %12432 = vmatprep.subr.bf16.mxu1 %v13881_v47  ;;  %v18938_v31 = vpack.c.bf16 %v18937_v51, %v15448_v29  ;;  %v18948_v51 = vld [vmem:[#allocation24_spill] sm:$0xff] }
 0x23b   : > { %12369 = vmatmul.mubr.bf16.gmra.mrb[16].mxu1 %v18929_v59  ;;  %v18940_v59 = vpack.c.bf16 %v18939_v28, %v15474_v42  ;;  %v13882_v28 = vld [vmem:[%s18077_s3 + $0x108] sm:$0xff]  }
 0x23c   : > { %12372 = vmatprep.mubr.bf16.mxu1 %v18931_v49  ;;  %v15996_v49 = vsel %vm1158_vm6, 1.0, %v18941_v7 }
 0x23d   : > { %18942 = vst [vmem:[#allocation98_spill] sm:$0xff] %v15996_v49 }
 0x243   : > { %12373 = vmatmul.mubr.bf16.gmra.mrb[20].mxu1 %v18933_v43  ;;  %v3229_v43 = vmul.f32 %v15996_v49, %v18943_v53  ;;  %v18951_v53 = vld [vmem:[#allocation142_spill] sm:$0xff] }
 0x244   : > { %12376 = vmatprep.mubr.bf16.mxu1 %v18935_v39  ;;  %v18945_v39 = vld [vmem:[#allocation141_spill] sm:$0xff] }
 0x245   : > { %v3261_v18 = vpack.c.bf16 %v18944_v63, %v3229_v43  ;;  %v18946_v56 = vpack.c.bf16 %v18945_v39, %v15497_v38  ;;  %v18953_v43 = vld [vmem:[#allocation65_spill] sm:$0xff]  ;;  %v18954_v39 = vld [vmem:[#allocation26_spill] sm:$0xff]  ;;  %v18956_v63 = vld [vmem:[#allocation64_spill] sm:$0xff] }
 0x24b   : > { %12377 = vmatmul.mubr.bf16.gmra.mrb[24].mxu1 %v18938_v31  ;;  %v3231_v31 = vmul.f32 %v18948_v51, %v18947_v26  ;;  %v18955_v51 = vld [vmem:[#allocation71_spill] sm:$0xff] }
 0x24c   : > { %12380 = vmatprep.mubr.bf16.mxu1 %v18940_v59  ;;  %v18950_v59 = vld [vmem:[#allocation58_spill] sm:$0xff] }
 0x24d   : > { %v3262_v29 = vpack.c.bf16 %v18949_v13, %v3231_v31  ;;  %v18952_v49 = vpack.c.bf16 %v18950_v59, %v18951_v53  ;;  %v3237_v31 = vmul.f32 %v18824_v17, %v18955_v51  ;;  %v13885_v53 = vld [vmem:[%s18077_s3 + $0x120] sm:$0xff]  }
 0x253   : > { %12381 = vmatmul.mubr.bf16.gmra.mrb[28].mxu1 %v18946_v56  ;;  %v3235_v56 = vmul.f32 %v18954_v39, %v18953_v43 }
 0x254   : > { %12400 = vmatprep.mubr.bf16.mxu1 %v3261_v18  ;;  %v13883_v18 = vld [vmem:[%s18077_s3 + $0x110] sm:$0xff]  }
 0x255   : > { %v3264_v13 = vpack.c.bf16 %v18956_v63, %v3235_v56  ;;  %v18958_v56 = vld [vmem:[#allocation143_spill] sm:$0xff] }
 0x256   : > { %v18959_v17 = vpack.c.bf16 %v18766_v8, %v18958_v56 }
 0x25b   : > { %12401 = vmatmul.mubr.bf16.vlgmr.msra.gmra.mrb[0].mxu1 %v3262_v29  ;;  %v13884_v29 = vld [vmem:[%s18077_s3 + $0x118] sm:$0xff]  }
 0x25c   : > { %12433 = vmatpush3.bf16.msra.mxu1 %v13881_v47  ;;  %12404 = vmatprep.mubr.bf16.mxu1 %v18952_v49  ;;  %v18957_v47 = vld [vmem:[#allocation70_spill] sm:$0xff] }
 0x25d   : > { %12434 = vmatprep.subr.bf16.mxu1 %v13882_v28  ;;  %v3265_v49 = vpack.c.bf16 %v18957_v47, %v3237_v31  ;;  %v18960_v31 = vld [vmem:[#allocation80_spill] sm:$0xff] }
 0x260   : > { %12435 = vmatpush3.bf16.msra.mxu1 %v13882_v28  ;;  %v13886_v28 = vld [vmem:[%s18077_s3 + $0x128] sm:$0xff]  }
 0x261   : > { %12436 = vmatprep.subr.bf16.mxu1 %v13883_v18 }
 0x263   : > { %12405 = vmatmul.mubr.bf16.gmra.mrb[4].mxu1 %v3264_v13  ;;  %v18961_v13 = vpack.c.bf16 %v18830_v15, %v18960_v31  ;;  %v18968_v15 = vld [vmem:[#allocation144_spill] sm:$0xff] }
 0x264   : > { %12408 = vmatprep.mubr.bf16.mxu1 %v3265_v49  ;;  %12437 = vmatpush3.bf16.msra.mxu1 %v13883_v18  ;;  %v13887_v18 = vld [vmem:[%s18077_s3 + $0x130] sm:$0xff]   ;;  %v18962_v49 = vld [vmem:[#allocation73_spill] sm:$0xff] }
 0x265   : > { %12438 = vmatprep.subr.bf16.mxu1 %v13884_v29  ;;  %v18963_v56 = vpack.c.bf16 %v14970_v1, %v18962_v49  ;;  %v18969_v49 = vpack.c.bf16 %v18847_v58, %v18968_v15  ;;  %v18976_v1 = vld [vmem:[#allocation146_spill] sm:$0xff] }
 0x268   : > { %12439 = vmatpush3.bf16.msra.mxu1 %v13884_v29  ;;  %v13888_v29 = vld [vmem:[%s18077_s3 + $0x138] sm:$0xff]  }
 0x269   : > { %12440 = vmatprep.subr.bf16.mxu1 %v13885_v53 }
 0x26b   : > { %12409 = vmatmul.mubr.bf16.gmra.mrb[8].mxu1 %v18959_v17  ;;  %v18964_v17 = vld [vmem:[#allocation86_spill] sm:$0xff] }
 0x26c   : > { %12412 = vmatprep.mubr.bf16.mxu1 %v18961_v13  ;;  %12441 = vmatpush3.bf16.msra.mxu1 %v13885_v53  ;;  %v18965_v31 = vpack.c.bf16 %v18778_v27, %v18964_v17  ;;  %v13889_v53 = vld [vmem:[%s18077_s3 + $0x140] sm:$0xff]  }
 0x26d   : > { %12442 = vmatprep.subr.bf16.mxu1 %v13886_v28  ;;  %v18974_v27 = vld [vmem:[#allocation145_spill] sm:$0xff] }
 0x270   : > { %12443 = vmatpush3.bf16.msra.mxu1 %v13886_v28  ;;  %v18966_v28 = vld [vmem:[#allocation74_spill] sm:$0xff] }
 0x271   : > { %12444 = vmatprep.subr.bf16.mxu1 %v13887_v18  ;;  %v18967_v13 = vpack.c.bf16 %v18784_v54, %v18966_v28  ;;  %v18977_v28 = vpack.c.bf16 %v18851_v30, %v18976_v1  ;;  %v13891_v1 = vld [vmem:[%s18077_s3 + $0x150] sm:$0xff]  }
 0x273   : > { %12413 = vmatmul.mubr.bf16.gmra.mrb[12].mxu1 %v18963_v56  ;;  %v18970_v56 = vld [vmem:[#allocation108_spill] sm:$0xff] }
 0x274   : > { %12416 = vmatprep.mubr.bf16.mxu1 %v18965_v31  ;;  %12445 = vmatpush3.bf16.msra.mxu1 %v13887_v18  ;;  %v18971_v17 = vpack.c.bf16 %v18848_v6, %v18970_v56  ;;  %v18972_v18 = vld [vmem:[#allocation60_spill] sm:$0xff] }
 0x275   : > { %12446 = vmatprep.subr.bf16.mxu1 %v13888_v29  ;;  %v18973_v31 = vpack.c.bf16 %v18849_v34, %v18972_v18  ;;  %v13895_v56 = vld [vmem:[%s18077_s3 + $0x170] sm:$0xff]   ;;  %v13897_v18 = vld [vmem:[%s18077_s3 + $0x180] sm:$0xff]  }
 0x278   : > { %12447 = vmatpush3.bf16.msra.mxu1 %v13888_v29  ;;  %v18975_v29 = vpack.c.bf16 %v18850_v60, %v18974_v27  ;;  %v13892_v27 = vld [vmem:[%s18077_s3 + $0x158] sm:$0xff]  }
 0x279   : > { %12480 = vmatprep.subr.bf16.mxu1 %v13889_v53 }
 0x27b   : > { %12417 = vmatmul.mubr.bf16.gmra.mrb[16].mxu1 %v18967_v13  ;;  %v18978_v13 = vld [vmem:[#allocation96_spill] sm:$0xff] }
 0x27c   : > { %12420 = vmatprep.mubr.bf16.mxu1 %v18969_v49  ;;  %v18979_v15 = vpack.c.bf16 %v15340_v37, %v18978_v13  ;;  %v13890_v49 = vld [vmem:[%s18077_s3 + $0x148] sm:$0xff]  }
 0x283   : > { %12421 = vmatmul.mubr.bf16.gmra.mrb[20].mxu1 %v18971_v17  ;;  %v13896_v17 = vld [vmem:[%s18077_s3 + $0x178] sm:$0xff]  }
 0x284   : > { %12424 = vmatprep.mubr.bf16.mxu1 %v18973_v31  ;;  %v1031_v31 = vadd.s32 8, %v18936_v16 }
 0x28b   : > { %12425 = vmatmul.mubr.bf16.gmra.mrb[24].mxu1 %v18975_v29  ;;  %v1063_v29 = vand.u32 15, %v1031_v31  ;;  %v18984_v31 = vld [vmem:[#allocation75_spill] sm:$0xff] }
 0x28c   : > { %12428 = vmatprep.mubr.bf16.mxu1 %v18977_v28 }
 0x28d   : > { %vm1191_vm7 = vcmp.lt.s32.totalorder %v1063_v29, 15  ;;  %v18985_v29 = vpack.c.bf16 %v18984_v31, %v18808_v41  ;;  %v18992_v31 = vld [vmem:[#allocation90_spill] sm:$0xff] }
 0x28e   : > { %v16113_v28 = vsel %vm1191_vm7, 1.0, %v18941_v7  ;;  %v13898_v7 = vld [vmem:[%s18077_s3 + $0x188] sm:$0xff]  }
 0x28f   : > { %18980 = vst [vmem:[#allocation104_spill] sm:$0xff] %v16113_v28  ;;  %v4066_v13 = vmul.f32 %v16113_v28, %v18910_v62 }
 0x293   : > { %12429 = vmatmul.mubr.bf16.gmra.mrb[28].mxu1 %v18979_v15  ;;  %v4097_v15 = vpack.c.bf16 %v4066_v13, %v18913_v14 }
 0x294   : > { %12448 = vmatprep.mubr.bf16.mxu1 %v18892_v45  ;;  %v13893_v45 = vld [vmem:[%s18077_s3 + $0x160] sm:$0xff]  }
 0x29b   : > { %12449 = vmatmul.mubr.bf16.vlgmr.msra.gmra.mrb[0].mxu1 %v18893_v4 }
 0x29c   : > { %12481 = vmatpush3.bf16.msra.mxu1 %v13889_v53  ;;  %12452 = vmatprep.mubr.bf16.mxu1 %v18894_v36  ;;  %v13894_v53 = vld [vmem:[%s18077_s3 + $0x168] sm:$0xff]  }
 0x29d   : > { %12482 = vmatprep.subr.bf16.mxu1 %v13890_v49 }
 0x2a0   : > { %12483 = vmatpush3.bf16.msra.mxu1 %v13890_v49  ;;  %v18981_v49 = vld [vmem:[#allocation123_spill] sm:$0xff] }
 0x2a1   : > { %12484 = vmatprep.subr.bf16.mxu1 %v13891_v1 }
 0x2a3   : > { %12453 = vmatmul.mubr.bf16.gmra.mrb[4].mxu1 %v18895_v40 }
 0x2a4   : > { %12456 = vmatprep.mubr.bf16.mxu1 %v18896_v22  ;;  %12485 = vmatpush3.bf16.msra.mxu1 %v13891_v1  ;;  %v4068_v1 = vmul.f32 %v18911_v48, %v18912_v25 }
 0x2a5   : > { %12486 = vmatprep.subr.bf16.mxu1 %v13892_v27 }
 0x2a8   : > { %12487 = vmatpush3.bf16.msra.mxu1 %v13892_v27  ;;  %v4098_v27 = vpack.c.bf16 %v4068_v1, %v18914_v5  ;;  %v13902_v1 = vld [vmem:[%s18077_s3 + $0x1a8] sm:$0xff]  }
 0x2a9   : > { %12488 = vmatprep.subr.bf16.mxu1 %v13893_v45 }
 0x2ab   : > { %12457 = vmatmul.mubr.bf16.gmra.mrb[8].mxu1 %v18897_v24 }
 0x2ac   : > { %12460 = vmatprep.mubr.bf16.mxu1 %v18898_v19  ;;  %12489 = vmatpush3.bf16.msra.mxu1 %v13893_v45  ;;  %v18982_v45 = vld [vmem:[#allocation121_spill] sm:$0xff] }
 0x2ad   : > { %12490 = vmatprep.subr.bf16.mxu1 %v13894_v53 }
 0x2b0   : > { %12491 = vmatpush3.bf16.msra.mxu1 %v13894_v53  ;;  %v18983_v53 = vpack.c.bf16 %v18982_v45, %v18916_v61  ;;  %v18990_v45 = vld [vmem:[#allocation149_spill] sm:$0xff] }
 0x2b1   : > { %12492 = vmatprep.subr.bf16.mxu1 %v13895_v56 }
 0x2b3   : > { %12461 = vmatmul.mubr.bf16.gmra.mrb[12].mxu1 %v18899_v23 }
 0x2b4   : > { %12464 = vmatprep.mubr.bf16.mxu1 %v18900_v44  ;;  %12493 = vmatpush3.bf16.msra.mxu1 %v13895_v56  ;;  %v13899_v56 = vld [vmem:[%s18077_s3 + $0x190] sm:$0xff]  }
 0x2b5   : > { %12494 = vmatprep.subr.bf16.mxu1 %v13896_v17 }
 0x2b8   : > { %12495 = vmatpush3.bf16.msra.mxu1 %v13896_v17  ;;  %v13900_v17 = vld [vmem:[%s18077_s3 + $0x198] sm:$0xff]  }
 0x2b9   : > { %12528 = vmatprep.subr.bf16.mxu1 %v13897_v18 }
 0x2bb   : > { %12465 = vmatmul.mubr.bf16.gmra.mrb[16].mxu1 %v18901_v9 }
 0x2bc   : > { %12468 = vmatprep.mubr.bf16.mxu1 %v18902_v0 }
 0x2c3   : > { %12469 = vmatmul.mubr.bf16.gmra.mrb[20].mxu1 %v18903_v10 }
 0x2c4   : > { %12472 = vmatprep.mubr.bf16.mxu1 %v18904_v57 }
 0x2cb   : > { %12473 = vmatmul.mubr.bf16.gmra.mrb[24].mxu1 %v18905_v32 }
 0x2cc   : > { %12476 = vmatprep.mubr.bf16.mxu1 %v18906_v50 }
 0x2d3   : > { %12477 = vmatmul.mubr.bf16.gmra.mrb[28].mxu1 %v18981_v49 }
 0x2d4   : > { %12496 = vmatprep.mubr.bf16.mxu1 %v4097_v15  ;;  %v13901_v15 = vld [vmem:[%s18077_s3 + $0x1a0] sm:$0xff]  }
 0x2db   : > { %12497 = vmatmul.mubr.bf16.vlgmr.msra.gmra.mrb[0].mxu1 %v4098_v27  ;;  %v18988_v27 = vld [vmem:[#allocation101_spill] sm:$0xff] }
 0x2dc   : > { %12529 = vmatpush3.bf16.msra.mxu1 %v13897_v18  ;;  %12500 = vmatprep.mubr.bf16.mxu1 %v18983_v53  ;;  %v18986_v18 = vld [vmem:[#allocation148_spill] sm:$0xff]  ;;  %v18991_v53 = vpack.c.bf16 %v18990_v45, %v18814_v21 }
 0x2dd   : > { %12530 = vmatprep.subr.bf16.mxu1 %v13898_v7  ;;  %v18987_v13 = vpack.c.bf16 %v18986_v18, %v18812_v20  ;;  %v18994_v18 = vld [vmem:[#allocation117_spill] sm:$0xff] }
 0x2e0   : > { %12531 = vmatpush3.bf16.msra.mxu1 %v13898_v7  ;;  %v18989_v7 = vpack.c.bf16 %v18988_v27, %v18813_v12  ;;  %v18997_v27 = vpack.c.bf16 %v15662_v2, %v15404_v33 }
 0x2e1   : > { %12532 = vmatprep.subr.bf16.mxu1 %v13899_v56 }
 0x2e3   : > { %12501 = vmatmul.mubr.bf16.gmra.mrb[4].mxu1 %v18985_v29  ;;  %v18993_v29 = vpack.c.bf16 %v18992_v31, %v15248_v52  ;;  %v19002_v31 = vld [vmem:[#allocation103_spill] sm:$0xff] }
 0x2e4   : > { %12504 = vmatprep.mubr.bf16.mxu1 %v18987_v13  ;;  %12533 = vmatpush3.bf16.msra.mxu1 %v13899_v56  ;;  %v13903_v56 = vld [vmem:[%s18077_s3 + $0x1b0] sm:$0xff]   ;;  %v18995_v13 = vpack.c.bf16 %v18994_v18, %v15296_v46  ;;  %v19006_v18 = vld [vmem:[#allocation98_spill] sm:$0xff] }
 0x2e5   : > { %12534 = vmatprep.subr.bf16.mxu1 %v13900_v17  ;;  %v4531_v2 = vmul.f32 %v19006_v18, %v18947_v26  ;;  %v4537_v26 = vmul.f32 %v18954_v39, %v18955_v51  ;;  %v13909_v51 = vld [vmem:[%s18077_s3 + $0x1e0] sm:$0xff]  }
 0x2e8   : > { %12535 = vmatpush3.bf16.msra.mxu1 %v13900_v17  ;;  %v13904_v17 = vld [vmem:[%s18077_s3 + $0x1b8] sm:$0xff]  }
 0x2e9   : > { %12536 = vmatprep.subr.bf16.mxu1 %v13901_v15 }
 0x2eb   : > { %12505 = vmatmul.mubr.bf16.gmra.mrb[8].mxu1 %v18989_v7  ;;  %v18998_v7 = vld [vmem:[#allocation97_spill] sm:$0xff] }
 0x2ec   : > { %12508 = vmatprep.mubr.bf16.mxu1 %v18991_v53  ;;  %12537 = vmatpush3.bf16.msra.mxu1 %v13901_v15  ;;  %v13905_v15 = vld [vmem:[%s18077_s3 + $0x1c0] sm:$0xff]   ;;  %v18999_v45 = vpack.c.bf16 %v18998_v7, %v15426_v55  ;;  %v19009_v7 = vld [vmem:[#allocation131_spill] sm:$0xff] }
 0x2ed   : > { %12538 = vmatprep.subr.bf16.mxu1 %v13902_v1  ;;  %v19000_v53 = vld [vmem:[#allocation137_spill] sm:$0xff] }
 0x2f0   : > { %12539 = vmatpush3.bf16.msra.mxu1 %v13902_v1  ;;  %v18996_v1 = vpack.c.bf16 %v15658_v3, %v15379_v11 }
 0x2f1   : > { %12540 = vmatprep.subr.bf16.mxu1 %v13903_v56 }
 0x2f3   : > { %12509 = vmatmul.mubr.bf16.gmra.mrb[12].mxu1 %v18993_v29  ;;  %v19004_v29 = vld [vmem:[#allocation112_spill] sm:$0xff] }
 0x2f4   : > { %12512 = vmatprep.mubr.bf16.mxu1 %v18995_v13  ;;  %12541 = vmatpush3.bf16.msra.mxu1 %v13903_v56  ;;  %v19001_v56 = vpack.c.bf16 %v15672_v35, %v19000_v53  ;;  %v19005_v3 = vpack.c.bf16 %v19004_v29, %v15497_v38  ;;  %v19007_v13 = vld [vmem:[#allocation53_spill] sm:$0xff] }
 0x2f5   : > { %12542 = vmatprep.subr.bf16.mxu1 %v13904_v17  ;;  %v19011_v35 = vld [vmem:[#allocation25_spill] sm:$0xff] }
 0x2f6   : > { %v19012_v29 = vld [vmem:[#allocation61_spill] sm:$0xff] }
 0x2f8   : > { %12543 = vmatpush3.bf16.msra.mxu1 %v13904_v17  ;;  %v19003_v17 = vpack.c.bf16 %v19002_v31, %v15474_v42  ;;  %v13906_v31 = vld [vmem:[%s18077_s3 + $0x1c8] sm:$0xff]  }
 0x2f9   : > { %12576 = vmatprep.subr.bf16.mxu1 %v13905_v15 }
 0x2fb   : > { %12513 = vmatmul.mubr.bf16.gmra.mrb[16].mxu1 %v18996_v1  ;;  %v4563_v1 = vpack.c.bf16 %v19007_v13, %v4531_v2  ;;  %v4566_v2 = vpack.c.bf16 %v18957_v47, %v4537_v26  ;;  %v13910_v47 = vld [vmem:[%s18077_s3 + $0x1e8] sm:$0xff]  }
 0x2fc   : > { %12516 = vmatprep.mubr.bf16.mxu1 %v18997_v27  ;;  %v19008_v27 = vld [vmem:[#allocation76_spill] sm:$0xff]  ;;  %v19016_v13 = vld [vmem:[#allocation79_spill] sm:$0xff] }
 0x303   : > { %12517 = vmatmul.mubr.bf16.gmra.mrb[20].mxu1 %v18999_v45  ;;  %v19010_v45 = vpack.c.bf16 %v19008_v27, %v19009_v7 }
 0x304   : > { %12520 = vmatprep.mubr.bf16.mxu1 %v19001_v56  ;;  %v4535_v56 = vmul.f32 %v19011_v35, %v18953_v43  ;;  %v13907_v43 = vld [vmem:[%s18077_s3 + $0x1d0] sm:$0xff]  }
 0x30b   : > { %12521 = vmatmul.mubr.bf16.gmra.mrb[24].mxu1 %v19003_v17  ;;  %v4565_v17 = vpack.c.bf16 %v18956_v63, %v4535_v56  ;;  %v13908_v63 = vld [vmem:[%s18077_s3 + $0x1d8] sm:$0xff]   ;;  %v19020_v56 = vld [vmem:[#allocation151_spill] sm:$0xff] }
 0x30c   : > { %12524 = vmatprep.mubr.bf16.mxu1 %v19005_v3  ;;  %v19013_v3 = vpack.c.bf16 %v18950_v59, %v19012_v29  ;;  %v19014_v59 = vld [vmem:[#allocation129_spill] sm:$0xff]  ;;  %v19022_v29 = vld [vmem:[#allocation91_spill] sm:$0xff] }
 0x313   : > { %12525 = vmatmul.mubr.bf16.gmra.mrb[28].mxu1 %v19010_v45  ;;  %v19019_v45 = vld [vmem:[#allocation85_spill] sm:$0xff] }
 0x314   : > { %12544 = vmatprep.mubr.bf16.mxu1 %v4563_v1  ;;  %v19017_v1 = vld [vmem:[#allocation150_spill] sm:$0xff] }
 0x315   : > { %v19018_v27 = vpack.c.bf16 %v19016_v13, %v19017_v1  ;;  %v19031_v13 = vld [vmem:[#allocation156_spill] sm:$0xff]  ;;  %v19033_v1 = vld [vmem:[#allocation157_spill] sm:$0xff] }
 0x31b   : > { %12545 = vmatmul.mubr.bf16.vlgmr.msra.gmra.mrb[0].mxu1 %v19013_v3  ;;  %v19023_v3 = vld [vmem:[#allocation152_spill] sm:$0xff] }
 0x31c   : > { %12577 = vmatpush3.bf16.msra.mxu1 %v13905_v15  ;;  %12548 = vmatprep.mubr.bf16.mxu1 %v4565_v17  ;;  %v19015_v15 = vpack.c.bf16 %v18766_v8, %v19014_v59  ;;  %v19021_v8 = vpack.c.bf16 %v19019_v45, %v19020_v56  ;;  %v13912_v17 = vld [vmem:[%s18077_s3 + $0x1f8] sm:$0xff]   ;;  %v19024_v26 = vpack.c.bf16 %v19022_v29, %v19023_v3  ;;  %v19027_v59 = vld [vmem:[#allocation154_spill] sm:$0xff] }
 0x31d   : > { %12578 = vmatprep.subr.bf16.mxu1 %v13906_v31  ;;  %v19035_v45 = vld [vmem:[#allocation82_spill] sm:$0xff] }
 0x31e   : > { %v19036_v56 = vpack.c.bf16 %v18851_v30, %v19035_v45  ;;  %v13914_v30 = vld [vmem:[%s18077_s3 + $0x208] sm:$0xff]   ;;  %v19062_v45 = vld [vmem:[#allocation109_spill] sm:$0xff] }
 0x320   : > { %12579 = vmatpush3.bf16.msra.mxu1 %v13906_v31  ;;  %v13911_v31 = vld [vmem:[%s18077_s3 + $0x1f0] sm:$0xff]  }
 0x321   : > { %12580 = vmatprep.subr.bf16.mxu1 %v13907_v43 }
 0x323   : > { %12549 = vmatmul.mubr.bf16.gmra.mrb[4].mxu1 %v4566_v2 }
 0x324   : > { %12552 = vmatprep.mubr.bf16.mxu1 %v19015_v15  ;;  %12581 = vmatpush3.bf16.msra.mxu1 %v13907_v43  ;;  %v19025_v43 = vld [vmem:[#allocation153_spill] sm:$0xff]  ;;  %v19028_v15 = vpack.c.bf16 %v18847_v58, %v19027_v59  ;;  %v13918_v59 = vld [vmem:[%s18077_s3 + $0x228] sm:$0xff]  }
 0x325   : > { %12582 = vmatprep.subr.bf16.mxu1 %v13908_v63  ;;  %v19026_v2 = vpack.c.bf16 %v18784_v54, %v19025_v43  ;;  %v19032_v54 = vpack.c.bf16 %v18849_v34, %v19031_v13  ;;  %v13921_v34 = vld [vmem:[#allocation4] sm:$0xff]  }
 0x326   : > { %12672 = vmatprep.subr.bf16.mxu0 %v13921_v34  ;;  %v13925_v43 = vld [vmem:[#allocation4 + $0x20] sm:$0xff]  }
 0x327   : > { %12673 = vmatpush3.bf16.msra.mxu0 %v13921_v34  ;;  %v19054_v13 = vld [vmem:[#allocation118_spill] sm:$0xff] }
 0x328   : > { %12583 = vmatpush3.bf16.msra.mxu1 %v13908_v63  ;;  %v13913_v63 = vld [vmem:[%s18077_s3 + $0x200] sm:$0xff]  }
 0x329   : > { %12584 = vmatprep.subr.bf16.mxu1 %v13909_v51 }
 0x32b   : > { %12553 = vmatmul.mubr.bf16.gmra.mrb[8].mxu1 %v19018_v27  ;;  %v19034_v27 = vpack.c.bf16 %v18850_v60, %v19033_v1  ;;  %v13923_v60 = vld [vmem:[#allocation4 + $0x10] sm:$0xff]  }
 0x32c   : > { %12556 = vmatprep.mubr.bf16.mxu1 %v19021_v8  ;;  %12585 = vmatpush3.bf16.msra.mxu1 %v13909_v51  ;;  %v19029_v51 = vld [vmem:[#allocation155_spill] sm:$0xff]  ;;  %v19037_v8 = vld [vmem:[#allocation158_spill] sm:$0xff] }
 0x32d   : > { %12586 = vmatprep.subr.bf16.mxu1 %v13910_v47  ;;  %v19038_v58 = vpack.c.bf16 %v15340_v37, %v19037_v8  ;;  %v13924_v37 = vld [vmem:[#allocation4 + $0x18] sm:$0xff]   ;;  %v19058_v1 = vld [vmem:[#allocation87_spill] sm:$0xff] }
 0x32e   : > { %v19066_v8 = vld [vmem:[#allocation160_spill] sm:$0xff] }
 0x330   : > { %12587 = vmatpush3.bf16.msra.mxu1 %v13910_v47  ;;  %v19030_v47 = vpack.c.bf16 %v18848_v6, %v19029_v51  ;;  %v19040_v6 = vld [vmem:[#allocation50_spill] sm:$0xff]  ;;  %v19052_v51 = vld [vmem:[#allocation113_spill] sm:$0xff] }
 0x331   : > { %12588 = vmatprep.subr.bf16.mxu1 %v13911_v31  ;;  %v4562_v29 = vmul.f32 0.0, %v19040_v6 }
 0x333   : > { %12557 = vmatmul.mubr.bf16.gmra.mrb[12].mxu1 %v19024_v26  ;;  %v13922_v26 = vld [vmem:[#allocation4 + $0x8] sm:$0xff]  }
 0x334   : > { %12560 = vmatprep.mubr.bf16.mxu1 %v19026_v2  ;;  %12589 = vmatpush3.bf16.msra.mxu1 %v13911_v31  ;;  %v19039_v31 = vld [vmem:[#allocation128_spill] sm:$0xff] }
 0x335   : > { %12590 = vmatprep.subr.bf16.mxu1 %v13912_v17  ;;  %12674 = vmatprep.subr.bf16.mxu0 %v13922_v26  ;;  %v13916_v2 = vld [vmem:[%s18077_s3 + $0x218] sm:$0xff]  }
 0x336   : > { %12675 = vmatpush3.bf16.msra.mxu0 %v13922_v26 }
 0x337   : > { %12676 = vmatprep.subr.bf16.mxu0 %v13923_v60 }
 0x338   : > { %12591 = vmatpush3.bf16.msra.mxu1 %v13912_v17  ;;  %v4561_v17 = vmul.f32 0.0, %v19039_v31  ;;  %v19070_v31 = vld [vmem:[#allocation93_spill] sm:$0xff] }
 0x339   : > { %12624 = vmatprep.subr.bf16.mxu1 %v13913_v63 }
 0x33a   : > { %v4578_v3 = vpack.c.bf16 %v4562_v29, %v4561_v17  ;;  %12677 = vmatpush3.bf16.msra.mxu0 %v13923_v60  ;;  %v5430_v17 = vmul.f32 0.0, %v18910_v62 }
 0x33b   : > { %12561 = vmatmul.mubr.bf16.gmra.mrb[16].mxu1 %v19028_v15  ;;  %12678 = vmatprep.subr.bf16.mxu0 %v13924_v37 }
 0x33c   : > { %12564 = vmatprep.mubr.bf16.mxu1 %v19030_v47  ;;  %v19053_v47 = vpack.c.bf16 %v19052_v51, %v18814_v21  ;;  %v19063_v21 = vpack.c.bf16 %v19062_v45, %v15426_v55  ;;  %v5429_v55 = vmul.f32 0.0, %v18913_v14 }
 0x33e   : > { %12679 = vmatpush3.bf16.msra.mxu0 %v13924_v37  ;;  %v5446_v6 = vpack.c.bf16 %v5430_v17, %v5429_v55 }
 0x33f   : > { %12680 = vmatprep.subr.bf16.mxu0 %v13925_v43 }
 0x342   : > { %12681 = vmatpush3.bf16.msra.mxu0 %v13925_v43 }
 0x343   : > { %12565 = vmatmul.mubr.bf16.gmra.mrb[20].mxu1 %v19032_v54  ;;  %v19056_v54 = vld [vmem:[#allocation124_spill] sm:$0xff] }
 0x344   : > { %12568 = vmatprep.mubr.bf16.mxu1 %v19034_v27  ;;  %v19060_v27 = vld [vmem:[#allocation95_spill] sm:$0xff] }
 0x34b   : > { %12569 = vmatmul.mubr.bf16.gmra.mrb[24].mxu1 %v19036_v56  ;;  %v19064_v56 = vld [vmem:[#allocation159_spill] sm:$0xff] }
 0x34c   : > { %12572 = vmatprep.mubr.bf16.mxu1 %v19038_v58  ;;  %v19068_v58 = vld [vmem:[#allocation161_spill] sm:$0xff] }
 0x353   : > { %12573 = vmatmul.mubr.bf16.gmra.mrb[28].mxu1 %v4578_v3 }
 0x354   : > { %12592 = vmatprep.mubr.bf16.mxu1 %v18893_v4  ;;  %v13915_v4 = vld [vmem:[%s18077_s3 + $0x210] sm:$0xff]  }
 0x35b   : > { %12593 = vmatmul.mubr.bf16.vlgmr.msra.gmra.mrb[0].mxu1 %v18894_v36  ;;  %v13926_v36 = vld [vmem:[#allocation4 + $0x28] sm:$0xff]  }
 0x35c   : > { %12625 = vmatpush3.bf16.msra.mxu1 %v13913_v63  ;;  %12596 = vmatprep.mubr.bf16.mxu1 %v18895_v40  ;;  %v13917_v40 = vld [vmem:[%s18077_s3 + $0x220] sm:$0xff]   ;;  %v13927_v63 = vld [vmem:[#allocation4 + $0x30] sm:$0xff]  }
 0x35d   : > { %12626 = vmatprep.subr.bf16.mxu1 %v13914_v30  ;;  %12682 = vmatprep.subr.bf16.mxu0 %v13926_v36 }
 0x35e   : > { %12683 = vmatpush3.bf16.msra.mxu0 %v13926_v36 }
 0x35f   : > { %12684 = vmatprep.subr.bf16.mxu0 %v13927_v63 }
 0x360   : > { %12627 = vmatpush3.bf16.msra.mxu1 %v13914_v30 }
 0x361   : > { %12628 = vmatprep.subr.bf16.mxu1 %v13915_v4 }
 0x362   : > { %12685 = vmatpush3.bf16.msra.mxu0 %v13927_v63 }
 0x363   : > { %12597 = vmatmul.mubr.bf16.gmra.mrb[4].mxu1 %v18896_v22  ;;  %v13919_v22 = vld [vmem:[%s18077_s3 + $0x230] sm:$0xff]  }
 0x364   : > { %12600 = vmatprep.mubr.bf16.mxu1 %v18897_v24  ;;  %12629 = vmatpush3.bf16.msra.mxu1 %v13915_v4  ;;  %v13920_v24 = vld [vmem:[%s18077_s3 + $0x238] sm:$0xff]  }
 0x365   : > { %12630 = vmatprep.subr.bf16.mxu1 %v13916_v2 }
 0x368   : > { %12631 = vmatpush3.bf16.msra.mxu1 %v13916_v2 }
 0x369   : > { %12632 = vmatprep.subr.bf16.mxu1 %v13917_v40 }
 0x36b   : > { %12601 = vmatmul.mubr.bf16.gmra.mrb[8].mxu1 %v18898_v19  ;;  %v5400_v19 = vmul.f32 %v16113_v28, %v18912_v25  ;;  %v19050_v25 = vld [vmem:[#allocation107_spill] sm:$0xff] }
 0x36c   : > { %12604 = vmatprep.mubr.bf16.mxu1 %v18899_v23  ;;  %12633 = vmatpush3.bf16.msra.mxu1 %v13917_v40 }
 0x36d   : > { %12634 = vmatprep.subr.bf16.mxu1 %v13918_v59  ;;  %v5431_v23 = vpack.c.bf16 %v5400_v19, %v18914_v5  ;;  %v19051_v5 = vpack.c.bf16 %v19050_v25, %v18813_v12  ;;  %v19061_v12 = vpack.c.bf16 %v19060_v27, %v15404_v33  ;;  %v19071_v33 = vpack.c.bf16 %v19070_v31, %v19009_v7 }
 0x370   : > { %12635 = vmatpush3.bf16.msra.mxu1 %v13918_v59 }
 0x371   : > { %12636 = vmatprep.subr.bf16.mxu1 %v13919_v22 }
 0x373   : > { %12605 = vmatmul.mubr.bf16.gmra.mrb[12].mxu1 %v18900_v44  ;;  %v19041_v44 = vld [vmem:[#allocation48_spill] sm:$0xff] }
 0x374   : > { %12608 = vmatprep.mubr.bf16.mxu1 %v18901_v9  ;;  %12637 = vmatpush3.bf16.msra.mxu1 %v13919_v22  ;;  %v19042_v9 = vld [vmem:[#allocation47_spill] sm:$0xff] }
 0x375   : > { %12638 = vmatprep.subr.bf16.mxu1 %v13920_v24  ;;  %v19043_v15 = vpack.c.bf16 %v19041_v44, %v19042_v9 }
 0x378   : > { %12639 = vmatpush3.bf16.msra.mxu1 %v13920_v24 }
 0x37b   : > { %12609 = vmatmul.mubr.bf16.gmra.mrb[16].mxu1 %v18902_v0  ;;  %v19044_v0 = vld [vmem:[#allocation84_spill] sm:$0xff] }
 0x37c   : > { %12612 = vmatprep.mubr.bf16.mxu1 %v18903_v10  ;;  %v19045_v10 = vpack.c.bf16 %v19044_v0, %v18916_v61  ;;  %v19055_v61 = vpack.c.bf16 %v19054_v13, %v15248_v52  ;;  %v19065_v52 = vpack.c.bf16 %v19064_v56, %v19000_v53  ;;  %v13928_v53 = vld [vmem:[#allocation4 + $0x38] sm:$0xff]  }
 0x37d   : > { %12686 = vmatprep.subr.bf16.mxu0 %v13928_v53 }
 0x37e   : > { %12687 = vmatpush3.bf16.msra.mxu0 %v13928_v53 }
 0x383   : > { %12613 = vmatmul.mubr.bf16.gmra.mrb[20].mxu1 %v18904_v57  ;;  %v19046_v57 = vld [vmem:[#allocation88_spill] sm:$0xff] }
 0x384   : > { %12616 = vmatprep.mubr.bf16.mxu1 %v18905_v32  ;;  %v19047_v32 = vpack.c.bf16 %v19046_v57, %v18808_v41  ;;  %v19057_v41 = vpack.c.bf16 %v19056_v54, %v15296_v46  ;;  %v19067_v46 = vpack.c.bf16 %v19066_v8, %v15474_v42  ;;  %v16349_v42 = vld [vmem:[%s18078_s4] ss:$0 sm:$0xff] }
 0x38b   : > { %12617 = vmatmul.mubr.bf16.gmra.mrb[24].mxu1 %v18906_v50  ;;  %v19048_v50 = vld [vmem:[#allocation102_spill] sm:$0xff] }
 0x38c   : > { %12620 = vmatprep.mubr.bf16.mxu1 %v18981_v49  ;;  %v19049_v49 = vpack.c.bf16 %v19048_v50, %v18812_v20  ;;  %v19059_v20 = vpack.c.bf16 %v19058_v1, %v15379_v11  ;;  %v19069_v11 = vpack.c.bf16 %v19068_v58, %v15497_v38 }
 0x393   : > { %12621 = vmatmul.mubr.bf16.gmra.mrb[28].mxu1 %v19043_v15 }
 0x394   : > { %12640 = vmatprep.mubr.bf16.mxu1 %v5431_v23 }
 0x39b   : > { %12641 = vmatmul.mubr.bf16.vlgmr.msra.gmra.mrb[0].mxu1 %v19045_v10 }
 0x39c   : > { %12644 = vmatprep.mubr.bf16.mxu1 %v19047_v32 }
 0x3a3   : > { %12645 = vmatmul.mubr.bf16.gmra.mrb[4].mxu1 %v19049_v49 }
 0x3a4   : > { %12648 = vmatprep.mubr.bf16.mxu1 %v19051_v5 }
 0x3ab   : > { %12649 = vmatmul.mubr.bf16.gmra.mrb[8].mxu1 %v19053_v47 }
 0x3ac   : > { %12652 = vmatprep.mubr.bf16.mxu1 %v19055_v61 }
 0x3b3   : > { %12653 = vmatmul.mubr.bf16.gmra.mrb[12].mxu1 %v19057_v41 }
 0x3b4   : > { %12656 = vmatprep.mubr.bf16.mxu1 %v19059_v20 }
 0x3bb   : > { %12657 = vmatmul.mubr.bf16.gmra.mrb[16].mxu1 %v19061_v12 }
 0x3bc   : > { %12660 = vmatprep.mubr.bf16.mxu1 %v19063_v21 }
 0x3c3   : > { %12661 = vmatmul.mubr.bf16.gmra.mrb[20].mxu1 %v19065_v52 }
 0x3c4   : > { %12664 = vmatprep.mubr.bf16.mxu1 %v19067_v46 }
 0x3cb   : > { %12665 = vmatmul.mubr.bf16.gmra.mrb[24].mxu1 %v19069_v11 }
 0x3cc   : > { %12668 = vmatprep.mubr.bf16.mxu1 %v19071_v33 }
 0x3d3   : > { %12669 = vmatmul.mubr.bf16.gmra.mrb[28].mxu1 %v5446_v6 }
 0x46e   : > { %v12642_v38 = vpop.f32.mrb[0].mxu1 }
 0x46f   : > { %v5810_v29 = vadd.f32 %v12642_v38, %v16349_v42  ;;  %v5546_v3 = vpop.f32.mrb[1].mxu1 }
 0x470   : > { %v5808_v7 = vadd.f32 %v16349_v42, %v5546_v3  ;;  %v12643_v34 = vpop.f32.mrb[2].mxu1 }
 0x471   : > { %v5811_v62 = vadd.f32 %v12643_v34, %v16349_v42  ;;  %v5549_v14 = vpop.f32.mrb[3].mxu1  ;;  %v5842_v60 = vmax.f32 %v5810_v29, 0.0 }
 0x472   : > { %v5809_v26 = vadd.f32 %v16349_v42, %v5549_v14  ;;  %v5840_v37 = vmax.f32 %v5808_v7, 0.0 }
 0x473   : > { %v5843_v30 = vmax.f32 %v5811_v62, 0.0 }
 0x474   : > { %v5841_v4 = vmax.f32 %v5809_v26, 0.0 }
 0x475   : > { %v5937_v43 = vpack.c.bf16 %v5843_v30, %v5842_v60 }
 0x476   : > { %v5936_v2 = vpack.c.bf16 %v5841_v4, %v5840_v37  ;;  %v12646_v36 = vpop.f32.mrb[4].mxu1 }
 0x477   : > { %v5814_v40 = vadd.f32 %v12646_v36, %v16349_v42  ;;  %v5562_v63 = vpop.f32.mrb[5].mxu1 }
 0x478   : > { %v5812_v59 = vadd.f32 %v16349_v42, %v5562_v63  ;;  %v12647_v22 = vpop.f32.mrb[6].mxu1  ;;  %12688 = vmatprep.mubr.bf16.mxu0 %v5936_v2 }
 0x479   : > { %v5815_v24 = vadd.f32 %v12647_v22, %v16349_v42  ;;  %v5565_v19 = vpop.f32.mrb[7].mxu1  ;;  %12689 = vmatmul.mubr.bf16.vlgmr.msra.gmra.mrb[32].mxu0 %v5937_v43  ;;  %v5846_v44 = vmax.f32 %v5814_v40, 0.0 }
 0x47a   : > { %v5813_v23 = vadd.f32 %v16349_v42, %v5565_v19  ;;  %v5844_v15 = vmax.f32 %v5812_v59, 0.0 }
 0x47b   : > { %v5847_v9 = vmax.f32 %v5815_v24, 0.0 }
 0x47c   : > { %v5845_v0 = vmax.f32 %v5813_v23, 0.0 }
 0x47d   : > { %v5939_v10 = vpack.c.bf16 %v5847_v9, %v5846_v44 }
 0x47e   : > { %v5938_v57 = vpack.c.bf16 %v5845_v0, %v5844_v15  ;;  %v12650_v32 = vpop.f32.mrb[8].mxu1 }
 0x47f   : > { %v5818_v50 = vadd.f32 %v12650_v32, %v16349_v42  ;;  %v5578_v49 = vpop.f32.mrb[9].mxu1 }
 0x480   : > { %v5816_v25 = vadd.f32 %v16349_v42, %v5578_v49  ;;  %v12651_v5 = vpop.f32.mrb[10].mxu1  ;;  %12692 = vmatprep.mubr.bf16.mxu0 %v5938_v57 }
 0x481   : > { %v5819_v51 = vadd.f32 %v12651_v5, %v16349_v42  ;;  %v5581_v47 = vpop.f32.mrb[11].mxu1  ;;  %12693 = vmatmul.mubr.bf16.gmra.mrb[36].mxu0 %v5939_v10  ;;  %v5850_v61 = vmax.f32 %v5818_v50, 0.0 }
 0x482   : > { %v5817_v13 = vadd.f32 %v16349_v42, %v5581_v47  ;;  %v5848_v41 = vmax.f32 %v5816_v25, 0.0 }
 0x483   : > { %v5851_v54 = vmax.f32 %v5819_v51, 0.0 }
 0x484   : > { %v5849_v1 = vmax.f32 %v5817_v13, 0.0 }
 0x485   : > { %v5941_v20 = vpack.c.bf16 %v5851_v54, %v5850_v61 }
 0x486   : > { %v5940_v27 = vpack.c.bf16 %v5849_v1, %v5848_v41  ;;  %v12654_v12 = vpop.f32.mrb[12].mxu1 }
 0x487   : > { %v5822_v45 = vadd.f32 %v12654_v12, %v16349_v42  ;;  %v5594_v21 = vpop.f32.mrb[13].mxu1 }
 0x488   : > { %v5820_v56 = vadd.f32 %v16349_v42, %v5594_v21  ;;  %v12655_v52 = vpop.f32.mrb[14].mxu1  ;;  %12696 = vmatprep.mubr.bf16.mxu0 %v5940_v27 }
 0x489   : > { %v5823_v8 = vadd.f32 %v12655_v52, %v16349_v42  ;;  %v5597_v46 = vpop.f32.mrb[15].mxu1  ;;  %12697 = vmatmul.mubr.bf16.gmra.mrb[40].mxu0 %v5941_v20  ;;  %v5854_v11 = vmax.f32 %v5822_v45, 0.0 }
 0x48a   : > { %v5821_v58 = vadd.f32 %v16349_v42, %v5597_v46  ;;  %v5852_v33 = vmax.f32 %v5820_v56, 0.0 }
 0x48b   : > { %v5855_v31 = vmax.f32 %v5823_v8, 0.0 }
 0x48c   : > { %v5853_v17 = vmax.f32 %v5821_v58, 0.0 }
 0x48d   : > { %v5943_v55 = vpack.c.bf16 %v5855_v31, %v5854_v11 }
 0x48e   : > { %v5942_v6 = vpack.c.bf16 %v5853_v17, %v5852_v33  ;;  %v12658_v53 = vpop.f32.mrb[16].mxu1 }
 0x48f   : > { %v5826_v38 = vadd.f32 %v12658_v53, %v16349_v42  ;;  %v5610_v29 = vpop.f32.mrb[17].mxu1  ;;  %v13930_v53 = vld [vmem:[#allocation7 + $0x8] sm:$0xff]  }
 0x490   : > { %v5824_v3 = vadd.f32 %v16349_v42, %v5610_v29  ;;  %v12659_v7 = vpop.f32.mrb[18].mxu1  ;;  %12700 = vmatprep.mubr.bf16.mxu0 %v5942_v6  ;;  %v13929_v6 = vld [vmem:[#allocation7] sm:$0xff]   ;;  %v13932_v29 = vld [vmem:[#allocation7 + $0x18] sm:$0xff]  }
 0x491   : > { %v5827_v34 = vadd.f32 %v12659_v7, %v16349_v42  ;;  %v5613_v62 = vpop.f32.mrb[19].mxu1  ;;  %12701 = vmatmul.mubr.bf16.gmra.mrb[44].mxu0 %v5943_v55  ;;  %v5858_v26 = vmax.f32 %v5826_v38, 0.0  ;;  %12720 = vmatprep.subr.bf16.mxu0 %v13929_v6  ;;  %v13931_v38 = vld [vmem:[#allocation7 + $0x10] sm:$0xff]  }
 0x492   : > { %v5825_v14 = vadd.f32 %v16349_v42, %v5613_v62  ;;  %v5856_v30 = vmax.f32 %v5824_v3, 0.0  ;;  %12721 = vmatpush3.bf16.msra.mxu0 %v13929_v6  ;;  %v13934_v3 = vld [vmem:[#allocation7 + $0x28] sm:$0xff]   ;;  %v13935_v7 = vld [vmem:[#allocation7 + $0x30] sm:$0xff]   ;;  %v16383_v62 = vld [vmem:[#allocation7 + $0x40] sm:$0xff]  }
 0x493   : > { %v5859_v60 = vmax.f32 %v5827_v34, 0.0  ;;  %12722 = vmatprep.subr.bf16.mxu0 %v13930_v53  ;;  %v13936_v34 = vld [vmem:[#allocation7 + $0x38] sm:$0xff]  }
 0x494   : > { %v5857_v37 = vmax.f32 %v5825_v14, 0.0  ;;  %v16389_v14 = vld [vmem:[%s18080_s6] ss:$0 sm:$0xff] }
 0x495   : > { %v5945_v4 = vpack.c.bf16 %v5859_v60, %v5858_v26 }
 0x496   : > { %v5944_v43 = vpack.c.bf16 %v5857_v37, %v5856_v30  ;;  %v12662_v2 = vpop.f32.mrb[20].mxu1  ;;  %12723 = vmatpush3.bf16.msra.mxu0 %v13930_v53 }
 0x497   : > { %v5830_v36 = vadd.f32 %v12662_v2, %v16349_v42  ;;  %v5626_v40 = vpop.f32.mrb[21].mxu1  ;;  %12724 = vmatprep.subr.bf16.mxu0 %v13931_v38 }
 0x498   : > { %v5828_v63 = vadd.f32 %v16349_v42, %v5626_v40  ;;  %v12663_v59 = vpop.f32.mrb[22].mxu1  ;;  %12704 = vmatprep.mubr.bf16.mxu0 %v5944_v43 }
 0x499   : > { %v5831_v22 = vadd.f32 %v12663_v59, %v16349_v42  ;;  %v5629_v24 = vpop.f32.mrb[23].mxu1  ;;  %12705 = vmatmul.mubr.bf16.gmra.mrb[48].mxu0 %v5945_v4  ;;  %v5862_v23 = vmax.f32 %v5830_v36, 0.0 }
 0x49a   : > { %v5829_v19 = vadd.f32 %v16349_v42, %v5629_v24  ;;  %v5860_v9 = vmax.f32 %v5828_v63, 0.0  ;;  %12725 = vmatpush3.bf16.msra.mxu0 %v13931_v38 }
 0x49b   : > { %v5863_v44 = vmax.f32 %v5831_v22, 0.0  ;;  %12726 = vmatprep.subr.bf16.mxu0 %v13932_v29 }
 0x49c   : > { %v5861_v15 = vmax.f32 %v5829_v19, 0.0 }
 0x49d   : > { %v5947_v0 = vpack.c.bf16 %v5863_v44, %v5862_v23 }
 0x49e   : > { %v5946_v10 = vpack.c.bf16 %v5861_v15, %v5860_v9  ;;  %v12666_v57 = vpop.f32.mrb[24].mxu1  ;;  %12727 = vmatpush3.bf16.msra.mxu0 %v13932_v29 }
 0x49f   : > { %v5834_v32 = vadd.f32 %v12666_v57, %v16349_v42  ;;  %v5642_v50 = vpop.f32.mrb[25].mxu1 }
 0x4a0   : > { %v5832_v49 = vadd.f32 %v16349_v42, %v5642_v50  ;;  %v12667_v25 = vpop.f32.mrb[26].mxu1  ;;  %12708 = vmatprep.mubr.bf16.mxu0 %v5946_v10 }
 0x4a1   : > { %v5835_v5 = vadd.f32 %v12667_v25, %v16349_v42  ;;  %v5645_v51 = vpop.f32.mrb[27].mxu1  ;;  %12709 = vmatmul.mubr.bf16.gmra.mrb[52].mxu0 %v5947_v0  ;;  %v5866_v13 = vmax.f32 %v5834_v32, 0.0 }
 0x4a2   : > { %v5833_v47 = vadd.f32 %v16349_v42, %v5645_v51  ;;  %v5864_v54 = vmax.f32 %v5832_v49, 0.0 }
 0x4a3   : > { %v5867_v61 = vmax.f32 %v5835_v5, 0.0 }
 0x4a4   : > { %v5865_v41 = vmax.f32 %v5833_v47, 0.0 }
 0x4a5   : > { %v5949_v1 = vpack.c.bf16 %v5867_v61, %v5866_v13 }
 0x4a6   : > { %v5948_v20 = vpack.c.bf16 %v5865_v41, %v5864_v54  ;;  %v12670_v27 = vpop.f32.mrb[28].mxu1 }
 0x4a7   : > { %v5838_v12 = vadd.f32 %v12670_v27, %v16349_v42  ;;  %v5658_v45 = vpop.f32.mrb[29].mxu1 }
 0x4a8   : > { %v5836_v21 = vadd.f32 %v16349_v42, %v5658_v45  ;;  %v12671_v56 = vpop.f32.mrb[30].mxu1  ;;  %12712 = vmatprep.mubr.bf16.mxu0 %v5948_v20 }
 0x4a9   : > { %v5839_v52 = vadd.f32 %v12671_v56, %v16349_v42  ;;  %v5661_v8 = vpop.f32.mrb[31].mxu1  ;;  %12713 = vmatmul.mubr.bf16.gmra.mrb[56].mxu0 %v5949_v1  ;;  %v5870_v58 = vmax.f32 %v5838_v12, 0.0 }
 0x4aa   : > { %v5837_v46 = vadd.f32 %v16349_v42, %v5661_v8  ;;  %v5868_v31 = vmax.f32 %v5836_v21, 0.0  ;;  %v13933_v42 = vld [vmem:[#allocation7 + $0x20] sm:$0xff]  }
 0x4ab   : > { %v5871_v11 = vmax.f32 %v5839_v52, 0.0  ;;  %12728 = vmatprep.subr.bf16.mxu0 %v13933_v42 }
 0x4ac   : > { %v5869_v33 = vmax.f32 %v5837_v46, 0.0  ;;  %12729 = vmatpush3.bf16.msra.mxu0 %v13933_v42 }
 0x4ad   : > { %v5951_v17 = vpack.c.bf16 %v5871_v11, %v5870_v58  ;;  %12730 = vmatprep.subr.bf16.mxu0 %v13934_v3 }
 0x4ae   : > { %v5950_v55 = vpack.c.bf16 %v5869_v33, %v5868_v31 }
 0x4b0   : > { %12716 = vmatprep.mubr.bf16.mxu0 %v5950_v55  ;;  %12731 = vmatpush3.bf16.msra.mxu0 %v13934_v3  ;;  %v19084_v3 = vld [vmem:[#allocation24_spill] sm:$0xff] }
 0x4b1   : > { %12717 = vmatmul.mubr.bf16.gmra.mrb[60].mxu0 %v5951_v17  ;;  %12732 = vmatprep.subr.bf16.mxu0 %v13935_v7 }
 0x4b4   : > { %12733 = vmatpush3.bf16.msra.mxu0 %v13935_v7 }
 0x4b5   : > { %12734 = vmatprep.subr.bf16.mxu0 %v13936_v34 }
 0x4b8   : > { %12735 = vmatpush3.bf16.msra.mxu0 %v13936_v34 }
 0x4b9   : > { %12768 = vmatprep.subr.bf16.mxu0 %v16383_v62 }
 0x54c   : > { %v12690_v26 = vpop.f32.mrb[32].mxu0 }
 0x54d   : > { %v6066_v60 = vadd.f32 %v12690_v26, %v16389_v14  ;;  %v6057_v30 = vpop.f32.mrb[33].mxu0 }
 0x54e   : > { %v6058_v37 = vadd.f32 %v16389_v14, %v6057_v30  ;;  %v12691_v4 = vpop.f32.mrb[34].mxu0 }
 0x54f   : > { %v6186_v43 = vmax.f32 %v6066_v60, 0.0  ;;  %v6069_v2 = vadd.f32 %v12691_v4, %v16389_v14  ;;  %v6060_v36 = vpop.f32.mrb[35].mxu0 }
 0x550   : > { %v16394_v40 = vmax.f32 %v6058_v37, 0.0  ;;  %v6061_v63 = vadd.f32 %v16389_v14, %v6060_v36 }
 0x551   : > { %v6187_v59 = vmax.f32 %v6069_v2, 0.0  ;;  %v6282_v22 = vrot.slane %v6186_v43, 7  ;;  %v7085_v24 = vrot.slane %v6186_v43, 1 }
 0x552   : > { %19072 = vst [vmem:[#allocation110_spill] sm:$0xff] %v16394_v40  ;;  %v16397_v19 = vmax.f32 %v6061_v63, 0.0  ;;  %v18353_v23 = vrot.slane %v16394_v40, 7  ;;  %v18352_v0 = vrot.slane %v16394_v40, 1  ;;  %v19099_v63 = vld [vmem:[#allocation29_spill] sm:$0xff] }
 0x553   : > { %v6283_v44 = vrot.slane %v6187_v59, 7  ;;  %v7086_v9 = vrot.slane %v6187_v59, 1  ;;  %v16400_v15 = vpack.c.bf16 %v6187_v59, %v6186_v43 }
 0x554   : > { %19073 = vst [vmem:[#allocation115_spill] sm:$0xff] %v16397_v19  ;;  %v6281_v10 = vrot.slane %v16397_v19, 7  ;;  %v16406_v57 = vpack.c.bf16 %v16397_v19, %v16394_v40  ;;  %v7084_v32 = vrot.slane %v16397_v19, 1  ;;  %v12694_v50 = vpop.f32.mrb[36].mxu0 }
 0x555   : > { %19074 = vst [vmem:[#allocation119_spill] sm:$0xff] %v16400_v15  ;;  %v6082_v49 = vadd.f32 %v12694_v50, %v16389_v14  ;;  %v6073_v25 = vpop.f32.mrb[37].mxu0  ;;  %v16412_v5 = vsel %vm1926_vm2, %v6282_v22, %v6283_v44  ;;  %v16416_v51 = vsel %vm2730_vm0, %v7085_v24, %v7086_v9 }
 0x556   : > { %19075 = vst [vmem:[#allocation125_spill] sm:$0xff] %v16406_v57  ;;  %19076 = vst [vmem:[#allocation126_spill] sm:$0xff] %v16412_v5  ;;  %v16422_v47 = vsel %vm1926_vm2, %v18353_v23, %v6281_v10  ;;  %v16426_v13 = vsel %vm2730_vm0, %v7084_v32, %v7085_v24  ;;  %v16432_v61 = vsel %vm2730_vm0, %v18352_v0, %v7084_v32  ;;  %v12695_v41 = vpop.f32.mrb[38].mxu0  ;;  %v19124_v57 = vld [vmem:[#allocation35_spill] sm:$0xff] }
 0x557   : > { %19077 = vst [vmem:[#allocation127_spill] sm:$0xff] %v16416_v51  ;;  %19078 = vst [vmem:[#allocation46_spill] sm:$0xff] %v16422_v47  ;;  %v6074_v54 = vadd.f32 %v16389_v14, %v6073_v25  ;;  %v16435_v1 = vmax.f32 %v6082_v49, 0.0  ;;  %v6085_v20 = vadd.f32 %v12695_v41, %v16389_v14  ;;  %v6076_v27 = vpop.f32.mrb[39].mxu0  ;;  %v16440_v12 = vsel %vm1926_vm2, %v6281_v10, %v6282_v22 }
 0x558   : > { %19079 = vst [vmem:[#allocation51_spill] sm:$0xff] %v16426_v13  ;;  %19080 = vst [vmem:[#allocation56_spill] sm:$0xff] %v16432_v61  ;;  %v6077_v21 = vadd.f32 %v16389_v14, %v6076_v27  ;;  %v16457_v55 = vmul.f32 %v19011_v35, %v16440_v12 }
 0x559   : > { %19081 = vst [vmem:[#allocation62_spill] sm:$0xff] %v16440_v12  ;;  %v16442_v45 = vmax.f32 %v6074_v54, 0.0  ;;  %v16445_v56 = vmax.f32 %v6085_v20, 0.0  ;;  %v6286_v58 = vrot.slane %v16435_v1, 7 }
 0x55a   : > { %v6189_v46 = vmax.f32 %v6077_v21, 0.0 }
 0x55b   : > { %v6284_v52 = vrot.slane %v16442_v45, 7  ;;  %v7087_v8 = vrot.slane %v16442_v45, 1  ;;  %v6287_v11 = vrot.slane %v16445_v56, 7  ;;  %v16453_v31 = vpack.c.bf16 %v16445_v56, %v16435_v1 }
 0x55c   : > { %v6285_v33 = vrot.slane %v6189_v46, 7  ;;  %v12698_v17 = vpop.f32.mrb[40].mxu0  ;;  %v16464_v53 = vpack.c.bf16 %v6189_v46, %v16442_v45  ;;  %v7088_v10 = vrot.slane %v6189_v46, 1  ;;  %v7090_v20 = vrot.slane %v16445_v56, 1 }
 0x55d   : > { %19082 = vst [vmem:[#allocation68_spill] sm:$0xff] %v16453_v31  ;;  %v16461_v6 = vsel %vm1926_vm2, %v6283_v44, %v6284_v52  ;;  %v6098_v38 = vadd.f32 %v12698_v17, %v16389_v14  ;;  %v6089_v29 = vpop.f32.mrb[41].mxu0  ;;  %v16477_v34 = vsel %vm1926_vm2, %v6286_v58, %v6287_v11  ;;  %v16490_v4 = vsel %vm2730_vm0, %v7086_v9, %v7087_v8  ;;  %v19093_v17 = vld [vmem:[#allocation27_spill] sm:$0xff] }
 0x55e   : > { %19083 = vst [vmem:[#allocation72_spill] sm:$0xff] %v16464_v53  ;;  %v16469_v42 = vmul.f32 %v18954_v39, %v16461_v6  ;;  %v16473_v7 = vmul.f32 %v19084_v3, %v16461_v6  ;;  %19086 = vst [vmem:[#allocation83_spill] sm:$0xff] %v16477_v34  ;;  %v6090_v26 = vadd.f32 %v16389_v14, %v6089_v29  ;;  %v12699_v60 = vpop.f32.mrb[42].mxu0  ;;  %v18354_v9 = vrot.slane %v16435_v1, 1 }
 0x55f   : > { %v16482_v30 = vsel %vm1926_vm2, %v6284_v52, %v6285_v33  ;;  %v16486_v37 = vsel %vm1926_vm2, %v6285_v33, %v6286_v58  ;;  %19089 = vst [vmem:[#allocation99_spill] sm:$0xff] %v16490_v4  ;;  %v16492_v43 = vmax.f32 %v6098_v38, 0.0  ;;  %v6101_v2 = vadd.f32 %v12699_v60, %v16389_v14  ;;  %v6092_v36 = vpop.f32.mrb[43].mxu0 }
 0x560   : > { %19085 = vst [vmem:[#allocation77_spill] sm:$0xff] %v16473_v7  ;;  %19087 = vst [vmem:[#allocation89_spill] sm:$0xff] %v16482_v30  ;;  %v16499_v22 = vmax.f32 %v6090_v26, 0.0  ;;  %v6093_v24 = vadd.f32 %v16389_v14, %v6092_v36  ;;  %v16530_v38 = vmul.f32 %v19093_v17, %v16486_v37  ;;  %v19104_v7 = vld [vmem:[#allocation30_spill] sm:$0xff]  ;;  %v19110_v4 = vrot.slane %v16435_v1, 1 }
 0x561   : > { %19088 = vst [vmem:[#allocation94_spill] sm:$0xff] %v16486_v37  ;;  %v16502_v44 = vmax.f32 %v6101_v2, 0.0  ;;  %v6290_v49 = vrot.slane %v16492_v43, 7  ;;  %v16549_v2 = vsel %vm2730_vm0, %v7088_v10, %v18354_v9 }
 0x562   : > { %v6288_v32 = vrot.slane %v16499_v22, 7  ;;  %v16506_v50 = vmax.f32 %v6093_v24, 0.0  ;;  %19097 = vst [vmem:[#allocation52_spill] sm:$0xff] %v16549_v2  ;;  %v16565_v54 = vmul.f32 %v19099_v63, %v16549_v2  ;;  %v19106_v12 = vrot.slane %v16499_v22, 1 }
 0x563   : > { %v6291_v25 = vrot.slane %v16502_v44, 7  ;;  %v16514_v41 = vpack.c.bf16 %v16502_v44, %v16492_v43  ;;  %v19121_v1 = vrot.slane %v16499_v22, 1 }
 0x564   : > { %v6289_v27 = vrot.slane %v16506_v50, 7  ;;  %v12702_v45 = vpop.f32.mrb[44].mxu0  ;;  %v16520_v21 = vsel %vm1926_vm2, %v6287_v11, %v6288_v32  ;;  %v16524_v52 = vpack.c.bf16 %v16506_v50, %v16499_v22  ;;  %19100 = vst [vmem:[#allocation49_spill] sm:$0xff] %v16565_v54  ;;  %v7092_v0 = vrot.slane %v16506_v50, 1 }
 0x565   : > { %19090 = vst [vmem:[#allocation105_spill] sm:$0xff] %v16514_v41  ;;  %19091 = vst [vmem:[#allocation111_spill] sm:$0xff] %v16520_v21  ;;  %v6114_v58 = vadd.f32 %v12702_v45, %v16389_v14  ;;  %v6105_v33 = vpop.f32.mrb[45].mxu0  ;;  %v16534_v56 = vsel %vm1926_vm2, %v6290_v49, %v6291_v25  ;;  %v16622_v54 = vsel %vm2730_vm0, %v7090_v20, %v19106_v12 }
 0x566   : > { %19092 = vst [vmem:[#allocation116_spill] sm:$0xff] %v16524_v52  ;;  %19094 = vst [vmem:[#allocation120_spill] sm:$0xff] %v16534_v56  ;;  %v6106_v11 = vadd.f32 %v16389_v14, %v6105_v33  ;;  %v12703_v29 = vpop.f32.mrb[46].mxu0  ;;  %v16539_v26 = vsel %vm1926_vm2, %v6288_v32, %v6289_v27  ;;  %v16543_v60 = vsel %vm1926_vm2, %v6289_v27, %v6290_v49  ;;  %v19118_v52 = vld [vmem:[#allocation32_spill] sm:$0xff] }
 0x567   : > { %19095 = vst [vmem:[#allocation132_spill] sm:$0xff] %v16539_v26  ;;  %19096 = vst [vmem:[#allocation133_spill] sm:$0xff] %v16543_v60  ;;  %v16553_v45 = vmax.f32 %v6114_v58, 0.0  ;;  %v6117_v33 = vadd.f32 %v12703_v29, %v16389_v14  ;;  %v6108_v32 = vpop.f32.mrb[47].mxu0  ;;  %v16561_v27 = vsel %vm2730_vm0, %v7087_v8, %v7088_v10  ;;  %v16640_v12 = vsel %vm2730_vm0, %v19110_v4, %v7090_v20  ;;  %v19138_v56 = vld [vmem:[#allocation36_spill] sm:$0xff] }
 0x568   : > { %v16556_v59 = vmax.f32 %v6106_v11, 0.0  ;;  %v6109_v49 = vadd.f32 %v16389_v14, %v6108_v32  ;;  %19098 = vst [vmem:[#allocation63_spill] sm:$0xff] %v16561_v27  ;;  %19107 = vst [vmem:[#allocation100_spill] sm:$0xff] %v16622_v54 }
 0x569   : > { %v6294_v58 = vrot.slane %v16553_v45, 7  ;;  %v16570_v29 = vmax.f32 %v6117_v33, 0.0  ;;  %v16586_v33 = vmul.f32 %v18911_v48, %v16549_v2  ;;  %19111 = vst [vmem:[#allocation114_spill] sm:$0xff] %v16640_v12  ;;  %v19115_v48 = vrot.slane %v16492_v43, 1 }
 0x56a   : > { %v6292_v11 = vrot.slane %v16556_v59, 7  ;;  %v16574_v24 = vmax.f32 %v6109_v49, 0.0  ;;  %v19129_v12 = vrot.slane %v16502_v44, 1 }
 0x56b   : > { %v6295_v10 = vrot.slane %v16570_v29, 7  ;;  %v16582_v50 = vpack.c.bf16 %v16570_v29, %v16553_v45  ;;  %19102 = vst [vmem:[#allocation81_spill] sm:$0xff] %v16586_v33 }
 0x56c   : > { %v6293_v23 = vrot.slane %v16574_v24, 7  ;;  %v12706_v32 = vpop.f32.mrb[48].mxu0  ;;  %v16592_v8 = vsel %vm1926_vm2, %v6291_v25, %v6292_v11  ;;  %v16596_v46 = vpack.c.bf16 %v16574_v24, %v16556_v59 }
 0x56d   : > { %19101 = vst [vmem:[#allocation69_spill] sm:$0xff] %v16582_v50  ;;  %v6130_v9 = vadd.f32 %v12706_v32, %v16389_v14  ;;  %v6121_v36 = vpop.f32.mrb[49].mxu0  ;;  %v16601_v28 = vmul.f32 %v19104_v7, %v16592_v8  ;;  %v16605_v17 = vsel %vm1926_vm2, %v6294_v58, %v6295_v10 }
 0x56e   : > { %19103 = vst [vmem:[#allocation78_spill] sm:$0xff] %v16596_v46  ;;  %v6122_v25 = vadd.f32 %v16389_v14, %v6121_v36  ;;  %v12707_v39 = vpop.f32.mrb[50].mxu0  ;;  %v16612_v37 = vsel %vm1926_vm2, %v6292_v11, %v6293_v23  ;;  %v16616_v32 = vsel %vm1926_vm2, %v6293_v23, %v6294_v58  ;;  %v19108_v11 = vld [vmem:[#allocation31_spill] sm:$0xff] }
 0x56f   : > { %19105 = vst [vmem:[#allocation92_spill] sm:$0xff] %v16601_v28  ;;  %v16624_v51 = vmax.f32 %v6130_v9, 0.0  ;;  %v6133_v49 = vadd.f32 %v12707_v39, %v16389_v14  ;;  %v6124_v36 = vpop.f32.mrb[51].mxu0  ;;  %v16631_v61 = vmul.f32 %v19108_v11, %v16616_v32  ;;  %v19112_v39 = vld [vmem:[#allocation34_spill] sm:$0xff]  ;;  %v19126_v28 = vld [vmem:[#allocation33_spill] sm:$0xff] }
 0x570   : > { %v16633_v23 = vmax.f32 %v6122_v25, 0.0  ;;  %v6125_v58 = vadd.f32 %v16389_v14, %v6124_v36  ;;  %v16644_v9 = vmul.f32 %v19112_v39, %v16622_v54  ;;  %v16668_v25 = vsel %vm2730_vm0, %v7092_v0, %v19115_v48 }
 0x571   : > { %19109 = vst [vmem:[#allocation106_spill] sm:$0xff] %v16631_v61  ;;  %v6298_v33 = vrot.slane %v16624_v51, 7  ;;  %v16648_v13 = vmax.f32 %v6133_v49, 0.0  ;;  %19116 = vst [vmem:[#allocation134_spill] sm:$0xff] %v16668_v25  ;;  %v16706_v61 = vmul.f32 %v19124_v57, %v16668_v25  ;;  %v19142_v39 = vrot.slane %v16553_v45, 1 }
 0x572   : > { %19113 = vst [vmem:[#allocation122_spill] sm:$0xff] %v16644_v9  ;;  %v6296_v36 = vrot.slane %v16633_v23, 7  ;;  %v16654_v50 = vmax.f32 %v6125_v58, 0.0  ;;  %v19143_v25 = vrot.slane %v16574_v24, 1 }
 0x573   : > { %v6299_v20 = vrot.slane %v16648_v13, 7  ;;  %v16662_v49 = vpack.c.bf16 %v16648_v13, %v16624_v51  ;;  %19125 = vst [vmem:[#allocation141_spill] sm:$0xff] %v16706_v61 }
 0x574   : > { %v6297_v58 = vrot.slane %v16654_v50, 7  ;;  %v12710_v41 = vpop.f32.mrb[52].mxu0  ;;  %v16674_v4 = vsel %vm1926_vm2, %v6295_v10, %v6296_v36  ;;  %v16678_v46 = vpack.c.bf16 %v16654_v50, %v16633_v23  ;;  %v16693_v10 = vsel %vm2730_vm0, %v19121_v1, %v7092_v0 }
 0x575   : > { %19114 = vst [vmem:[#allocation130_spill] sm:$0xff] %v16662_v49  ;;  %v6146_v9 = vadd.f32 %v12710_v41, %v16389_v14  ;;  %v6137_v49 = vpop.f32.mrb[53].mxu0  ;;  %v16683_v48 = vmul.f32 %v19118_v52, %v16674_v4  ;;  %v16687_v31 = vsel %vm1926_vm2, %v6298_v33, %v6299_v20  ;;  %19122 = vst [vmem:[#allocation138_spill] sm:$0xff] %v16693_v10  ;;  %v19131_v10 = vmov %v19129_v12 }
 0x576   : > { %19117 = vst [vmem:[#allocation135_spill] sm:$0xff] %v16678_v46  ;;  %19120 = vst [vmem:[#allocation22_spill] sm:$0xff] %v16687_v31  ;;  %v6138_v53 = vadd.f32 %v16389_v14, %v6137_v49  ;;  %v12711_v46 = vpop.f32.mrb[54].mxu0  ;;  %v16698_v41 = vsel %vm1926_vm2, %v6296_v36, %v6297_v58  ;;  %v16702_v15 = vsel %vm1926_vm2, %v6297_v58, %v6298_v33  ;;  %v19135_v58 = vld [vmem:[#allocation38_spill] sm:$0xff]  ;;  %v19147_v2 = vmov %v19143_v25 }
 0x577   : > { %19119 = vst [vmem:[#allocation136_spill] sm:$0xff] %v16683_v48  ;;  %19123 = vst [vmem:[#allocation139_spill] sm:$0xff] %v16698_v41  ;;  %v16708_v22 = vmax.f32 %v6146_v9, 0.0  ;;  %v6149_v0 = vadd.f32 %v12711_v46, %v16389_v14  ;;  %v6140_v1 = vpop.f32.mrb[55].mxu0  ;;  %v16715_v36 = vmul.f32 %v19126_v28, %v16702_v15  ;;  %v19128_v9 = vrot.slane %v16556_v59, 1  ;;  %v19164_v41 = vld [vmem:[#allocation43_spill] sm:$0xff] }
 0x578   : > { %v16717_v19 = vmax.f32 %v6138_v53, 0.0  ;;  %v6141_v33 = vadd.f32 %v16389_v14, %v6140_v1  ;;  %v16794_v63 = vsel %vm2730_vm0, %v19143_v25, %v19142_v39  ;;  %v19148_v39 = vrot.slane %v16556_v59, 1 }
 0x579   : > { %19127 = vst [vmem:[#allocation54_spill] sm:$0xff] %v16715_v36  ;;  %v16728_v46 = vsel %vm2730_vm0, %v19129_v12, %v19128_v9  ;;  %v6302_v49 = vrot.slane %v16708_v22, 7  ;;  %v16732_v27 = vmax.f32 %v6149_v0, 0.0  ;;  %v19132_v12 = vrot.slane %v16492_v43, 1  ;;  %19144 = vst [vmem:[#allocation73_spill] sm:$0xff] %v16794_v63 }
 0x57a   : > { %19130 = vst [vmem:[#allocation58_spill] sm:$0xff] %v16728_v46  ;;  %v6300_v1 = vrot.slane %v16717_v19, 7  ;;  %v16738_v61 = vmax.f32 %v6141_v33, 0.0  ;;  %v16756_v33 = vmul.f32 %v19135_v58, %v16728_v46  ;;  %v16814_v25 = vsel %vm2730_vm0, %v19148_v39, %v19147_v2 }
 0x57b   : > { %v16746_v9 = vsel %vm2730_vm0, %v19132_v12, %v19131_v10  ;;  %v6303_v0 = vrot.slane %v16732_v27, 7  ;;  %v16752_v53 = vpack.c.bf16 %v16732_v27, %v16708_v22  ;;  %19149 = vst [vmem:[#allocation74_spill] sm:$0xff] %v16814_v25  ;;  %v19160_v2 = vrot.slane %v16570_v29, 1 }
 0x57c   : > { %19133 = vst [vmem:[#allocation142_spill] sm:$0xff] %v16746_v9  ;;  %19136 = vst [vmem:[#allocation71_spill] sm:$0xff] %v16756_v33  ;;  %v6301_v44 = vrot.slane %v16738_v61, 7  ;;  %v12714_v36 = vpop.f32.mrb[56].mxu0  ;;  %v16762_v10 = vsel %vm1926_vm2, %v6299_v20, %v6300_v1  ;;  %v16766_v12 = vpack.c.bf16 %v16738_v61, %v16717_v19  ;;  %v19145_v9 = vld [vmem:[#allocation37_spill] sm:$0xff] }
 0x57d   : > { %19134 = vst [vmem:[#allocation65_spill] sm:$0xff] %v16752_v53  ;;  %v6162_v48 = vadd.f32 %v12714_v36, %v16389_v14  ;;  %v6153_v53 = vpop.f32.mrb[57].mxu0  ;;  %v16771_v58 = vmul.f32 %v19138_v56, %v16762_v10  ;;  %v16775_v57 = vsel %vm1926_vm2, %v6302_v49, %v6303_v0 }
 0x57e   : > { %19137 = vst [vmem:[#allocation64_spill] sm:$0xff] %v16766_v12  ;;  %19140 = vst [vmem:[#allocation143_spill] sm:$0xff] %v16775_v57  ;;  %v6154_v20 = vadd.f32 %v16389_v14, %v6153_v53  ;;  %v12715_v46 = vpop.f32.mrb[58].mxu0  ;;  %v16782_v12 = vsel %vm1926_vm2, %v6300_v1, %v6301_v44  ;;  %v16786_v36 = vsel %vm1926_vm2, %v6301_v44, %v6302_v49 }
 0x57f   : > { %19139 = vst [vmem:[#allocation70_spill] sm:$0xff] %v16771_v58  ;;  %19141 = vst [vmem:[#allocation80_spill] sm:$0xff] %v16782_v12  ;;  %v16796_v43 = vmax.f32 %v6162_v48, 0.0  ;;  %v6165_v53 = vadd.f32 %v12715_v46, %v16389_v14  ;;  %v6156_v33 = vpop.f32.mrb[59].mxu0  ;;  %v16803_v49 = vmul.f32 %v19145_v9, %v16786_v36  ;;  %v19150_v48 = vld [vmem:[#allocation41_spill] sm:$0xff]  ;;  %v19153_v58 = vrot.slane %v16633_v23, 1 }
 0x580   : > { %v16805_v44 = vmax.f32 %v6154_v20, 0.0  ;;  %v6157_v54 = vadd.f32 %v16389_v14, %v6156_v33  ;;  %v16818_v46 = vmul.f32 %v19150_v48, %v16794_v63  ;;  %v19154_v33 = vrot.slane %v16570_v29, 1  ;;  %v19157_v63 = vld [vmem:[#allocation39_spill] sm:$0xff] }
 0x581   : > { %19146 = vst [vmem:[#allocation86_spill] sm:$0xff] %v16803_v49  ;;  %v6306_v1 = vrot.slane %v16796_v43, 7  ;;  %v16822_v20 = vmax.f32 %v6165_v53, 0.0 }
 0x582   : > { %19151 = vst [vmem:[#allocation144_spill] sm:$0xff] %v16818_v46  ;;  %v6304_v24 = vrot.slane %v16805_v44, 7  ;;  %v16828_v26 = vmax.f32 %v6157_v54, 0.0  ;;  %v16844_v59 = vsel %vm2730_vm0, %v19154_v33, %v19153_v58 }
 0x583   : > { %v6307_v39 = vrot.slane %v16822_v20, 7  ;;  %v16836_v53 = vpack.c.bf16 %v16822_v20, %v16796_v43  ;;  %19155 = vst [vmem:[#allocation60_spill] sm:$0xff] %v16844_v59  ;;  %v16884_v29 = vmul.f32 %v19164_v41, %v16844_v59  ;;  %v19170_v41 = vrot.slane %v16654_v50, 1 }
 0x584   : > { %v6305_v54 = vrot.slane %v16828_v26, 7  ;;  %v12718_v46 = vpop.f32.mrb[60].mxu0  ;;  %v16850_v48 = vsel %vm1926_vm2, %v6303_v0, %v6304_v24  ;;  %v19161_v0 = vrot.slane %v16553_v45, 1 }
 0x585   : > { %19152 = vst [vmem:[#allocation108_spill] sm:$0xff] %v16836_v53  ;;  %v16854_v53 = vpack.c.bf16 %v16828_v26, %v16805_v44  ;;  %v6178_v49 = vadd.f32 %v12718_v46, %v16389_v14  ;;  %v6169_v25 = vpop.f32.mrb[61].mxu0  ;;  %v16859_v58 = vmul.f32 %v19157_v63, %v16850_v48  ;;  %v16863_v33 = vsel %vm1926_vm2, %v6306_v1, %v6307_v39  ;;  %v19167_v63 = vld [vmem:[#allocation40_spill] sm:$0xff] }
 0x586   : > { %19159 = vst [vmem:[#allocation96_spill] sm:$0xff] %v16863_v33  ;;  %v16871_v57 = vsel %vm2730_vm0, %v19161_v0, %v19160_v2  ;;  %v12719_v46 = vpop.f32.mrb[62].mxu0  ;;  %v16876_v12 = vsel %vm1926_vm2, %v6304_v24, %v6305_v54  ;;  %v16880_v31 = vsel %vm1926_vm2, %v6305_v54, %v6306_v1  ;;  %19165 = vst [vmem:[#allocation75_spill] sm:$0xff] %v16884_v29 }
 0x587   : > { %19156 = vst [vmem:[#allocation145_spill] sm:$0xff] %v16854_v53  ;;  %19158 = vst [vmem:[#allocation146_spill] sm:$0xff] %v16859_v58  ;;  %v6170_v53 = vadd.f32 %v16389_v14, %v6169_v25  ;;  %v16886_v45 = vmax.f32 %v6178_v49, 0.0  ;;  %v6181_v2 = vadd.f32 %v12719_v46, %v16389_v14  ;;  %v6172_v0 = vpop.f32.mrb[63].mxu0  ;;  %v16893_v24 = vmul.f32 %v19167_v63, %v16880_v31 }
 0x588   : > { %19162 = vst [vmem:[#allocation123_spill] sm:$0xff] %v16871_v57  ;;  %19163 = vst [vmem:[#allocation121_spill] sm:$0xff] %v16876_v12  ;;  %v6173_v1 = vadd.f32 %v16389_v14, %v6172_v0  ;;  %v19169_v49 = vrot.slane %v16624_v51, 1  ;;  %v19176_v63 = vrot.slane %v16633_v23, 1 }
 0x589   : > { %19166 = vst [vmem:[#allocation148_spill] sm:$0xff] %v16886_v45  ;;  %19168 = vst [vmem:[#allocation101_spill] sm:$0xff] %v16893_v24  ;;  %v16895_v9 = vmax.f32 %v6170_v53, 0.0  ;;  %v6310_v25 = vrot.slane %v16886_v45, 7  ;;  %v7113_v58 = vrot.slane %v16886_v45, 1  ;;  %v16910_v59 = vmax.f32 %v6181_v2, 0.0 }
 0x58a   : > { %v16906_v46 = vsel %vm2730_vm0, %v19170_v41, %v19169_v49  ;;  %v6213_v54 = vmax.f32 %v6173_v1, 0.0  ;;  %v16917_v29 = vmul.f32 0.0, %v16886_v45  ;;  %v19175_v2 = vrot.slane %v16654_v50, 1 }
 0x58b   : > { %19171 = vst [vmem:[#allocation149_spill] sm:$0xff] %v16906_v46  ;;  %19172 = vst [vmem:[#allocation90_spill] sm:$0xff] %v16910_v59  ;;  %v6308_v53 = vrot.slane %v16895_v9, 7  ;;  %v7111_v0 = vrot.slane %v16895_v9, 1  ;;  %v6311_v41 = vrot.slane %v16910_v59, 7  ;;  %v7114_v49 = vrot.slane %v16910_v59, 1 }
 0x58c   : > { %19173 = vst [vmem:[#allocation117_spill] sm:$0xff] %v16917_v29  ;;  %v16922_v57 = vmul.f32 0.0, %v16910_v59  ;;  %v16930_v14 = vsel %vm2730_vm0, %v19176_v63, %v19175_v2  ;;  %v6309_v24 = vrot.slane %v6213_v54, 7  ;;  %v7112_v1 = vrot.slane %v6213_v54, 1  ;;  %v19180_v63 = vld [vmem:[#allocation42_spill] sm:$0xff] }
 0x58d   : > { %v16934_v45 = vsel %vm1926_vm2, %v6307_v39, %v6308_v53  ;;  %v16937_v33 = vpack.c.bf16 %v6213_v54, %v16895_v9  ;;  %v19178_v59 = vrot.slane %v16394_v40, 7  ;;  %v16947_v23 = vsel %vm1926_vm2, %v6310_v25, %v6311_v41 }
 0x58e   : > { %19174 = vst [vmem:[#allocation97_spill] sm:$0xff] %v16922_v57  ;;  %19179 = vst [vmem:[#allocation103_spill] sm:$0xff] %v16947_v23  ;;  %v16951_v2 = vmul.f32 %v19180_v63, %v16934_v45  ;;  %v16957_v9 = vsel %vm1926_vm2, %v6309_v24, %v6310_v25  ;;  %v6345_v54 = vmul.f32 0.0, %v16947_v23  ;;  %v16971_v39 = vsel %vm2730_vm0, %v7113_v58, %v7114_v49  ;;  %v19188_v63 = vld [vmem:[#allocation44_spill] sm:$0xff] }
 0x58f   : > { %19177 = vst [vmem:[#allocation137_spill] sm:$0xff] %v16937_v33  ;;  %v16943_v50 = vsel %vm1926_vm2, %v6311_v41, %v19178_v59  ;;  %v16964_v41 = vsel %vm1926_vm2, %v6308_v53, %v6309_v24  ;;  %v6344_v33 = vmul.f32 0.0, %v16957_v9  ;;  %19183 = vst [vmem:[#allocation76_spill] sm:$0xff] %v16971_v39  ;;  %v19184_v25 = vrot.slane %v16394_v40, 1 }
 0x590   : > { %19181 = vst [vmem:[#allocation112_spill] sm:$0xff] %v16951_v2  ;;  %v6346_v59 = vmul.f32 %v19084_v3, %v16943_v50  ;;  %19182 = vst [vmem:[#allocation53_spill] sm:$0xff] %v16964_v41  ;;  %v16981_v24 = vmul.f32 0.0, %v16971_v39  ;;  %v16988_v57 = vmul.f32 %v19188_v63, %v16906_v46  ;;  %v19190_v23 = vrot.slane %v16717_v19, 1  ;;  %v13938_v63 = vld [vmem:[#allocation7 + $0x48] sm:$0xff]  }
 0x591   : > { %v16977_v29 = vsel %vm2730_vm0, %v7114_v49, %v19184_v25  ;;  %v6376_v2 = vpack.c.bf16 %v6345_v54, %v6344_v33  ;;  %v19191_v40 = vrot.slane %v16648_v13, 1  ;;  %v19193_v25 = vrot.slane %v16624_v51, 1  ;;  %v19196_v51 = vld [vmem:[#allocation45_spill] sm:$0xff] }
 0x592   : > { %19185 = vst [vmem:[#allocation131_spill] sm:$0xff] %v16977_v29  ;;  %v6377_v3 = vpack.c.bf16 %v16422_v47, %v6346_v59  ;;  %19186 = vst [vmem:[#allocation61_spill] sm:$0xff] %v16981_v24  ;;  %v16984_v53 = vmul.f32 0.0, %v16977_v29  ;;  %v19194_v29 = vrot.slane %v16708_v22, 1  ;;  %v19195_v33 = vrot.slane %v16738_v61, 1 }
 0x593   : > { %19189 = vst [vmem:[#allocation79_spill] sm:$0xff] %v16988_v57  ;;  %v16996_v49 = vsel %vm2730_vm0, %v19191_v40, %v19190_v23  ;;  %v19192_v59 = vmov %v19191_v40  ;;  %12736 = vmatprep.mubr.bf16.mxu0 %v6376_v2  ;;  %v19202_v40 = vrot.slane %v16805_v44, 1  ;;  %v19203_v13 = vrot.slane %v16732_v27, 1  ;;  %v19208_v27 = vld [vmem:[#allocation57_spill] sm:$0xff] }
 0x594   : > { %19187 = vst [vmem:[#allocation129_spill] sm:$0xff] %v16984_v53  ;;  %v17004_v39 = vsel %vm2730_vm0, %v19193_v25, %v19192_v59  ;;  %v17012_v54 = vsel %vm2730_vm0, %v19195_v33, %v19194_v29  ;;  %v17020_v23 = vmul.f32 %v19196_v51, %v16996_v49  ;;  %v19198_v59 = vmov %v19195_v33  ;;  %v19200_v29 = vld [vmem:[#allocation55_spill] sm:$0xff] }
 0x595   : > { %v19199_v25 = vrot.slane %v16717_v19, 1  ;;  %v17032_v33 = vmul.f32 %v19200_v29, %v17012_v54  ;;  %v17040_v57 = vsel %vm2730_vm0, %v19203_v13, %v19202_v40  ;;  %v19204_v61 = vmov %v19203_v13  ;;  %12737 = vmatmul.mubr.bf16.vlgmr.msra.gmra.mrb[64].mxu0 %v6377_v3  ;;  %v19212_v53 = vld [vmem:[#allocation59_spill] sm:$0xff] }
 0x596   : > { %19197 = vst [vmem:[#allocation150_spill] sm:$0xff] %v17020_v23  ;;  %v19205_v19 = vrot.slane %v16708_v22, 1  ;;  %v19206_v2 = vrot.slane %v16796_v43, 1  ;;  %v17062_v13 = vmul.f32 %v19208_v27, %v17040_v57  ;;  %12769 = vmatpush3.bf16.msra.mxu0 %v16383_v62  ;;  %v19214_v3 = vpack.c.bf16 %v16412_v5, %v16457_v55  ;;  %v13939_v55 = vld [vmem:[#allocation7 + $0x50] sm:$0xff]  }
 0x597   : > { %v17028_v46 = vsel %vm2730_vm0, %v19199_v25, %v19198_v59  ;;  %19201 = vst [vmem:[#allocation85_spill] sm:$0xff] %v17032_v33  ;;  %v19207_v25 = vrot.slane %v16828_v26, 1  ;;  %v19215_v26 = vrot.slane %v16822_v20, 1  ;;  %12770 = vmatprep.subr.bf16.mxu0 %v13938_v63  ;;  %v17106_v20 = vsel %vm2730_vm0, %v7112_v1, %v7113_v58  ;;  %v19226_v58 = vld [vmem:[#allocation140_spill] sm:$0xff]  ;;  %v19260_v33 = vld [vmem:[#allocation35_spill] sm:$0xff] }
 0x598   : > { %v17048_v59 = vsel %vm2730_vm0, %v19205_v19, %v19204_v61  ;;  %19209 = vst [vmem:[#allocation151_spill] sm:$0xff] %v17062_v13  ;;  %v19211_v61 = vmov %v19202_v40  ;;  %12740 = vmatprep.mubr.bf16.mxu0 %v19214_v3  ;;  %v19218_v40 = vld [vmem:[#allocation66_spill] sm:$0xff]  ;;  %v17118_v3 = vmul.f32 %v19006_v18, %v16943_v50  ;;  %v19224_v18 = vld [vmem:[#allocation28_spill] sm:$0xff] }
 0x599   : > { %v17056_v24 = vsel %vm2730_vm0, %v19207_v25, %v19206_v2  ;;  %v19210_v22 = vmov %v19207_v25  ;;  %v17086_v44 = vsel %vm2730_vm0, %v19215_v26, %v7111_v0  ;;  %v17122_v25 = vmul.f32 %v19011_v35, %v16461_v6  ;;  %v13940_v35 = vld [vmem:[#allocation7 + $0x58] sm:$0xff]   ;;  %v13941_v13 = vld [vmem:[#allocation7 + $0x60] sm:$0xff]  }
 0x59a   : > { %v17070_v19 = vsel %vm2730_vm0, %v19211_v61, %v19210_v22  ;;  %v17074_v2 = vmul.f32 %v19212_v53, %v17056_v24  ;;  %v19216_v22 = vmov %v19215_v26  ;;  %v19217_v61 = vrot.slane %v16796_v43, 1  ;;  %19222 = vst [vmem:[#allocation154_spill] sm:$0xff] %v17118_v3  ;;  %12771 = vmatpush3.bf16.msra.mxu0 %v13938_v63  ;;  %v19250_v23 = vld [vmem:[#allocation52_spill] sm:$0xff] }
 0x59b   : > { %v17102_v26 = vmul.f32 %v19218_v40, %v17086_v44  ;;  %v17110_v43 = vsel %vm2730_vm0, %v7111_v0, %v7112_v1  ;;  %19223 = vst [vmem:[#allocation155_spill] sm:$0xff] %v17122_v25  ;;  %v17134_v5 = vmul.f32 %v19224_v18, %v16592_v8  ;;  %v6380_v6 = vpack.c.bf16 %v16477_v34, %v16530_v38 }
 0x59c   : > { %19213 = vst [vmem:[#allocation91_spill] sm:$0xff] %v17074_v2  ;;  %v17094_v62 = vsel %vm2730_vm0, %v19217_v61, %v19216_v22  ;;  %v19220_v22 = vld [vmem:[#allocation67_spill] sm:$0xff]  ;;  %12772 = vmatprep.subr.bf16.mxu0 %v13939_v55  ;;  %v6354_v63 = vmul.f32 %v19226_v58, %v16520_v21  ;;  %v6356_v16 = vmul.f32 %v19224_v18, %v16543_v60  ;;  %vm11014_vm0 = vcmask 24576  }
 0x59d   : > { %19219 = vst [vmem:[#allocation152_spill] sm:$0xff] %v17102_v26  ;;  %v17114_v61 = vmul.f32 %v19220_v22, %v17106_v20  ;;  %19225 = vst [vmem:[#allocation156_spill] sm:$0xff] %v17134_v5  ;;  %v17144_v0 = vmul.f32 %v19104_v7, %v16616_v32  ;;  %v17150_v25 = vmul.f32 %v19108_v11, %v16674_v4  ;;  %v19233_v5 = vld [vmem:[#allocation37_spill] sm:$0xff] }
 0x59e   : > { %v17154_v38 = vmul.f32 %v19118_v52, %v16702_v15  ;;  %v17158_v34 = vmul.f32 %v19126_v28, %v16762_v10  ;;  %v19231_v60 = vpack.c.bf16 %v16482_v30, %v16469_v42  ;;  %v17167_v1 = vmul.f32 %v19138_v56, %v16786_v36  ;;  %12773 = vmatpush3.bf16.msra.mxu0 %v13939_v55  ;;  %v19237_v42 = vld [vmem:[#allocation139_spill] sm:$0xff]  ;;  %v19274_v55 = vld [vmem:[#allocation74_spill] sm:$0xff] }
 0x59f   : > { %19221 = vst [vmem:[#allocation153_spill] sm:$0xff] %v17114_v61  ;;  %19227 = vst [vmem:[#allocation157_spill] sm:$0xff] %v17144_v0  ;;  %v17171_v3 = vmul.f32 %v19233_v5, %v16850_v48  ;;  %v19235_v61 = vld [vmem:[#allocation39_spill] sm:$0xff]  ;;  %12774 = vmatprep.subr.bf16.mxu0 %v13940_v35  ;;  %v19248_v0 = vld [vmem:[#allocation90_spill] sm:$0xff] }
 0x5a0   : > { %19228 = vst [vmem:[#allocation82_spill] sm:$0xff] %v17150_v25  ;;  %19229 = vst [vmem:[#allocation158_spill] sm:$0xff] %v17154_v38  ;;  %12741 = vmatmul.mubr.bf16.gmra.mrb[68].mxu0 %v19231_v60  ;;  %v17175_v26 = vmul.f32 %v19235_v61, %v16880_v31  ;;  %v19242_v61 = vld [vmem:[#allocation40_spill] sm:$0xff]  ;;  %v19245_v38 = vld [vmem:[#allocation42_spill] sm:$0xff] }
 0x5a1   : > { %19230 = vst [vmem:[#allocation128_spill] sm:$0xff] %v17158_v34  ;;  %19232 = vst [vmem:[#allocation50_spill] sm:$0xff] %v17167_v1  ;;  %12744 = vmatprep.mubr.bf16.mxu0 %v6380_v6  ;;  %v17191_v60 = vmul.f32 %v19242_v61, %v16934_v45  ;;  %v19244_v25 = vld [vmem:[#allocation132_spill] sm:$0xff]  ;;  %v17196_v2 = vmul.f32 %v19245_v38, %v16957_v9  ;;  %v19251_v1 = vld [vmem:[#allocation147_spill] sm:$0xff] }
 0x5a2   : > { %19234 = vst [vmem:[#allocation48_spill] sm:$0xff] %v17171_v3  ;;  %19236 = vst [vmem:[#allocation47_spill] sm:$0xff] %v17175_v26  ;;  %v6381_v21 = vpack.c.bf16 %v19244_v25, %v6354_v63  ;;  %v19247_v34 = vld [vmem:[#allocation148_spill] sm:$0xff]  ;;  %v17204_v47 = vmul.f32 %v19251_v1, %v19250_v23  ;;  %v19254_v3 = vld [vmem:[#allocation29_spill] sm:$0xff]  ;;  %12775 = vmatpush3.bf16.msra.mxu0 %v13940_v35 }
 0x5a3   : > { %19243 = vst [vmem:[#allocation84_spill] sm:$0xff] %v17191_v60  ;;  %19246 = vst [vmem:[#allocation88_spill] sm:$0xff] %v17196_v2  ;;  %v17200_v30 = vpack.c.bf16 %v19248_v0, %v19247_v34  ;;  %v19253_v26 = vld [vmem:[#allocation100_spill] sm:$0xff]  ;;  %v19256_v63 = vld [vmem:[#allocation134_spill] sm:$0xff]  ;;  %12776 = vmatprep.subr.bf16.mxu0 %v13941_v13 }
 0x5a4   : > { %19252 = vst [vmem:[#allocation107_spill] sm:$0xff] %v17204_v47  ;;  %v17210_v6 = vmul.f32 %v19254_v3, %v19253_v26  ;;  %v19257_v25 = vld [vmem:[#allocation34_spill] sm:$0xff]  ;;  %v19262_v34 = vld [vmem:[#allocation120_spill] sm:$0xff]  ;;  %v19265_v60 = vld [vmem:[#allocation73_spill] sm:$0xff]  ;;  %v17261_v47 = vmul.f32 %v19208_v27, %v17056_v24  ;;  %v17291_v27 = vmul.f32 %v19226_v58, %v16592_v8 }
 0x5a5   : > { %19249 = vst [vmem:[#allocation102_spill] sm:$0xff] %v17200_v30  ;;  %v17214_v12 = vmul.f32 %v19257_v25, %v19256_v63  ;;  %v19259_v38 = vld [vmem:[#allocation58_spill] sm:$0xff]  ;;  %v6382_v0 = vpack.c.bf16 %v19262_v34, %v6356_v16  ;;  %v19271_v34 = vld [vmem:[#allocation60_spill] sm:$0xff]  ;;  %v19272_v30 = vld [vmem:[#allocation41_spill] sm:$0xff] }
 0x5a6   : > { %19255 = vst [vmem:[#allocation113_spill] sm:$0xff] %v17210_v6  ;;  %v17218_v61 = vmul.f32 %v19260_v33, %v19259_v38  ;;  %v19266_v3 = vld [vmem:[#allocation38_spill] sm:$0xff]  ;;  %v17237_v2 = vmul.f32 %v19272_v30, %v19271_v34  ;;  %v19275_v1 = vld [vmem:[#allocation149_spill] sm:$0xff]  ;;  %v19277_v23 = vld [vmem:[#allocation44_spill] sm:$0xff]  ;;  %v17251_v38 = vmul.f32 %v19196_v51, %v17012_v54  ;;  %12777 = vmatpush3.bf16.msra.mxu0 %v13941_v13 }
 0x5a7   : > { %19258 = vst [vmem:[#allocation118_spill] sm:$0xff] %v17214_v12  ;;  %v17227_v26 = vmul.f32 %v19266_v3, %v19265_v60  ;;  %v13942_v25 = vld [vmem:[#allocation7 + $0x68] sm:$0xff]   ;;  %v17247_v41 = vmul.f32 %v19277_v23, %v16996_v49  ;;  %v17257_v12 = vmul.f32 %v19200_v29, %v17040_v57  ;;  %19281 = vst [vmem:[#allocation160_spill] sm:$0xff] %v17261_v47  ;;  %v13943_v6 = vld [vmem:[#allocation7 + $0x70] sm:$0xff]  }
 0x5a8   : > { %19261 = vst [vmem:[#allocation124_spill] sm:$0xff] %v17218_v61  ;;  %v19268_v63 = vld [vmem:[#allocation114_spill] sm:$0xff]  ;;  %19273 = vst [vmem:[#allocation95_spill] sm:$0xff] %v17237_v2  ;;  %v19276_v3 = vld [vmem:[#allocation43_spill] sm:$0xff]  ;;  %12745 = vmatmul.mubr.bf16.gmra.mrb[72].mxu0 %v6381_v21  ;;  %12778 = vmatprep.subr.bf16.mxu0 %v13942_v25 }
 0x5a9   : > { %19267 = vst [vmem:[#allocation87_spill] sm:$0xff] %v17227_v26  ;;  %v19269_v33 = vld [vmem:[#allocation138_spill] sm:$0xff]  ;;  %v17243_v60 = vmul.f32 %v19276_v3, %v19275_v1  ;;  %19278 = vst [vmem:[#allocation109_spill] sm:$0xff] %v17251_v38  ;;  %v19279_v35 = vld [vmem:[#allocation123_spill] sm:$0xff]  ;;  %v17265_v26 = vmul.f32 %v19212_v53, %v17086_v44  ;;  %12748 = vmatprep.mubr.bf16.mxu0 %v6382_v0  ;;  %v17281_v0 = vmul.f32 %v19218_v40, %v17106_v20 }
 0x5aa   : > { %v19270_v16 = vld [vmem:[#allocation142_spill] sm:$0xff]  ;;  %19280 = vst [vmem:[#allocation159_spill] sm:$0xff] %v17257_v12  ;;  %v19284_v21 = vld [vmem:[#allocation131_spill] sm:$0xff]  ;;  %19286 = vst [vmem:[#allocation31_spill] sm:$0xff] %v17291_v27  ;;  %v17295_v53 = vmul.f32 %v19224_v18, %v16616_v32  ;;  %12779 = vmatpush3.bf16.msra.mxu0 %v13942_v25  ;;  %v17311_v18 = vmul.f32 %v19104_v7, %v16674_v4  ;;  %v17314_v32 = vmul.f32 0.0, %v16943_v50 }
 0x5ab   : > { %19282 = vst [vmem:[#allocation161_spill] sm:$0xff] %v17265_v26  ;;  %19283 = vst [vmem:[#allocation93_spill] sm:$0xff] %v17281_v0  ;;  %v17285_v61 = vmul.f32 %v19220_v22, %v19284_v21  ;;  %v19289_v47 = vld [vmem:[#allocation110_spill] sm:$0xff]  ;;  %v19291_v22 = vld [vmem:[#allocation115_spill] sm:$0xff]  ;;  %12780 = vmatprep.subr.bf16.mxu0 %v13943_v6  ;;  %v17322_v25 = vmul.f32 %v19118_v52, %v16762_v10  ;;  %v17330_v0 = vmul.f32 %v19138_v56, %v16850_v48 }
 0x5ac   : > { %19287 = vst [vmem:[#allocation32_spill] sm:$0xff] %v17295_v53  ;;  %v17300_v12 = vmul.f32 0.0, %v19289_v47  ;;  %v17303_v38 = vmul.f32 0.0, %v19291_v22  ;;  %v13944_v2 = vld [vmem:[#allocation7 + $0x78] sm:$0xff]   ;;  %19293 = vst [vmem:[#allocation45_spill] sm:$0xff] %v17311_v18  ;;  %v17318_v47 = vmul.f32 %v19108_v11, %v16702_v15  ;;  %v17326_v22 = vmul.f32 %v19126_v28, %v16786_v36  ;;  %v19302_v52 = vld [vmem:[#allocation39_spill] sm:$0xff] }
 0x5ad   : > { %19285 = vst [vmem:[#allocation30_spill] sm:$0xff] %v17285_v61  ;;  %19294 = vst [vmem:[#allocation55_spill] sm:$0xff] %v17314_v32  ;;  %v19299_v7 = vld [vmem:[#allocation92_spill] sm:$0xff]  ;;  %v17339_v11 = vmul.f32 %v19233_v5, %v16880_v31  ;;  %v17343_v10 = vmul.f32 %v19302_v52, %v16934_v45  ;;  %v19306_v56 = vld [vmem:[#allocation106_spill] sm:$0xff] }
 0x5ae   : > { %19290 = vst [vmem:[#allocation33_spill] sm:$0xff] %v17300_v12  ;;  %19292 = vst [vmem:[#allocation36_spill] sm:$0xff] %v17303_v38  ;;  %v19300_v4 = vpack.c.bf16 %v16612_v37, %v19299_v7  ;;  %v19304_v28 = vld [vmem:[#allocation40_spill] sm:$0xff]  ;;  %v19307_v48 = vpack.c.bf16 %v16605_v17, %v19306_v56  ;;  %12781 = vmatpush3.bf16.msra.mxu0 %v13943_v6  ;;  %v19308_v50 = vld [vmem:[#allocation22_spill] sm:$0xff] }
 0x5af   : > { %19295 = vst [vmem:[#allocation66_spill] sm:$0xff] %v17318_v47  ;;  %19296 = vst [vmem:[#allocation67_spill] sm:$0xff] %v17322_v25  ;;  %v17347_v36 = vmul.f32 %v19304_v28, %v16957_v9  ;;  %v19310_v31 = vld [vmem:[#allocation143_spill] sm:$0xff]  ;;  %v19311_v45 = vld [vmem:[#allocation46_spill] sm:$0xff]  ;;  %12782 = vmatprep.subr.bf16.mxu0 %v13944_v2 }
 0x5b0   : > { %19297 = vst [vmem:[#allocation28_spill] sm:$0xff] %v17326_v22  ;;  %19298 = vst [vmem:[#allocation140_spill] sm:$0xff] %v17330_v0  ;;  %12749 = vmatmul.mubr.bf16.gmra.mrb[76].mxu0 %v19300_v4  ;;  %v19309_v4 = vld [vmem:[#allocation80_spill] sm:$0xff]  ;;  %v17359_v52 = vmul.f32 0.0, %v19311_v45  ;;  %v13945_v9 = vld [vmem:[#allocation7 + $0x80] sm:$0xff]  }
 0x5b1   : > { %19301 = vst [vmem:[#allocation37_spill] sm:$0xff] %v17339_v11  ;;  %19303 = vst [vmem:[#allocation139_spill] sm:$0xff] %v17343_v10  ;;  %12752 = vmatprep.mubr.bf16.mxu0 %v19307_v48  ;;  %v19313_v28 = vld [vmem:[#allocation121_spill] sm:$0xff]  ;;  %v19314_v56 = vld [vmem:[#allocation96_spill] sm:$0xff] }
 0x5b2   : > { %19305 = vst [vmem:[#allocation42_spill] sm:$0xff] %v17347_v36  ;;  %19312 = vst [vmem:[#allocation148_spill] sm:$0xff] %v17359_v52  ;;  %v19315_v48 = vld [vmem:[#allocation53_spill] sm:$0xff]  ;;  %v19316_v26 = vld [vmem:[#allocation103_spill] sm:$0xff]  ;;  %12783 = vmatpush3.bf16.msra.mxu0 %v13944_v2 }
 0x5b3   : > { %v19317_v25 = vld [vmem:[#allocation100_spill] sm:$0xff]  ;;  %v19318_v47 = vld [vmem:[#allocation147_spill] sm:$0xff]  ;;  %v19320_v8 = vld [vmem:[#allocation134_spill] sm:$0xff]  ;;  %12816 = vmatprep.subr.bf16.mxu0 %v13945_v9 }
 0x5b4   : > { %v17375_v18 = vmul.f32 %v19318_v47, %v19317_v25  ;;  %v19321_v0 = vld [vmem:[#allocation29_spill] sm:$0xff]  ;;  %v19323_v6 = vld [vmem:[#allocation58_spill] sm:$0xff]  ;;  %v19327_v5 = vld [vmem:[#allocation35_spill] sm:$0xff] }
 0x5b5   : > { %v17379_v53 = vmul.f32 %v19321_v0, %v19320_v8  ;;  %v19324_v11 = vld [vmem:[#allocation34_spill] sm:$0xff]  ;;  %v19326_v10 = vld [vmem:[#allocation73_spill] sm:$0xff]  ;;  %v17397_v0 = vmul.f32 %v19272_v30, %v19275_v1  ;;  %v17401_v8 = vmul.f32 %v19276_v3, %v16996_v49  ;;  %v17417_v3 = vmul.f32 %v19277_v23, %v17012_v54  ;;  %v19340_v49 = vld [vmem:[#allocation59_spill] sm:$0xff] }
 0x5b6   : > { %19319 = vst [vmem:[#allocation90_spill] sm:$0xff] %v17375_v18  ;;  %v17383_v7 = vmul.f32 %v19324_v11, %v19323_v6  ;;  %v17387_v36 = vmul.f32 %v19327_v5, %v19326_v10  ;;  %v19329_v15 = vld [vmem:[#allocation38_spill] sm:$0xff]  ;;  %v17421_v1 = vmul.f32 %v19196_v51, %v17040_v57  ;;  %v19335_v10 = vld [vmem:[#allocation136_spill] sm:$0xff]  ;;  %v17428_v6 = vmul.f32 %v19200_v29, %v17056_v24  ;;  %v19338_v30 = vld [vmem:[#allocation57_spill] sm:$0xff] }
 0x5b7   : > { %19322 = vst [vmem:[#allocation52_spill] sm:$0xff] %v17379_v53  ;;  %v17391_v32 = vmul.f32 %v19329_v15, %v19271_v34  ;;  %19331 = vst [vmem:[#allocation60_spill] sm:$0xff] %v17397_v0  ;;  %v19336_v5 = vpack.c.bf16 %v19237_v42, %v19335_v10  ;;  %v17432_v15 = vmul.f32 %v19338_v30, %v17086_v44  ;;  %v19343_v51 = vld [vmem:[#allocation54_spill] sm:$0xff]  ;;  %v19356_v24 = vld [vmem:[#allocation117_spill] sm:$0xff] }
 0x5b8   : > { %19325 = vst [vmem:[#allocation114_spill] sm:$0xff] %v17383_v7  ;;  %19328 = vst [vmem:[#allocation138_spill] sm:$0xff] %v17387_v36  ;;  %v17436_v54 = vmul.f32 %v19340_v49, %v17106_v20  ;;  %v17440_v57 = vmul.f32 %v19218_v40, %v19284_v21  ;;  %v19344_v23 = vpack.c.bf16 %v19308_v50, %v19343_v51  ;;  %v19345_v30 = vld [vmem:[#allocation70_spill] sm:$0xff]  ;;  %v19351_v20 = vld [vmem:[#allocation101_spill] sm:$0xff] }
 0x5b9   : > { %19330 = vst [vmem:[#allocation142_spill] sm:$0xff] %v17391_v32  ;;  %19332 = vst [vmem:[#allocation41_spill] sm:$0xff] %v17401_v8  ;;  %12753 = vmatmul.mubr.bf16.gmra.mrb[80].mxu0 %v19336_v5  ;;  %v19346_v49 = vpack.c.bf16 %v19309_v4, %v19345_v30  ;;  %v19347_v10 = vld [vmem:[#allocation86_spill] sm:$0xff]  ;;  %v19352_v44 = vpack.c.bf16 %v19314_v56, %v19351_v20  ;;  %v19353_v40 = vld [vmem:[#allocation112_spill] sm:$0xff] }
 0x5ba   : > { %19333 = vst [vmem:[#allocation74_spill] sm:$0xff] %v17417_v3  ;;  %19334 = vst [vmem:[#allocation149_spill] sm:$0xff] %v17421_v1  ;;  %12756 = vmatprep.mubr.bf16.mxu0 %v19344_v23  ;;  %v19348_v5 = vpack.c.bf16 %v19310_v31, %v19347_v10  ;;  %v19349_v51 = vld [vmem:[#allocation146_spill] sm:$0xff]  ;;  %v19354_v29 = vpack.c.bf16 %v19315_v48, %v19353_v40  ;;  %v19355_v21 = vld [vmem:[#allocation97_spill] sm:$0xff] }
 0x5bb   : > { %19337 = vst [vmem:[#allocation43_spill] sm:$0xff] %v17428_v6  ;;  %19339 = vst [vmem:[#allocation44_spill] sm:$0xff] %v17432_v15  ;;  %v19350_v23 = vpack.c.bf16 %v19313_v28, %v19349_v51  ;;  %v19357_v30 = vpack.c.bf16 %v19355_v21, %v19356_v24  ;;  %v19358_v2 = vld [vmem:[#allocation125_spill] sm:$0xff]  ;;  %v19359_v10 = vld [vmem:[#allocation119_spill] sm:$0xff] }
 0x5bc   : > { %19341 = vst [vmem:[#allocation123_spill] sm:$0xff] %v17436_v54  ;;  %19342 = vst [vmem:[#allocation131_spill] sm:$0xff] %v17440_v57  ;;  %v13948_v20 = vld [vmem:[#allocation7 + $0x98] sm:$0xff]   ;;  %v13950_v24 = vld [vmem:[#allocation7 + $0xa8] sm:$0xff]  }
 0x5bd   : > { %v19361_v51 = vld [vmem:[#allocation68_spill] sm:$0xff]  ;;  %v19367_v34 = vld [vmem:[#allocation130_spill] sm:$0xff]  ;;  %v19372_v22 = vld [vmem:[#allocation137_spill] sm:$0xff] }
 0x5be   : > { %v19362_v40 = vld [vmem:[#allocation116_spill] sm:$0xff]  ;;  %v19373_v57 = vld [vmem:[#allocation129_spill] sm:$0xff]  ;;  %v19377_v15 = vld [vmem:[#allocation23_spill] sm:$0xff] }
 0x5bf   : > { %v13951_v21 = vld [vmem:[#allocation7 + $0xb0] sm:$0xff]   ;;  %v13954_v32 = vld [vmem:[#allocation7 + $0xc8] sm:$0xff]  }
 0x5c0   : > { %v19368_v11 = vld [vmem:[#allocation64_spill] sm:$0xff]  ;;  %v19378_v1 = vld [vmem:[#allocation99_spill] sm:$0xff]  ;;  %v19384_v12 = vld [vmem:[#allocation122_spill] sm:$0xff] }
 0x5c1   : > { %12757 = vmatmul.mubr.bf16.gmra.mrb[84].mxu0 %v19346_v49  ;;  %v13946_v49 = vld [vmem:[#allocation7 + $0x88] sm:$0xff]   ;;  %v19371_v25 = vld [vmem:[#allocation108_spill] sm:$0xff]  ;;  %v7152_v3 = vmul.f32 %v19318_v47, %v19378_v1  ;;  %v19385_v47 = vpack.c.bf16 %v19384_v12, %v19268_v63 }
 0x5c2   : > { %12760 = vmatprep.mubr.bf16.mxu0 %v19348_v5  ;;  %v13947_v5 = vld [vmem:[#allocation7 + $0x90] sm:$0xff]   ;;  %v13960_v12 = vld [vmem:[#allocation7 + $0xf8] sm:$0xff]   ;;  %v13962_v27 = vld [vmem:[#allocation7 + $0x108] sm:$0xff]  }
 0x5c3   : > { %v19379_v8 = vld [vmem:[#allocation56_spill] sm:$0xff]  ;;  %v19380_v36 = vld [vmem:[#allocation127_spill] sm:$0xff] }
 0x5c4   : > { %v7181_v7 = vpack.c.bf16 %v7152_v3, %v19380_v36  ;;  %v13955_v53 = vld [vmem:[#allocation7 + $0xd0] sm:$0xff]  }
 0x5c5   : > { %v19411_v38 = vld [vmem:[#allocation24_spill] sm:$0xff]  ;;  %v19418_v61 = vld [vmem:[#allocation111_spill] sm:$0xff] }
 0x5c6   : > { %v13963_v13 = vld [vmem:[#allocation7 + $0x110] sm:$0xff]  }
 0x5c9   : > { %12761 = vmatmul.mubr.bf16.gmra.mrb[88].mxu0 %v19350_v23  ;;  %v13952_v23 = vld [vmem:[#allocation7 + $0xb8] sm:$0xff]  }
 0x5ca   : > { %12764 = vmatprep.mubr.bf16.mxu0 %v19352_v44  ;;  %v19360_v44 = vld [vmem:[#allocation72_spill] sm:$0xff] }
 0x5d1   : > { %12765 = vmatmul.mubr.bf16.gmra.mrb[92].mxu0 %v19354_v29  ;;  %v13949_v29 = vld [vmem:[#allocation7 + $0xa0] sm:$0xff]  }
 0x5d2   : > { %12784 = vmatprep.mubr.bf16.mxu0 %v19357_v30  ;;  %v19364_v30 = vld [vmem:[#allocation78_spill] sm:$0xff] }
 0x5d9   : > { %12785 = vmatmul.mubr.bf16.vlgmr.msra.gmra.mrb[64].mxu0 %v19358_v2 }
 0x5da   : > { %12817 = vmatpush3.bf16.msra.mxu0 %v13945_v9  ;;  %12788 = vmatprep.mubr.bf16.mxu0 %v19359_v10  ;;  %v19363_v9 = vld [vmem:[#allocation105_spill] sm:$0xff] }
 0x5db   : > { %12818 = vmatprep.subr.bf16.mxu0 %v13946_v49 }
 0x5de   : > { %12819 = vmatpush3.bf16.msra.mxu0 %v13946_v49  ;;  %v19365_v49 = vld [vmem:[#allocation69_spill] sm:$0xff] }
 0x5df   : > { %12820 = vmatprep.subr.bf16.mxu0 %v13947_v5 }
 0x5e1   : > { %12789 = vmatmul.mubr.bf16.gmra.mrb[68].mxu0 %v19360_v44 }
 0x5e2   : > { %12792 = vmatprep.mubr.bf16.mxu0 %v19361_v51  ;;  %12821 = vmatpush3.bf16.msra.mxu0 %v13947_v5  ;;  %v13953_v5 = vld [vmem:[#allocation7 + $0xc0] sm:$0xff]  }
 0x5e3   : > { %12822 = vmatprep.subr.bf16.mxu0 %v13948_v20 }
 0x5e6   : > { %12823 = vmatpush3.bf16.msra.mxu0 %v13948_v20  ;;  %v19366_v20 = vld [vmem:[#allocation135_spill] sm:$0xff] }
 0x5e7   : > { %12824 = vmatprep.subr.bf16.mxu0 %v13949_v29 }
 0x5e9   : > { %12793 = vmatmul.mubr.bf16.gmra.mrb[72].mxu0 %v19362_v40 }
 0x5ea   : > { %12796 = vmatprep.mubr.bf16.mxu0 %v19363_v9  ;;  %12825 = vmatpush3.bf16.msra.mxu0 %v13949_v29  ;;  %v19369_v29 = vld [vmem:[#allocation65_spill] sm:$0xff] }
 0x5eb   : > { %12826 = vmatprep.subr.bf16.mxu0 %v13950_v24 }
 0x5ee   : > { %12827 = vmatpush3.bf16.msra.mxu0 %v13950_v24  ;;  %v19370_v24 = vld [vmem:[#allocation145_spill] sm:$0xff] }
 0x5ef   : > { %12828 = vmatprep.subr.bf16.mxu0 %v13951_v21 }
 0x5f1   : > { %12797 = vmatmul.mubr.bf16.gmra.mrb[76].mxu0 %v19364_v30 }
 0x5f2   : > { %12800 = vmatprep.mubr.bf16.mxu0 %v19365_v49  ;;  %12829 = vmatpush3.bf16.msra.mxu0 %v13951_v21  ;;  %v19374_v21 = vld [vmem:[#allocation61_spill] sm:$0xff] }
 0x5f3   : > { %12830 = vmatprep.subr.bf16.mxu0 %v13952_v23  ;;  %v19375_v54 = vpack.c.bf16 %v19373_v57, %v19374_v21  ;;  %v13956_v57 = vld [vmem:[#allocation7 + $0xd8] sm:$0xff]   ;;  %v19382_v21 = vld [vmem:[#allocation63_spill] sm:$0xff] }
 0x5f6   : > { %12831 = vmatpush3.bf16.msra.mxu0 %v13952_v23  ;;  %v19376_v23 = vld [vmem:[#allocation51_spill] sm:$0xff] }
 0x5f7   : > { %12864 = vmatprep.subr.bf16.mxu0 %v13953_v5  ;;  %v7150_v6 = vmul.f32 %v19377_v15, %v19376_v23 }
 0x5f9   : > { %12801 = vmatmul.mubr.bf16.gmra.mrb[80].mxu0 %v19366_v20  ;;  %v7180_v0 = vpack.c.bf16 %v7150_v6, %v19379_v8  ;;  %v13957_v6 = vld [vmem:[#allocation7 + $0xe0] sm:$0xff]  }
 0x5fa   : > { %12804 = vmatprep.mubr.bf16.mxu0 %v19367_v34 }
 0x601   : > { %12805 = vmatmul.mubr.bf16.gmra.mrb[84].mxu0 %v19368_v11 }
 0x602   : > { %12808 = vmatprep.mubr.bf16.mxu0 %v19369_v29 }
 0x609   : > { %12809 = vmatmul.mubr.bf16.gmra.mrb[88].mxu0 %v19370_v24 }
 0x60a   : > { %12812 = vmatprep.mubr.bf16.mxu0 %v19371_v25 }
 0x611   : > { %12813 = vmatmul.mubr.bf16.gmra.mrb[92].mxu0 %v19372_v22 }
 0x612   : > { %12832 = vmatprep.mubr.bf16.mxu0 %v19375_v54  ;;  %v19381_v54 = vld [vmem:[#allocation49_spill] sm:$0xff] }
 0x613   : > { %v19383_v18 = vpack.c.bf16 %v19381_v54, %v19382_v21 }
 0x619   : > { %12833 = vmatmul.mubr.bf16.vlgmr.msra.gmra.mrb[64].mxu0 %v7180_v0  ;;  %v13958_v0 = vld [vmem:[#allocation7 + $0xe8] sm:$0xff]  }
 0x61a   : > { %12865 = vmatpush3.bf16.msra.mxu0 %v13953_v5  ;;  %12836 = vmatprep.mubr.bf16.mxu0 %v7181_v7  ;;  %v19386_v7 = vld [vmem:[#allocation141_spill] sm:$0xff] }
 0x61b   : > { %12866 = vmatprep.subr.bf16.mxu0 %v13954_v32  ;;  %v19387_v3 = vpack.c.bf16 %v19386_v7, %v19269_v33  ;;  %v13961_v7 = vld [vmem:[#allocation7 + $0x100] sm:$0xff]  }
 0x61e   : > { %12867 = vmatpush3.bf16.msra.mxu0 %v13954_v32  ;;  %v19388_v32 = vld [vmem:[#allocation71_spill] sm:$0xff] }
 0x61f   : > { %12868 = vmatprep.subr.bf16.mxu0 %v13955_v53  ;;  %v19389_v5 = vpack.c.bf16 %v19388_v32, %v19270_v16 }
 0x621   : > { %12837 = vmatmul.mubr.bf16.gmra.mrb[68].mxu0 %v19383_v18  ;;  %v13959_v18 = vld [vmem:[#allocation7 + $0xf0] sm:$0xff]  }
 0x622   : > { %12840 = vmatprep.mubr.bf16.mxu0 %v19385_v47  ;;  %12869 = vmatpush3.bf16.msra.mxu0 %v13955_v53  ;;  %v19390_v53 = vld [vmem:[#allocation144_spill] sm:$0xff] }
 0x623   : > { %12870 = vmatprep.subr.bf16.mxu0 %v13956_v57  ;;  %v19391_v54 = vpack.c.bf16 %v19390_v53, %v19274_v55 }
 0x626   : > { %12871 = vmatpush3.bf16.msra.mxu0 %v13956_v57  ;;  %v19392_v57 = vld [vmem:[#allocation75_spill] sm:$0xff] }
 0x627   : > { %12872 = vmatprep.subr.bf16.mxu0 %v13957_v6  ;;  %v19393_v47 = vpack.c.bf16 %v19392_v57, %v19279_v35 }
 0x629   : > { %12841 = vmatmul.mubr.bf16.gmra.mrb[72].mxu0 %v19387_v3  ;;  %v19394_v3 = vld [vmem:[#allocation79_spill] sm:$0xff] }
 0x62a   : > { %12844 = vmatprep.mubr.bf16.mxu0 %v19389_v5  ;;  %12873 = vmatpush3.bf16.msra.mxu0 %v13957_v6  ;;  %v19395_v6 = vpack.c.bf16 %v19394_v3, %v16930_v14  ;;  %v19398_v5 = vld [vmem:[#allocation85_spill] sm:$0xff] }
 0x62b   : > { %12874 = vmatprep.subr.bf16.mxu0 %v13958_v0  ;;  %v19399_v53 = vpack.c.bf16 %v19398_v5, %v17028_v46 }
 0x62e   : > { %12875 = vmatpush3.bf16.msra.mxu0 %v13958_v0  ;;  %v19396_v0 = vld [vmem:[#allocation150_spill] sm:$0xff] }
 0x62f   : > { %12876 = vmatprep.subr.bf16.mxu0 %v13959_v18  ;;  %v19397_v32 = vpack.c.bf16 %v19396_v0, %v17004_v39 }
 0x631   : > { %12845 = vmatmul.mubr.bf16.gmra.mrb[76].mxu0 %v19391_v54  ;;  %v19400_v54 = vld [vmem:[#allocation151_spill] sm:$0xff] }
 0x632   : > { %12848 = vmatprep.mubr.bf16.mxu0 %v19393_v47  ;;  %12877 = vmatpush3.bf16.msra.mxu0 %v13959_v18  ;;  %v19401_v57 = vpack.c.bf16 %v19400_v54, %v17048_v59  ;;  %v19402_v18 = vld [vmem:[#allocation91_spill] sm:$0xff]  ;;  %v19404_v47 = vld [vmem:[#allocation152_spill] sm:$0xff] }
 0x633   : > { %12878 = vmatprep.subr.bf16.mxu0 %v13960_v12  ;;  %v19405_v3 = vpack.c.bf16 %v19404_v47, %v17094_v62 }
 0x636   : > { %12879 = vmatpush3.bf16.msra.mxu0 %v13960_v12  ;;  %v19403_v12 = vpack.c.bf16 %v19402_v18, %v17070_v19  ;;  %v19413_v18 = vld [vmem:[#allocation89_spill] sm:$0xff] }
 0x637   : > { %12912 = vmatprep.subr.bf16.mxu0 %v13961_v7 }
 0x639   : > { %12849 = vmatmul.mubr.bf16.gmra.mrb[80].mxu0 %v19395_v6  ;;  %v19406_v6 = vld [vmem:[#allocation153_spill] sm:$0xff] }
 0x63a   : > { %12852 = vmatprep.mubr.bf16.mxu0 %v19397_v32  ;;  %v19407_v0 = vpack.c.bf16 %v19406_v6, %v17110_v43  ;;  %v19408_v32 = vld [vmem:[#allocation154_spill] sm:$0xff] }
 0x63b   : > { %v19409_v5 = vpack.c.bf16 %v19311_v45, %v19408_v32  ;;  %v19417_v6 = vld [vmem:[#allocation26_spill] sm:$0xff]  ;;  %v19419_v45 = vld [vmem:[#allocation27_spill] sm:$0xff] }
 0x63c   : > { %v7621_v32 = vmul.f32 %v19419_v45, %v19418_v61  ;;  %v13966_v45 = vld [vmem:[#allocation7 + $0x128] sm:$0xff]  }
 0x641   : > { %12853 = vmatmul.mubr.bf16.gmra.mrb[84].mxu0 %v19399_v53  ;;  %v19410_v53 = vld [vmem:[#allocation62_spill] sm:$0xff] }
 0x642   : > { %12856 = vmatprep.mubr.bf16.mxu0 %v19401_v57  ;;  %v7615_v54 = vmul.f32 %v19411_v38, %v19410_v53  ;;  %v19412_v57 = vld [vmem:[#allocation126_spill] sm:$0xff] }
 0x644   : > { %v7646_v52 = vpack.c.bf16 %v19412_v57, %v7615_v54  ;;  %v13964_v54 = vld [vmem:[#allocation7 + $0x118] sm:$0xff]  }
 0x645   : > { %v19421_v57 = vld [vmem:[#allocation132_spill] sm:$0xff] }
 0x649   : > { %12857 = vmatmul.mubr.bf16.gmra.mrb[88].mxu0 %v19403_v12  ;;  %v19414_v12 = vld [vmem:[#allocation155_spill] sm:$0xff] }
 0x64a   : > { %12860 = vmatprep.mubr.bf16.mxu0 %v19405_v3  ;;  %v19415_v47 = vpack.c.bf16 %v19413_v18, %v19414_v12  ;;  %v19416_v3 = vld [vmem:[#allocation94_spill] sm:$0xff] }
 0x651   : > { %12861 = vmatmul.mubr.bf16.gmra.mrb[92].mxu0 %v19407_v0  ;;  %v7619_v0 = vmul.f32 %v19417_v6, %v19416_v3  ;;  %v19423_v6 = vld [vmem:[#allocation120_spill] sm:$0xff] }
 0x652   : > { %12880 = vmatprep.mubr.bf16.mxu0 %v19409_v5  ;;  %v19420_v5 = vld [vmem:[#allocation83_spill] sm:$0xff] }
 0x653   : > { %v7648_v38 = vpack.c.bf16 %v19420_v5, %v7619_v0 }
 0x659   : > { %12881 = vmatmul.mubr.bf16.vlgmr.msra.gmra.mrb[64].mxu0 %v7646_v52  ;;  %v7649_v52 = vpack.c.bf16 %v19421_v57, %v7621_v32  ;;  %v13967_v32 = vld [vmem:[#allocation7 + $0x130] sm:$0xff]  }
 0x65a   : > { %12913 = vmatpush3.bf16.msra.mxu0 %v13961_v7  ;;  %12884 = vmatprep.mubr.bf16.mxu0 %v19415_v47  ;;  %v19422_v7 = vld [vmem:[#allocation133_spill] sm:$0xff] }
 0x65b   : > { %12914 = vmatprep.subr.bf16.mxu0 %v13962_v27  ;;  %v7623_v12 = vmul.f32 %v19226_v58, %v19422_v7  ;;  %v13965_v47 = vld [vmem:[#allocation7 + $0x120] sm:$0xff]  }
 0x65c   : > { %v19426_v58 = vld [vmem:[#allocation157_spill] sm:$0xff] }
 0x65d   : > { %v7650_v18 = vpack.c.bf16 %v19423_v6, %v7623_v12  ;;  %v19430_v12 = vld [vmem:[#allocation158_spill] sm:$0xff] }
 0x65e   : > { %12915 = vmatpush3.bf16.msra.mxu0 %v13962_v27  ;;  %v19424_v27 = vld [vmem:[#allocation156_spill] sm:$0xff] }
 0x65f   : > { %12916 = vmatprep.subr.bf16.mxu0 %v13963_v13  ;;  %v19425_v0 = vpack.c.bf16 %v16612_v37, %v19424_v27 }
 0x661   : > { %12885 = vmatmul.mubr.bf16.gmra.mrb[68].mxu0 %v7648_v38  ;;  %v19427_v38 = vpack.c.bf16 %v16605_v17, %v19426_v58 }
 0x662   : > { %12888 = vmatprep.mubr.bf16.mxu0 %v7649_v52  ;;  %12917 = vmatpush3.bf16.msra.mxu0 %v13963_v13  ;;  %v13968_v13 = vld [vmem:[#allocation7 + $0x138] sm:$0xff]  }
 0x663   : > { %12918 = vmatprep.subr.bf16.mxu0 %v13964_v54 }
 0x666   : > { %12919 = vmatpush3.bf16.msra.mxu0 %v13964_v54  ;;  %v19428_v54 = vld [vmem:[#allocation82_spill] sm:$0xff] }
 0x667   : > { %12920 = vmatprep.subr.bf16.mxu0 %v13965_v47  ;;  %v19429_v52 = vpack.c.bf16 %v19237_v42, %v19428_v54 }
 0x669   : > { %12889 = vmatmul.mubr.bf16.gmra.mrb[72].mxu0 %v7650_v18  ;;  %v13969_v18 = vld [vmem:[#allocation7 + $0x140] sm:$0xff]  }
 0x66a   : > { %12892 = vmatprep.mubr.bf16.mxu0 %v19425_v0  ;;  %12921 = vmatpush3.bf16.msra.mxu0 %v13965_v47  ;;  %v19431_v47 = vpack.c.bf16 %v19308_v50, %v19430_v12  ;;  %v19434_v0 = vld [vmem:[#allocation50_spill] sm:$0xff] }
 0x66b   : > { %12922 = vmatprep.subr.bf16.mxu0 %v13966_v45  ;;  %v19435_v58 = vpack.c.bf16 %v19310_v31, %v19434_v0  ;;  %v13971_v0 = vld [vmem:[#allocation7 + $0x150] sm:$0xff]  }
 0x66e   : > { %12923 = vmatpush3.bf16.msra.mxu0 %v13966_v45  ;;  %v19432_v45 = vld [vmem:[#allocation128_spill] sm:$0xff] }
 0x66f   : > { %12924 = vmatprep.subr.bf16.mxu0 %v13967_v32  ;;  %v19433_v27 = vpack.c.bf16 %v19309_v4, %v19432_v45 }
 0x671   : > { %12893 = vmatmul.mubr.bf16.gmra.mrb[76].mxu0 %v19427_v38  ;;  %v19436_v38 = vld [vmem:[#allocation48_spill] sm:$0xff] }
 0x672   : > { %12896 = vmatprep.mubr.bf16.mxu0 %v19429_v52  ;;  %12925 = vmatpush3.bf16.msra.mxu0 %v13967_v32  ;;  %v19437_v54 = vpack.c.bf16 %v19313_v28, %v19436_v38  ;;  %v19438_v32 = vld [vmem:[#allocation47_spill] sm:$0xff]  ;;  %v19440_v52 = vld [vmem:[#allocation84_spill] sm:$0xff]  ;;  %v13973_v38 = vld [vmem:[#allocation7 + $0x160] sm:$0xff]  }
 0x673   : > { %12926 = vmatprep.subr.bf16.mxu0 %v13968_v13  ;;  %v19441_v12 = vpack.c.bf16 %v19315_v48, %v19440_v52 }
 0x676   : > { %12927 = vmatpush3.bf16.msra.mxu0 %v13968_v13  ;;  %v19439_v13 = vpack.c.bf16 %v19314_v56, %v19438_v32  ;;  %v13977_v32 = vld [vmem:[#allocation7 + $0x180] sm:$0xff]  }
 0x677   : > { %12960 = vmatprep.subr.bf16.mxu0 %v13969_v18 }
 0x679   : > { %12897 = vmatmul.mubr.bf16.gmra.mrb[80].mxu0 %v19431_v47  ;;  %v19442_v47 = vld [vmem:[#allocation88_spill] sm:$0xff] }
 0x67a   : > { %12900 = vmatprep.mubr.bf16.mxu0 %v19433_v27  ;;  %v19443_v45 = vpack.c.bf16 %v19316_v26, %v19442_v47  ;;  %v13970_v27 = vld [vmem:[#allocation7 + $0x148] sm:$0xff]  }
 0x67b   : > { %v19445_v47 = vld [vmem:[#allocation102_spill] sm:$0xff] }
 0x681   : > { %12901 = vmatmul.mubr.bf16.gmra.mrb[84].mxu0 %v19435_v58  ;;  %v13972_v58 = vld [vmem:[#allocation7 + $0x158] sm:$0xff]  }
 0x682   : > { %12904 = vmatprep.mubr.bf16.mxu0 %v19437_v54  ;;  %v13976_v54 = vld [vmem:[#allocation7 + $0x178] sm:$0xff]  }
 0x689   : > { %12905 = vmatmul.mubr.bf16.gmra.mrb[88].mxu0 %v19439_v13  ;;  %v19444_v13 = vld [vmem:[#allocation104_spill] sm:$0xff] }
 0x68a   : > { %12908 = vmatprep.mubr.bf16.mxu0 %v19441_v12  ;;  %v8450_v52 = vmul.f32 %v19444_v13, %v19376_v23  ;;  %v13986_v23 = vld [vmem:[#allocation7 + $0x1c8] sm:$0xff]  }
 0x68c   : > { %v8481_v12 = vpack.c.bf16 %v8450_v52, %v19379_v8  ;;  %v19477_v8 = vld [vmem:[#allocation77_spill] sm:$0xff] }
 0x691   : > { %12909 = vmatmul.mubr.bf16.gmra.mrb[92].mxu0 %v19443_v45  ;;  %v8452_v45 = vmul.f32 %v19377_v15, %v19378_v1 }
 0x692   : > { %12928 = vmatprep.mubr.bf16.mxu0 %v19358_v2  ;;  %v13974_v2 = vld [vmem:[#allocation7 + $0x168] sm:$0xff]  }
 0x699   : > { %12929 = vmatmul.mubr.bf16.vlgmr.msra.gmra.mrb[64].mxu0 %v19359_v10 }
 0x69a   : > { %12961 = vmatpush3.bf16.msra.mxu0 %v13969_v18  ;;  %12932 = vmatprep.mubr.bf16.mxu0 %v19360_v44  ;;  %v13975_v18 = vld [vmem:[#allocation7 + $0x170] sm:$0xff]  }
 0x69b   : > { %12962 = vmatprep.subr.bf16.mxu0 %v13970_v27 }
 0x69e   : > { %12963 = vmatpush3.bf16.msra.mxu0 %v13970_v27  ;;  %v8482_v27 = vpack.c.bf16 %v8452_v45, %v19380_v36  ;;  %v13982_v45 = vld [vmem:[#allocation7 + $0x1a8] sm:$0xff]  }
 0x69f   : > { %12964 = vmatprep.subr.bf16.mxu0 %v13971_v0 }
 0x6a1   : > { %12933 = vmatmul.mubr.bf16.gmra.mrb[68].mxu0 %v19361_v51 }
 0x6a2   : > { %12936 = vmatprep.mubr.bf16.mxu0 %v19362_v40  ;;  %12965 = vmatpush3.bf16.msra.mxu0 %v13971_v0  ;;  %v13978_v0 = vld [vmem:[#allocation7 + $0x188] sm:$0xff]  }
 0x6a3   : > { %12966 = vmatprep.subr.bf16.mxu0 %v13972_v58 }
 0x6a6   : > { %12967 = vmatpush3.bf16.msra.mxu0 %v13972_v58  ;;  %v19446_v58 = vld [vmem:[#allocation107_spill] sm:$0xff] }
 0x6a7   : > { %12968 = vmatprep.subr.bf16.mxu0 %v13973_v38 }
 0x6a9   : > { %12937 = vmatmul.mubr.bf16.gmra.mrb[72].mxu0 %v19363_v9 }
 0x6aa   : > { %12940 = vmatprep.mubr.bf16.mxu0 %v19364_v30  ;;  %12969 = vmatpush3.bf16.msra.mxu0 %v13973_v38  ;;  %v19447_v38 = vpack.c.bf16 %v19446_v58, %v19382_v21 }
 0x6ab   : > { %12970 = vmatprep.subr.bf16.mxu0 %v13974_v2 }
 0x6ae   : > { %12971 = vmatpush3.bf16.msra.mxu0 %v13974_v2  ;;  %v13979_v2 = vld [vmem:[#allocation7 + $0x190] sm:$0xff]  }
 0x6af   : > { %12972 = vmatprep.subr.bf16.mxu0 %v13975_v18 }
 0x6b1   : > { %12941 = vmatmul.mubr.bf16.gmra.mrb[76].mxu0 %v19365_v49 }
 0x6b2   : > { %12944 = vmatprep.mubr.bf16.mxu0 %v19366_v20  ;;  %12973 = vmatpush3.bf16.msra.mxu0 %v13975_v18  ;;  %v13980_v18 = vld [vmem:[#allocation7 + $0x198] sm:$0xff]  }
 0x6b3   : > { %12974 = vmatprep.subr.bf16.mxu0 %v13976_v54 }
 0x6b6   : > { %12975 = vmatpush3.bf16.msra.mxu0 %v13976_v54  ;;  %v19448_v54 = vld [vmem:[#allocation113_spill] sm:$0xff] }
 0x6b7   : > { %13008 = vmatprep.subr.bf16.mxu0 %v13977_v32  ;;  %v19449_v52 = vpack.c.bf16 %v19448_v54, %v19268_v63  ;;  %v13983_v54 = vld [vmem:[#allocation7 + $0x1b0] sm:$0xff]  }
 0x6b9   : > { %12945 = vmatmul.mubr.bf16.gmra.mrb[80].mxu0 %v19367_v34 }
 0x6ba   : > { %12948 = vmatprep.mubr.bf16.mxu0 %v19368_v11 }
 0x6c1   : > { %12949 = vmatmul.mubr.bf16.gmra.mrb[84].mxu0 %v19369_v29 }
 0x6c2   : > { %12952 = vmatprep.mubr.bf16.mxu0 %v19370_v24 }
 0x6c9   : > { %12953 = vmatmul.mubr.bf16.gmra.mrb[88].mxu0 %v19371_v25 }
 0x6ca   : > { %12956 = vmatprep.mubr.bf16.mxu0 %v19372_v22 }
 0x6d1   : > { %12957 = vmatmul.mubr.bf16.gmra.mrb[92].mxu0 %v19445_v47 }
 0x6d2   : > { %12976 = vmatprep.mubr.bf16.mxu0 %v8481_v12  ;;  %v19450_v12 = vld [vmem:[#allocation118_spill] sm:$0xff] }
 0x6d3   : > { %v19451_v15 = vpack.c.bf16 %v19450_v12, %v19269_v33 }
 0x6d9   : > { %12977 = vmatmul.mubr.bf16.vlgmr.msra.gmra.mrb[64].mxu0 %v8482_v27  ;;  %v19452_v27 = vld [vmem:[#allocation124_spill] sm:$0xff] }
 0x6da   : > { %13009 = vmatpush3.bf16.msra.mxu0 %v13977_v32  ;;  %12980 = vmatprep.mubr.bf16.mxu0 %v19447_v38  ;;  %v13981_v32 = vld [vmem:[#allocation7 + $0x1a0] sm:$0xff]   ;;  %v19453_v58 = vpack.c.bf16 %v19452_v27, %v19270_v16 }
 0x6db   : > { %13010 = vmatprep.subr.bf16.mxu0 %v13978_v0 }
 0x6de   : > { %13011 = vmatpush3.bf16.msra.mxu0 %v13978_v0  ;;  %v19454_v0 = vld [vmem:[#allocation87_spill] sm:$0xff] }
 0x6df   : > { %13012 = vmatprep.subr.bf16.mxu0 %v13979_v2  ;;  %v19455_v38 = vpack.c.bf16 %v19454_v0, %v19274_v55 }
 0x6e1   : > { %12981 = vmatmul.mubr.bf16.gmra.mrb[68].mxu0 %v19449_v52  ;;  %v13984_v52 = vld [vmem:[#allocation7 + $0x1b8] sm:$0xff]  }
 0x6e2   : > { %12984 = vmatprep.mubr.bf16.mxu0 %v19451_v15  ;;  %13013 = vmatpush3.bf16.msra.mxu0 %v13979_v2  ;;  %v19456_v2 = vld [vmem:[#allocation95_spill] sm:$0xff]  ;;  %v13985_v15 = vld [vmem:[#allocation7 + $0x1c0] sm:$0xff]  }
 0x6e3   : > { %13014 = vmatprep.subr.bf16.mxu0 %v13980_v18  ;;  %v19457_v12 = vpack.c.bf16 %v19456_v2, %v19279_v35  ;;  %v19468_v2 = vld [vmem:[#allocation93_spill] sm:$0xff] }
 0x6e6   : > { %13015 = vmatpush3.bf16.msra.mxu0 %v13980_v18  ;;  %v19458_v18 = vpack.c.bf16 %v17243_v60, %v16930_v14 }
 0x6e7   : > { %13016 = vmatprep.subr.bf16.mxu0 %v13981_v32 }
 0x6e9   : > { %12985 = vmatmul.mubr.bf16.gmra.mrb[72].mxu0 %v19453_v58  ;;  %v19462_v58 = vld [vmem:[#allocation159_spill] sm:$0xff] }
 0x6ea   : > { %12988 = vmatprep.mubr.bf16.mxu0 %v19455_v38  ;;  %13017 = vmatpush3.bf16.msra.mxu0 %v13981_v32  ;;  %v19459_v32 = vpack.c.bf16 %v17247_v41, %v17004_v39  ;;  %v19463_v0 = vpack.c.bf16 %v19462_v58, %v17048_v59  ;;  %v19464_v38 = vld [vmem:[#allocation160_spill] sm:$0xff]  ;;  %v19469_v41 = vpack.c.bf16 %v19468_v2, %v17110_v43 }
 0x6eb   : > { %13018 = vmatprep.subr.bf16.mxu0 %v13982_v45  ;;  %v19465_v60 = vpack.c.bf16 %v19464_v38, %v17070_v19  ;;  %v19473_v58 = vld [vmem:[#allocation76_spill] sm:$0xff]  ;;  %v19475_v38 = vld [vmem:[#allocation25_spill] sm:$0xff] }
 0x6ee   : > { %13019 = vmatpush3.bf16.msra.mxu0 %v13982_v45  ;;  %v19460_v45 = vld [vmem:[#allocation109_spill] sm:$0xff] }
 0x6ef   : > { %13020 = vmatprep.subr.bf16.mxu0 %v13983_v54  ;;  %v19461_v27 = vpack.c.bf16 %v19460_v45, %v17028_v46 }
 0x6f1   : > { %12989 = vmatmul.mubr.bf16.gmra.mrb[76].mxu0 %v19457_v12  ;;  %v19470_v12 = vld [vmem:[#allocation98_spill] sm:$0xff] }
 0x6f2   : > { %12992 = vmatprep.mubr.bf16.mxu0 %v19458_v18  ;;  %13021 = vmatpush3.bf16.msra.mxu0 %v13983_v54  ;;  %v19466_v54 = vld [vmem:[#allocation161_spill] sm:$0xff]  ;;  %v8915_v18 = vmul.f32 %v19470_v12, %v19410_v53  ;;  %v19479_v53 = vld [vmem:[#allocation26_spill] sm:$0xff]  ;;  %v13987_v12 = vld [vmem:[#allocation7 + $0x1d0] sm:$0xff]  }
 0x6f3   : > { %13022 = vmatprep.subr.bf16.mxu0 %v13984_v52 }
 0x6f6   : > { %13023 = vmatpush3.bf16.msra.mxu0 %v13984_v52  ;;  %v19467_v52 = vpack.c.bf16 %v19466_v54, %v17094_v62 }
 0x6f7   : > { %13056 = vmatprep.subr.bf16.mxu0 %v13985_v15 }
 0x6f9   : > { %12993 = vmatmul.mubr.bf16.gmra.mrb[80].mxu0 %v19459_v32  ;;  %v19471_v32 = vld [vmem:[#allocation126_spill] sm:$0xff] }
 0x6fa   : > { %12996 = vmatprep.mubr.bf16.mxu0 %v19461_v27  ;;  %v8947_v45 = vpack.c.bf16 %v19471_v32, %v8915_v18  ;;  %v19472_v27 = vld [vmem:[#allocation30_spill] sm:$0xff]  ;;  %v19480_v18 = vld [vmem:[#allocation27_spill] sm:$0xff] }
 0x6fb   : > { %v8923_v32 = vmul.f32 %v19480_v18, %v19422_v7  ;;  %v19497_v18 = vld [vmem:[#allocation139_spill] sm:$0xff] }
 0x701   : > { %12997 = vmatmul.mubr.bf16.gmra.mrb[84].mxu0 %v19463_v0  ;;  %v19474_v0 = vpack.c.bf16 %v19472_v27, %v19473_v58 }
 0x702   : > { %13000 = vmatprep.mubr.bf16.mxu0 %v19465_v60  ;;  %v8919_v60 = vmul.f32 %v19475_v38, %v19416_v3 }
 0x704   : > { %v8949_v54 = vpack.c.bf16 %v19420_v5, %v8919_v60  ;;  %v8951_v5 = vpack.c.bf16 %v19423_v6, %v8923_v32  ;;  %v13992_v6 = vld [vmem:[#allocation7 + $0x1f8] sm:$0xff]   ;;  %v19487_v60 = vld [vmem:[#allocation66_spill] sm:$0xff]  ;;  %v19498_v32 = vpack.c.bf16 %v19315_v48, %v19497_v18  ;;  %v17706_v48 = vld [vmem:[#allocation9 + $0x10] sm:$0xff]  }
 0x709   : > { %13001 = vmatmul.mubr.bf16.gmra.mrb[88].mxu0 %v19467_v52  ;;  %v19476_v52 = vld [vmem:[#allocation89_spill] sm:$0xff] }
 0x70a   : > { %13004 = vmatprep.mubr.bf16.mxu0 %v19469_v41  ;;  %v19478_v2 = vpack.c.bf16 %v19476_v52, %v19477_v8  ;;  %v8921_v41 = vmul.f32 %v19479_v53, %v19418_v61  ;;  %v13989_v8 = vld [vmem:[#allocation7 + $0x1e0] sm:$0xff]   ;;  %v19481_v61 = vld [vmem:[#allocation31_spill] sm:$0xff] }
 0x70b   : > { %v19482_v27 = vpack.c.bf16 %v16612_v37, %v19481_v61  ;;  %v13993_v37 = vld [vmem:[#allocation7 + $0x200] sm:$0xff]  }
 0x70c   : > { %v8950_v3 = vpack.c.bf16 %v19421_v57, %v8921_v41  ;;  %v13991_v57 = vld [vmem:[#allocation7 + $0x1f0] sm:$0xff]   ;;  %v14005_v61 = vld [vmem:[#allocation9 + $0x20] sm:$0xff]  }
 0x711   : > { %13005 = vmatmul.mubr.bf16.gmra.mrb[92].mxu0 %v19474_v0  ;;  %v19485_v0 = vld [vmem:[#allocation45_spill] sm:$0xff] }
 0x712   : > { %13024 = vmatprep.mubr.bf16.mxu0 %v8947_v45  ;;  %v13988_v45 = vld [vmem:[#allocation7 + $0x1d8] sm:$0xff]   ;;  %v19486_v38 = vpack.c.bf16 %v19237_v42, %v19485_v0 }
 0x713   : > { %v19493_v42 = vld [vmem:[#allocation140_spill] sm:$0xff] }
 0x714   : > { %v19494_v41 = vpack.c.bf16 %v19313_v28, %v19493_v42  ;;  %v17702_v28 = vld [vmem:[#allocation9 + $0x8] sm:$0xff]  }
 0x719   : > { %13025 = vmatmul.mubr.bf16.vlgmr.msra.gmra.mrb[64].mxu0 %v19478_v2  ;;  %v19491_v2 = vld [vmem:[#allocation28_spill] sm:$0xff] }
 0x71a   : > { %13057 = vmatpush3.bf16.msra.mxu0 %v13985_v15  ;;  %13028 = vmatprep.mubr.bf16.mxu0 %v8949_v54  ;;  %v13990_v15 = vld [vmem:[#allocation7 + $0x1e8] sm:$0xff]   ;;  %v19488_v54 = vpack.c.bf16 %v19308_v50, %v19487_v60  ;;  %v19492_v53 = vpack.c.bf16 %v19310_v31, %v19491_v2  ;;  %v19495_v50 = vld [vmem:[#allocation37_spill] sm:$0xff] }
 0x71b   : > { %13058 = vmatprep.subr.bf16.mxu0 %v13986_v23  ;;  %v19525_v60 = vld [vmem:[#allocation149_spill] sm:$0xff]  ;;  %v19533_v2 = vld [vmem:[#allocation131_spill] sm:$0xff] }
 0x71e   : > { %13059 = vmatpush3.bf16.msra.mxu0 %v13986_v23  ;;  %v19483_v23 = vld [vmem:[#allocation32_spill] sm:$0xff] }
 0x71f   : > { %13060 = vmatprep.subr.bf16.mxu0 %v13987_v12  ;;  %v19484_v7 = vpack.c.bf16 %v16605_v17, %v19483_v23  ;;  %v19489_v17 = vld [vmem:[#allocation67_spill] sm:$0xff] }
 0x720   : > { %v19490_v52 = vpack.c.bf16 %v19309_v4, %v19489_v17  ;;  %v14007_v23 = vld [vmem:[#allocation9 + $0x30] sm:$0xff]  }
 0x721   : > { %13029 = vmatmul.mubr.bf16.gmra.mrb[68].mxu0 %v8950_v3  ;;  %v19499_v3 = vld [vmem:[#allocation42_spill] sm:$0xff]  ;;  %v19529_v17 = vld [vmem:[#allocation44_spill] sm:$0xff] }
 0x722   : > { %13032 = vmatprep.mubr.bf16.mxu0 %v8951_v5  ;;  %13061 = vmatpush3.bf16.msra.mxu0 %v13987_v12  ;;  %v19496_v12 = vpack.c.bf16 %v19314_v56, %v19495_v50  ;;  %v19500_v4 = vpack.c.bf16 %v19316_v26, %v19499_v3  ;;  %v19502_v5 = vld [vmem:[#allocation55_spill] sm:$0xff] }
 0x723   : > { %13062 = vmatprep.subr.bf16.mxu0 %v13988_v45  ;;  %v13994_v56 = vld [vmem:[#allocation7 + $0x208] sm:$0xff]   ;;  %v13995_v26 = vld [vmem:[#allocation7 + $0x210] sm:$0xff]  }
 0x726   : > { %13063 = vmatpush3.bf16.msra.mxu0 %v13988_v45  ;;  %v19501_v45 = vld [vmem:[#allocation148_spill] sm:$0xff] }
 0x727   : > { %13064 = vmatprep.subr.bf16.mxu0 %v13989_v8  ;;  %v19503_v31 = vpack.c.bf16 %v19501_v45, %v19502_v5 }
 0x729   : > { %13033 = vmatmul.mubr.bf16.gmra.mrb[72].mxu0 %v19482_v27  ;;  %v13998_v27 = vld [vmem:[#allocation7 + $0x228] sm:$0xff]  }
 0x72a   : > { %13036 = vmatprep.mubr.bf16.mxu0 %v19484_v7  ;;  %13065 = vmatpush3.bf16.msra.mxu0 %v13989_v8  ;;  %v17698_v8 = vld [vmem:[#allocation9] sm:$0xff]  }
 0x72b   : > { %13066 = vmatprep.subr.bf16.mxu0 %v13990_v15  ;;  %13248 = vmatprep.subr.bf16.mxu1 %v17698_v8 }
 0x72c   : > { %13256 = vmatpush3.bf16.msra.mxu1 %v17698_v8 }
 0x72d   : > { %13249 = vmatprep.subr.bf16.mxu1 %v17702_v28 }
 0x72e   : > { %13067 = vmatpush3.bf16.msra.mxu0 %v13990_v15  ;;  %v13996_v15 = vld [vmem:[#allocation7 + $0x218] sm:$0xff]  }
 0x72f   : > { %13068 = vmatprep.subr.bf16.mxu0 %v13991_v57 }
 0x730   : > { %13257 = vmatpush3.bf16.msra.mxu1 %v17702_v28 }
 0x731   : > { %13037 = vmatmul.mubr.bf16.gmra.mrb[76].mxu0 %v19486_v38  ;;  %13250 = vmatprep.subr.bf16.mxu1 %v17706_v48  ;;  %v19523_v38 = vld [vmem:[#allocation74_spill] sm:$0xff] }
 0x732   : > { %13040 = vmatprep.mubr.bf16.mxu0 %v19488_v54  ;;  %13069 = vmatpush3.bf16.msra.mxu0 %v13991_v57  ;;  %v19527_v54 = vld [vmem:[#allocation43_spill] sm:$0xff] }
 0x733   : > { %13070 = vmatprep.subr.bf16.mxu0 %v13992_v6 }
 0x734   : > { %13258 = vmatpush3.bf16.msra.mxu1 %v17706_v48 }
 0x736   : > { %13071 = vmatpush3.bf16.msra.mxu0 %v13992_v6  ;;  %v19521_v6 = vld [vmem:[#allocation41_spill] sm:$0xff] }
 0x737   : > { %13104 = vmatprep.subr.bf16.mxu0 %v13993_v37  ;;  %v19522_v0 = vpack.c.bf16 %v19521_v6, %v17004_v39 }
 0x739   : > { %13041 = vmatmul.mubr.bf16.gmra.mrb[80].mxu0 %v19490_v52  ;;  %v19531_v52 = vld [vmem:[#allocation123_spill] sm:$0xff] }
 0x73a   : > { %13044 = vmatprep.mubr.bf16.mxu0 %v19492_v53  ;;  %v19532_v39 = vpack.c.bf16 %v19531_v52, %v17110_v43  ;;  %v19535_v53 = vld [vmem:[#allocation56_spill] sm:$0xff]  ;;  %v17787_v43 = vld [vmem:[%s18082_s8] ss:$0 sm:$0xff] }
 0x73b   : > { %v9813_v42 = vmul.f32 0.0, %v19535_v53 }
 0x741   : > { %13045 = vmatmul.mubr.bf16.gmra.mrb[84].mxu0 %v19494_v41 }
 0x742   : > { %13048 = vmatprep.mubr.bf16.mxu0 %v19496_v12 }
 0x749   : > { %13049 = vmatmul.mubr.bf16.gmra.mrb[88].mxu0 %v19498_v32 }
 0x74a   : > { %13052 = vmatprep.mubr.bf16.mxu0 %v19500_v4 }
 0x751   : > { %13053 = vmatmul.mubr.bf16.gmra.mrb[92].mxu0 %v19503_v31 }
 0x752   : > { %13072 = vmatprep.mubr.bf16.mxu0 %v19359_v10  ;;  %v14004_v10 = vld [vmem:[#allocation9 + $0x18] sm:$0xff]  }
 0x753   : > { %13251 = vmatprep.subr.bf16.mxu1 %v14004_v10 }
 0x754   : > { %13259 = vmatpush3.bf16.msra.mxu1 %v14004_v10 }
 0x755   : > { %13252 = vmatprep.subr.bf16.mxu1 %v14005_v61 }
 0x758   : > { %13260 = vmatpush3.bf16.msra.mxu1 %v14005_v61 }
 0x759   : > { %13073 = vmatmul.mubr.bf16.vlgmr.msra.gmra.mrb[64].mxu0 %v19360_v44  ;;  %v13997_v44 = vld [vmem:[#allocation7 + $0x220] sm:$0xff]  }
 0x75a   : > { %13105 = vmatpush3.bf16.msra.mxu0 %v13993_v37  ;;  %13076 = vmatprep.mubr.bf16.mxu0 %v19361_v51  ;;  %v14006_v51 = vld [vmem:[#allocation9 + $0x28] sm:$0xff]   ;;  %v19528_v37 = vpack.c.bf16 %v19527_v54, %v17070_v19  ;;  %v14008_v19 = vld [vmem:[#allocation9 + $0x38] sm:$0xff]  }
 0x75b   : > { %13106 = vmatprep.subr.bf16.mxu0 %v13994_v56  ;;  %13253 = vmatprep.subr.bf16.mxu1 %v14006_v51 }
 0x75c   : > { %13261 = vmatpush3.bf16.msra.mxu1 %v14006_v51 }
 0x75d   : > { %13254 = vmatprep.subr.bf16.mxu1 %v14007_v23 }
 0x75e   : > { %13107 = vmatpush3.bf16.msra.mxu0 %v13994_v56 }
 0x75f   : > { %13108 = vmatprep.subr.bf16.mxu0 %v13995_v26 }
 0x760   : > { %13262 = vmatpush3.bf16.msra.mxu1 %v14007_v23 }
 0x761   : > { %13077 = vmatmul.mubr.bf16.gmra.mrb[68].mxu0 %v19362_v40  ;;  %v13999_v40 = vld [vmem:[#allocation7 + $0x230] sm:$0xff]   ;;  %13255 = vmatprep.subr.bf16.mxu1 %v14008_v19 }
 0x762   : > { %13080 = vmatprep.mubr.bf16.mxu0 %v19363_v9  ;;  %13109 = vmatpush3.bf16.msra.mxu0 %v13995_v26  ;;  %v14000_v9 = vld [vmem:[#allocation7 + $0x238] sm:$0xff]  }
 0x763   : > { %13110 = vmatprep.subr.bf16.mxu0 %v13996_v15 }
 0x764   : > { %13263 = vmatpush3.bf16.msra.mxu1 %v14008_v19 }
 0x766   : > { %13111 = vmatpush3.bf16.msra.mxu0 %v13996_v15 }
 0x767   : > { %13112 = vmatprep.subr.bf16.mxu0 %v13997_v44 }
 0x769   : > { %13081 = vmatmul.mubr.bf16.gmra.mrb[72].mxu0 %v19364_v30 }
 0x76a   : > { %13084 = vmatprep.mubr.bf16.mxu0 %v19365_v49  ;;  %13113 = vmatpush3.bf16.msra.mxu0 %v13997_v44  ;;  %v19504_v49 = vld [vmem:[#allocation36_spill] sm:$0xff] }
 0x76b   : > { %13114 = vmatprep.subr.bf16.mxu0 %v13998_v27 }
 0x76e   : > { %13115 = vmatpush3.bf16.msra.mxu0 %v13998_v27 }
 0x76f   : > { %13116 = vmatprep.subr.bf16.mxu0 %v13999_v40 }
 0x771   : > { %13085 = vmatmul.mubr.bf16.gmra.mrb[76].mxu0 %v19366_v20  ;;  %v19505_v20 = vld [vmem:[#allocation33_spill] sm:$0xff] }
 0x772   : > { %13088 = vmatprep.mubr.bf16.mxu0 %v19367_v34  ;;  %13117 = vmatpush3.bf16.msra.mxu0 %v13999_v40  ;;  %v9784_v34 = vmul.f32 %v19444_v13, %v19378_v1  ;;  %v19506_v7 = vpack.c.bf16 %v19504_v49, %v19505_v20  ;;  %v19513_v1 = vld [vmem:[#allocation114_spill] sm:$0xff] }
 0x773   : > { %13118 = vmatprep.subr.bf16.mxu0 %v14000_v9 }
 0x774   : > { %v9815_v30 = vpack.c.bf16 %v9784_v34, %v19380_v36 }
 0x776   : > { %13119 = vmatpush3.bf16.msra.mxu0 %v14000_v9 }
 0x777   : > { %13152 = vmatprep.subr.bf16.mxu0 %v17698_v8 }
 0x779   : > { %13089 = vmatmul.mubr.bf16.gmra.mrb[80].mxu0 %v19368_v11  ;;  %v19507_v11 = vld [vmem:[#allocation81_spill] sm:$0xff] }
 0x77a   : > { %13092 = vmatprep.mubr.bf16.mxu0 %v19369_v29  ;;  %v19508_v29 = vpack.c.bf16 %v19507_v11, %v19382_v21  ;;  %v19514_v21 = vpack.c.bf16 %v19513_v1, %v19270_v16 }
 0x781   : > { %13093 = vmatmul.mubr.bf16.gmra.mrb[84].mxu0 %v19370_v24  ;;  %v19509_v24 = vld [vmem:[#allocation90_spill] sm:$0xff] }
 0x782   : > { %13096 = vmatprep.mubr.bf16.mxu0 %v19371_v25  ;;  %v19510_v25 = vpack.c.bf16 %v19509_v24, %v19268_v63  ;;  %v19515_v63 = vld [vmem:[#allocation138_spill] sm:$0xff] }
 0x783   : > { %v19516_v13 = vpack.c.bf16 %v19515_v63, %v19274_v55  ;;  %v19524_v55 = vpack.c.bf16 %v19523_v38, %v17028_v46  ;;  %v19534_v46 = vpack.c.bf16 %v19533_v2, %v19473_v58 }
 0x789   : > { %13097 = vmatmul.mubr.bf16.gmra.mrb[88].mxu0 %v19372_v22  ;;  %v19511_v22 = vld [vmem:[#allocation52_spill] sm:$0xff] }
 0x78a   : > { %13100 = vmatprep.mubr.bf16.mxu0 %v19445_v47  ;;  %v19512_v36 = vpack.c.bf16 %v19511_v22, %v19269_v33  ;;  %v19517_v47 = vld [vmem:[#allocation142_spill] sm:$0xff]  ;;  %v19519_v33 = vld [vmem:[#allocation60_spill] sm:$0xff] }
 0x78b   : > { %v19518_v57 = vpack.c.bf16 %v19517_v47, %v19279_v35  ;;  %v19520_v16 = vpack.c.bf16 %v19519_v33, %v16930_v14  ;;  %v19526_v35 = vpack.c.bf16 %v19525_v60, %v17048_v59  ;;  %v19530_v14 = vpack.c.bf16 %v19529_v17, %v17094_v62  ;;  %v19536_v59 = vld [vmem:[#allocation51_spill] sm:$0xff]  ;;  %v14009_v62 = vld [vmem:[%s18085_s11] sm:$0xff]  }
 0x78c   : > { %v9814_v41 = vmul.f32 0.0, %v19536_v59  ;;  %13200 = vmatprep.subr.bf16.mxu1 %v14009_v62 }
 0x78e   : > { %v9830_v50 = vpack.c.bf16 %v9814_v41, %v9813_v42 }
 0x791   : > { %13101 = vmatmul.mubr.bf16.gmra.mrb[92].mxu0 %v19506_v7 }
 0x792   : > { %13120 = vmatprep.mubr.bf16.mxu0 %v9815_v30 }
 0x799   : > { %13121 = vmatmul.mubr.bf16.vlgmr.msra.gmra.mrb[64].mxu0 %v19508_v29 }
 0x79a   : > { %13124 = vmatprep.mubr.bf16.mxu0 %v19510_v25  ;;  %13153 = vmatpush3.bf16.msra.mxu0 %v17698_v8  ;;  %v14010_v25 = vld [vmem:[%s18085_s11 + $0x8] sm:$0xff]  }
 0x79b   : > { %13154 = vmatprep.subr.bf16.mxu0 %v17702_v28 }
 0x79e   : > { %13155 = vmatpush3.bf16.msra.mxu0 %v17702_v28 }
 0x79f   : > { %13156 = vmatprep.subr.bf16.mxu0 %v17706_v48 }
 0x7a1   : > { %13125 = vmatmul.mubr.bf16.gmra.mrb[68].mxu0 %v19512_v36 }
 0x7a2   : > { %13128 = vmatprep.mubr.bf16.mxu0 %v19514_v21  ;;  %13157 = vmatpush3.bf16.msra.mxu0 %v17706_v48 }
 0x7a3   : > { %13158 = vmatprep.subr.bf16.mxu0 %v14004_v10 }
 0x7a6   : > { %13159 = vmatpush3.bf16.msra.mxu0 %v14004_v10 }
 0x7a7   : > { %13160 = vmatprep.subr.bf16.mxu0 %v14005_v61 }
 0x7a9   : > { %13129 = vmatmul.mubr.bf16.gmra.mrb[72].mxu0 %v19516_v13 }
 0x7aa   : > { %13132 = vmatprep.mubr.bf16.mxu0 %v19518_v57  ;;  %13161 = vmatpush3.bf16.msra.mxu0 %v14005_v61  ;;  %v14011_v57 = vld [vmem:[%s18085_s11 + $0x10] sm:$0xff]  }
 0x7ab   : > { %13162 = vmatprep.subr.bf16.mxu0 %v14006_v51 }
 0x7ae   : > { %13163 = vmatpush3.bf16.msra.mxu0 %v14006_v51 }
 0x7af   : > { %13164 = vmatprep.subr.bf16.mxu0 %v14007_v23 }
 0x7b1   : > { %13133 = vmatmul.mubr.bf16.gmra.mrb[76].mxu0 %v19520_v16 }
 0x7b2   : > { %13136 = vmatprep.mubr.bf16.mxu0 %v19522_v0  ;;  %13165 = vmatpush3.bf16.msra.mxu0 %v14007_v23 }
 0x7b3   : > { %13166 = vmatprep.subr.bf16.mxu0 %v14008_v19 }
 0x7b6   : > { %13167 = vmatpush3.bf16.msra.mxu0 %v14008_v19 }
 0x7b9   : > { %13137 = vmatmul.mubr.bf16.gmra.mrb[80].mxu0 %v19524_v55 }
 0x7ba   : > { %13140 = vmatprep.mubr.bf16.mxu0 %v19526_v35  ;;  %v14012_v35 = vld [vmem:[%s18085_s11 + $0x18] sm:$0xff]  }
 0x7c1   : > { %13141 = vmatmul.mubr.bf16.gmra.mrb[84].mxu0 %v19528_v37 }
 0x7c2   : > { %13144 = vmatprep.mubr.bf16.mxu0 %v19530_v14 }
 0x7c9   : > { %13145 = vmatmul.mubr.bf16.gmra.mrb[88].mxu0 %v19532_v39 }
 0x7ca   : > { %13148 = vmatprep.mubr.bf16.mxu0 %v19534_v46  ;;  %v14013_v46 = vld [vmem:[%s18085_s11 + $0x20] sm:$0xff]  }
 0x7d1   : > { %13149 = vmatmul.mubr.bf16.gmra.mrb[92].mxu0 %v9830_v50 }
 0x86c   : > { %v13122_v58 = vpop.f32.mrb[64].mxu0 }
 0x86d   : > { %v10194_v12 = vadd.f32 %v13122_v58, %v17787_v43  ;;  %v9930_v18 = vpop.f32.mrb[65].mxu0  ;;  %v14014_v58 = vld [vmem:[%s18085_s11 + $0x28] sm:$0xff]  }
 0x86e   : > { %v10192_v32 = vadd.f32 %v17787_v43, %v9930_v18  ;;  %v13123_v3 = vpop.f32.mrb[66].mxu0 }
 0x86f   : > { %v10195_v4 = vadd.f32 %v13123_v3, %v17787_v43  ;;  %v9933_v45 = vpop.f32.mrb[67].mxu0  ;;  %v10226_v31 = vmax.f32 %v10194_v12, 0.0 }
 0x870   : > { %v10193_v5 = vadd.f32 %v17787_v43, %v9933_v45  ;;  %v10224_v28 = vmax.f32 %v10192_v32, 0.0 }
 0x871   : > { %v10227_v8 = vmax.f32 %v10195_v4, 0.0 }
 0x872   : > { %v10225_v56 = vmax.f32 %v10193_v5, 0.0 }
 0x873   : > { %v10321_v48 = vpack.c.bf16 %v10227_v8, %v10226_v31  ;;  %v14015_v31 = vld [vmem:[%s18085_s11 + $0x30] sm:$0xff]  }
 0x874   : > { %v10320_v26 = vpack.c.bf16 %v10225_v56, %v10224_v28  ;;  %v13126_v10 = vpop.f32.mrb[68].mxu0 }
 0x875   : > { %v10198_v15 = vadd.f32 %v13126_v10, %v17787_v43  ;;  %v9946_v61 = vpop.f32.mrb[69].mxu0 }
 0x876   : > { %v10196_v44 = vadd.f32 %v17787_v43, %v9946_v61  ;;  %v13127_v51 = vpop.f32.mrb[70].mxu0  ;;  %13168 = vmatprep.mubr.bf16.mxu0 %v10320_v26 }
 0x877   : > { %v10199_v27 = vadd.f32 %v13127_v51, %v17787_v43  ;;  %v9949_v23 = vpop.f32.mrb[71].mxu0  ;;  %13169 = vmatmul.mubr.bf16.vlgmr.msra.gmra.mrb[96].mxu0 %v10321_v48  ;;  %v10230_v9 = vmax.f32 %v10198_v15, 0.0 }
 0x878   : > { %v10197_v40 = vadd.f32 %v17787_v43, %v9949_v23  ;;  %v10228_v30 = vmax.f32 %v10196_v44, 0.0 }
 0x879   : > { %v10231_v34 = vmax.f32 %v10199_v27, 0.0 }
 0x87a   : > { %v10229_v49 = vmax.f32 %v10197_v40, 0.0 }
 0x87b   : > { %v10323_v20 = vpack.c.bf16 %v10231_v34, %v10230_v9 }
 0x87c   : > { %v10322_v7 = vpack.c.bf16 %v10229_v49, %v10228_v30  ;;  %v13130_v11 = vpop.f32.mrb[72].mxu0 }
 0x87d   : > { %v10202_v29 = vadd.f32 %v13130_v11, %v17787_v43  ;;  %v9962_v24 = vpop.f32.mrb[73].mxu0 }
 0x87e   : > { %v10200_v22 = vadd.f32 %v17787_v43, %v9962_v24  ;;  %v13131_v36 = vpop.f32.mrb[74].mxu0  ;;  %13172 = vmatprep.mubr.bf16.mxu1 %v10322_v7 }
 0x87f   : > { %v10203_v1 = vadd.f32 %v13131_v36, %v17787_v43  ;;  %v9965_v21 = vpop.f32.mrb[75].mxu0  ;;  %13173 = vmatmul.mubr.bf16.vlgmr.msra.gmra.mrb[32].mxu1 %v10323_v20  ;;  %v10234_v13 = vmax.f32 %v10202_v29, 0.0 }
 0x880   : > { %v10201_v63 = vadd.f32 %v17787_v43, %v9965_v21  ;;  %13201 = vmatpush3.bf16.msra.mxu1 %v14009_v62  ;;  %v10232_v33 = vmax.f32 %v10200_v22, 0.0 }
 0x881   : > { %v10235_v47 = vmax.f32 %v10203_v1, 0.0  ;;  %13202 = vmatprep.subr.bf16.mxu1 %v14010_v25 }
 0x882   : > { %v10233_v16 = vmax.f32 %v10201_v63, 0.0 }
 0x883   : > { %v10325_v6 = vpack.c.bf16 %v10235_v47, %v10234_v13 }
 0x884   : > { %v10324_v0 = vpack.c.bf16 %v10233_v16, %v10232_v33  ;;  %v13134_v38 = vpop.f32.mrb[76].mxu0  ;;  %13203 = vmatpush3.bf16.msra.mxu1 %v14010_v25 }
 0x885   : > { %v10206_v55 = vadd.f32 %v13134_v38, %v17787_v43  ;;  %v9978_v60 = vpop.f32.mrb[77].mxu0  ;;  %13204 = vmatprep.subr.bf16.mxu1 %v14011_v57 }
 0x886   : > { %v10204_v54 = vadd.f32 %v17787_v43, %v9978_v60  ;;  %v13135_v37 = vpop.f32.mrb[78].mxu0  ;;  %13176 = vmatprep.mubr.bf16.mxu1 %v10324_v0 }
 0x887   : > { %v10207_v17 = vadd.f32 %v13135_v37, %v17787_v43  ;;  %v9981_v14 = vpop.f32.mrb[79].mxu0  ;;  %13177 = vmatmul.mubr.bf16.gmra.mrb[36].mxu1 %v10325_v6  ;;  %v10238_v39 = vmax.f32 %v10206_v55, 0.0 }
 0x888   : > { %v10205_v52 = vadd.f32 %v17787_v43, %v9981_v14  ;;  %13205 = vmatpush3.bf16.msra.mxu1 %v14011_v57  ;;  %v10236_v53 = vmax.f32 %v10204_v54, 0.0 }
 0x889   : > { %v10239_v2 = vmax.f32 %v10207_v17, 0.0  ;;  %13206 = vmatprep.subr.bf16.mxu1 %v14012_v35 }
 0x88a   : > { %v10237_v42 = vmax.f32 %v10205_v52, 0.0 }
 0x88b   : > { %v10327_v59 = vpack.c.bf16 %v10239_v2, %v10238_v39 }
 0x88c   : > { %v10326_v41 = vpack.c.bf16 %v10237_v42, %v10236_v53  ;;  %v13138_v50 = vpop.f32.mrb[80].mxu0  ;;  %13207 = vmatpush3.bf16.msra.mxu1 %v14012_v35  ;;  %v17845_v53 = vld [vmem:[%s18084_s10] ss:$0 sm:$0xff] }
 0x88d   : > { %v10210_v19 = vadd.f32 %v13138_v50, %v17787_v43  ;;  %v9994_v62 = vpop.f32.mrb[81].mxu0  ;;  %13208 = vmatprep.subr.bf16.mxu1 %v14013_v46 }
 0x88e   : > { %v10208_v12 = vadd.f32 %v17787_v43, %v9994_v62  ;;  %v13139_v18 = vpop.f32.mrb[82].mxu0  ;;  %13180 = vmatprep.mubr.bf16.mxu1 %v10326_v41 }
 0x88f   : > { %v10211_v32 = vadd.f32 %v13139_v18, %v17787_v43  ;;  %v9997_v3 = vpop.f32.mrb[83].mxu0  ;;  %13181 = vmatmul.mubr.bf16.gmra.mrb[40].mxu1 %v10327_v59  ;;  %v10242_v45 = vmax.f32 %v10210_v19, 0.0 }
 0x890   : > { %v10209_v4 = vadd.f32 %v17787_v43, %v9997_v3  ;;  %13209 = vmatpush3.bf16.msra.mxu1 %v14013_v46  ;;  %v10240_v8 = vmax.f32 %v10208_v12, 0.0  ;;  %v14016_v46 = vld [vmem:[%s18085_s11 + $0x38] sm:$0xff]  }
 0x891   : > { %v10243_v5 = vmax.f32 %v10211_v32, 0.0  ;;  %13210 = vmatprep.subr.bf16.mxu1 %v14014_v58 }
 0x892   : > { %v10241_v28 = vmax.f32 %v10209_v4, 0.0 }
 0x893   : > { %v10329_v56 = vpack.c.bf16 %v10243_v5, %v10242_v45 }
 0x894   : > { %v10328_v48 = vpack.c.bf16 %v10241_v28, %v10240_v8  ;;  %v13142_v26 = vpop.f32.mrb[84].mxu0  ;;  %13211 = vmatpush3.bf16.msra.mxu1 %v14014_v58 }
 0x895   : > { %v10214_v10 = vadd.f32 %v13142_v26, %v17787_v43  ;;  %v10010_v15 = vpop.f32.mrb[85].mxu0  ;;  %13212 = vmatprep.subr.bf16.mxu1 %v14015_v31 }
 0x896   : > { %v10212_v61 = vadd.f32 %v17787_v43, %v10010_v15  ;;  %v13143_v44 = vpop.f32.mrb[86].mxu0  ;;  %13184 = vmatprep.mubr.bf16.mxu1 %v10328_v48 }
 0x897   : > { %v10215_v51 = vadd.f32 %v13143_v44, %v17787_v43  ;;  %v10013_v27 = vpop.f32.mrb[87].mxu0  ;;  %13185 = vmatmul.mubr.bf16.gmra.mrb[44].mxu1 %v10329_v56  ;;  %v10246_v40 = vmax.f32 %v10214_v10, 0.0 }
 0x898   : > { %v10213_v23 = vadd.f32 %v17787_v43, %v10013_v27  ;;  %13213 = vmatpush3.bf16.msra.mxu1 %v14015_v31  ;;  %v10244_v34 = vmax.f32 %v10212_v61, 0.0 }
 0x899   : > { %v10247_v9 = vmax.f32 %v10215_v51, 0.0  ;;  %13214 = vmatprep.subr.bf16.mxu1 %v14016_v46 }
 0x89a   : > { %v10245_v30 = vmax.f32 %v10213_v23, 0.0 }
 0x89b   : > { %v10331_v49 = vpack.c.bf16 %v10247_v9, %v10246_v40 }
 0x89c   : > { %v10330_v20 = vpack.c.bf16 %v10245_v30, %v10244_v34  ;;  %v13146_v7 = vpop.f32.mrb[88].mxu0  ;;  %13215 = vmatpush3.bf16.msra.mxu1 %v14016_v46 }
 0x89d   : > { %v10218_v11 = vadd.f32 %v13146_v7, %v17787_v43  ;;  %v10026_v29 = vpop.f32.mrb[89].mxu0 }
 0x89e   : > { %v10216_v24 = vadd.f32 %v17787_v43, %v10026_v29  ;;  %v13147_v25 = vpop.f32.mrb[90].mxu0  ;;  %13188 = vmatprep.mubr.bf16.mxu1 %v10330_v20 }
 0x89f   : > { %v10219_v22 = vadd.f32 %v13147_v25, %v17787_v43  ;;  %v10029_v36 = vpop.f32.mrb[91].mxu0  ;;  %13189 = vmatmul.mubr.bf16.gmra.mrb[48].mxu1 %v10331_v49  ;;  %v10250_v21 = vmax.f32 %v10218_v11, 0.0 }
 0x8a0   : > { %v10217_v1 = vadd.f32 %v17787_v43, %v10029_v36  ;;  %v10248_v13 = vmax.f32 %v10216_v24, 0.0 }
 0x8a1   : > { %v10251_v63 = vmax.f32 %v10219_v22, 0.0 }
 0x8a2   : > { %v10249_v47 = vmax.f32 %v10217_v1, 0.0 }
 0x8a3   : > { %v10333_v57 = vpack.c.bf16 %v10251_v63, %v10250_v21 }
 0x8a4   : > { %v10332_v33 = vpack.c.bf16 %v10249_v47, %v10248_v13  ;;  %v13150_v16 = vpop.f32.mrb[92].mxu0 }
 0x8a5   : > { %v10222_v6 = vadd.f32 %v13150_v16, %v17787_v43  ;;  %v10042_v0 = vpop.f32.mrb[93].mxu0 }
 0x8a6   : > { %v10220_v38 = vadd.f32 %v17787_v43, %v10042_v0  ;;  %v13151_v55 = vpop.f32.mrb[94].mxu0  ;;  %13192 = vmatprep.mubr.bf16.mxu1 %v10332_v33 }
 0x8a7   : > { %v10223_v60 = vadd.f32 %v13151_v55, %v17787_v43  ;;  %v10045_v35 = vpop.f32.mrb[95].mxu0  ;;  %13193 = vmatmul.mubr.bf16.gmra.mrb[52].mxu1 %v10333_v57  ;;  %v10254_v37 = vmax.f32 %v10222_v6, 0.0 }
 0x8a8   : > { %v10221_v54 = vadd.f32 %v17787_v43, %v10045_v35  ;;  %v10252_v14 = vmax.f32 %v10220_v38, 0.0 }
 0x8a9   : > { %v10255_v17 = vmax.f32 %v10223_v60, 0.0 }
 0x8aa   : > { %v10253_v52 = vmax.f32 %v10221_v54, 0.0 }
 0x8ab   : > { %v10335_v39 = vpack.c.bf16 %v10255_v17, %v10254_v37 }
 0x8ac   : > { %v10334_v2 = vpack.c.bf16 %v10253_v52, %v10252_v14 }
 0x8ae   : > { %13196 = vmatprep.mubr.bf16.mxu1 %v10334_v2 }
 0x8af   : > { %13197 = vmatmul.mubr.bf16.gmra.mrb[56].mxu1 %v10335_v39 }
 0x94a   : > { %v13170_v43 = vpop.f32.mrb[96].mxu0 }
 0x94b   : > { %v10450_v42 = vadd.f32 %v13170_v43, %v17845_v53  ;;  %v10441_v59 = vpop.f32.mrb[97].mxu0 }
 0x94c   : > { %v10442_v41 = vadd.f32 %v17845_v53, %v10441_v59  ;;  %v13171_v50 = vpop.f32.mrb[98].mxu0 }
 0x94d   : > { %v10453_v19 = vadd.f32 %v13171_v50, %v17845_v53  ;;  %v10444_v62 = vpop.f32.mrb[99].mxu0  ;;  %v10570_v12 = vmax.f32 %v10450_v42, 0.0 }
 0x94e   : > { %v10445_v58 = vadd.f32 %v17845_v53, %v10444_v62  ;;  %v10568_v32 = vmax.f32 %v10442_v41, 0.0 }
 0x94f   : > { %v10571_v18 = vmax.f32 %v10453_v19, 0.0 }
 0x950   : > { %v10569_v3 = vmax.f32 %v10445_v58, 0.0 }
 0x951   : > { %v10682_v4 = vpack.c.bf16 %v10571_v18, %v10570_v12 }
 0x952   : > { %v10681_v45 = vpack.c.bf16 %v10569_v3, %v10568_v32  ;;  %v13174_v5 = vpop.f32.mrb[32].mxu1 }
 0x953   : > { %v10466_v31 = vadd.f32 %v13174_v5, %v17845_v53  ;;  %v10457_v8 = vpop.f32.mrb[33].mxu1 }
 0x954   : > { %v10458_v28 = vadd.f32 %v17845_v53, %v10457_v8  ;;  %v13175_v56 = vpop.f32.mrb[34].mxu1  ;;  %13216 = vmatprep.mubr.bf16.mxu1 %v10681_v45 }
 0x955   : > { %v10469_v48 = vadd.f32 %v13175_v56, %v17845_v53  ;;  %v10460_v26 = vpop.f32.mrb[35].mxu1  ;;  %13217 = vmatmul.mubr.bf16.vlgmr.msra.gmra.mrb[60].mxu1 %v10682_v4  ;;  %v10574_v15 = vmax.f32 %v10466_v31, 0.0 }
 0x956   : > { %v10461_v10 = vadd.f32 %v17845_v53, %v10460_v26  ;;  %v10572_v44 = vmax.f32 %v10458_v28, 0.0 }
 0x957   : > { %v10575_v61 = vmax.f32 %v10469_v48, 0.0 }
 0x958   : > { %v10573_v51 = vmax.f32 %v10461_v10, 0.0 }
 0x959   : > { %v10684_v27 = vpack.c.bf16 %v10575_v61, %v10574_v15 }
 0x95a   : > { %v10683_v23 = vpack.c.bf16 %v10573_v51, %v10572_v44  ;;  %v13178_v40 = vpop.f32.mrb[36].mxu1 }
 0x95b   : > { %v10482_v9 = vadd.f32 %v13178_v40, %v17845_v53  ;;  %v10473_v34 = vpop.f32.mrb[37].mxu1 }
 0x95c   : > { %v10474_v30 = vadd.f32 %v17845_v53, %v10473_v34  ;;  %v13179_v49 = vpop.f32.mrb[38].mxu1  ;;  %13220 = vmatprep.mubr.bf16.mxu1 %v10683_v23 }
 0x95d   : > { %v10485_v20 = vadd.f32 %v13179_v49, %v17845_v53  ;;  %v10476_v7 = vpop.f32.mrb[39].mxu1  ;;  %13221 = vmatmul.mubr.bf16.gmra.mrb[64].mxu1 %v10684_v27  ;;  %v10578_v29 = vmax.f32 %v10482_v9, 0.0 }
 0x95e   : > { %v10477_v11 = vadd.f32 %v17845_v53, %v10476_v7  ;;  %v10576_v25 = vmax.f32 %v10474_v30, 0.0 }
 0x95f   : > { %v10579_v24 = vmax.f32 %v10485_v20, 0.0 }
 0x960   : > { %v10577_v22 = vmax.f32 %v10477_v11, 0.0 }
 0x961   : > { %v10686_v36 = vpack.c.bf16 %v10579_v24, %v10578_v29 }
 0x962   : > { %v10685_v1 = vpack.c.bf16 %v10577_v22, %v10576_v25  ;;  %v13182_v21 = vpop.f32.mrb[40].mxu1 }
 0x963   : > { %v10498_v63 = vadd.f32 %v13182_v21, %v17845_v53  ;;  %v10489_v13 = vpop.f32.mrb[41].mxu1 }
 0x964   : > { %v10490_v47 = vadd.f32 %v17845_v53, %v10489_v13  ;;  %v13183_v57 = vpop.f32.mrb[42].mxu1  ;;  %13224 = vmatprep.mubr.bf16.mxu1 %v10685_v1 }
 0x965   : > { %v10501_v33 = vadd.f32 %v13183_v57, %v17845_v53  ;;  %v10492_v16 = vpop.f32.mrb[43].mxu1  ;;  %13225 = vmatmul.mubr.bf16.gmra.mrb[68].mxu1 %v10686_v36  ;;  %v10582_v0 = vmax.f32 %v10498_v63, 0.0 }
 0x966   : > { %v10493_v6 = vadd.f32 %v17845_v53, %v10492_v16  ;;  %v10580_v55 = vmax.f32 %v10490_v47, 0.0 }
 0x967   : > { %v10583_v38 = vmax.f32 %v10501_v33, 0.0 }
 0x968   : > { %v10581_v60 = vmax.f32 %v10493_v6, 0.0  ;;  %v17882_v6 = vld [vmem:[%s18086_s12] ss:$0 sm:$0xff] }
 0x969   : > { %v10688_v35 = vpack.c.bf16 %v10583_v38, %v10582_v0 }
 0x96a   : > { %v10687_v54 = vpack.c.bf16 %v10581_v60, %v10580_v55  ;;  %v13186_v37 = vpop.f32.mrb[44].mxu1 }
 0x96b   : > { %v10514_v17 = vadd.f32 %v13186_v37, %v17845_v53  ;;  %v10505_v14 = vpop.f32.mrb[45].mxu1 }
 0x96c   : > { %v10506_v52 = vadd.f32 %v17845_v53, %v10505_v14  ;;  %v13187_v39 = vpop.f32.mrb[46].mxu1  ;;  %13228 = vmatprep.mubr.bf16.mxu1 %v10687_v54 }
 0x96d   : > { %v10517_v2 = vadd.f32 %v13187_v39, %v17845_v53  ;;  %v10508_v46 = vpop.f32.mrb[47].mxu1  ;;  %13229 = vmatmul.mubr.bf16.gmra.mrb[72].mxu1 %v10688_v35  ;;  %v10586_v42 = vmax.f32 %v10514_v17, 0.0 }
 0x96e   : > { %v10509_v43 = vadd.f32 %v17845_v53, %v10508_v46  ;;  %v10584_v41 = vmax.f32 %v10506_v52, 0.0 }
 0x96f   : > { %v10587_v59 = vmax.f32 %v10517_v2, 0.0 }
 0x970   : > { %v10585_v50 = vmax.f32 %v10509_v43, 0.0 }
 0x971   : > { %v10690_v19 = vpack.c.bf16 %v10587_v59, %v10586_v42 }
 0x972   : > { %v10689_v62 = vpack.c.bf16 %v10585_v50, %v10584_v41  ;;  %v13190_v58 = vpop.f32.mrb[48].mxu1 }
 0x973   : > { %v10530_v12 = vadd.f32 %v13190_v58, %v17845_v53  ;;  %v10521_v18 = vpop.f32.mrb[49].mxu1 }
 0x974   : > { %v10522_v32 = vadd.f32 %v17845_v53, %v10521_v18  ;;  %v13191_v3 = vpop.f32.mrb[50].mxu1  ;;  %13232 = vmatprep.mubr.bf16.mxu1 %v10689_v62 }
 0x975   : > { %v10533_v4 = vadd.f32 %v13191_v3, %v17845_v53  ;;  %v10524_v45 = vpop.f32.mrb[51].mxu1  ;;  %13233 = vmatmul.mubr.bf16.gmra.mrb[76].mxu1 %v10690_v19  ;;  %v10590_v31 = vmax.f32 %v10530_v12, 0.0 }
 0x976   : > { %v10525_v5 = vadd.f32 %v17845_v53, %v10524_v45  ;;  %v10588_v28 = vmax.f32 %v10522_v32, 0.0 }
 0x977   : > { %v10591_v8 = vmax.f32 %v10533_v4, 0.0 }
 0x978   : > { %v10589_v56 = vmax.f32 %v10525_v5, 0.0 }
 0x979   : > { %v10692_v48 = vpack.c.bf16 %v10591_v8, %v10590_v31 }
 0x97a   : > { %v10691_v26 = vpack.c.bf16 %v10589_v56, %v10588_v28  ;;  %v13194_v10 = vpop.f32.mrb[52].mxu1 }
 0x97b   : > { %v10546_v15 = vadd.f32 %v13194_v10, %v17845_v53  ;;  %v10537_v61 = vpop.f32.mrb[53].mxu1 }
 0x97c   : > { %v10538_v44 = vadd.f32 %v17845_v53, %v10537_v61  ;;  %v13195_v51 = vpop.f32.mrb[54].mxu1  ;;  %13236 = vmatprep.mubr.bf16.mxu1 %v10691_v26 }
 0x97d   : > { %v10549_v27 = vadd.f32 %v13195_v51, %v17845_v53  ;;  %v10540_v23 = vpop.f32.mrb[55].mxu1  ;;  %13237 = vmatmul.mubr.bf16.gmra.mrb[80].mxu1 %v10692_v48  ;;  %v10594_v9 = vmax.f32 %v10546_v15, 0.0 }
 0x97e   : > { %v10541_v40 = vadd.f32 %v17845_v53, %v10540_v23  ;;  %v10592_v30 = vmax.f32 %v10538_v44, 0.0 }
 0x97f   : > { %v10595_v34 = vmax.f32 %v10549_v27, 0.0 }
 0x980   : > { %v10593_v49 = vmax.f32 %v10541_v40, 0.0 }
 0x981   : > { %v10694_v20 = vpack.c.bf16 %v10595_v34, %v10594_v9 }
 0x982   : > { %v10693_v7 = vpack.c.bf16 %v10593_v49, %v10592_v30  ;;  %v13198_v11 = vpop.f32.mrb[56].mxu1 }
 0x983   : > { %v10562_v29 = vadd.f32 %v13198_v11, %v17845_v53  ;;  %v10553_v24 = vpop.f32.mrb[57].mxu1 }
 0x984   : > { %v10554_v25 = vadd.f32 %v17845_v53, %v10553_v24  ;;  %v13199_v22 = vpop.f32.mrb[58].mxu1  ;;  %13240 = vmatprep.mubr.bf16.mxu1 %v10693_v7 }
 0x985   : > { %v10565_v36 = vadd.f32 %v13199_v22, %v17845_v53  ;;  %v10556_v1 = vpop.f32.mrb[59].mxu1  ;;  %13241 = vmatmul.mubr.bf16.gmra.mrb[84].mxu1 %v10694_v20  ;;  %v10598_v63 = vmax.f32 %v10562_v29, 0.0 }
 0x986   : > { %v10557_v21 = vadd.f32 %v17845_v53, %v10556_v1  ;;  %v10596_v47 = vmax.f32 %v10554_v25, 0.0 }
 0x987   : > { %v10599_v13 = vmax.f32 %v10565_v36, 0.0 }
 0x988   : > { %v10597_v57 = vmax.f32 %v10557_v21, 0.0 }
 0x989   : > { %v10696_v33 = vpack.c.bf16 %v10599_v13, %v10598_v63 }
 0x98a   : > { %v10695_v16 = vpack.c.bf16 %v10597_v57, %v10596_v47 }
 0x98c   : > { %13244 = vmatprep.mubr.bf16.mxu1 %v10695_v16 }
 0x98d   : > { %13245 = vmatmul.mubr.bf16.gmra.mrb[88].mxu1 %v10696_v33 }
 0xa28   : > { %v13218_v53 = vpop.f32.mrb[60].mxu1 }
 0xa29   : > { %v10794_v0 = vadd.f32 %v13218_v53, %v17882_v6  ;;  %v10785_v38 = vpop.f32.mrb[61].mxu1 }
 0xa2a   : > { %v10786_v55 = vadd.f32 %v17882_v6, %v10785_v38  ;;  %v13219_v60 = vpop.f32.mrb[62].mxu1 }
 0xa2b   : > { %10914 = vst.msk [vmem:[%s17889_s18 + $0x10] sm:$0xff] %vm639_vm1, %v10794_v0  ;;  %v10797_v35 = vadd.f32 %v13219_v60, %v17882_v6  ;;  %v10788_v54 = vpop.f32.mrb[63].mxu1  ;;  %v10947_v39 = vsel %vm639_vm1, %v10794_v0, 0.0 }
 0xa2c   : > { %10912 = vst.msk [vmem:[%s17889_s18] sm:$0xff] %vm639_vm1, %v10786_v55  ;;  %v10789_v37 = vadd.f32 %v17882_v6, %v10788_v54  ;;  %v10944_v17 = vsel %vm639_vm1, %v10786_v55, 0.0 }
 0xa2d   : > { %10915 = vst.msk [vmem:[%s17889_s18 + $0x18] sm:$0xff] %vm639_vm1, %v10797_v35  ;;  %v10949_v59 = vsel %vm639_vm1, %v10797_v35, 0.0 }
 0xa2e   : > { %10913 = vst.msk [vmem:[%s17889_s18 + $0x8] sm:$0xff] %vm639_vm1, %v10789_v37  ;;  %v10945_v14 = vsel %vm639_vm1, %v10789_v37, 0.0 }
 0xa2f   : > { %v10946_v52 = vadd.f32 %v10945_v14, %v10944_v17 }
 0xa30   : > { %v13222_v2 = vpop.f32.mrb[64].mxu1 }
 0xa31   : > { %v10948_v46 = vadd.f32 %v10947_v39, %v10946_v52  ;;  %v10810_v43 = vadd.f32 %v13222_v2, %v17882_v6  ;;  %v10801_v42 = vpop.f32.mrb[65].mxu1 }
 0xa32   : > { %v10802_v41 = vadd.f32 %v17882_v6, %v10801_v42  ;;  %v13223_v50 = vpop.f32.mrb[66].mxu1 }
 0xa33   : > { %10918 = vst.msk [vmem:[%s17889_s18 + $0x30] sm:$0xff] %vm639_vm1, %v10810_v43  ;;  %v10950_v19 = vadd.f32 %v10949_v59, %v10948_v46  ;;  %v10813_v62 = vadd.f32 %v13223_v50, %v17882_v6  ;;  %v10804_v58 = vpop.f32.mrb[67].mxu1  ;;  %v10955_v45 = vsel %vm639_vm1, %v10810_v43, 0.0 }
 0xa34   : > { %10916 = vst.msk [vmem:[%s17889_s18 + $0x20] sm:$0xff] %vm639_vm1, %v10802_v41  ;;  %v10951_v12 = vsel %vm639_vm1, %v10802_v41, 0.0  ;;  %v10805_v18 = vadd.f32 %v17882_v6, %v10804_v58 }
 0xa35   : > { %v10952_v32 = vadd.f32 %v10951_v12, %v10950_v19  ;;  %10919 = vst.msk [vmem:[%s17889_s18 + $0x38] sm:$0xff] %vm639_vm1, %v10813_v62  ;;  %v10957_v56 = vsel %vm639_vm1, %v10813_v62, 0.0 }
 0xa36   : > { %10917 = vst.msk [vmem:[%s17889_s18 + $0x28] sm:$0xff] %vm639_vm1, %v10805_v18  ;;  %v10953_v3 = vsel %vm639_vm1, %v10805_v18, 0.0 }
 0xa37   : > { %v10954_v4 = vadd.f32 %v10953_v3, %v10952_v32 }
 0xa38   : > { %v13226_v5 = vpop.f32.mrb[68].mxu1 }
 0xa39   : > { %v10956_v31 = vadd.f32 %v10955_v45, %v10954_v4  ;;  %v10826_v8 = vadd.f32 %v13226_v5, %v17882_v6  ;;  %v10817_v28 = vpop.f32.mrb[69].mxu1 }
 0xa3a   : > { %v10818_v48 = vadd.f32 %v17882_v6, %v10817_v28  ;;  %v13227_v26 = vpop.f32.mrb[70].mxu1 }
 0xa3b   : > { %10922 = vst.msk [vmem:[%s17889_s18 + $0x50] sm:$0xff] %vm639_vm1, %v10826_v8  ;;  %v10958_v10 = vadd.f32 %v10957_v56, %v10956_v31  ;;  %v10829_v15 = vadd.f32 %v13227_v26, %v17882_v6  ;;  %v10820_v61 = vpop.f32.mrb[71].mxu1  ;;  %v10963_v9 = vsel %vm639_vm1, %v10826_v8, 0.0 }
 0xa3c   : > { %10920 = vst.msk [vmem:[%s17889_s18 + $0x40] sm:$0xff] %vm639_vm1, %v10818_v48  ;;  %v10959_v44 = vsel %vm639_vm1, %v10818_v48, 0.0  ;;  %v10821_v51 = vadd.f32 %v17882_v6, %v10820_v61 }
 0xa3d   : > { %v10960_v27 = vadd.f32 %v10959_v44, %v10958_v10  ;;  %10923 = vst.msk [vmem:[%s17889_s18 + $0x58] sm:$0xff] %vm639_vm1, %v10829_v15  ;;  %v10965_v7 = vsel %vm639_vm1, %v10829_v15, 0.0 }
 0xa3e   : > { %10921 = vst.msk [vmem:[%s17889_s18 + $0x48] sm:$0xff] %vm639_vm1, %v10821_v51  ;;  %v10961_v23 = vsel %vm639_vm1, %v10821_v51, 0.0 }
 0xa3f   : > { %v10962_v40 = vadd.f32 %v10961_v23, %v10960_v27 }
 0xa40   : > { %v13230_v34 = vpop.f32.mrb[72].mxu1 }
 0xa41   : > { %v10964_v30 = vadd.f32 %v10963_v9, %v10962_v40  ;;  %v10842_v49 = vadd.f32 %v13230_v34, %v17882_v6  ;;  %v10833_v20 = vpop.f32.mrb[73].mxu1 }
 0xa42   : > { %v10834_v11 = vadd.f32 %v17882_v6, %v10833_v20  ;;  %v13231_v29 = vpop.f32.mrb[74].mxu1 }
 0xa43   : > { %10926 = vst.msk [vmem:[%s17889_s18 + $0x70] sm:$0xff] %vm639_vm1, %v10842_v49  ;;  %v10966_v24 = vadd.f32 %v10965_v7, %v10964_v30  ;;  %v10845_v25 = vadd.f32 %v13231_v29, %v17882_v6  ;;  %v10836_v22 = vpop.f32.mrb[75].mxu1  ;;  %v10971_v47 = vsel %vm639_vm1, %v10842_v49, 0.0 }
 0xa44   : > { %10924 = vst.msk [vmem:[%s17889_s18 + $0x60] sm:$0xff] %vm639_vm1, %v10834_v11  ;;  %v10967_v36 = vsel %vm639_vm1, %v10834_v11, 0.0  ;;  %v10837_v1 = vadd.f32 %v17882_v6, %v10836_v22 }
 0xa45   : > { %v10968_v21 = vadd.f32 %v10967_v36, %v10966_v24  ;;  %10927 = vst.msk [vmem:[%s17889_s18 + $0x78] sm:$0xff] %vm639_vm1, %v10845_v25  ;;  %v10973_v0 = vsel %vm639_vm1, %v10845_v25, 0.0 }
 0xa46   : > { %10925 = vst.msk [vmem:[%s17889_s18 + $0x68] sm:$0xff] %vm639_vm1, %v10837_v1  ;;  %v10969_v63 = vsel %vm639_vm1, %v10837_v1, 0.0 }
 0xa47   : > { %v10970_v13 = vadd.f32 %v10969_v63, %v10968_v21 }
 0xa48   : > { %v13234_v57 = vpop.f32.mrb[76].mxu1 }
 0xa49   : > { %v10972_v33 = vadd.f32 %v10971_v47, %v10970_v13  ;;  %v10858_v16 = vadd.f32 %v13234_v57, %v17882_v6  ;;  %v10849_v53 = vpop.f32.mrb[77].mxu1 }
 0xa4a   : > { %v10850_v38 = vadd.f32 %v17882_v6, %v10849_v53  ;;  %v13235_v55 = vpop.f32.mrb[78].mxu1 }
 0xa4b   : > { %10930 = vst.msk [vmem:[%s17889_s18 + $0x90] sm:$0xff] %vm639_vm1, %v10858_v16  ;;  %v10974_v60 = vadd.f32 %v10973_v0, %v10972_v33  ;;  %v10861_v35 = vadd.f32 %v13235_v55, %v17882_v6  ;;  %v10852_v54 = vpop.f32.mrb[79].mxu1  ;;  %v10979_v2 = vsel %vm639_vm1, %v10858_v16, 0.0 }
 0xa4c   : > { %10928 = vst.msk [vmem:[%s17889_s18 + $0x80] sm:$0xff] %vm639_vm1, %v10850_v38  ;;  %v10975_v37 = vsel %vm639_vm1, %v10850_v38, 0.0  ;;  %v10853_v17 = vadd.f32 %v17882_v6, %v10852_v54 }
 0xa4d   : > { %v10976_v14 = vadd.f32 %v10975_v37, %v10974_v60  ;;  %10931 = vst.msk [vmem:[%s17889_s18 + $0x98] sm:$0xff] %vm639_vm1, %v10861_v35  ;;  %v10981_v41 = vsel %vm639_vm1, %v10861_v35, 0.0 }
 0xa4e   : > { %10929 = vst.msk [vmem:[%s17889_s18 + $0x88] sm:$0xff] %vm639_vm1, %v10853_v17  ;;  %v10977_v52 = vsel %vm639_vm1, %v10853_v17, 0.0 }
 0xa4f   : > { %v10978_v39 = vadd.f32 %v10977_v52, %v10976_v14 }
 0xa50   : > { %v13238_v46 = vpop.f32.mrb[80].mxu1 }
 0xa51   : > { %v10980_v43 = vadd.f32 %v10979_v2, %v10978_v39  ;;  %v10874_v42 = vadd.f32 %v13238_v46, %v17882_v6  ;;  %v10865_v59 = vpop.f32.mrb[81].mxu1  ;;  %v11016_v46 = vld [vmem:[%s589_s0] sm:$0x1]  ;;  %s14111_s0 = scalar_lea.vmem %s14110_s22, 32 }
 0xa52   : > { %v10866_v50 = vadd.f32 %v17882_v6, %v10865_v59  ;;  %v13239_v19 = vpop.f32.mrb[82].mxu1  ;;  %p14113_p1 = scmp.lt.s32.totalorder %s14111_s0, %s14105_s21 }
 0xa53   : > { %10934 = vst.msk [vmem:[%s17889_s18 + $0xb0] sm:$0xff] %vm639_vm1, %v10874_v42  ;;  %v10982_v62 = vadd.f32 %v10981_v41, %v10980_v43  ;;  %v10877_v58 = vadd.f32 %v13239_v19, %v17882_v6  ;;  %v10868_v12 = vpop.f32.mrb[83].mxu1  ;;  %v10987_v5 = vsel %vm639_vm1, %v10874_v42, 0.0 }
 0xa54   : > { %10932 = vst.msk [vmem:[%s17889_s18 + $0xa0] sm:$0xff] %vm639_vm1, %v10866_v50  ;;  %v10983_v18 = vsel %vm639_vm1, %v10866_v50, 0.0  ;;  %v10869_v32 = vadd.f32 %v17882_v6, %v10868_v12  ;;  %v11030_v50 = vsub.f32 1.0, %v11016_v46  ;;  %p14114_p6 = por %p14113_p1, %p14112_p13 }
 0xa55   : > { %v10984_v3 = vadd.f32 %v10983_v18, %v10982_v62  ;;  %10935 = vst.msk [vmem:[%s17889_s18 + $0xb8] sm:$0xff] %vm639_vm1, %v10877_v58  ;;  %v10989_v48 = vsel %vm639_vm1, %v10877_v58, 0.0 }
 0xa56   : > { %10933 = vst.msk [vmem:[%s17889_s18 + $0xa8] sm:$0xff] %vm639_vm1, %v10869_v32  ;;  %v10985_v4 = vsel %vm639_vm1, %v10869_v32, 0.0  ;;  %p14115_p9 = pnand %p14114_p6, %p14108_p11 }
 0xa57   : > { %v10986_v45 = vadd.f32 %v10985_v4, %v10984_v3 }
 0xa58   : > { %v13242_v31 = vpop.f32.mrb[84].mxu1 }
 0xa59   : > { %v10988_v8 = vadd.f32 %v10987_v5, %v10986_v45  ;;  %v10890_v28 = vadd.f32 %v13242_v31, %v17882_v6  ;;  %v10881_v56 = vpop.f32.mrb[85].mxu1 }
 0xa5a   : > { %v10882_v26 = vadd.f32 %v17882_v6, %v10881_v56  ;;  %v13243_v10 = vpop.f32.mrb[86].mxu1 }
 0xa5b   : > { %10938 = vst.msk [vmem:[%s17889_s18 + $0xd0] sm:$0xff] %vm639_vm1, %v10890_v28  ;;  %v10990_v15 = vadd.f32 %v10989_v48, %v10988_v8  ;;  %v10893_v61 = vadd.f32 %v13243_v10, %v17882_v6  ;;  %v10884_v44 = vpop.f32.mrb[87].mxu1  ;;  %v10995_v34 = vsel %vm639_vm1, %v10890_v28, 0.0 }
 0xa5c   : > { %10936 = vst.msk [vmem:[%s17889_s18 + $0xc0] sm:$0xff] %vm639_vm1, %v10882_v26  ;;  %v10991_v51 = vsel %vm639_vm1, %v10882_v26, 0.0  ;;  %v10885_v27 = vadd.f32 %v17882_v6, %v10884_v44 }
 0xa5d   : > { %v10992_v23 = vadd.f32 %v10991_v51, %v10990_v15  ;;  %10939 = vst.msk [vmem:[%s17889_s18 + $0xd8] sm:$0xff] %vm639_vm1, %v10893_v61  ;;  %v10997_v11 = vsel %vm639_vm1, %v10893_v61, 0.0 }
 0xa5e   : > { %10937 = vst.msk [vmem:[%s17889_s18 + $0xc8] sm:$0xff] %vm639_vm1, %v10885_v27  ;;  %v10993_v40 = vsel %vm639_vm1, %v10885_v27, 0.0 }
 0xa5f   : > { %v10994_v9 = vadd.f32 %v10993_v40, %v10992_v23 }
 0xa60   : > { %v13246_v30 = vpop.f32.mrb[88].mxu1 }
 0xa61   : > { %v10996_v49 = vadd.f32 %v10995_v34, %v10994_v9  ;;  %v10906_v20 = vadd.f32 %v13246_v30, %v17882_v6  ;;  %v10897_v7 = vpop.f32.mrb[89].mxu1 }
 0xa62   : > { %v10898_v29 = vadd.f32 %v17882_v6, %v10897_v7  ;;  %v13247_v24 = vpop.f32.mrb[90].mxu1 }
 0xa63   : > { %10942 = vst.msk [vmem:[%s17889_s18 + $0xf0] sm:$0xff] %vm639_vm1, %v10906_v20  ;;  %v10998_v25 = vadd.f32 %v10997_v11, %v10996_v49  ;;  %v10909_v22 = vadd.f32 %v13247_v24, %v17882_v6  ;;  %v10900_v36 = vpop.f32.mrb[91].mxu1  ;;  %v11003_v57 = vsel %vm639_vm1, %v10906_v20, 0.0 }
 0xa64   : > { %10940 = vst.msk [vmem:[%s17889_s18 + $0xe0] sm:$0xff] %vm639_vm1, %v10898_v29  ;;  %v10999_v1 = vsel %vm639_vm1, %v10898_v29, 0.0  ;;  %v10901_v21 = vadd.f32 %v17882_v6, %v10900_v36 }
 0xa65   : > { %v11000_v63 = vadd.f32 %v10999_v1, %v10998_v25  ;;  %10943 = vst.msk [vmem:[%s17889_s18 + $0xf8] sm:$0xff] %vm639_vm1, %v10909_v22  ;;  %v11005_v16 = vsel %vm639_vm1, %v10909_v22, 0.0 }
 0xa66   : > { %10941 = vst.msk [vmem:[%s17889_s18 + $0xe8] sm:$0xff] %vm639_vm1, %v10901_v21  ;;  %v11001_v13 = vsel %vm639_vm1, %v10901_v21, 0.0  ;;  %s11047_s18 = scalar_lea.sflag [#allocation6], %s575_s26 }
 0xa67   : > { %v11002_v47 = vadd.f32 %v11001_v13, %v11000_v63 }
 0xa69   : > { %v11004_v33 = vadd.f32 %v11003_v57, %v11002_v47 }
 0xa6b   : > { %v11006_v53 = vadd.f32 %v11005_v16, %v11004_v33 }
 0xa6d   : > { %v11007_v0 = vrot.slane %v11006_v53, 4 }
 0xa6f   : > { %v11008_v38 = vadd.f32 %v11007_v0, %v11006_v53 }
 0xa71   : > { %v11009_v55 = vrot.slane %v11008_v38, 2 }
 0xa73   : > { %v11010_v6 = vadd.f32 %v11009_v55, %v11008_v38 }
 0xa75   : > { %v11011_v60 = vrot.slane %v11010_v6, 1 }
 0xa77   : > { %v11012_v35 = vadd.f32 %v11011_v60, %v11010_v6 }
 0xa79   : > { %v11013_v54 = vmul.f32 0.00390625, %v11012_v35 }
 0xa7b   : > { %11015 = vst.msk [vmem:[%s576_s27] sm:$0x1] %vm11014_vm0, %v11013_v54  ;;  %v11017_v37 = vand.u32 2147483647, %v11013_v54  ;;  %v11026_v2 = vsub.f32 0.0, %v11013_v54  ;;  %v11024_v59 = vmin.f32 %v11013_v54, 0.0 }
 0xa7d   : > { %v11018_v17 = vsub.f32 0.0, %v11017_v37  ;;  %v11027_v41 = vmin.f32 %v11026_v2, 0.0 }
 0xa7f   : > { %v11019_v14 = vmul.f32 1.442695, %v11018_v17 }
 0xa81   : > { %14017 = vpow2.f32 %v11019_v14 }
 0xa8b   : > { %v14018_v52 = vpop.eup %14017 }
 0xa8c   : > { %v11021_v39 = vadd.f32 1.0, %v14018_v52 }
 0xa8e   : > { %14019 = vlog2.f32 %v11021_v39 }
 0xa98   : > { %v14020_v43 = vpop.eup %14019 }
 0xa99   : > { %v11023_v42 = vmul.f32 0.6931472, %v14020_v43 }
 0xa9b   : > { %v11025_v19 = vsub.f32 %v11024_v59, %v11023_v42  ;;  %v11028_v62 = vsub.f32 %v11027_v41, %v11023_v42 }
 0xa9d   : > { %v11029_v58 = vmul.f32 %v11025_v19, %v11016_v46  ;;  %v11031_v12 = vmul.f32 %v11030_v50, %v11028_v62 }
 0xa9f   : > { %v11032_v18 = vadd.f32 %v11031_v12, %v11029_v58 }
 0xaa1   : > { %v11033_v32 = vsub.f32 0.0, %v11032_v18 }
 0xaa3   : > { %v11034_v3 = vsel %vm11014_vm0, %v11033_v32, 0.0 }
 0xaa4   : > { %11035 = vadd.xlane.f32.xlu0 %v11034_v3 }
 0xaa5   : > { %14118 = shalt.err (!%p14115_p9)
}
 0xaa6   : > { %s14119_s25 = scalar_lea.hbm %s18032_s29, 16  ;;  %s14123_s27 = scalar_lea.hbm %s19541_s20, 32 }
 0xaa7   : > { %p14120_p2 = scmp.ne.s32.totalorder %s18032_s29, %s14119_s25  ;;  %p14124_p5 = scmp.lt.u32.totalorder %s18032_s29, %s19541_s20 }
 0xaa8   : > { %p14125_p10 = scmp.lt.u32.totalorder %s14123_s27, %s14119_s25  ;;  %p14127_p12 = scmp.lt.u32.totalorder %s14119_s25, %s18032_s29 }
 0xaa9   : > { %p14121_p0 = pnand %p14120_p2, %p19542_p7 }
 0xaaa   : > { %p14126_p4 = por %p14125_p10, %p14124_p5 }
 0xaab   : > { %p14122_p3 = pneg %p14121_p0 }
 0xaac   : > { %p14128_p8 = por %p14127_p12, %p14126_p4 }
 0xaae   : > { %p14129_p11 = pnand %p14128_p8, %p14122_p3 }
 0xab0   : > { %14132 = shalt.err (!%p14129_p11)
}
 0xab1   : > { %13788 = dma.vmem_to_hbm [thread:$0]  (%p19542_p7), %s11066_s13, 16, %s18032_s29, %s11047_s18   ;;  %vm11039_vm1 = vcmask 0  }
 0xab2   : > { %s19543_s21 = sld [smem:[#allocation165_spill]] }
 0xab8   : > { %s597_s15 = scalar_lea.vmem %s19543_s21, %s14428_s16 }
 0xb31   : > { %v11036_v4 = vpop.xlane.xlu0 %11035 }
 0xb32   : > { %v11038_v45 = vmul.f32 0.25, %v11036_v4 }
 0xb34   : > { %11040 = vst.msk [vmem:[%s597_s15] sm:$0x1] %vm11039_vm1, %v11038_v45 }
 0xb35 PF: > { %s19544_s22 = sld [smem:[#allocation17_spill]]  ;;  %s19545_s0 = sld [smem:[#allocation14_spill]] }
 0xb36   : > { %s19546_s25 = sld [smem:[#allocation21_spill]] }
 0xb3b   : > { %p13810_p13 = scmp.ge.s32.totalorder %s19544_s22, 2  ;;  %s11088_s23 = sand.u32 1, %s19545_s0  }
 0xb3c   : > { %p19547_p1 = scmp.ne.s32.totalorder %s19546_s25, 0  ;;  %s11089_s17 = scalar_lea.sflag [#allocation6], %s11088_s23 }
 0xb3e   : > { %p13801_p6 = pnand %p13810_p13, %p19547_p1 }
 0xb40   : > { %14158 = dma.done.wait (!%p13801_p6), %s11089_s17, 16  }
 0xb41   : > { %14160 = vsyncadd (!%p13801_p6), %s11089_s17, 4294967280  ;;  %s19548_s24 = sld [smem:[#allocation18_spill]]  ;;  %s19549_s21 = sld [smem:[#allocation15_spill]] }
 0xb42   : > { %s19550_s22 = sld [smem:[#allocation16_spill]]  ;;  %s19551_s23 = sld [smem:[#allocation19_spill]] }
 0xb47   : > { %p29_p7 = scmp.ge.s32.totalorder %s19548_s24, 4  }
 0xb49   :  { %31 = sbr.rel (!%p29_p7) target bundleno = 10 (0xa), region = 167 }
 0xb50   :  { %11099 = vsyncpa [#allocation5], 1 }
 0xb51   :  { %11101 = vsyncpa [#allocation5 + $0x1], 1 }
 0xb52   :  { %11102 = vsyncpa [#allocation8], 1 }
 0xb53   :  { %11103 = vsyncpa [#allocation6], 1 }
 0xb54   :  { %11105 = vsyncpa [#allocation6 + $0x1], 1 }

</bundles_post_ra>
